<compile_context>
chip_gen: v6e
topology: v6e:2x2x1
jax: 0.10.0
libtpu: 0.0.40
codegen_flags: <defaults>
</compile_context>

<pallas_src>
import jax
import jax.numpy as jnp
import numpy as np
from jax.experimental import pallas as pl
from jax.experimental.pallas import tpu as pltpu

KSIZE = 5
POOL = 3
OUT_PAD = 128   # pad num_classes to a full lane width -> unmasked output stores


def _conv_relu_pool(x, w_ref, b_ref, p_ref, cdt):
    """One SC_CNN stage (Conv1d k=5 valid + bias + ReLU + avg_pool k=3 s=3)
    on batch-stacked activations.

    x:     (block_b * l_band, c_in) f32; sample s occupies rows
           [s*l_band, (s+1)*l_band).
    w_ref: (KSIZE, c_in, c_out) in compute dtype.
    b_ref: (1, c_out) f32.
    p_ref: (block_b * l_pool, block_b * l_band) block-diagonal pool/select
           matrix (compute dtype).  It both averages (1/3 coefficients) and
           discards the invalid conv tail rows of every band.
    Returns (block_b * l_pool, c_out) f32.
    """
    acc = jnp.dot(x.astype(cdt), w_ref[0], preferred_element_type=jnp.float32)
    for k in range(1, KSIZE):
        # Rotate rows up by k so row r sees x[r + k].  Rows that wrap across
        # samples are only ever the invalid conv tail of each band, and those
        # rows get multiplied by exact zeros in p_ref below.
        xk = jnp.concatenate([x[k:], x[:k]], axis=0)
        acc = acc + jnp.dot(xk.astype(cdt), w_ref[k],
                            preferred_element_type=jnp.float32)
    acc = jnp.maximum(acc + b_ref[...], 0.0)             # bias + ReLU (f32 VPU)
    return jnp.dot(p_ref[...], acc.astype(cdt),
                   preferred_element_type=jnp.float32)    # pool + row-select


def _sc_cnn_kernel(x_ref, p1, p2, p3, w1, b1, w2, b2, w3, b3,
                   fw1, fb1, fw2, fb2, out_ref):
    cdt = fw1.dtype
    x = x_ref[...].astype(jnp.float32)          # (block_b*L0, Cin)
    h = _conv_relu_pool(x, w1, b1, p1, cdt)     # (block_b*l1p, 64)
    h = _conv_relu_pool(h, w2, b2, p2, cdt)     # (block_b*l2p, 128)
    h = _conv_relu_pool(h, w3, b3, p3, cdt)     # (block_b, 256) == flatten(x,1)
    h = jnp.dot(h.astype(cdt), fw1[...],
                preferred_element_type=jnp.float32) + fb1[...]
    h = jnp.maximum(h, 0.0)                     # fc1 + ReLU
    out = jnp.dot(h.astype(cdt), fw2[...],
                  preferred_element_type=jnp.float32) + fb2[...]
    out_ref[...] = out.astype(out_ref.dtype)    # (block_b, OUT_PAD), lane-dense


def sc_cnn_forward(x_blc, params, *, block_b=8, compute_dtype=jnp.bfloat16):
    B, L0, Cin = x_blc.shape
    l1c = L0 - (KSIZE - 1)
    l1p = l1c // POOL
    l2c = l1p - (KSIZE - 1)
    l2p = l2c // POOL
    l3c = l2p - (KSIZE - 1)
    l3p = l3c // POOL
    assert l3p == 1, "sequence length must flatten to exactly 256 features (fc1)"
    num_classes = params["fb2"].shape[1]
    assert num_classes <= OUT_PAD
    assert (block_b * L0) % 8 == 0, "block_b * L must be a multiple of 8 sublanes"

    # Pad batch to a multiple of block_b so every output tile is sublane-full.
    bpad = (-B) % block_b
    if bpad:
        x_blc = jnp.concatenate(
            [x_blc, jnp.zeros((bpad, L0, Cin), x_blc.dtype)], axis=0)
    Bp = B + bpad
    grid = (Bp // block_b,)

    # Batch-stacked activation layout: (Bp*L0, Cin), contiguous -> free reshape.
    x2d = x_blc.reshape(Bp * L0, Cin)

    cdt = compute_dtype
    f32 = jnp.float32

    def pool_mat(l_band, l_conv):
        """Block-diagonal matrix: stacked conv rows -> stacked pooled rows."""
        l_pool = l_conv // POOL
        p = np.zeros((block_b * l_pool, block_b * l_band), np.float32)
        for s in range(block_b):
            for q in range(l_pool):
                c0 = s * l_band + POOL * q
                p[s * l_pool + q, c0:c0 + POOL] = 1.0 / POOL
        return jnp.asarray(p, cdt)

    p1 = pool_mat(L0, l1c)     # (block_b*l1p, block_b*L0)
    p2 = pool_mat(l1p, l2c)    # (block_b*l2p, block_b*l1p)
    p3 = pool_mat(l2p, l3c)    # (block_b,     block_b*l2p)

    # Weights feed the MXU in compute_dtype; biases stay f32 (VPU adds).
    fw2_p = jnp.zeros((params["fw2"].shape[0], OUT_PAD), cdt)
    fw2_p = fw2_p.at[:, :num_classes].set(params["fw2"].astype(cdt))
    fb2_p = jnp.zeros((1, OUT_PAD), f32)
    fb2_p = fb2_p.at[:, :num_classes].set(params["fb2"].astype(f32))
    consts = [
        p1, p2, p3,
        params["w1"].astype(cdt), params["b1"].astype(f32),
        params["w2"].astype(cdt), params["b2"].astype(f32),
        params["w3"].astype(cdt), params["b3"].astype(f32),
        params["fw1"].astype(cdt), params["fb1"].astype(f32),
        fw2_p, fb2_p,
    ]

    def full_spec(arr):
        zeros = (0,) * arr.ndim
        return pl.BlockSpec(arr.shape, lambda b, _z=zeros: _z)

    rows1, rows2, rows3 = block_b * L0, block_b * l1p, block_b * l2p
    flops_per_block = 2 * (
        KSIZE * rows1 * Cin * 64 + rows2 * rows1 * 64
        + KSIZE * rows2 * 64 * 128 + rows3 * rows2 * 128
        + KSIZE * rows3 * 128 * 256 + block_b * rows3 * 256
        + block_b * 256 * 128 + block_b * 128 * OUT_PAD)
    bytes_accessed = (
        x2d.size * x2d.dtype.itemsize
        + sum(int(c.size) * c.dtype.itemsize for c in consts)
        + Bp * OUT_PAD * 4)

    out = pl.pallas_call(
        _sc_cnn_kernel,
        out_shape=jax.ShapeDtypeStruct((Bp, OUT_PAD), jnp.float32),
        grid=grid,
        in_specs=[pl.BlockSpec((block_b * L0, Cin), lambda b: (b, 0))]
                + [full_spec(c) for c in consts],
        out_specs=pl.BlockSpec((block_b, OUT_PAD), lambda b: (b, 0)),
        compiler_params=pltpu.CompilerParams(
            dimension_semantics=("parallel",)),
        cost_estimate=pl.CostEstimate(
            flops=flops_per_block * (Bp // block_b),
            transcendentals=0,
            bytes_accessed=bytes_accessed),
    )(x2d, *consts)
    return out[:B, :num_classes]


def sc_cnn_reference(x_blc, params):
    """Pure-JAX f32 reference with PyTorch-equivalent math."""
    HI = jax.lax.Precision.HIGHEST

    def conv_relu(x, w, b, l_out):
        acc = jnp.zeros((l_out, w.shape[2]), jnp.float32)
        for k in range(KSIZE):
            acc = acc + jnp.dot(x[k:k + l_out], w[k], precision=HI)
        return jnp.maximum(acc + b, 0.0)

    def pool(x):
        p = x.shape[0] // POOL
        return x[:p * POOL].reshape(p, POOL, -1).mean(axis=1)

    def one(x):
        h = pool(conv_relu(x, params["w1"], params["b1"], x.shape[0] - 4))
        h = pool(conv_relu(h, params["w2"], params["b2"], h.shape[0] - 4))
        h = pool(conv_relu(h, params["w3"], params["b3"], h.shape[0] - 4))
        h = jnp.maximum(jnp.dot(h, params["fw1"], precision=HI)
                        + params["fb1"], 0.0)
        return (jnp.dot(h, params["fw2"], precision=HI) + params["fb2"])[0]

    return jax.vmap(one)(x_blc)


if __name__ == "__main__":
    key = jax.random.PRNGKey(0)
    # forward() requires the final flattened size == 256, i.e. the last pool
    # output has length 1; L = 81 satisfies 81 -> 77 -> 25 -> 21 -> 7 -> 3 -> 1.
    B, Cin, L, num_classes = 16, 4, 81, 5
    block_b = 8                     # grid = (2,): both v7x cores get a block
    ks = jax.random.split(key, 12)

    x_ncl = jax.random.normal(ks[0], (B, Cin, L), jnp.float32)  # PyTorch NCL
    x_blc = jnp.transpose(x_ncl, (0, 2, 1))                     # kernel (B,L,C)

    def init(k, shape, fan_in):
        bound = 1.0 / (fan_in ** 0.5)
        return jax.random.uniform(k, shape, jnp.float32, -bound, bound)

    params = {
        # conv weights stored as (kernel, c_in, c_out) == torch (c_out, c_in, k) transposed
        "w1":  init(ks[1], (KSIZE, Cin, 64), Cin * KSIZE),
        "b1":  init(ks[2], (1, 64), Cin * KSIZE),
        "w2":  init(ks[3], (KSIZE, 64, 128), 64 * KSIZE),
        "b2":  init(ks[4], (1, 128), 64 * KSIZE),
        "w3":  init(ks[5], (KSIZE, 128, 256), 128 * KSIZE),
        "b3":  init(ks[6], (1, 256), 128 * KSIZE),
        # fc weights stored as (in, out) == torch (out, in) transposed
        "fw1": init(ks[7], (256, 128), 256),
        "fb1": init(ks[8], (1, 128), 256),
        "fw2": init(ks[9], (128, num_classes), 128),
        "fb2": init(ks[10], (1, num_classes), 128),
    }

    ref = sc_cnn_reference(x_blc, params)

    # Exact-semantics path (f32 MXU operands): tight check.
    out_f32 = jax.block_until_ready(
        sc_cnn_forward(x_blc, params, block_b=block_b,
                       compute_dtype=jnp.float32))
    assert out_f32.shape == (B, num_classes)
    assert jnp.allclose(out_f32, ref, atol=5e-4, rtol=5e-4)

    # Fast path (bf16 MXU operands, f32 accumulation): loose check.
    out_bf16 = jax.block_until_ready(
        sc_cnn_forward(x_blc, params, block_b=block_b,
                       compute_dtype=jnp.bfloat16))
    assert out_bf16.shape == (B, num_classes)
    assert jnp.allclose(out_bf16, ref, atol=2e-2, rtol=2e-2)

    print("KERNEL_OK")
</pallas_src>

<mosaic_0001>
module attributes {stable_mosaic.version = 11 : i64} {
  func.func @_sc_cnn_kernel(%arg0: i32, %arg1: memref<648x4xf32, #tpu.memory_space<vmem>>, %arg2: memref<200x648xf32, #tpu.memory_space<vmem>>, %arg3: memref<56x200xf32, #tpu.memory_space<vmem>>, %arg4: memref<8x56xf32, #tpu.memory_space<vmem>>, %arg5: memref<5x4x64xf32, #tpu.memory_space<vmem>>, %arg6: memref<1x64xf32, #tpu.memory_space<vmem>>, %arg7: memref<5x64x128xf32, #tpu.memory_space<vmem>>, %arg8: memref<1x128xf32, #tpu.memory_space<vmem>>, %arg9: memref<5x128x256xf32, #tpu.memory_space<vmem>>, %arg10: memref<1x256xf32, #tpu.memory_space<vmem>>, %arg11: memref<256x128xf32, #tpu.memory_space<vmem>>, %arg12: memref<1x128xf32, #tpu.memory_space<vmem>>, %arg13: memref<128x128xf32, #tpu.memory_space<vmem>>, %arg14: memref<1x128xf32, #tpu.memory_space<vmem>>, %arg15: memref<8x128xf32, #tpu.memory_space<vmem>>) attributes {dimension_semantics = [#tpu.dimension_semantics<parallel>], iteration_bounds = array<i64: 2>, scalar_prefetch = 0 : i64, scratch_operands = 0 : i64, tpu.core_type = #tpu.core_type<tc>, window_params = [{transform_indices = @transform_0, window_bounds = array<i64: 648, 4>}, {pipeline_mode = #tpu.pipeline_mode<synchronous>, transform_indices = @transform_1, window_bounds = array<i64: 200, 648>}, {pipeline_mode = #tpu.pipeline_mode<synchronous>, transform_indices = @transform_2, window_bounds = array<i64: 56, 200>}, {pipeline_mode = #tpu.pipeline_mode<synchronous>, transform_indices = @transform_3, window_bounds = array<i64: 8, 56>}, {pipeline_mode = #tpu.pipeline_mode<synchronous>, transform_indices = @transform_4, window_bounds = array<i64: 5, 4, 64>}, {pipeline_mode = #tpu.pipeline_mode<synchronous>, transform_indices = @transform_5, window_bounds = array<i64: 1, 64>}, {pipeline_mode = #tpu.pipeline_mode<synchronous>, transform_indices = @transform_6, window_bounds = array<i64: 5, 64, 128>}, {pipeline_mode = #tpu.pipeline_mode<synchronous>, transform_indices = @transform_7, window_bounds = array<i64: 1, 128>}, {pipeline_mode = #tpu.pipeline_mode<synchronous>, transform_indices = @transform_8, window_bounds = array<i64: 5, 128, 256>}, {pipeline_mode = #tpu.pipeline_mode<synchronous>, transform_indices = @transform_9, window_bounds = array<i64: 1, 256>}, {pipeline_mode = #tpu.pipeline_mode<synchronous>, transform_indices = @transform_10, window_bounds = array<i64: 256, 128>}, {pipeline_mode = #tpu.pipeline_mode<synchronous>, transform_indices = @transform_11, window_bounds = array<i64: 1, 128>}, {pipeline_mode = #tpu.pipeline_mode<synchronous>, transform_indices = @transform_12, window_bounds = array<i64: 128, 128>}, {pipeline_mode = #tpu.pipeline_mode<synchronous>, transform_indices = @transform_13, window_bounds = array<i64: 1, 128>}, {transform_indices = @transform_14, window_bounds = array<i64: 8, 128>}]} {
    %c0 = arith.constant 0 : index
    %c0_0 = arith.constant 0 : index
    %0 = vector.load %arg1[%c0, %c0_0] : memref<648x4xf32, #tpu.memory_space<vmem>>, vector<648x4xf32>
    %c0_1 = arith.constant 0 : index
    %c0_2 = arith.constant 0 : index
    %c0_3 = arith.constant 0 : index
    %1 = vector.load %arg5[%c0_1, %c0_2, %c0_3] : memref<5x4x64xf32, #tpu.memory_space<vmem>>, vector<1x4x64xf32>
    %2 = vector.shape_cast %1 : vector<1x4x64xf32> to vector<4x64xf32>
    %cst = arith.constant dense<0.000000e+00> : vector<648x64xf32>
    %3 = tpu.matmul %0, %2, %cst {dimension_numbers = #tpu.dot_dimension_numbers<[1], [0], [0], [1], [0, 0, 1, 1], [], []>} : vector<648x4xf32>, vector<4x64xf32>, vector<648x64xf32> -> vector<648x64xf32>
    %4 = vector.extract_strided_slice %0 {offsets = [1, 0], sizes = [647, 4], strides = [1, 1]} : vector<648x4xf32> to vector<647x4xf32>
    %5 = vector.extract_strided_slice %0 {offsets = [0, 0], sizes = [1, 4], strides = [1, 1]} : vector<648x4xf32> to vector<1x4xf32>
    %6 = tpu.concatenate %4, %5 in 0 : vector<647x4xf32>, vector<1x4xf32> -> vector<648x4xf32>
    %c1 = arith.constant 1 : index
    %c0_4 = arith.constant 0 : index
    %c0_5 = arith.constant 0 : index
    %7 = vector.load %arg5[%c1, %c0_4, %c0_5] : memref<5x4x64xf32, #tpu.memory_space<vmem>>, vector<1x4x64xf32>
    %8 = vector.shape_cast %7 : vector<1x4x64xf32> to vector<4x64xf32>
    %cst_6 = arith.constant dense<0.000000e+00> : vector<648x64xf32>
    %9 = tpu.matmul %6, %8, %cst_6 {dimension_numbers = #tpu.dot_dimension_numbers<[1], [0], [0], [1], [0, 0, 1, 1], [], []>} : vector<648x4xf32>, vector<4x64xf32>, vector<648x64xf32> -> vector<648x64xf32>
    %10 = arith.addf %3, %9 : vector<648x64xf32>
    %11 = vector.extract_strided_slice %0 {offsets = [2, 0], sizes = [646, 4], strides = [1, 1]} : vector<648x4xf32> to vector<646x4xf32>
    %12 = vector.extract_strided_slice %0 {offsets = [0, 0], sizes = [2, 4], strides = [1, 1]} : vector<648x4xf32> to vector<2x4xf32>
    %13 = tpu.concatenate %11, %12 in 0 : vector<646x4xf32>, vector<2x4xf32> -> vector<648x4xf32>
    %c2 = arith.constant 2 : index
    %c0_7 = arith.constant 0 : index
    %c0_8 = arith.constant 0 : index
    %14 = vector.load %arg5[%c2, %c0_7, %c0_8] : memref<5x4x64xf32, #tpu.memory_space<vmem>>, vector<1x4x64xf32>
    %15 = vector.shape_cast %14 : vector<1x4x64xf32> to vector<4x64xf32>
    %cst_9 = arith.constant dense<0.000000e+00> : vector<648x64xf32>
    %16 = tpu.matmul %13, %15, %cst_9 {dimension_numbers = #tpu.dot_dimension_numbers<[1], [0], [0], [1], [0, 0, 1, 1], [], []>} : vector<648x4xf32>, vector<4x64xf32>, vector<648x64xf32> -> vector<648x64xf32>
    %17 = arith.addf %10, %16 : vector<648x64xf32>
    %18 = vector.extract_strided_slice %0 {offsets = [3, 0], sizes = [645, 4], strides = [1, 1]} : vector<648x4xf32> to vector<645x4xf32>
    %19 = vector.extract_strided_slice %0 {offsets = [0, 0], sizes = [3, 4], strides = [1, 1]} : vector<648x4xf32> to vector<3x4xf32>
    %20 = tpu.concatenate %18, %19 in 0 : vector<645x4xf32>, vector<3x4xf32> -> vector<648x4xf32>
    %c3 = arith.constant 3 : index
    %c0_10 = arith.constant 0 : index
    %c0_11 = arith.constant 0 : index
    %21 = vector.load %arg5[%c3, %c0_10, %c0_11] : memref<5x4x64xf32, #tpu.memory_space<vmem>>, vector<1x4x64xf32>
    %22 = vector.shape_cast %21 : vector<1x4x64xf32> to vector<4x64xf32>
    %cst_12 = arith.constant dense<0.000000e+00> : vector<648x64xf32>
    %23 = tpu.matmul %20, %22, %cst_12 {dimension_numbers = #tpu.dot_dimension_numbers<[1], [0], [0], [1], [0, 0, 1, 1], [], []>} : vector<648x4xf32>, vector<4x64xf32>, vector<648x64xf32> -> vector<648x64xf32>
    %24 = arith.addf %17, %23 : vector<648x64xf32>
    %25 = vector.extract_strided_slice %0 {offsets = [4, 0], sizes = [644, 4], strides = [1, 1]} : vector<648x4xf32> to vector<644x4xf32>
    %26 = vector.extract_strided_slice %0 {offsets = [0, 0], sizes = [4, 4], strides = [1, 1]} : vector<648x4xf32> to vector<4x4xf32>
    %27 = tpu.concatenate %25, %26 in 0 : vector<644x4xf32>, vector<4x4xf32> -> vector<648x4xf32>
    %c4 = arith.constant 4 : index
    %c0_13 = arith.constant 0 : index
    %c0_14 = arith.constant 0 : index
    %28 = vector.load %arg5[%c4, %c0_13, %c0_14] : memref<5x4x64xf32, #tpu.memory_space<vmem>>, vector<1x4x64xf32>
    %29 = vector.shape_cast %28 : vector<1x4x64xf32> to vector<4x64xf32>
    %cst_15 = arith.constant dense<0.000000e+00> : vector<648x64xf32>
    %30 = tpu.matmul %27, %29, %cst_15 {dimension_numbers = #tpu.dot_dimension_numbers<[1], [0], [0], [1], [0, 0, 1, 1], [], []>} : vector<648x4xf32>, vector<4x64xf32>, vector<648x64xf32> -> vector<648x64xf32>
    %31 = arith.addf %24, %30 : vector<648x64xf32>
    %c0_16 = arith.constant 0 : index
    %c0_17 = arith.constant 0 : index
    %32 = vector.load %arg6[%c0_16, %c0_17] : memref<1x64xf32, #tpu.memory_space<vmem>>, vector<1x64xf32>
    %33 = vector.broadcast %32 : vector<1x64xf32> to vector<648x64xf32>
    %34 = arith.addf %31, %33 : vector<648x64xf32>
    %cst_18 = arith.constant 0.000000e+00 : f32
    %35 = vector.broadcast %cst_18 : f32 to vector<648x64xf32>
    %36 = arith.maximumf %34, %35 : vector<648x64xf32>
    %c0_19 = arith.constant 0 : index
    %c0_20 = arith.constant 0 : index
    %37 = vector.load %arg2[%c0_19, %c0_20] : memref<200x648xf32, #tpu.memory_space<vmem>>, vector<200x648xf32>
    %cst_21 = arith.constant dense<0.000000e+00> : vector<200x64xf32>
    %38 = tpu.matmul %37, %36, %cst_21 {dimension_numbers = #tpu.dot_dimension_numbers<[1], [0], [0], [1], [0, 0, 1, 1], [], []>} : vector<200x648xf32>, vector<648x64xf32>, vector<200x64xf32> -> vector<200x64xf32>
    %c0_22 = arith.constant 0 : index
    %c0_23 = arith.constant 0 : index
    %c0_24 = arith.constant 0 : index
    %39 = vector.load %arg7[%c0_22, %c0_23, %c0_24] : memref<5x64x128xf32, #tpu.memory_space<vmem>>, vector<1x64x128xf32>
    %40 = vector.shape_cast %39 : vector<1x64x128xf32> to vector<64x128xf32>
    %cst_25 = arith.constant dense<0.000000e+00> : vector<200x128xf32>
    %41 = tpu.matmul %38, %40, %cst_25 {dimension_numbers = #tpu.dot_dimension_numbers<[1], [0], [0], [1], [0, 0, 1, 1], [], []>} : vector<200x64xf32>, vector<64x128xf32>, vector<200x128xf32> -> vector<200x128xf32>
    %42 = vector.extract_strided_slice %38 {offsets = [1, 0], sizes = [199, 64], strides = [1, 1]} : vector<200x64xf32> to vector<199x64xf32>
    %43 = vector.extract_strided_slice %38 {offsets = [0, 0], sizes = [1, 64], strides = [1, 1]} : vector<200x64xf32> to vector<1x64xf32>
    %44 = tpu.concatenate %42, %43 in 0 : vector<199x64xf32>, vector<1x64xf32> -> vector<200x64xf32>
    %c1_26 = arith.constant 1 : index
    %c0_27 = arith.constant 0 : index
    %c0_28 = arith.constant 0 : index
    %45 = vector.load %arg7[%c1_26, %c0_27, %c0_28] : memref<5x64x128xf32, #tpu.memory_space<vmem>>, vector<1x64x128xf32>
    %46 = vector.shape_cast %45 : vector<1x64x128xf32> to vector<64x128xf32>
    %cst_29 = arith.constant dense<0.000000e+00> : vector<200x128xf32>
    %47 = tpu.matmul %44, %46, %cst_29 {dimension_numbers = #tpu.dot_dimension_numbers<[1], [0], [0], [1], [0, 0, 1, 1], [], []>} : vector<200x64xf32>, vector<64x128xf32>, vector<200x128xf32> -> vector<200x128xf32>
    %48 = arith.addf %41, %47 : vector<200x128xf32>
    %49 = vector.extract_strided_slice %38 {offsets = [2, 0], sizes = [198, 64], strides = [1, 1]} : vector<200x64xf32> to vector<198x64xf32>
    %50 = vector.extract_strided_slice %38 {offsets = [0, 0], sizes = [2, 64], strides = [1, 1]} : vector<200x64xf32> to vector<2x64xf32>
    %51 = tpu.concatenate %49, %50 in 0 : vector<198x64xf32>, vector<2x64xf32> -> vector<200x64xf32>
    %c2_30 = arith.constant 2 : index
    %c0_31 = arith.constant 0 : index
    %c0_32 = arith.constant 0 : index
    %52 = vector.load %arg7[%c2_30, %c0_31, %c0_32] : memref<5x64x128xf32, #tpu.memory_space<vmem>>, vector<1x64x128xf32>
    %53 = vector.shape_cast %52 : vector<1x64x128xf32> to vector<64x128xf32>
    %cst_33 = arith.constant dense<0.000000e+00> : vector<200x128xf32>
    %54 = tpu.matmul %51, %53, %cst_33 {dimension_numbers = #tpu.dot_dimension_numbers<[1], [0], [0], [1], [0, 0, 1, 1], [], []>} : vector<200x64xf32>, vector<64x128xf32>, vector<200x128xf32> -> vector<200x128xf32>
    %55 = arith.addf %48, %54 : vector<200x128xf32>
    %56 = vector.extract_strided_slice %38 {offsets = [3, 0], sizes = [197, 64], strides = [1, 1]} : vector<200x64xf32> to vector<197x64xf32>
    %57 = vector.extract_strided_slice %38 {offsets = [0, 0], sizes = [3, 64], strides = [1, 1]} : vector<200x64xf32> to vector<3x64xf32>
    %58 = tpu.concatenate %56, %57 in 0 : vector<197x64xf32>, vector<3x64xf32> -> vector<200x64xf32>
    %c3_34 = arith.constant 3 : index
    %c0_35 = arith.constant 0 : index
    %c0_36 = arith.constant 0 : index
    %59 = vector.load %arg7[%c3_34, %c0_35, %c0_36] : memref<5x64x128xf32, #tpu.memory_space<vmem>>, vector<1x64x128xf32>
    %60 = vector.shape_cast %59 : vector<1x64x128xf32> to vector<64x128xf32>
    %cst_37 = arith.constant dense<0.000000e+00> : vector<200x128xf32>
    %61 = tpu.matmul %58, %60, %cst_37 {dimension_numbers = #tpu.dot_dimension_numbers<[1], [0], [0], [1], [0, 0, 1, 1], [], []>} : vector<200x64xf32>, vector<64x128xf32>, vector<200x128xf32> -> vector<200x128xf32>
    %62 = arith.addf %55, %61 : vector<200x128xf32>
    %63 = vector.extract_strided_slice %38 {offsets = [4, 0], sizes = [196, 64], strides = [1, 1]} : vector<200x64xf32> to vector<196x64xf32>
    %64 = vector.extract_strided_slice %38 {offsets = [0, 0], sizes = [4, 64], strides = [1, 1]} : vector<200x64xf32> to vector<4x64xf32>
    %65 = tpu.concatenate %63, %64 in 0 : vector<196x64xf32>, vector<4x64xf32> -> vector<200x64xf32>
    %c4_38 = arith.constant 4 : index
    %c0_39 = arith.constant 0 : index
    %c0_40 = arith.constant 0 : index
    %66 = vector.load %arg7[%c4_38, %c0_39, %c0_40] : memref<5x64x128xf32, #tpu.memory_space<vmem>>, vector<1x64x128xf32>
    %67 = vector.shape_cast %66 : vector<1x64x128xf32> to vector<64x128xf32>
    %cst_41 = arith.constant dense<0.000000e+00> : vector<200x128xf32>
    %68 = tpu.matmul %65, %67, %cst_41 {dimension_numbers = #tpu.dot_dimension_numbers<[1], [0], [0], [1], [0, 0, 1, 1], [], []>} : vector<200x64xf32>, vector<64x128xf32>, vector<200x128xf32> -> vector<200x128xf32>
    %69 = arith.addf %62, %68 : vector<200x128xf32>
    %c0_42 = arith.constant 0 : index
    %c0_43 = arith.constant 0 : index
    %70 = vector.load %arg8[%c0_42, %c0_43] : memref<1x128xf32, #tpu.memory_space<vmem>>, vector<1x128xf32>
    %71 = vector.broadcast %70 : vector<1x128xf32> to vector<200x128xf32>
    %72 = arith.addf %69, %71 : vector<200x128xf32>
    %cst_44 = arith.constant 0.000000e+00 : f32
    %73 = vector.broadcast %cst_44 : f32 to vector<200x128xf32>
    %74 = arith.maximumf %72, %73 : vector<200x128xf32>
    %c0_45 = arith.constant 0 : index
    %c0_46 = arith.constant 0 : index
    %75 = vector.load %arg3[%c0_45, %c0_46] : memref<56x200xf32, #tpu.memory_space<vmem>>, vector<56x200xf32>
    %cst_47 = arith.constant dense<0.000000e+00> : vector<56x128xf32>
    %76 = tpu.matmul %75, %74, %cst_47 {dimension_numbers = #tpu.dot_dimension_numbers<[1], [0], [0], [1], [0, 0, 1, 1], [], []>} : vector<56x200xf32>, vector<200x128xf32>, vector<56x128xf32> -> vector<56x128xf32>
    %c0_48 = arith.constant 0 : index
    %c0_49 = arith.constant 0 : index
    %c0_50 = arith.constant 0 : index
    %77 = vector.load %arg9[%c0_48, %c0_49, %c0_50] : memref<5x128x256xf32, #tpu.memory_space<vmem>>, vector<1x128x256xf32>
    %78 = vector.shape_cast %77 : vector<1x128x256xf32> to vector<128x256xf32>
    %cst_51 = arith.constant dense<0.000000e+00> : vector<56x256xf32>
    %79 = tpu.matmul %76, %78, %cst_51 {dimension_numbers = #tpu.dot_dimension_numbers<[1], [0], [0], [1], [0, 0, 1, 1], [], []>} : vector<56x128xf32>, vector<128x256xf32>, vector<56x256xf32> -> vector<56x256xf32>
    %80 = vector.extract_strided_slice %76 {offsets = [1, 0], sizes = [55, 128], strides = [1, 1]} : vector<56x128xf32> to vector<55x128xf32>
    %81 = vector.extract_strided_slice %76 {offsets = [0, 0], sizes = [1, 128], strides = [1, 1]} : vector<56x128xf32> to vector<1x128xf32>
    %82 = tpu.concatenate %80, %81 in 0 : vector<55x128xf32>, vector<1x128xf32> -> vector<56x128xf32>
    %c1_52 = arith.constant 1 : index
    %c0_53 = arith.constant 0 : index
    %c0_54 = arith.constant 0 : index
    %83 = vector.load %arg9[%c1_52, %c0_53, %c0_54] : memref<5x128x256xf32, #tpu.memory_space<vmem>>, vector<1x128x256xf32>
    %84 = vector.shape_cast %83 : vector<1x128x256xf32> to vector<128x256xf32>
    %cst_55 = arith.constant dense<0.000000e+00> : vector<56x256xf32>
    %85 = tpu.matmul %82, %84, %cst_55 {dimension_numbers = #tpu.dot_dimension_numbers<[1], [0], [0], [1], [0, 0, 1, 1], [], []>} : vector<56x128xf32>, vector<128x256xf32>, vector<56x256xf32> -> vector<56x256xf32>
    %86 = arith.addf %79, %85 : vector<56x256xf32>
    %87 = vector.extract_strided_slice %76 {offsets = [2, 0], sizes = [54, 128], strides = [1, 1]} : vector<56x128xf32> to vector<54x128xf32>
    %88 = vector.extract_strided_slice %76 {offsets = [0, 0], sizes = [2, 128], strides = [1, 1]} : vector<56x128xf32> to vector<2x128xf32>
    %89 = tpu.concatenate %87, %88 in 0 : vector<54x128xf32>, vector<2x128xf32> -> vector<56x128xf32>
    %c2_56 = arith.constant 2 : index
    %c0_57 = arith.constant 0 : index
    %c0_58 = arith.constant 0 : index
    %90 = vector.load %arg9[%c2_56, %c0_57, %c0_58] : memref<5x128x256xf32, #tpu.memory_space<vmem>>, vector<1x128x256xf32>
    %91 = vector.shape_cast %90 : vector<1x128x256xf32> to vector<128x256xf32>
    %cst_59 = arith.constant dense<0.000000e+00> : vector<56x256xf32>
    %92 = tpu.matmul %89, %91, %cst_59 {dimension_numbers = #tpu.dot_dimension_numbers<[1], [0], [0], [1], [0, 0, 1, 1], [], []>} : vector<56x128xf32>, vector<128x256xf32>, vector<56x256xf32> -> vector<56x256xf32>
    %93 = arith.addf %86, %92 : vector<56x256xf32>
    %94 = vector.extract_strided_slice %76 {offsets = [3, 0], sizes = [53, 128], strides = [1, 1]} : vector<56x128xf32> to vector<53x128xf32>
    %95 = vector.extract_strided_slice %76 {offsets = [0, 0], sizes = [3, 128], strides = [1, 1]} : vector<56x128xf32> to vector<3x128xf32>
    %96 = tpu.concatenate %94, %95 in 0 : vector<53x128xf32>, vector<3x128xf32> -> vector<56x128xf32>
    %c3_60 = arith.constant 3 : index
    %c0_61 = arith.constant 0 : index
    %c0_62 = arith.constant 0 : index
    %97 = vector.load %arg9[%c3_60, %c0_61, %c0_62] : memref<5x128x256xf32, #tpu.memory_space<vmem>>, vector<1x128x256xf32>
    %98 = vector.shape_cast %97 : vector<1x128x256xf32> to vector<128x256xf32>
    %cst_63 = arith.constant dense<0.000000e+00> : vector<56x256xf32>
    %99 = tpu.matmul %96, %98, %cst_63 {dimension_numbers = #tpu.dot_dimension_numbers<[1], [0], [0], [1], [0, 0, 1, 1], [], []>} : vector<56x128xf32>, vector<128x256xf32>, vector<56x256xf32> -> vector<56x256xf32>
    %100 = arith.addf %93, %99 : vector<56x256xf32>
    %101 = vector.extract_strided_slice %76 {offsets = [4, 0], sizes = [52, 128], strides = [1, 1]} : vector<56x128xf32> to vector<52x128xf32>
    %102 = vector.extract_strided_slice %76 {offsets = [0, 0], sizes = [4, 128], strides = [1, 1]} : vector<56x128xf32> to vector<4x128xf32>
    %103 = tpu.concatenate %101, %102 in 0 : vector<52x128xf32>, vector<4x128xf32> -> vector<56x128xf32>
    %c4_64 = arith.constant 4 : index
    %c0_65 = arith.constant 0 : index
    %c0_66 = arith.constant 0 : index
    %104 = vector.load %arg9[%c4_64, %c0_65, %c0_66] : memref<5x128x256xf32, #tpu.memory_space<vmem>>, vector<1x128x256xf32>
    %105 = vector.shape_cast %104 : vector<1x128x256xf32> to vector<128x256xf32>
    %cst_67 = arith.constant dense<0.000000e+00> : vector<56x256xf32>
    %106 = tpu.matmul %103, %105, %cst_67 {dimension_numbers = #tpu.dot_dimension_numbers<[1], [0], [0], [1], [0, 0, 1, 1], [], []>} : vector<56x128xf32>, vector<128x256xf32>, vector<56x256xf32> -> vector<56x256xf32>
    %107 = arith.addf %100, %106 : vector<56x256xf32>
    %c0_68 = arith.constant 0 : index
    %c0_69 = arith.constant 0 : index
    %108 = vector.load %arg10[%c0_68, %c0_69] : memref<1x256xf32, #tpu.memory_space<vmem>>, vector<1x256xf32>
    %109 = vector.broadcast %108 : vector<1x256xf32> to vector<56x256xf32>
    %110 = arith.addf %107, %109 : vector<56x256xf32>
    %cst_70 = arith.constant 0.000000e+00 : f32
    %111 = vector.broadcast %cst_70 : f32 to vector<56x256xf32>
    %112 = arith.maximumf %110, %111 : vector<56x256xf32>
    %c0_71 = arith.constant 0 : index
    %c0_72 = arith.constant 0 : index
    %113 = vector.load %arg4[%c0_71, %c0_72] : memref<8x56xf32, #tpu.memory_space<vmem>>, vector<8x56xf32>
    %cst_73 = arith.constant dense<0.000000e+00> : vector<8x256xf32>
    %114 = tpu.matmul %113, %112, %cst_73 {dimension_numbers = #tpu.dot_dimension_numbers<[1], [0], [0], [1], [0, 0, 1, 1], [], []>} : vector<8x56xf32>, vector<56x256xf32>, vector<8x256xf32> -> vector<8x256xf32>
    %c0_74 = arith.constant 0 : index
    %c0_75 = arith.constant 0 : index
    %115 = vector.load %arg11[%c0_74, %c0_75] : memref<256x128xf32, #tpu.memory_space<vmem>>, vector<256x128xf32>
    %cst_76 = arith.constant dense<0.000000e+00> : vector<8x128xf32>
    %116 = tpu.matmul %114, %115, %cst_76 {dimension_numbers = #tpu.dot_dimension_numbers<[1], [0], [0], [1], [0, 0, 1, 1], [], []>} : vector<8x256xf32>, vector<256x128xf32>, vector<8x128xf32> -> vector<8x128xf32>
    %c0_77 = arith.constant 0 : index
    %c0_78 = arith.constant 0 : index
    %117 = vector.load %arg12[%c0_77, %c0_78] : memref<1x128xf32, #tpu.memory_space<vmem>>, vector<1x128xf32>
    %118 = vector.broadcast %117 : vector<1x128xf32> to vector<8x128xf32>
    %119 = arith.addf %116, %118 : vector<8x128xf32>
    %cst_79 = arith.constant 0.000000e+00 : f32
    %120 = vector.broadcast %cst_79 : f32 to vector<8x128xf32>
    %121 = arith.maximumf %119, %120 : vector<8x128xf32>
    %c0_80 = arith.constant 0 : index
    %c0_81 = arith.constant 0 : index
    %122 = vector.load %arg13[%c0_80, %c0_81] : memref<128x128xf32, #tpu.memory_space<vmem>>, vector<128x128xf32>
    %cst_82 = arith.constant dense<0.000000e+00> : vector<8x128xf32>
    %123 = tpu.matmul %121, %122, %cst_82 {dimension_numbers = #tpu.dot_dimension_numbers<[1], [0], [0], [1], [0, 0, 1, 1], [], []>} : vector<8x128xf32>, vector<128x128xf32>, vector<8x128xf32> -> vector<8x128xf32>
    %c0_83 = arith.constant 0 : index
    %c0_84 = arith.constant 0 : index
    %124 = vector.load %arg14[%c0_83, %c0_84] : memref<1x128xf32, #tpu.memory_space<vmem>>, vector<1x128xf32>
    %125 = vector.broadcast %124 : vector<1x128xf32> to vector<8x128xf32>
    %126 = arith.addf %123, %125 : vector<8x128xf32>
    %c0_85 = arith.constant 0 : index
    %c0_86 = arith.constant 0 : index
    %127 = vector.load %arg15[%c0_85, %c0_86] : memref<8x128xf32, #tpu.memory_space<vmem>>, vector<8x128xf32>
    tpu.vector_store %arg15[%c0_85, %c0_86], %126 {strides = array<i32>} : memref<8x128xf32, #tpu.memory_space<vmem>>, vector<8x128xf32>,
    return
  }
  func.func @transform_0(%arg0: i32) -> (i32, i32) {
    %c0_i32 = arith.constant 0 : i32
    %c0_i32_0 = arith.constant 0 : i32
    return %arg0, %c0_i32 : i32, i32
  }
  func.func @transform_1(%arg0: i32) -> (i32, i32) {
    %c0_i32 = arith.constant 0 : i32
    %c0_i32_0 = arith.constant 0 : i32
    %c0_i32_1 = arith.constant 0 : i32
    return %c0_i32, %c0_i32_0 : i32, i32
  }
  func.func @transform_2(%arg0: i32) -> (i32, i32) {
    %c0_i32 = arith.constant 0 : i32
    %c0_i32_0 = arith.constant 0 : i32
    %c0_i32_1 = arith.constant 0 : i32
    return %c0_i32, %c0_i32_0 : i32, i32
  }
  func.func @transform_3(%arg0: i32) -> (i32, i32) {
    %c0_i32 = arith.constant 0 : i32
    %c0_i32_0 = arith.constant 0 : i32
    %c0_i32_1 = arith.constant 0 : i32
    return %c0_i32, %c0_i32_0 : i32, i32
  }
  func.func @transform_4(%arg0: i32) -> (i32, i32, i32) {
    %c0_i32 = arith.constant 0 : i32
    %c0_i32_0 = arith.constant 0 : i32
    %c0_i32_1 = arith.constant 0 : i32
    %c0_i32_2 = arith.constant 0 : i32
    return %c0_i32, %c0_i32_0, %c0_i32_1 : i32, i32, i32
  }
  func.func @transform_5(%arg0: i32) -> (i32, i32) {
    %c0_i32 = arith.constant 0 : i32
    %c0_i32_0 = arith.constant 0 : i32
    %c0_i32_1 = arith.constant 0 : i32
    return %c0_i32, %c0_i32_0 : i32, i32
  }
  func.func @transform_6(%arg0: i32) -> (i32, i32, i32) {
    %c0_i32 = arith.constant 0 : i32
    %c0_i32_0 = arith.constant 0 : i32
    %c0_i32_1 = arith.constant 0 : i32
    %c0_i32_2 = arith.constant 0 : i32
    return %c0_i32, %c0_i32_0, %c0_i32_1 : i32, i32, i32
  }
  func.func @transform_7(%arg0: i32) -> (i32, i32) {
    %c0_i32 = arith.constant 0 : i32
    %c0_i32_0 = arith.constant 0 : i32
    %c0_i32_1 = arith.constant 0 : i32
    return %c0_i32, %c0_i32_0 : i32, i32
  }
  func.func @transform_8(%arg0: i32) -> (i32, i32, i32) {
    %c0_i32 = arith.constant 0 : i32
    %c0_i32_0 = arith.constant 0 : i32
    %c0_i32_1 = arith.constant 0 : i32
    %c0_i32_2 = arith.constant 0 : i32
    return %c0_i32, %c0_i32_0, %c0_i32_1 : i32, i32, i32
  }
  func.func @transform_9(%arg0: i32) -> (i32, i32) {
    %c0_i32 = arith.constant 0 : i32
    %c0_i32_0 = arith.constant 0 : i32
    %c0_i32_1 = arith.constant 0 : i32
    return %c0_i32, %c0_i32_0 : i32, i32
  }
  func.func @transform_10(%arg0: i32) -> (i32, i32) {
    %c0_i32 = arith.constant 0 : i32
    %c0_i32_0 = arith.constant 0 : i32
    %c0_i32_1 = arith.constant 0 : i32
    return %c0_i32, %c0_i32_0 : i32, i32
  }
  func.func @transform_11(%arg0: i32) -> (i32, i32) {
    %c0_i32 = arith.constant 0 : i32
    %c0_i32_0 = arith.constant 0 : i32
    %c0_i32_1 = arith.constant 0 : i32
    return %c0_i32, %c0_i32_0 : i32, i32
  }
  func.func @transform_12(%arg0: i32) -> (i32, i32) {
    %c0_i32 = arith.constant 0 : i32
    %c0_i32_0 = arith.constant 0 : i32
    %c0_i32_1 = arith.constant 0 : i32
    return %c0_i32, %c0_i32_0 : i32, i32
  }
  func.func @transform_13(%arg0: i32) -> (i32, i32) {
    %c0_i32 = arith.constant 0 : i32
    %c0_i32_0 = arith.constant 0 : i32
    %c0_i32_1 = arith.constant 0 : i32
    return %c0_i32, %c0_i32_0 : i32, i32
  }
  func.func @transform_14(%arg0: i32) -> (i32, i32) {
    %c0_i32 = arith.constant 0 : i32
    %c0_i32_0 = arith.constant 0 : i32
    return %arg0, %c0_i32 : i32, i32
  }
}

</mosaic_0001>

<bundles_post_ra>
// kernel: tpu_custom_call.1
= control target key start
LH: loop header
LB: loop body
LE: loop exit
PB: predicated region body
PF: predicated region fallthrough
CT: control target
= control target key end

     0   :  { %s17762_s0 = inlined_call_operand.vmem [shape: f32[1296,4], index: 0, kind: input, shape index: {}]   ;;  %s17763_s1 = inlined_call_operand.hbm [shape: f32[200,648], index: 1, kind: input, shape index: {}]   ;;  %s17764_s2 = inlined_call_operand.hbm [shape: f32[56,200], index: 2, kind: input, shape index: {}]   ;;  %s17765_s3 = inlined_call_operand.vmem [shape: f32[8,56], index: 3, kind: input, shape index: {}]   ;;  %s17766_s4 = inlined_call_operand.vmem [shape: f32[5,4,64], index: 4, kind: input, shape index: {}]   ;;  %s17767_s5 = inlined_call_operand.vmem [shape: f32[1,64], index: 5, kind: input, shape index: {}]   ;;  %s17768_s6 = inlined_call_operand.hbm [shape: f32[5,64,128], index: 6, kind: input, shape index: {}]   ;;  %s17769_s7 = inlined_call_operand.vmem [shape: f32[1,128], index: 7, kind: input, shape index: {}]   ;;  %s17770_s8 = inlined_call_operand.vmem [shape: f32[5,128,256], index: 8, kind: input, shape index: {}]   ;;  %s17771_s9 = inlined_call_operand.vmem [shape: f32[1,256], index: 9, kind: input, shape index: {}]   ;;  %s17772_s10 = inlined_call_operand.hbm [shape: f32[256,128], index: 10, kind: input, shape index: {}]   ;;  %s17773_s11 = inlined_call_operand.vmem [shape: f32[1,128], index: 11, kind: input, shape index: {}]   ;;  %s17774_s12 = inlined_call_operand.hbm [shape: f32[128,128], index: 12, kind: input, shape index: {}]   ;;  %s17775_s13 = inlined_call_operand.vmem [shape: f32[1,128], index: 13, kind: input, shape index: {}]   ;;  %s17776_s14 = inlined_call_operand.hbm [shape: f32[16,128], index: 14, kind: output, shape index: {}]  }
   0x1   :  { %17799 = sst [smem:[#allocation64_spill]] %s17776_s14 }
   0x2   :  { %19 = vsyncpa [#allocation3], 0 }
   0x3   :  { %20 = vsyncpa [#allocation6], 0 }
   0x4   :  { %21 = vsyncpa [#allocation9], 0 }
   0x5   :  { %22 = vsyncpa [#allocation4], 0 }
   0x6   :  { %24 = vsyncpa [#allocation4 + $0x1], 0  ;;  %s12413_s29 = smov 0   ;;  %s12415_s30 = smov 0  }
   0x7   :  { %s12417_s15 = smov 0   ;;  %s12419_s16 = smov 0  }
   0x8 LB: > { %17800 = sst [smem:[#allocation16_spill]] %s12310_s29  ;;  %s12434_s17 = sadd.s32 4294967295, %s12322_s16   ;;  %s12322_s16 = sphi %s12419_s16, %s18058_s16   ;;  %s12318_s15 = sphi %s12417_s15, %s18060_s15   ;;  %s12314_s30 = sphi %s12415_s30, %s18062_s30   ;;  %s12310_s29 = sphi %s12413_s29, %s18061_s29  }
   0x9   : > { %17801 = sst [smem:[#allocation17_spill]] %s12318_s15  ;;  %s8789_s18 = sadd.s32 4294967294, %s12322_s16  }
   0xa   : > { %17802 = sst [smem:[#allocation18_spill]] %s12322_s16  ;;  %s12438_s19 = sadd.s32 1, %s12322_s16  }
   0xb   : > { %17803 = sst [smem:[#allocation19_spill]] %s12438_s19  ;;  %s336_s20 = sadd.s32 1, %s12318_s15 }
   0xc   : > { %s333_s21 = ssub.s32 %s12322_s16, %s12438_s19  ;;  %p346_p0 = scmp.ne.s32.totalorder %s12318_s15, %s12314_s30 }
   0xd   : > { %p334_p1 = scmp.eq.s32.totalorder %s333_s21, 0  ;;  %p347_p2 = scmp.eq.s32.totalorder %s12434_s17, 1 }
   0xe   : > { %p352_p3 = scmp.ne.s32.totalorder %s12314_s30, %s12310_s29  ;;  %p353_p4 = scmp.eq.s32.totalorder %s8789_s18, 1 }
   0xf   : > { %s12449_s22 = scalar_select %p334_p1, %s12318_s15, %s336_s20  }
  0x10   : > { %p12451_p5 = por %p347_p2, %p346_p0  ;;  %p12455_p6 = por %p353_p4, %p352_p3 }
  0x11   : > { %17804 = sst [smem:[#allocation20_spill]] %s12449_s22  ;;  %p8790_p7 = scmp.ge.s32.totalorder %s12322_s16, 1 }
  0x12   : > { %s17806_s24 = scalar_select %p12455_p6, 1, 0 }
  0x13   : > { %p360_p8 = scmp.lt.s32.totalorder %s12322_s16, 3  ;;  %p17788_p9 = scmp.eq.s32.totalorder %s12434_s17, 0 }
  0x14   : > { %17807 = sst [smem:[#allocation21_spill]] %s17806_s24  ;;  %s12324_s26 = smov [#allocation5]  }
  0x15   : > { %p12462_p10 = pnand %p8790_p7, %p360_p8  ;;  %s385_s27 = sshll.u32 %s12324_s26, 4  ;;  %s386_s27 = int_to_ptr.vmem [resolvable:$true] %s385_s27 }
  0x16   : > { %s12325_s18 = smov [#allocation8]   ;;  %s12131_s22 = scalar_lea.vmem %s386_s27, 1792 }
  0x17   : > { %p11879_p11 = pneg %p12462_p10  ;;  %s429_s20 = sshll.u32 %s12325_s18, 4  ;;  %s430_s20 = int_to_ptr.vmem [resolvable:$true] %s429_s20 }
  0x18   : > { %p12132_p0 = scmp.ne.s32.totalorder %s386_s27, %s12131_s22  ;;  %p12139_p3 = scmp.lt.s32.totalorder %s386_s27, %s386_s27 }
  0x19   : > { %p12470_p12 = pnand %p17788_p9, %p11879_p11  ;;  %p12140_p4 = scmp.lt.s32.totalorder %s12131_s22, %s12131_s22 }
  0x1b   : > { %p12476_p13 = pneg %p12470_p12  ;;  %p12141_p7 = por %p12140_p4, %p12139_p3 }
  0x1d   : > { %p12134_p1 = pnand %p12132_p0, %p12476_p13 }
  0x1f   : > { %p12135_p2 = pneg %p12134_p1 }
  0x21   : > { %p12142_p8 = pnand %p12141_p7, %p12135_p2 }
  0x23   : > { %12145 = shalt.err (!%p12142_p8)
}
  0x24   : > { %s12326_s26 = smov 256   ;;  %s12327_s18 = smov 16  }
  0x25   : > { %11885 = dma.hbm_to_vmem [thread:$0]  (!%p12470_p12), %s17764_s2, 1792, %s386_s27, [#allocation6], %s12326_s26, %s12326_s26, %s12327_s18  }
  0x26   : > { %s12328_s24 = smov [#allocation2]   ;;  %s12157_s16 = scalar_lea.vmem %s430_s20, 4096 }
  0x27   : > { %s372_s29 = sshll.u32 %s12328_s24, 4  ;;  %p12158_p11 = scmp.ne.s32.totalorder %s430_s20, %s12157_s16  ;;  %s373_s29 = int_to_ptr.vmem [resolvable:$true] %s372_s29 }
  0x28   : > { %p12165_p3 = scmp.lt.s32.totalorder %s430_s20, %s430_s20  ;;  %p12166_p2 = scmp.lt.s32.totalorder %s12157_s16, %s12157_s16 }
  0x29   : > { %p12160_p0 = pnand %p12158_p11, %p12476_p13 }
  0x2a   : > { %p12167_p4 = por %p12166_p2, %p12165_p3 }
  0x2b   : > { %p12161_p1 = pneg %p12160_p0 }
  0x2d   : > { %p12168_p7 = pnand %p12167_p4, %p12161_p1 }
  0x2f   : > { %12171 = shalt.err (!%p12168_p7)
}
  0x30   : > { %s17784_s22 = smov 128   ;;  %s17786_s14 = smov 8  }
  0x31   : > { %11891 = dma.hbm_to_vmem [thread:$0]  (!%p12470_p12), %s17772_s10, 4096, %s430_s20, [#allocation9], %s17784_s22, %s17784_s22, %s17786_s14  }
  0x32   : > { %s12183_s24 = scalar_lea.vmem %s373_s29, 19200  ;;  %p12191_p1 = scmp.lt.s32.totalorder %s373_s29, %s373_s29 }
  0x33   : > { %p12184_p8 = scmp.ne.s32.totalorder %s373_s29, %s12183_s24  ;;  %p12192_p3 = scmp.lt.s32.totalorder %s12183_s24, %s12183_s24 }
  0x35   : > { %p12186_p11 = pnand %p12184_p8, %p12476_p13  ;;  %p12193_p2 = por %p12192_p3, %p12191_p1 }
  0x37   : > { %p12187_p0 = pneg %p12186_p11 }
  0x39   : > { %p12194_p4 = pnand %p12193_p2, %p12187_p0 }
  0x3b   : > { %12197 = shalt.err (!%p12194_p4)
}
  0x3c   : > { %s12331_s16 = smov 768   ;;  %s12332_s27 = smov 48  }
  0x3d   : > { %11882 = dma.hbm_to_vmem [thread:$0]  (!%p12470_p12), %s17763_s1, 19200, %s373_s29, [#allocation3], %s12331_s16, %s12331_s16, %s12332_s27  }
  0x3e   : > { %s12333_s20 = smov [#allocation7]   ;;  %s12334_s19 = smov [#allocation10]  }
  0x3f   : > { %s407_s15 = sshll.u32 %s12333_s20, 4  ;;  %s445_s22 = sshll.u32 %s12334_s19, 4  ;;  %s408_s15 = int_to_ptr.vmem [resolvable:$true] %s407_s15  ;;  %s446_s22 = int_to_ptr.vmem [resolvable:$true] %s445_s22 }
  0x40   : > { %s12209_s14 = scalar_lea.vmem %s408_s15, 5120  ;;  %p12217_p0 = scmp.lt.s32.totalorder %s408_s15, %s408_s15 }
  0x41   : > { %p12210_p7 = scmp.ne.s32.totalorder %s408_s15, %s12209_s14  ;;  %p12218_p1 = scmp.lt.s32.totalorder %s12209_s14, %s12209_s14 }
  0x43   : > { %p12212_p8 = pnand %p12210_p7, %p12476_p13  ;;  %p12219_p3 = por %p12218_p1, %p12217_p0 }
  0x45   : > { %p12213_p11 = pneg %p12212_p8 }
  0x47   : > { %p12220_p2 = pnand %p12219_p3, %p12213_p11 }
  0x49   : > { %12223 = shalt.err (!%p12220_p2)
}
  0x4a   : > { %s17811_s24 = smov 8   ;;  %s17812_s26 = smov 128  }
  0x4b   : > { %11888 = dma.hbm_to_vmem [thread:$0]  (!%p12470_p12), %s17768_s6, 5120, %s408_s15, [#allocation6], %s17812_s26, %s17812_s26, %s17811_s24  }
  0x4c   : > { %s12235_s27 = scalar_lea.vmem %s446_s22, 2048  ;;  %p12243_p9 = scmp.lt.s32.totalorder %s446_s22, %s446_s22 }
  0x4d   : > { %p12236_p4 = scmp.ne.s32.totalorder %s446_s22, %s12235_s27  ;;  %p12244_p0 = scmp.lt.s32.totalorder %s12235_s27, %s12235_s27 }
  0x4f   : > { %p12238_p7 = pnand %p12236_p4, %p12476_p13  ;;  %p12245_p11 = por %p12244_p0, %p12243_p9 }
  0x51   : > { %p12239_p8 = pneg %p12238_p7 }
  0x53   : > { %p12246_p1 = pnand %p12245_p11, %p12239_p8 }
  0x55   : > { %12249 = shalt.err (!%p12246_p1)
}
  0x56   : > { %11894 = dma.hbm_to_vmem [thread:$0]  (!%p12470_p12), %s17774_s12, 2048, %s446_s22, [#allocation9], %s17812_s26, %s17812_s26, %s17811_s24  }
  0x57   : > { %473 = sbr.rel (%p12462_p10) target bundleno = 3162 (0xc5a), region = 76 }
  0x5c   : > { %p17813_p13 = scmp.eq.s32.totalorder %s12434_s17, 0 }
  0x5e   : > { %12293 = dma.done.wait (%p17813_p13), [#allocation3], 19200   ;;  %p17814_p3 = pmov %p17813_p13 }
  0x60   : > { %12295 = vsyncadd (%p17814_p3), [#allocation3], 4294948096  ;;  %p17815_p9 = pmov %p17814_p3 }
  0x61   : > { %p17816_p2 = pmov %p17814_p3 }
  0x62   : > { %12297 = dma.done.wait (%p17815_p9), [#allocation6], 6912  }
  0x63   : > { %12299 = vsyncadd (%p17816_p2), [#allocation6], 4294960384  ;;  %p17817_p4 = pmov %p17816_p2 }
  0x64   : > { %p17818_p12 = pmov %p17816_p2 }
  0x65   : > { %12301 = dma.done.wait (%p17817_p4), [#allocation9], 6144  }
  0x66   : > { %12303 = vsyncadd (%p17818_p12), [#allocation9], 4294961152  ;;  %s535_s25 = smul.u32 81, %s12434_s17  ;;  %v17796_v0 = vmov 0.0   ;;  %vm12336_vm0 = vmmov 0   ;;  %vm1035_vm1 = vcmask 1043456  }
  0x67   : > { %10140 = vmatprep.subr.mxu0 %v17796_v0  ;;  %11855 = vmatprep.subr.mxu1 %v17796_v0  ;;  %v8805_v1 = vld [vmem:[%s17766_s4 + $0x4] sm:$0xf]  ;;  %vm704_vm2 = vcmask 1046528   ;;  %vm871_vm3 = vcmask 31744   ;;  %v622_v14 = vld [vmem:[%s17766_s4] sm:$0xf] }
  0x68   : > { %10142 = vmatprep.mubr.msk.f32.mxu0 %vm12336_vm0, %v17796_v0  ;;  %10379 = vmatprep.mubr.msk.f32.mxu1 %vm12336_vm0, %v17796_v0  ;;  %p536_p10 = scmp.lt.s32.totalorder %s535_s25, 161  ;;  %vm2144_vm4 = vcmask 1045504   ;;  %vm3028_vm5 = vcmask 1044480   ;;  %vm5114_vm6 = vcmask 64512   ;;  %vm5854_vm7 = vcmask 523264   ;;  %s532_s27 = sand.u32 1, %s12314_s30  }
  0x69   : > { %10141 = vmatpush3.msk.msra.mxu0 %vm1035_vm1, %v8805_v1  ;;  %11856 = vmatpush3.msk.msra.mxu1 %vm1035_vm1, %v8805_v1  ;;  %vm7388_vm8 = vcmask 588800   ;;  %vm8387_vm9 = vcmask 457728   ;;  %s8803_s14 = sshll.u32 %s532_s27, 3  ;;  %s8667_s26 = scalar_lea.sflag [#allocation4], %s532_s27 }
  0x6a   : > { %s18064_s25 = smov (!%p536_p10, %s535_s25), 161  ;;  %10385 = vmatprep.subr.mxu1 %v17796_v0  ;;  %10630 = vmatprep.subr.mxu0 %v17796_v0  ;;  %s534_s21 = scalar_lea.vmem [#allocation11], %s8803_s14 }
  0x6b   : > { %s8804_s28 = sshll.u32 %s18064_s25, 3  ;;  %s8680_s22 = sshll.u32 %s534_s21, 4  ;;  %s8681_s22 = int_to_ptr.vmem [resolvable:$true] %s8680_s22 }
  0x6c   : > { %s12551_s19 = scalar_lea.vmem %s17762_s0, %s8804_s28  ;;  %s9510_s28 = sshll.u32 %s12434_s17, 7 }
  0x6d   : > { %v541_v2 = vld [vmem:[%s12551_s19] sm:$0xff]  ;;  %v542_v3 = vld [vmem:[%s12551_s19 + $0x8] sm:$0xff]  ;;  %v12558_v4 = vld [vmem:[%s12551_s19 + $0x278] sm:$0xff]  ;;  %s12250_s29 = scalar_lea.vmem %s8681_s22, 128  ;;  %s12337_s16 = smov [#allocation11]  }
  0x6e   : > { %v705_v5 = vrot.slane %v541_v2, 1  ;;  %v706_v6 = vrot.slane %v542_v3, 1  ;;  %v621_v7 = vld [vmem:[%s12551_s19 + $0x280] sm:$0xff]  ;;  %v862_v8 = vrot.slane %v12558_v4, 1  ;;  %v543_v9 = vld [vmem:[%s12551_s19 + $0x10] sm:$0xff]  ;;  %v544_v12 = vld [vmem:[%s12551_s19 + $0x18] sm:$0xff]  ;;  %p12251_p7 = scmp.ne.s32.totalorder %s8681_s22, %s12250_s29 }
  0x6f   : > { %v864_v10 = vrot.slane %v621_v7, 1  ;;  %v708_v11 = vrot.slane %v543_v9, 1  ;;  %v710_v17 = vrot.slane %v544_v12, 1  ;;  %v545_v19 = vld [vmem:[%s12551_s19 + $0x20] sm:$0xff]  ;;  %v546_v22 = vld [vmem:[%s12551_s19 + $0x28] sm:$0xff]  ;;  %v547_v25 = vld [vmem:[%s12551_s19 + $0x30] sm:$0xff] }
  0x70   : > { %v707_v13 = vsel %vm704_vm2, %v705_v5, %v706_v6  ;;  %v712_v21 = vrot.slane %v545_v19, 1  ;;  %v714_v24 = vrot.slane %v546_v22, 1  ;;  %v716_v27 = vrot.slane %v547_v25, 1  ;;  %v548_v28 = vld [vmem:[%s12551_s19 + $0x38] sm:$0xff]  ;;  %v549_v31 = vld [vmem:[%s12551_s19 + $0x40] sm:$0xff]  ;;  %v550_v34 = vld [vmem:[%s12551_s19 + $0x48] sm:$0xff]  ;;  %p12252_p8 = pnand %p12251_p7, %p12451_p5 }
  0x71   : > { %10143 = vmatmul.mubr.msk.f32.vlgmr.msra.gmra.mxu0 %vm871_vm3, %v707_v13  ;;  %v865_v15 = vsel %vm704_vm2, %v862_v8, %v864_v10  ;;  %v709_v16 = vsel %vm704_vm2, %v706_v6, %v708_v11  ;;  %v868_v18 = vsel %vm704_vm2, %v864_v10, %v705_v5  ;;  %v711_v20 = vsel %vm704_vm2, %v708_v11, %v710_v17  ;;  %v551_v37 = vld [vmem:[%s12551_s19 + $0x50] sm:$0xff]  ;;  %v552_v40 = vld [vmem:[%s12551_s19 + $0x58] sm:$0xff]  ;;  %v553_v43 = vld [vmem:[%s12551_s19 + $0x60] sm:$0xff]  ;;  %s12254_s17 = sshll.u32 %s12337_s16, 4  ;;  %s12255_s17 = int_to_ptr.vmem [resolvable:$false] %s12254_s17 }
  0x72   : > { %10380 = vmatmul.mubr.msk.f32.vlgmr.msra.gmra.mxu1 %vm871_vm3, %v865_v15  ;;  %10145 = vmatprep.mubr.msk.f32.mxu0 %vm12336_vm0, %v17796_v0  ;;  %v713_v23 = vsel %vm704_vm2, %v710_v17, %v712_v21  ;;  %v715_v26 = vsel %vm704_vm2, %v712_v21, %v714_v24  ;;  %v717_v29 = vsel %vm704_vm2, %v714_v24, %v716_v27  ;;  %v718_v30 = vrot.slane %v548_v28, 1  ;;  %v554_v46 = vld [vmem:[%s12551_s19 + $0x68] sm:$0xff]  ;;  %v555_v49 = vld [vmem:[%s12551_s19 + $0x70] sm:$0xff]  ;;  %v556_v52 = vld [vmem:[%s12551_s19 + $0x78] sm:$0xff]  ;;  %p12253_p0 = pneg %p12252_p8  ;;  %s12256_s14 = scalar_lea.vmem %s12255_s17, 256 }
  0x73   : > { %10382 = vmatprep.mubr.msk.f32.mxu1 %vm12336_vm0, %v17796_v0  ;;  %10386 = vmatpush3.msk.msra.mxu1 %vm1035_vm1, %v622_v14  ;;  %v720_v33 = vrot.slane %v549_v31, 1  ;;  %v722_v36 = vrot.slane %v550_v34, 1  ;;  %v724_v39 = vrot.slane %v551_v37, 1  ;;  %v726_v42 = vrot.slane %v552_v40, 1  ;;  %v557_v55 = vld [vmem:[%s12551_s19 + $0x80] sm:$0xff]  ;;  %v558_v58 = vld [vmem:[%s12551_s19 + $0x88] sm:$0xff]  ;;  %p12257_p11 = scmp.lt.s32.totalorder %s8681_s22, %s12255_s17  ;;  %p12258_p1 = scmp.lt.s32.totalorder %s12256_s14, %s12250_s29 }
  0x74   : > { %10875 = vmatprep.subr.mxu1 %v17796_v0  ;;  %v719_v32 = vsel %vm704_vm2, %v716_v27, %v718_v30  ;;  %v728_v45 = vrot.slane %v553_v43, 1  ;;  %v730_v48 = vrot.slane %v554_v46, 1  ;;  %v732_v51 = vrot.slane %v555_v49, 1  ;;  %v559_v61 = vld [vmem:[%s12551_s19 + $0x90] sm:$0xff]  ;;  %v560_v1 = vld [vmem:[%s12551_s19 + $0x98] sm:$0xff]  ;;  %v561_v5 = vld [vmem:[%s12551_s19 + $0xa0] sm:$0xff] }
  0x75   : > { %10146 = vmatmul.mubr.msk.f32.gmra.mxu0 %vm871_vm3, %v709_v16  ;;  %v721_v35 = vsel %vm704_vm2, %v718_v30, %v720_v33  ;;  %v723_v38 = vsel %vm704_vm2, %v720_v33, %v722_v36  ;;  %v725_v41 = vsel %vm704_vm2, %v722_v36, %v724_v39  ;;  %v727_v44 = vsel %vm704_vm2, %v724_v39, %v726_v42  ;;  %v8970_v13 = vld [vmem:[%s17766_s4 + $0x8] sm:$0xf]  ;;  %v564_v16 = vld [vmem:[%s12551_s19 + $0xb8] sm:$0xff]  ;;  %p12259_p13 = por %p12258_p1, %p12257_p11 }
  0x76   : > { %10383 = vmatmul.mubr.msk.f32.gmra.mxu1 %vm871_vm3, %v868_v18  ;;  %10148 = vmatprep.mubr.msk.f32.mxu0 %vm12336_vm0, %v17796_v0  ;;  %v729_v47 = vsel %vm704_vm2, %v726_v42, %v728_v45  ;;  %v731_v50 = vsel %vm704_vm2, %v728_v45, %v730_v48  ;;  %v733_v53 = vsel %vm704_vm2, %v730_v48, %v732_v51  ;;  %v734_v54 = vrot.slane %v556_v52, 1 }
  0x77   : > { %10387 = vmatprep.mubr.msk.f32.mxu1 %vm12336_vm0, %v17796_v0  ;;  %v736_v57 = vrot.slane %v557_v55, 1  ;;  %v738_v60 = vrot.slane %v558_v58, 1  ;;  %v740_v63 = vrot.slane %v559_v61, 1  ;;  %v744_v7 = vrot.slane %v561_v5, 1  ;;  %10631 = vmatpush3.msk.msra.mxu0 %vm1035_vm1, %v8970_v13  ;;  %p12260_p3 = pnand %p12259_p13, %p12253_p0 }
  0x78   : > { %v735_v56 = vsel %vm704_vm2, %v732_v51, %v734_v54  ;;  %11120 = vmatprep.subr.mxu0 %v17796_v0  ;;  %v750_v18 = vrot.slane %v564_v16, 1 }
  0x79   : > { %10149 = vmatmul.mubr.msk.f32.gmra.mxu0 %vm871_vm3, %v711_v20  ;;  %v737_v59 = vsel %vm704_vm2, %v734_v54, %v736_v57  ;;  %v739_v62 = vsel %vm704_vm2, %v736_v57, %v738_v60 }
  0x7a   : > { %10388 = vmatmul.mubr.msk.f32.vlgmr.msra.gmra.mxu1 %vm871_vm3, %v541_v2  ;;  %10151 = vmatprep.mubr.msk.f32.mxu0 %vm12336_vm0, %v17796_v0  ;;  %v741_v2 = vsel %vm704_vm2, %v738_v60, %v740_v63 }
  0x7b   : > { %10390 = vmatprep.mubr.msk.f32.mxu1 %vm12336_vm0, %v17796_v0 }
  0x7d   : > { %10152 = vmatmul.mubr.msk.f32.gmra.mxu0 %vm871_vm3, %v713_v23 }
  0x7e   : > { %10391 = vmatmul.mubr.msk.f32.gmra.mxu1 %vm871_vm3, %v542_v3  ;;  %10154 = vmatprep.mubr.msk.f32.mxu0 %vm12336_vm0, %v17796_v0  ;;  %v742_v3 = vrot.slane %v560_v1, 1 }
  0x7f   : > { %10393 = vmatprep.mubr.msk.f32.mxu1 %vm12336_vm0, %v17796_v0 }
  0x80   : > { %v743_v6 = vsel %vm704_vm2, %v740_v63, %v742_v3  ;;  %v745_v10 = vsel %vm704_vm2, %v742_v3, %v744_v7 }
  0x81   : > { %10155 = vmatmul.mubr.msk.f32.gmra.mxu0 %vm871_vm3, %v715_v26 }
  0x82   : > { %10394 = vmatmul.mubr.msk.f32.gmra.mxu1 %vm871_vm3, %v543_v9  ;;  %10157 = vmatprep.mubr.msk.f32.mxu0 %vm12336_vm0, %v17796_v0  ;;  %v562_v9 = vld [vmem:[%s12551_s19 + $0xa8] sm:$0xff] }
  0x83   : > { %10396 = vmatprep.mubr.msk.f32.mxu1 %vm12336_vm0, %v17796_v0  ;;  %v746_v11 = vrot.slane %v562_v9, 1 }
  0x85   : > { %10158 = vmatmul.mubr.msk.f32.gmra.mxu0 %vm871_vm3, %v717_v29  ;;  %v747_v14 = vsel %vm704_vm2, %v744_v7, %v746_v11 }
  0x86   : > { %10397 = vmatmul.mubr.msk.f32.gmra.mxu1 %vm871_vm3, %v544_v12  ;;  %10160 = vmatprep.mubr.msk.f32.mxu0 %vm12336_vm0, %v17796_v0  ;;  %v563_v12 = vld [vmem:[%s12551_s19 + $0xb0] sm:$0xff] }
  0x87   : > { %10399 = vmatprep.mubr.msk.f32.mxu1 %vm12336_vm0, %v17796_v0  ;;  %v748_v15 = vrot.slane %v563_v12, 1 }
  0x89   : > { %10161 = vmatmul.mubr.msk.f32.gmra.mxu0 %vm871_vm3, %v719_v32  ;;  %v749_v17 = vsel %vm704_vm2, %v746_v11, %v748_v15  ;;  %v751_v20 = vsel %vm704_vm2, %v748_v15, %v750_v18  ;;  %v584_v15 = vld [vmem:[%s12551_s19 + $0x158] sm:$0xff] }
  0x8a   : > { %10400 = vmatmul.mubr.msk.f32.gmra.mxu1 %vm871_vm3, %v545_v19  ;;  %10163 = vmatprep.mubr.msk.f32.mxu0 %vm12336_vm0, %v17796_v0  ;;  %v565_v19 = vld [vmem:[%s12551_s19 + $0xc0] sm:$0xff] }
  0x8b   : > { %10402 = vmatprep.mubr.msk.f32.mxu1 %vm12336_vm0, %v17796_v0  ;;  %v752_v21 = vrot.slane %v565_v19, 1 }
  0x8d   : > { %10164 = vmatmul.mubr.msk.f32.gmra.mxu0 %vm871_vm3, %v721_v35  ;;  %v753_v23 = vsel %vm704_vm2, %v750_v18, %v752_v21  ;;  %v585_v18 = vld [vmem:[%s12551_s19 + $0x160] sm:$0xff] }
  0x8e   : > { %10403 = vmatmul.mubr.msk.f32.gmra.mxu1 %vm871_vm3, %v546_v22  ;;  %10166 = vmatprep.mubr.msk.f32.mxu0 %vm12336_vm0, %v17796_v0  ;;  %v566_v22 = vld [vmem:[%s12551_s19 + $0xc8] sm:$0xff] }
  0x8f   : > { %10405 = vmatprep.mubr.msk.f32.mxu1 %vm12336_vm0, %v17796_v0  ;;  %v754_v24 = vrot.slane %v566_v22, 1 }
  0x91   : > { %10167 = vmatmul.mubr.msk.f32.gmra.mxu0 %vm871_vm3, %v723_v38  ;;  %v755_v26 = vsel %vm704_vm2, %v752_v21, %v754_v24  ;;  %v586_v21 = vld [vmem:[%s12551_s19 + $0x168] sm:$0xff] }
  0x92   : > { %10406 = vmatmul.mubr.msk.f32.gmra.mxu1 %vm871_vm3, %v547_v25  ;;  %10169 = vmatprep.mubr.msk.f32.mxu0 %vm12336_vm0, %v17796_v0  ;;  %v567_v25 = vld [vmem:[%s12551_s19 + $0xd0] sm:$0xff] }
  0x93   : > { %10408 = vmatprep.mubr.msk.f32.mxu1 %vm12336_vm0, %v17796_v0  ;;  %v756_v27 = vrot.slane %v567_v25, 1 }
  0x95   : > { %10170 = vmatmul.mubr.msk.f32.gmra.mxu0 %vm871_vm3, %v725_v41  ;;  %v757_v29 = vsel %vm704_vm2, %v754_v24, %v756_v27  ;;  %v587_v24 = vld [vmem:[%s12551_s19 + $0x170] sm:$0xff] }
  0x96   : > { %10409 = vmatmul.mubr.msk.f32.gmra.mxu1 %vm871_vm3, %v548_v28  ;;  %10172 = vmatprep.mubr.msk.f32.mxu0 %vm12336_vm0, %v17796_v0  ;;  %v568_v28 = vld [vmem:[%s12551_s19 + $0xd8] sm:$0xff] }
  0x97   : > { %10411 = vmatprep.mubr.msk.f32.mxu1 %vm12336_vm0, %v17796_v0  ;;  %v758_v30 = vrot.slane %v568_v28, 1 }
  0x99   : > { %10173 = vmatmul.mubr.msk.f32.gmra.mxu0 %vm871_vm3, %v727_v44  ;;  %v759_v32 = vsel %vm704_vm2, %v756_v27, %v758_v30  ;;  %v588_v27 = vld [vmem:[%s12551_s19 + $0x178] sm:$0xff] }
  0x9a   : > { %10412 = vmatmul.mubr.msk.f32.gmra.mxu1 %vm871_vm3, %v549_v31  ;;  %10175 = vmatprep.mubr.msk.f32.mxu0 %vm12336_vm0, %v17796_v0  ;;  %v569_v31 = vld [vmem:[%s12551_s19 + $0xe0] sm:$0xff] }
  0x9b   : > { %10414 = vmatprep.mubr.msk.f32.mxu1 %vm12336_vm0, %v17796_v0  ;;  %v760_v33 = vrot.slane %v569_v31, 1 }
  0x9d   : > { %10176 = vmatmul.mubr.msk.f32.gmra.mxu0 %vm871_vm3, %v729_v47  ;;  %v761_v35 = vsel %vm704_vm2, %v758_v30, %v760_v33  ;;  %v589_v30 = vld [vmem:[%s12551_s19 + $0x180] sm:$0xff] }
  0x9e   : > { %10415 = vmatmul.mubr.msk.f32.gmra.mxu1 %vm871_vm3, %v550_v34  ;;  %10178 = vmatprep.mubr.msk.f32.mxu0 %vm12336_vm0, %v17796_v0  ;;  %v570_v34 = vld [vmem:[%s12551_s19 + $0xe8] sm:$0xff] }
  0x9f   : > { %10417 = vmatprep.mubr.msk.f32.mxu1 %vm12336_vm0, %v17796_v0  ;;  %v762_v36 = vrot.slane %v570_v34, 1 }
  0xa1   : > { %10179 = vmatmul.mubr.msk.f32.gmra.mxu0 %vm871_vm3, %v731_v50  ;;  %v763_v38 = vsel %vm704_vm2, %v760_v33, %v762_v36  ;;  %v590_v33 = vld [vmem:[%s12551_s19 + $0x188] sm:$0xff] }
  0xa2   : > { %10418 = vmatmul.mubr.msk.f32.gmra.mxu1 %vm871_vm3, %v551_v37  ;;  %10181 = vmatprep.mubr.msk.f32.mxu0 %vm12336_vm0, %v17796_v0  ;;  %v571_v37 = vld [vmem:[%s12551_s19 + $0xf0] sm:$0xff] }
  0xa3   : > { %10420 = vmatprep.mubr.msk.f32.mxu1 %vm12336_vm0, %v17796_v0  ;;  %v764_v39 = vrot.slane %v571_v37, 1 }
  0xa5   : > { %10182 = vmatmul.mubr.msk.f32.gmra.mxu0 %vm871_vm3, %v733_v53  ;;  %v765_v41 = vsel %vm704_vm2, %v762_v36, %v764_v39  ;;  %v591_v36 = vld [vmem:[%s12551_s19 + $0x190] sm:$0xff] }
  0xa6   : > { %10421 = vmatmul.mubr.msk.f32.gmra.mxu1 %vm871_vm3, %v552_v40  ;;  %10184 = vmatprep.mubr.msk.f32.mxu0 %vm12336_vm0, %v17796_v0  ;;  %v572_v40 = vld [vmem:[%s12551_s19 + $0xf8] sm:$0xff] }
  0xa7   : > { %10423 = vmatprep.mubr.msk.f32.mxu1 %vm12336_vm0, %v17796_v0  ;;  %v766_v42 = vrot.slane %v572_v40, 1 }
  0xa9   : > { %10185 = vmatmul.mubr.msk.f32.gmra.mxu0 %vm871_vm3, %v735_v56  ;;  %v767_v44 = vsel %vm704_vm2, %v764_v39, %v766_v42  ;;  %v12965_v39 = vld [vmem:[%s12551_s19 + $0x198] sm:$0xff] }
  0xaa   : > { %10424 = vmatmul.mubr.msk.f32.gmra.mxu1 %vm871_vm3, %v553_v43  ;;  %10187 = vmatprep.mubr.msk.f32.mxu0 %vm12336_vm0, %v17796_v0  ;;  %v573_v43 = vld [vmem:[%s12551_s19 + $0x100] sm:$0xff] }
  0xab   : > { %10426 = vmatprep.mubr.msk.f32.mxu1 %vm12336_vm0, %v17796_v0  ;;  %v768_v45 = vrot.slane %v573_v43, 1 }
  0xad   : > { %10188 = vmatmul.mubr.msk.f32.gmra.mxu0 %vm871_vm3, %v737_v59  ;;  %v769_v47 = vsel %vm704_vm2, %v766_v42, %v768_v45 }
  0xae   : > { %10427 = vmatmul.mubr.msk.f32.gmra.mxu1 %vm871_vm3, %v554_v46  ;;  %10190 = vmatprep.mubr.msk.f32.mxu0 %vm12336_vm0, %v17796_v0  ;;  %v574_v46 = vld [vmem:[%s12551_s19 + $0x108] sm:$0xff] }
  0xaf   : > { %10429 = vmatprep.mubr.msk.f32.mxu1 %vm12336_vm0, %v17796_v0  ;;  %v770_v48 = vrot.slane %v574_v46, 1 }
  0xb1   : > { %10191 = vmatmul.mubr.msk.f32.gmra.mxu0 %vm871_vm3, %v739_v62  ;;  %v771_v50 = vsel %vm704_vm2, %v768_v45, %v770_v48  ;;  %v12978_v45 = vld [vmem:[%s12551_s19 + $0x1a0] sm:$0xff] }
  0xb2   : > { %10430 = vmatmul.mubr.msk.f32.gmra.mxu1 %vm871_vm3, %v555_v49  ;;  %10193 = vmatprep.mubr.msk.f32.mxu0 %vm12336_vm0, %v17796_v0  ;;  %v575_v49 = vld [vmem:[%s12551_s19 + $0x110] sm:$0xff] }
  0xb3   : > { %10432 = vmatprep.mubr.msk.f32.mxu1 %vm12336_vm0, %v17796_v0  ;;  %v772_v51 = vrot.slane %v575_v49, 1 }
  0xb5   : > { %10194 = vmatmul.mubr.msk.f32.gmra.mxu0 %vm871_vm3, %v741_v2  ;;  %v773_v53 = vsel %vm704_vm2, %v770_v48, %v772_v51 }
  0xb6   : > { %10433 = vmatmul.mubr.msk.f32.gmra.mxu1 %vm871_vm3, %v556_v52  ;;  %10196 = vmatprep.mubr.msk.f32.mxu0 %vm12336_vm0, %v17796_v0  ;;  %v576_v52 = vld [vmem:[%s12551_s19 + $0x118] sm:$0xff] }
  0xb7   : > { %10435 = vmatprep.mubr.msk.f32.mxu1 %vm12336_vm0, %v17796_v0  ;;  %v774_v54 = vrot.slane %v576_v52, 1 }
  0xb9   : > { %10197 = vmatmul.mubr.msk.f32.gmra.mxu0 %vm871_vm3, %v743_v6  ;;  %v775_v56 = vsel %vm704_vm2, %v772_v51, %v774_v54 }
  0xba   : > { %10436 = vmatmul.mubr.msk.f32.gmra.mxu1 %vm871_vm3, %v557_v55  ;;  %10199 = vmatprep.mubr.msk.f32.mxu0 %vm12336_vm0, %v17796_v0  ;;  %v577_v55 = vld [vmem:[%s12551_s19 + $0x120] sm:$0xff] }
  0xbb   : > { %10438 = vmatprep.mubr.msk.f32.mxu1 %vm12336_vm0, %v17796_v0  ;;  %v776_v57 = vrot.slane %v577_v55, 1 }
  0xbd   : > { %10200 = vmatmul.mubr.msk.f32.gmra.mxu0 %vm871_vm3, %v745_v10  ;;  %v777_v59 = vsel %vm704_vm2, %v774_v54, %v776_v57 }
  0xbe   : > { %10439 = vmatmul.mubr.msk.f32.gmra.mxu1 %vm871_vm3, %v558_v58  ;;  %10202 = vmatprep.mubr.msk.f32.mxu0 %vm12336_vm0, %v17796_v0  ;;  %v578_v58 = vld [vmem:[%s12551_s19 + $0x128] sm:$0xff] }
  0xbf   : > { %10441 = vmatprep.mubr.msk.f32.mxu1 %vm12336_vm0, %v17796_v0  ;;  %v778_v60 = vrot.slane %v578_v58, 1 }
  0xc1   : > { %10203 = vmatmul.mubr.msk.f32.gmra.mxu0 %vm871_vm3, %v747_v14  ;;  %v779_v62 = vsel %vm704_vm2, %v776_v57, %v778_v60 }
  0xc2   : > { %10442 = vmatmul.mubr.msk.f32.gmra.mxu1 %vm871_vm3, %v559_v61  ;;  %10205 = vmatprep.mubr.msk.f32.mxu0 %vm12336_vm0, %v17796_v0  ;;  %v579_v61 = vld [vmem:[%s12551_s19 + $0x130] sm:$0xff] }
  0xc3   : > { %10444 = vmatprep.mubr.msk.f32.mxu1 %vm12336_vm0, %v17796_v0  ;;  %v780_v63 = vrot.slane %v579_v61, 1 }
  0xc5   : > { %10206 = vmatmul.mubr.msk.f32.gmra.mxu0 %vm871_vm3, %v749_v17  ;;  %v781_v2 = vsel %vm704_vm2, %v778_v60, %v780_v63  ;;  %v790_v17 = vrot.slane %v584_v15, 1  ;;  %v13004_v60 = vld [vmem:[%s12551_s19 + $0x1b0] sm:$0xff] }
  0xc6   : > { %10445 = vmatmul.mubr.msk.f32.gmra.mxu1 %vm871_vm3, %v560_v1  ;;  %10208 = vmatprep.mubr.msk.f32.mxu0 %vm12336_vm0, %v17796_v0  ;;  %v580_v1 = vld [vmem:[%s12551_s19 + $0x138] sm:$0xff] }
  0xc7   : > { %10447 = vmatprep.mubr.msk.f32.mxu1 %vm12336_vm0, %v17796_v0  ;;  %v782_v3 = vrot.slane %v580_v1, 1 }
  0xc9   : > { %10209 = vmatmul.mubr.msk.f32.gmra.mxu0 %vm871_vm3, %v751_v20  ;;  %v783_v6 = vsel %vm704_vm2, %v780_v63, %v782_v3  ;;  %v792_v20 = vrot.slane %v585_v18, 1 }
  0xca   : > { %10448 = vmatmul.mubr.msk.f32.gmra.mxu1 %vm871_vm3, %v561_v5  ;;  %10211 = vmatprep.mubr.msk.f32.mxu0 %vm12336_vm0, %v17796_v0  ;;  %v581_v5 = vld [vmem:[%s12551_s19 + $0x140] sm:$0xff] }
  0xcb   : > { %10450 = vmatprep.mubr.msk.f32.mxu1 %vm12336_vm0, %v17796_v0  ;;  %v784_v7 = vrot.slane %v581_v5, 1 }
  0xcd   : > { %10212 = vmatmul.mubr.msk.f32.gmra.mxu0 %vm871_vm3, %v753_v23  ;;  %v785_v10 = vsel %vm704_vm2, %v782_v3, %v784_v7  ;;  %v794_v23 = vrot.slane %v586_v21, 1  ;;  %v812_v3 = vrot.slane %v13004_v60, 1 }
  0xce   : > { %10451 = vmatmul.mubr.msk.f32.gmra.mxu1 %vm871_vm3, %v562_v9  ;;  %10214 = vmatprep.mubr.msk.f32.mxu0 %vm12336_vm0, %v17796_v0  ;;  %v582_v9 = vld [vmem:[%s12551_s19 + $0x148] sm:$0xff] }
  0xcf   : > { %10453 = vmatprep.mubr.msk.f32.mxu1 %vm12336_vm0, %v17796_v0  ;;  %v786_v11 = vrot.slane %v582_v9, 1 }
  0xd1   : > { %10215 = vmatmul.mubr.msk.f32.gmra.mxu0 %vm871_vm3, %v755_v26  ;;  %v787_v13 = vsel %vm704_vm2, %v784_v7, %v786_v11  ;;  %v796_v26 = vrot.slane %v587_v24, 1  ;;  %v13021_v7 = vld [vmem:[%s12551_s19 + $0x1b8] sm:$0xff] }
  0xd2   : > { %10454 = vmatmul.mubr.msk.f32.gmra.mxu1 %vm871_vm3, %v563_v12  ;;  %10217 = vmatprep.mubr.msk.f32.mxu0 %vm12336_vm0, %v17796_v0  ;;  %v583_v12 = vld [vmem:[%s12551_s19 + $0x150] sm:$0xff] }
  0xd3   : > { %10456 = vmatprep.mubr.msk.f32.mxu1 %vm12336_vm0, %v17796_v0  ;;  %v788_v14 = vrot.slane %v583_v12, 1 }
  0xd5   : > { %10218 = vmatmul.mubr.msk.f32.gmra.mxu0 %vm871_vm3, %v757_v29  ;;  %v798_v29 = vrot.slane %v588_v27, 1 }
  0xd6   : > { %10457 = vmatmul.mubr.msk.f32.gmra.mxu1 %vm871_vm3, %v564_v16  ;;  %10220 = vmatprep.mubr.msk.f32.mxu0 %vm12336_vm0, %v17796_v0  ;;  %v789_v16 = vsel %vm704_vm2, %v786_v11, %v788_v14 }
  0xd7   : > { %10459 = vmatprep.mubr.msk.f32.mxu1 %vm12336_vm0, %v17796_v0 }
  0xd9   : > { %10221 = vmatmul.mubr.msk.f32.gmra.mxu0 %vm871_vm3, %v759_v32  ;;  %v800_v32 = vrot.slane %v589_v30, 1 }
  0xda   : > { %10460 = vmatmul.mubr.msk.f32.gmra.mxu1 %vm871_vm3, %v565_v19  ;;  %10223 = vmatprep.mubr.msk.f32.mxu0 %vm12336_vm0, %v17796_v0  ;;  %v791_v19 = vsel %vm704_vm2, %v788_v14, %v790_v17 }
  0xdb   : > { %10462 = vmatprep.mubr.msk.f32.mxu1 %vm12336_vm0, %v17796_v0 }
  0xdd   : > { %10224 = vmatmul.mubr.msk.f32.gmra.mxu0 %vm871_vm3, %v761_v35  ;;  %v802_v35 = vrot.slane %v590_v33, 1 }
  0xde   : > { %10463 = vmatmul.mubr.msk.f32.gmra.mxu1 %vm871_vm3, %v566_v22  ;;  %10226 = vmatprep.mubr.msk.f32.mxu0 %vm12336_vm0, %v17796_v0  ;;  %v793_v22 = vsel %vm704_vm2, %v790_v17, %v792_v20 }
  0xdf   : > { %10465 = vmatprep.mubr.msk.f32.mxu1 %vm12336_vm0, %v17796_v0 }
  0xe1   : > { %10227 = vmatmul.mubr.msk.f32.gmra.mxu0 %vm871_vm3, %v763_v38  ;;  %v804_v38 = vrot.slane %v591_v36, 1 }
  0xe2   : > { %10466 = vmatmul.mubr.msk.f32.gmra.mxu1 %vm871_vm3, %v567_v25  ;;  %10229 = vmatprep.mubr.msk.f32.mxu0 %vm12336_vm0, %v17796_v0  ;;  %v795_v25 = vsel %vm704_vm2, %v792_v20, %v794_v23 }
  0xe3   : > { %10468 = vmatprep.mubr.msk.f32.mxu1 %vm12336_vm0, %v17796_v0  ;;  %v805_v42 = vsel %vm704_vm2, %v802_v35, %v804_v38 }
  0xe5   : > { %10230 = vmatmul.mubr.msk.f32.gmra.mxu0 %vm871_vm3, %v765_v41 }
  0xe6   : > { %10469 = vmatmul.mubr.msk.f32.gmra.mxu1 %vm871_vm3, %v568_v28  ;;  %10232 = vmatprep.mubr.msk.f32.mxu0 %vm12336_vm0, %v17796_v0  ;;  %v797_v28 = vsel %vm704_vm2, %v794_v23, %v796_v26 }
  0xe7   : > { %10471 = vmatprep.mubr.msk.f32.mxu1 %vm12336_vm0, %v17796_v0 }
  0xe9   : > { %10233 = vmatmul.mubr.msk.f32.gmra.mxu0 %vm871_vm3, %v767_v44 }
  0xea   : > { %10472 = vmatmul.mubr.msk.f32.gmra.mxu1 %vm871_vm3, %v569_v31  ;;  %10235 = vmatprep.mubr.msk.f32.mxu0 %vm12336_vm0, %v17796_v0  ;;  %v799_v31 = vsel %vm704_vm2, %v796_v26, %v798_v29 }
  0xeb   : > { %10474 = vmatprep.mubr.msk.f32.mxu1 %vm12336_vm0, %v17796_v0 }
  0xed   : > { %10236 = vmatmul.mubr.msk.f32.gmra.mxu0 %vm871_vm3, %v769_v47 }
  0xee   : > { %10475 = vmatmul.mubr.msk.f32.gmra.mxu1 %vm871_vm3, %v570_v34  ;;  %10238 = vmatprep.mubr.msk.f32.mxu0 %vm12336_vm0, %v17796_v0  ;;  %v801_v34 = vsel %vm704_vm2, %v798_v29, %v800_v32 }
  0xef   : > { %10477 = vmatprep.mubr.msk.f32.mxu1 %vm12336_vm0, %v17796_v0 }
  0xf1   : > { %10239 = vmatmul.mubr.msk.f32.gmra.mxu0 %vm871_vm3, %v771_v50  ;;  %v808_v50 = vrot.slane %v12978_v45, 1 }
  0xf2   : > { %10478 = vmatmul.mubr.msk.f32.gmra.mxu1 %vm871_vm3, %v571_v37  ;;  %10241 = vmatprep.mubr.msk.f32.mxu0 %vm12336_vm0, %v17796_v0  ;;  %v803_v37 = vsel %vm704_vm2, %v800_v32, %v802_v35  ;;  %v13063_v32 = vld [vmem:[%s12551_s19 + $0x1d0] sm:$0xff] }
  0xf3   : > { %10480 = vmatprep.mubr.msk.f32.mxu1 %vm12336_vm0, %v17796_v0 }
  0xf5   : > { %10242 = vmatmul.mubr.msk.f32.gmra.mxu0 %vm871_vm3, %v773_v53 }
  0xf6   : > { %10481 = vmatmul.mubr.msk.f32.gmra.mxu1 %vm871_vm3, %v572_v40  ;;  %10244 = vmatprep.mubr.msk.f32.mxu0 %vm12336_vm0, %v17796_v0 }
  0xf7   : > { %10483 = vmatprep.mubr.msk.f32.mxu1 %vm12336_vm0, %v17796_v0 }
  0xf9   : > { %10245 = vmatmul.mubr.msk.f32.gmra.mxu0 %vm871_vm3, %v775_v56 }
  0xfa   : > { %10484 = vmatmul.mubr.msk.f32.gmra.mxu1 %vm871_vm3, %v573_v43  ;;  %10247 = vmatprep.mubr.msk.f32.mxu0 %vm12336_vm0, %v17796_v0  ;;  %v806_v43 = vrot.slane %v12965_v39, 1 }
  0xfb   : > { %10486 = vmatprep.mubr.msk.f32.mxu1 %vm12336_vm0, %v17796_v0 }
  0xfc   : > { %v809_v56 = vsel %vm704_vm2, %v806_v43, %v808_v50 }
  0xfd   : > { %10248 = vmatmul.mubr.msk.f32.gmra.mxu0 %vm871_vm3, %v777_v59 }
  0xfe   : > { %10487 = vmatmul.mubr.msk.f32.gmra.mxu1 %vm871_vm3, %v574_v46  ;;  %10250 = vmatprep.mubr.msk.f32.mxu0 %vm12336_vm0, %v17796_v0 }
  0xff   : > { %10489 = vmatprep.mubr.msk.f32.mxu1 %vm12336_vm0, %v17796_v0 }
 0x101   : > { %10251 = vmatmul.mubr.msk.f32.gmra.mxu0 %vm871_vm3, %v779_v62  ;;  %v9053_v62 = vld [vmem:[%s17766_s4 + $0xc] sm:$0xf] }
 0x102   : > { %10490 = vmatmul.mubr.msk.f32.gmra.mxu1 %vm871_vm3, %v575_v49  ;;  %10253 = vmatprep.mubr.msk.f32.mxu0 %vm12336_vm0, %v17796_v0  ;;  %v807_v49 = vsel %vm704_vm2, %v804_v38, %v806_v43 }
 0x103   : > { %10492 = vmatprep.mubr.msk.f32.mxu1 %vm12336_vm0, %v17796_v0  ;;  %10876 = vmatpush3.msk.msra.mxu1 %vm1035_vm1, %v9053_v62 }
 0x104   : > { %5190 = vmatprep.subr.mxu1 %v17796_v0 }
 0x105   : > { %10254 = vmatmul.mubr.msk.f32.gmra.mxu0 %vm871_vm3, %v781_v2 }
 0x106   : > { %10493 = vmatmul.mubr.msk.f32.gmra.mxu1 %vm871_vm3, %v576_v52  ;;  %10256 = vmatprep.mubr.msk.f32.mxu0 %vm12336_vm0, %v17796_v0  ;;  %v12991_v52 = vld [vmem:[%s12551_s19 + $0x1a8] sm:$0xff] }
 0x107   : > { %10495 = vmatprep.mubr.msk.f32.mxu1 %vm12336_vm0, %v17796_v0  ;;  %v810_v57 = vrot.slane %v12991_v52, 1 }
 0x109   : > { %10257 = vmatmul.mubr.msk.f32.gmra.mxu0 %vm871_vm3, %v783_v6  ;;  %v811_v2 = vsel %vm704_vm2, %v808_v50, %v810_v57  ;;  %v13091_v50 = vld [vmem:[%s12551_s19 + $0x1e0] sm:$0xff] }
 0x10a   : > { %10496 = vmatmul.mubr.msk.f32.gmra.mxu1 %vm871_vm3, %v577_v55  ;;  %10259 = vmatprep.mubr.msk.f32.mxu0 %vm12336_vm0, %v17796_v0 }
 0x10b   : > { %10498 = vmatprep.mubr.msk.f32.mxu1 %vm12336_vm0, %v17796_v0 }
 0x10d   : > { %10260 = vmatmul.mubr.msk.f32.gmra.mxu0 %vm871_vm3, %v785_v10 }
 0x10e   : > { %10499 = vmatmul.mubr.msk.f32.gmra.mxu1 %vm871_vm3, %v578_v58  ;;  %10262 = vmatprep.mubr.msk.f32.mxu0 %vm12336_vm0, %v17796_v0 }
 0x10f   : > { %10501 = vmatprep.mubr.msk.f32.mxu1 %vm12336_vm0, %v17796_v0 }
 0x111   : > { %10263 = vmatmul.mubr.msk.f32.gmra.mxu0 %vm871_vm3, %v787_v13  ;;  %v814_v13 = vrot.slane %v13021_v7, 1 }
 0x112   : > { %10502 = vmatmul.mubr.msk.f32.gmra.mxu1 %vm871_vm3, %v579_v61  ;;  %10265 = vmatprep.mubr.msk.f32.mxu0 %vm12336_vm0, %v17796_v0 }
 0x113   : > { %10504 = vmatprep.mubr.msk.f32.mxu1 %vm12336_vm0, %v17796_v0  ;;  %v815_v20 = vsel %vm704_vm2, %v812_v3, %v814_v13 }
 0x115   : > { %10266 = vmatmul.mubr.msk.f32.gmra.mxu0 %vm871_vm3, %v789_v16  ;;  %v13035_v16 = vld [vmem:[%s12551_s19 + $0x1c0] sm:$0xff] }
 0x116   : > { %10505 = vmatmul.mubr.msk.f32.gmra.mxu1 %vm871_vm3, %v580_v1  ;;  %10268 = vmatprep.mubr.msk.f32.mxu0 %vm12336_vm0, %v17796_v0 }
 0x117   : > { %10507 = vmatprep.mubr.msk.f32.mxu1 %vm12336_vm0, %v17796_v0 }
 0x119   : > { %10269 = vmatmul.mubr.msk.f32.gmra.mxu0 %vm871_vm3, %v791_v19 }
 0x11a   : > { %10508 = vmatmul.mubr.msk.f32.gmra.mxu1 %vm871_vm3, %v581_v5  ;;  %10271 = vmatprep.mubr.msk.f32.mxu0 %vm12336_vm0, %v17796_v0 }
 0x11b   : > { %10510 = vmatprep.mubr.msk.f32.mxu1 %vm12336_vm0, %v17796_v0 }
 0x11d   : > { %10272 = vmatmul.mubr.msk.f32.gmra.mxu0 %vm871_vm3, %v793_v22 }
 0x11e   : > { %10511 = vmatmul.mubr.msk.f32.gmra.mxu1 %vm871_vm3, %v582_v9  ;;  %10274 = vmatprep.mubr.msk.f32.mxu0 %vm12336_vm0, %v17796_v0 }
 0x11f   : > { %10513 = vmatprep.mubr.msk.f32.mxu1 %vm12336_vm0, %v17796_v0 }
 0x121   : > { %10275 = vmatmul.mubr.msk.f32.gmra.mxu0 %vm871_vm3, %v795_v25 }
 0x122   : > { %10514 = vmatmul.mubr.msk.f32.gmra.mxu1 %vm871_vm3, %v583_v12  ;;  %10277 = vmatprep.mubr.msk.f32.mxu0 %vm12336_vm0, %v17796_v0  ;;  %v813_v12 = vsel %vm704_vm2, %v810_v57, %v812_v3 }
 0x123   : > { %10516 = vmatprep.mubr.msk.f32.mxu1 %vm12336_vm0, %v17796_v0 }
 0x125   : > { %10278 = vmatmul.mubr.msk.f32.gmra.mxu0 %vm871_vm3, %v797_v28 }
 0x126   : > { %10517 = vmatmul.mubr.msk.f32.gmra.mxu1 %vm871_vm3, %v584_v15  ;;  %10280 = vmatprep.mubr.msk.f32.mxu0 %vm12336_vm0, %v17796_v0 }
 0x127   : > { %10519 = vmatprep.mubr.msk.f32.mxu1 %vm12336_vm0, %v17796_v0 }
 0x129   : > { %10281 = vmatmul.mubr.msk.f32.gmra.mxu0 %vm871_vm3, %v799_v31 }
 0x12a   : > { %10520 = vmatmul.mubr.msk.f32.gmra.mxu1 %vm871_vm3, %v585_v18  ;;  %10283 = vmatprep.mubr.msk.f32.mxu0 %vm12336_vm0, %v17796_v0 }
 0x12b   : > { %10522 = vmatprep.mubr.msk.f32.mxu1 %vm12336_vm0, %v17796_v0 }
 0x12d   : > { %10284 = vmatmul.mubr.msk.f32.gmra.mxu0 %vm871_vm3, %v801_v34 }
 0x12e   : > { %10523 = vmatmul.mubr.msk.f32.gmra.mxu1 %vm871_vm3, %v586_v21  ;;  %10286 = vmatprep.mubr.msk.f32.mxu0 %vm12336_vm0, %v17796_v0  ;;  %v816_v21 = vrot.slane %v13035_v16, 1 }
 0x12f   : > { %10525 = vmatprep.mubr.msk.f32.mxu1 %vm12336_vm0, %v17796_v0 }
 0x130   : > { %v817_v28 = vsel %vm704_vm2, %v814_v13, %v816_v21 }
 0x131   : > { %v1105_v40 = vpop.f32.mrf.mxu0  ;;  %10287 = vmatmul.mubr.msk.f32.gmra.mxu0 %vm871_vm3, %v803_v37  ;;  %v820_v37 = vrot.slane %v13063_v32, 1 }
 0x132   : > { %v12968_v41 = vpop.f32.mrf.mxu1  ;;  %10526 = vmatmul.mubr.msk.f32.gmra.mxu1 %vm871_vm3, %v587_v24  ;;  %10289 = vmatprep.mubr.msk.f32.mxu0 %vm12336_vm0, %v17796_v0  ;;  %v13049_v24 = vld [vmem:[%s12551_s19 + $0x1c8] sm:$0xff] }
 0x133   : > { %17819 = vst [vmem:[#allocation22_spill] sm:$0xff] %v12968_v41  ;;  %v10144_v44 = vpop.f32.mrf.mxu0  ;;  %10528 = vmatprep.mubr.msk.f32.mxu1 %vm12336_vm0, %v17796_v0  ;;  %v818_v29 = vrot.slane %v13049_v24, 1 }
 0x134   : > { %v10381_v46 = vpop.f32.mrf.mxu1 }
 0x135   : > { %v1110_v47 = vpop.f32.mrf.mxu0  ;;  %10290 = vmatmul.mubr.msk.f32.gmra.mxu0 %vm871_vm3, %v805_v42 }
 0x136   : > { %v12981_v48 = vpop.f32.mrf.mxu1  ;;  %10529 = vmatmul.mubr.msk.f32.gmra.mxu1 %vm871_vm3, %v588_v27  ;;  %10292 = vmatprep.mubr.msk.f32.mxu0 %vm12336_vm0, %v17796_v0 }
 0x137   : > { %17820 = vst [vmem:[#allocation23_spill] sm:$0xff] %v12981_v48  ;;  %v10147_v51 = vpop.f32.mrf.mxu0  ;;  %10531 = vmatprep.mubr.msk.f32.mxu1 %vm12336_vm0, %v17796_v0 }
 0x138   : > { %v10384_v53 = vpop.f32.mrf.mxu1 }
 0x139   : > { %v1115_v54 = vpop.f32.mrf.mxu0  ;;  %10293 = vmatmul.mubr.msk.f32.gmra.mxu0 %vm871_vm3, %v807_v49 }
 0x13a   : > { %v1740_v55 = vpop.f32.mrf.mxu1  ;;  %10532 = vmatmul.mubr.msk.f32.gmra.mxu1 %vm871_vm3, %v589_v30  ;;  %10295 = vmatprep.mubr.msk.f32.mxu0 %vm12336_vm0, %v17796_v0 }
 0x13b   : > { %v12999_v58 = vadd.f32 %v1740_v55, %v1105_v40  ;;  %v10150_v59 = vpop.f32.mrf.mxu0  ;;  %10534 = vmatprep.mubr.msk.f32.mxu1 %vm12336_vm0, %v17796_v0  ;;  %v13077_v40 = vld [vmem:[%s12551_s19 + $0x1d8] sm:$0xff]  ;;  %v824_v55 = vrot.slane %v13091_v50, 1 }
 0x13c   : > { %v10389_v61 = vpop.f32.mrf.mxu1  ;;  %v822_v46 = vrot.slane %v13077_v40, 1  ;;  %v13105_v59 = vld [vmem:[%s12551_s19 + $0x1e8] sm:$0xff] }
 0x13d   : > { %v1120_v63 = vpop.f32.mrf.mxu0  ;;  %10296 = vmatmul.mubr.msk.f32.gmra.mxu0 %vm871_vm3, %v809_v56 }
 0x13e   : > { %v1745_v1 = vpop.f32.mrf.mxu1  ;;  %10535 = vmatmul.mubr.msk.f32.gmra.mxu1 %vm871_vm3, %v590_v33  ;;  %10298 = vmatprep.mubr.msk.f32.mxu0 %vm12336_vm0, %v17796_v0 }
 0x13f   : > { %v13016_v5 = vadd.f32 %v1745_v1, %v1110_v47  ;;  %v10153_v6 = vpop.f32.mrf.mxu0  ;;  %10537 = vmatprep.mubr.msk.f32.mxu1 %vm12336_vm0, %v17796_v0  ;;  %v826_v1 = vrot.slane %v13105_v59, 1 }
 0x140   : > { %v10392_v9 = vpop.f32.mrf.mxu1  ;;  %v13119_v6 = vld [vmem:[%s12551_s19 + $0x1f0] sm:$0xff] }
 0x141   : > { %v1125_v10 = vpop.f32.mrf.mxu0  ;;  %10299 = vmatmul.mubr.msk.f32.gmra.mxu0 %vm871_vm3, %v811_v2 }
 0x142   : > { %v1750_v11 = vpop.f32.mrf.mxu1  ;;  %10538 = vmatmul.mubr.msk.f32.gmra.mxu1 %vm871_vm3, %v591_v36  ;;  %10301 = vmatprep.mubr.msk.f32.mxu0 %vm12336_vm0, %v17796_v0  ;;  %v819_v36 = vsel %vm704_vm2, %v816_v21, %v818_v29 }
 0x143   : > { %v13030_v14 = vadd.f32 %v1750_v11, %v1115_v54  ;;  %v10156_v15 = vpop.f32.mrf.mxu0  ;;  %10540 = vmatprep.mubr.msk.f32.mxu1 %vm12336_vm0, %v17796_v0  ;;  %v823_v54 = vsel %vm704_vm2, %v820_v37, %v822_v46  ;;  %v827_v11 = vsel %vm704_vm2, %v824_v55, %v826_v1 }
 0x144   : > { %v10395_v17 = vpop.f32.mrf.mxu1 }
 0x145   : > { %v1130_v18 = vpop.f32.mrf.mxu0  ;;  %10302 = vmatmul.mubr.msk.f32.gmra.mxu0 %vm871_vm3, %v813_v12  ;;  %v828_v12 = vrot.slane %v13119_v6, 1 }
 0x146   : > { %v1755_v19 = vpop.f32.mrf.mxu1  ;;  %10541 = vmatmul.mubr.msk.f32.gmra.mxu1 %vm871_vm3, %v12965_v39  ;;  %10304 = vmatprep.mubr.msk.f32.mxu0 %vm12336_vm0, %v17796_v0 }
 0x147   : > { %v13044_v22 = vadd.f32 %v1755_v19, %v1120_v63  ;;  %v10159_v23 = vpop.f32.mrf.mxu0  ;;  %10543 = vmatprep.mubr.msk.f32.mxu1 %vm12336_vm0, %v17796_v0  ;;  %v825_v63 = vsel %vm704_vm2, %v822_v46, %v824_v55 }
 0x148   : > { %v10398_v25 = vpop.f32.mrf.mxu1 }
 0x149   : > { %v1135_v26 = vpop.f32.mrf.mxu0  ;;  %10305 = vmatmul.mubr.msk.f32.gmra.mxu0 %vm871_vm3, %v815_v20  ;;  %v829_v20 = vsel %vm704_vm2, %v826_v1, %v828_v12  ;;  %v13147_v25 = vld [vmem:[%s12551_s19 + $0x200] sm:$0xff] }
 0x14a   : > { %v1760_v27 = vpop.f32.mrf.mxu1  ;;  %10544 = vmatmul.mubr.msk.f32.gmra.mxu1 %vm871_vm3, %v12978_v45  ;;  %10307 = vmatprep.mubr.msk.f32.mxu0 %vm12336_vm0, %v17796_v0  ;;  %v821_v45 = vsel %vm704_vm2, %v818_v29, %v820_v37  ;;  %v13203_v1 = vld [vmem:[%s12551_s19 + $0x220] sm:$0xff] }
 0x14b   : > { %v13058_v30 = vadd.f32 %v1760_v27, %v1125_v10  ;;  %v10162_v31 = vpop.f32.mrf.mxu0  ;;  %10546 = vmatprep.mubr.msk.f32.mxu1 %vm12336_vm0, %v17796_v0 }
 0x14c   : > { %v10401_v33 = vpop.f32.mrf.mxu1  ;;  %v832_v31 = vrot.slane %v13147_v25, 1 }
 0x14d   : > { %v1140_v34 = vpop.f32.mrf.mxu0  ;;  %10308 = vmatmul.mubr.msk.f32.gmra.mxu0 %vm871_vm3, %v817_v28 }
 0x14e   : > { %v1765_v35 = vpop.f32.mrf.mxu1  ;;  %10547 = vmatmul.mubr.msk.f32.gmra.mxu1 %vm871_vm3, %v12991_v52  ;;  %10310 = vmatprep.mubr.msk.f32.mxu0 %vm12336_vm0, %v17796_v0 }
 0x14f   : > { %v13072_v38 = vadd.f32 %v1765_v35, %v1130_v18  ;;  %v10165_v39 = vpop.f32.mrf.mxu0  ;;  %10549 = vmatprep.mubr.msk.f32.mxu1 %vm12336_vm0, %v17796_v0 }
 0x150   : > { %v10404_v42 = vpop.f32.mrf.mxu1 }
 0x151   : > { %v1145_v43 = vpop.f32.mrf.mxu0  ;;  %10311 = vmatmul.mubr.msk.f32.gmra.mxu0 %vm871_vm3, %v819_v36 }
 0x152   : > { %v1770_v44 = vpop.f32.mrf.mxu1  ;;  %10550 = vmatmul.mubr.msk.f32.gmra.mxu1 %vm871_vm3, %v13004_v60  ;;  %10313 = vmatprep.mubr.msk.f32.mxu0 %vm12336_vm0, %v17796_v0 }
 0x153   : > { %v13086_v47 = vadd.f32 %v1770_v44, %v1135_v26  ;;  %v10168_v49 = vpop.f32.mrf.mxu0  ;;  %10552 = vmatprep.mubr.msk.f32.mxu1 %vm12336_vm0, %v17796_v0  ;;  %v13175_v44 = vld [vmem:[%s12551_s19 + $0x210] sm:$0xff] }
 0x154   : > { %v10407_v51 = vpop.f32.mrf.mxu1 }
 0x155   : > { %v1150_v52 = vpop.f32.mrf.mxu0  ;;  %10314 = vmatmul.mubr.msk.f32.gmra.mxu0 %vm871_vm3, %v821_v45  ;;  %v836_v51 = vrot.slane %v13175_v44, 1 }
 0x156   : > { %v1775_v53 = vpop.f32.mrf.mxu1  ;;  %10553 = vmatmul.mubr.msk.f32.gmra.mxu1 %vm871_vm3, %v13021_v7  ;;  %10316 = vmatprep.mubr.msk.f32.mxu0 %vm12336_vm0, %v17796_v0 }
 0x157   : > { %v13100_v56 = vadd.f32 %v1775_v53, %v1140_v34  ;;  %v10171_v57 = vpop.f32.mrf.mxu0  ;;  %10555 = vmatprep.mubr.msk.f32.mxu1 %vm12336_vm0, %v17796_v0  ;;  %v13161_v34 = vld [vmem:[%s12551_s19 + $0x208] sm:$0xff] }
 0x158   : > { %v10410_v60 = vpop.f32.mrf.mxu1 }
 0x159   : > { %v1155_v61 = vpop.f32.mrf.mxu0  ;;  %10317 = vmatmul.mubr.msk.f32.gmra.mxu0 %vm871_vm3, %v823_v54  ;;  %v13189_v54 = vld [vmem:[%s12551_s19 + $0x218] sm:$0xff] }
 0x15a   : > { %v1780_v62 = vpop.f32.mrf.mxu1  ;;  %10556 = vmatmul.mubr.msk.f32.gmra.mxu1 %vm871_vm3, %v13035_v16  ;;  %10319 = vmatprep.mubr.msk.f32.mxu0 %vm12336_vm0, %v17796_v0  ;;  %v13133_v16 = vld [vmem:[%s12551_s19 + $0x1f8] sm:$0xff] }
 0x15b   : > { %v13114_v2 = vadd.f32 %v1780_v62, %v1145_v43  ;;  %v10174_v3 = vpop.f32.mrf.mxu0  ;;  %10558 = vmatprep.mubr.msk.f32.mxu1 %vm12336_vm0, %v17796_v0  ;;  %v830_v21 = vrot.slane %v13133_v16, 1 }
 0x15c   : > { %v10413_v7 = vpop.f32.mrf.mxu1 }
 0x15d   : > { %v1160_v9 = vpop.f32.mrf.mxu0  ;;  %10320 = vmatmul.mubr.msk.f32.gmra.mxu0 %vm871_vm3, %v825_v63  ;;  %v831_v29 = vsel %vm704_vm2, %v828_v12, %v830_v21  ;;  %v833_v39 = vsel %vm704_vm2, %v830_v21, %v832_v31 }
 0x15e   : > { %v1785_v10 = vpop.f32.mrf.mxu1  ;;  %10559 = vmatmul.mubr.msk.f32.gmra.mxu1 %vm871_vm3, %v13049_v24  ;;  %10322 = vmatprep.mubr.msk.f32.mxu0 %vm12336_vm0, %v17796_v0 }
 0x15f   : > { %v13128_v13 = vadd.f32 %v1785_v10, %v1150_v52  ;;  %v10177_v15 = vpop.f32.mrf.mxu0  ;;  %10561 = vmatprep.mubr.msk.f32.mxu1 %vm12336_vm0, %v17796_v0  ;;  %v840_v10 = vrot.slane %v13203_v1, 1 }
 0x160   : > { %v10416_v17 = vpop.f32.mrf.mxu1  ;;  %v13217_v15 = vld [vmem:[%s12551_s19 + $0x228] sm:$0xff] }
 0x161   : > { %v1165_v18 = vpop.f32.mrf.mxu0  ;;  %10323 = vmatmul.mubr.msk.f32.gmra.mxu0 %vm871_vm3, %v827_v11 }
 0x162   : > { %v1790_v19 = vpop.f32.mrf.mxu1  ;;  %10562 = vmatmul.mubr.msk.f32.gmra.mxu1 %vm871_vm3, %v13063_v32  ;;  %10325 = vmatprep.mubr.msk.f32.mxu0 %vm12336_vm0, %v17796_v0 }
 0x163   : > { %v13142_v23 = vadd.f32 %v1790_v19, %v1155_v61  ;;  %v10180_v24 = vpop.f32.mrf.mxu0  ;;  %10564 = vmatprep.mubr.msk.f32.mxu1 %vm12336_vm0, %v17796_v0  ;;  %v838_v61 = vrot.slane %v13189_v54, 1 }
 0x164   : > { %v10419_v26 = vpop.f32.mrf.mxu1 }
 0x165   : > { %v1170_v27 = vpop.f32.mrf.mxu0  ;;  %10326 = vmatmul.mubr.msk.f32.gmra.mxu0 %vm871_vm3, %v829_v20  ;;  %v841_v19 = vsel %vm704_vm2, %v838_v61, %v840_v10  ;;  %v842_v20 = vrot.slane %v13217_v15, 1  ;;  %v13231_v26 = vld [vmem:[%s12551_s19 + $0x230] sm:$0xff] }
 0x166   : > { %v1795_v28 = vpop.f32.mrf.mxu1  ;;  %10565 = vmatmul.mubr.msk.f32.gmra.mxu1 %vm871_vm3, %v13077_v40  ;;  %10328 = vmatprep.mubr.msk.f32.mxu0 %vm12336_vm0, %v17796_v0  ;;  %v834_v40 = vrot.slane %v13161_v34, 1 }
 0x167   : > { %v13156_v32 = vadd.f32 %v1795_v28, %v1160_v9  ;;  %v10183_v33 = vpop.f32.mrf.mxu0  ;;  %10567 = vmatprep.mubr.msk.f32.mxu1 %vm12336_vm0, %v17796_v0  ;;  %v839_v9 = vsel %vm704_vm2, %v836_v51, %v838_v61 }
 0x168   : > { %v10422_v35 = vpop.f32.mrf.mxu1  ;;  %v837_v60 = vsel %vm704_vm2, %v834_v40, %v836_v51 }
 0x169   : > { %v1175_v36 = vpop.f32.mrf.mxu0  ;;  %10329 = vmatmul.mubr.msk.f32.gmra.mxu0 %vm871_vm3, %v831_v29  ;;  %v843_v29 = vsel %vm704_vm2, %v840_v10, %v842_v20  ;;  %v13287_v10 = vld [vmem:[%s12551_s19 + $0x250] sm:$0xff] }
 0x16a   : > { %v1800_v37 = vpop.f32.mrf.mxu1  ;;  %10568 = vmatmul.mubr.msk.f32.gmra.mxu1 %vm871_vm3, %v13091_v50  ;;  %10331 = vmatprep.mubr.msk.f32.mxu0 %vm12336_vm0, %v17796_v0  ;;  %v835_v50 = vsel %vm704_vm2, %v832_v31, %v834_v40  ;;  %v844_v31 = vrot.slane %v13231_v26, 1 }
 0x16b   : > { %v13170_v42 = vadd.f32 %v1800_v37, %v1165_v18  ;;  %v10186_v43 = vpop.f32.mrf.mxu0  ;;  %10570 = vmatprep.mubr.msk.f32.mxu1 %vm12336_vm0, %v17796_v0 }
 0x16c   : > { %v10425_v45 = vpop.f32.mrf.mxu1  ;;  %v845_v40 = vsel %vm704_vm2, %v842_v20, %v844_v31 }
 0x16d   : > { %v1180_v46 = vpop.f32.mrf.mxu0  ;;  %10332 = vmatmul.mubr.msk.f32.gmra.mxu0 %vm871_vm3, %v833_v39 }
 0x16e   : > { %v1805_v49 = vpop.f32.mrf.mxu1  ;;  %10571 = vmatmul.mubr.msk.f32.gmra.mxu1 %vm871_vm3, %v13105_v59  ;;  %10334 = vmatprep.mubr.msk.f32.mxu0 %vm12336_vm0, %v17796_v0 }
 0x16f   : > { %v13184_v52 = vadd.f32 %v1805_v49, %v1170_v27  ;;  %v10189_v53 = vpop.f32.mrf.mxu0  ;;  %10573 = vmatprep.mubr.msk.f32.mxu1 %vm12336_vm0, %v17796_v0  ;;  %v13259_v49 = vld [vmem:[%s12551_s19 + $0x240] sm:$0xff] }
 0x170   : > { %v10428_v55 = vpop.f32.mrf.mxu1 }
 0x171   : > { %v1185_v57 = vpop.f32.mrf.mxu0  ;;  %10335 = vmatmul.mubr.msk.f32.gmra.mxu0 %vm871_vm3, %v835_v50  ;;  %v848_v55 = vrot.slane %v13259_v49, 1 }
 0x172   : > { %v1810_v59 = vpop.f32.mrf.mxu1  ;;  %10574 = vmatmul.mubr.msk.f32.gmra.mxu1 %vm871_vm3, %v13119_v6  ;;  %10337 = vmatprep.mubr.msk.f32.mxu0 %vm12336_vm0, %v17796_v0 }
 0x173   : > { %v13198_v62 = vadd.f32 %v1810_v59, %v1175_v36  ;;  %v10192_v63 = vpop.f32.mrf.mxu0  ;;  %10576 = vmatprep.mubr.msk.f32.mxu1 %vm12336_vm0, %v17796_v0  ;;  %v13245_v36 = vld [vmem:[%s12551_s19 + $0x238] sm:$0xff] }
 0x174   : > { %v10431_v3 = vpop.f32.mrf.mxu1  ;;  %v846_v43 = vrot.slane %v13245_v36, 1 }
 0x175   : > { %v1190_v7 = vpop.f32.mrf.mxu0  ;;  %10338 = vmatmul.mubr.msk.f32.gmra.mxu0 %vm871_vm3, %v837_v60  ;;  %v13273_v60 = vld [vmem:[%s12551_s19 + $0x248] sm:$0xff] }
 0x176   : > { %v1815_v6 = vpop.f32.mrf.mxu1  ;;  %10577 = vmatmul.mubr.msk.f32.gmra.mxu1 %vm871_vm3, %v13133_v16  ;;  %10340 = vmatprep.mubr.msk.f32.mxu0 %vm12336_vm0, %v17796_v0  ;;  %v847_v53 = vsel %vm704_vm2, %v844_v31, %v846_v43  ;;  %v849_v3 = vsel %vm704_vm2, %v846_v43, %v848_v55 }
 0x177   : > { %v13212_v11 = vadd.f32 %v1815_v6, %v1180_v46  ;;  %v10195_v12 = vpop.f32.mrf.mxu0  ;;  %10579 = vmatprep.mubr.msk.f32.mxu1 %vm12336_vm0, %v17796_v0 }
 0x178   : > { %v10434_v17 = vpop.f32.mrf.mxu1 }
 0x179   : > { %v1195_v18 = vpop.f32.mrf.mxu0  ;;  %10341 = vmatmul.mubr.msk.f32.gmra.mxu0 %vm871_vm3, %v839_v9 }
 0x17a   : > { %v1820_v16 = vpop.f32.mrf.mxu1  ;;  %10580 = vmatmul.mubr.msk.f32.gmra.mxu1 %vm871_vm3, %v13147_v25  ;;  %10343 = vmatprep.mubr.msk.f32.mxu0 %vm12336_vm0, %v17796_v0 }
 0x17b   : > { %v13226_v21 = vadd.f32 %v1820_v16, %v1185_v57  ;;  %v10198_v24 = vpop.f32.mrf.mxu0  ;;  %10582 = vmatprep.mubr.msk.f32.mxu1 %vm12336_vm0, %v17796_v0  ;;  %v852_v16 = vrot.slane %v13287_v10, 1 }
 0x17c   : > { %v10437_v27 = vpop.f32.mrf.mxu1  ;;  %v616_v24 = vld [vmem:[%s12551_s19 + $0x258] sm:$0xff] }
 0x17d   : > { %v1200_v28 = vpop.f32.mrf.mxu0  ;;  %10344 = vmatmul.mubr.msk.f32.gmra.mxu0 %vm871_vm3, %v841_v19 }
 0x17e   : > { %v1825_v25 = vpop.f32.mrf.mxu1  ;;  %10583 = vmatmul.mubr.msk.f32.gmra.mxu1 %vm871_vm3, %v13161_v34  ;;  %10346 = vmatprep.mubr.msk.f32.mxu0 %vm12336_vm0, %v17796_v0 }
 0x17f   : > { %v13240_v33 = vadd.f32 %v1825_v25, %v1190_v7  ;;  %v10201_v35 = vpop.f32.mrf.mxu0  ;;  %10585 = vmatprep.mubr.msk.f32.mxu1 %vm12336_vm0, %v17796_v0  ;;  %v850_v7 = vrot.slane %v13273_v60, 1 }
 0x180   : > { %v10440_v37 = vpop.f32.mrf.mxu1 }
 0x181   : > { %v1205_v39 = vpop.f32.mrf.mxu0  ;;  %10347 = vmatmul.mubr.msk.f32.gmra.mxu0 %vm871_vm3, %v843_v29  ;;  %v853_v25 = vsel %vm704_vm2, %v850_v7, %v852_v16  ;;  %v854_v29 = vrot.slane %v616_v24, 1  ;;  %v13312_v37 = vld [vmem:[%s12551_s19 + $0x260] sm:$0xff] }
 0x182   : > { %v1830_v34 = vpop.f32.mrf.mxu1  ;;  %10586 = vmatmul.mubr.msk.f32.gmra.mxu1 %vm871_vm3, %v13175_v44  ;;  %10349 = vmatprep.mubr.msk.f32.mxu0 %vm12336_vm0, %v17796_v0  ;;  %v856_v43 = vrot.slane %v13312_v37, 1 }
 0x183   : > { %v13254_v45 = vadd.f32 %v1830_v34, %v1195_v18  ;;  %v10204_v46 = vpop.f32.mrf.mxu0  ;;  %10588 = vmatprep.mubr.msk.f32.mxu1 %vm12336_vm0, %v17796_v0  ;;  %v851_v18 = vsel %vm704_vm2, %v848_v55, %v850_v7 }
 0x184   : > { %v10443_v50 = vpop.f32.mrf.mxu1  ;;  %v857_v55 = vsel %vm704_vm2, %v854_v29, %v856_v43 }
 0x185   : > { %v1210_v51 = vpop.f32.mrf.mxu0  ;;  %10350 = vmatmul.mubr.msk.f32.gmra.mxu0 %vm871_vm3, %v845_v40  ;;  %v855_v40 = vsel %vm704_vm2, %v852_v16, %v854_v29 }
 0x186   : > { %v1835_v44 = vpop.f32.mrf.mxu1  ;;  %10589 = vmatmul.mubr.msk.f32.gmra.mxu1 %vm871_vm3, %v13189_v54  ;;  %10352 = vmatprep.mubr.msk.f32.mxu0 %vm12336_vm0, %v17796_v0 }
 0x187   : > { %v13268_v57 = vadd.f32 %v1835_v44, %v1200_v28  ;;  %v10207_v59 = vpop.f32.mrf.mxu0  ;;  %10591 = vmatprep.mubr.msk.f32.mxu1 %vm12336_vm0, %v17796_v0 }
 0x188   : > { %v10446_v61 = vpop.f32.mrf.mxu1 }
 0x189   : > { %v1215_v63 = vpop.f32.mrf.mxu0  ;;  %10353 = vmatmul.mubr.msk.f32.gmra.mxu0 %vm871_vm3, %v847_v53 }
 0x18a   : > { %v1840_v54 = vpop.f32.mrf.mxu1  ;;  %10592 = vmatmul.mubr.msk.f32.gmra.mxu1 %vm871_vm3, %v13203_v1  ;;  %10355 = vmatprep.mubr.msk.f32.mxu0 %vm12336_vm0, %v17796_v0 }
 0x18b   : > { %v13282_v6 = vadd.f32 %v1840_v54, %v1205_v39  ;;  %v10210_v9 = vpop.f32.mrf.mxu0  ;;  %10594 = vmatprep.mubr.msk.f32.mxu1 %vm12336_vm0, %v17796_v0  ;;  %v13340_v54 = vld [vmem:[%s12551_s19 + $0x270] sm:$0xff] }
 0x18c   : > { %v10449_v12 = vpop.f32.mrf.mxu1 }
 0x18d   : > { %v1220_v17 = vpop.f32.mrf.mxu0  ;;  %10356 = vmatmul.mubr.msk.f32.gmra.mxu0 %vm871_vm3, %v849_v3  ;;  %v860_v12 = vrot.slane %v13340_v54, 1 }
 0x18e   : > { %v1845_v1 = vpop.f32.mrf.mxu1  ;;  %10595 = vmatmul.mubr.msk.f32.gmra.mxu1 %vm871_vm3, %v13217_v15  ;;  %10358 = vmatprep.mubr.msk.f32.mxu0 %vm12336_vm0, %v17796_v0 }
 0x18f   : > { %v13296_v19 = vadd.f32 %v1845_v1, %v1210_v51  ;;  %v10213_v20 = vpop.f32.mrf.mxu0  ;;  %10597 = vmatprep.mubr.msk.f32.mxu1 %vm12336_vm0, %v17796_v0  ;;  %v13326_v51 = vld [vmem:[%s12551_s19 + $0x268] sm:$0xff] }
 0x190   : > { %v10452_v27 = vpop.f32.mrf.mxu1  ;;  %v858_v59 = vrot.slane %v13326_v51, 1 }
 0x191   : > { %v1225_v28 = vpop.f32.mrf.mxu0  ;;  %10359 = vmatmul.mubr.msk.f32.gmra.mxu0 %vm871_vm3, %v851_v18 }
 0x192   : > { %v1850_v15 = vpop.f32.mrf.mxu1  ;;  %10598 = vmatmul.mubr.msk.f32.gmra.mxu1 %vm871_vm3, %v13231_v26  ;;  %10361 = vmatprep.mubr.msk.f32.mxu0 %vm12336_vm0, %v17796_v0  ;;  %v859_v9 = vsel %vm704_vm2, %v856_v43, %v858_v59 }
 0x193   : > { %v13307_v31 = vadd.f32 %v1850_v15, %v1215_v63  ;;  %v10216_v35 = vpop.f32.mrf.mxu0  ;;  %10600 = vmatprep.mubr.msk.f32.mxu1 %vm12336_vm0, %v17796_v0 }
 0x194   : > { %v10455_v39 = vpop.f32.mrf.mxu1  ;;  %v13371_v35 = vld [vmem:[%s12551_s19] sm:$0xff] }
 0x195   : > { %v1230_v34 = vpop.f32.mrf.mxu0  ;;  %10362 = vmatmul.mubr.msk.f32.gmra.mxu0 %vm871_vm3, %v853_v25  ;;  %v17790_v39 = vrot.slane %v13371_v35, 2 }
 0x196   : > { %v1855_v26 = vpop.f32.mrf.mxu1  ;;  %10601 = vmatmul.mubr.msk.f32.gmra.mxu1 %vm871_vm3, %v13245_v36  ;;  %10364 = vmatprep.mubr.msk.f32.mxu0 %vm12336_vm0, %v17796_v0 }
 0x197   : > { %v13321_v46 = vadd.f32 %v1855_v26, %v1220_v17  ;;  %v10219_v50 = vpop.f32.mrf.mxu0  ;;  %10603 = vmatprep.mubr.msk.f32.mxu1 %vm12336_vm0, %v17796_v0 }
 0x198   : > { %v10458_v44 = vpop.f32.mrf.mxu1 }
 0x199   : > { %v1235_v53 = vpop.f32.mrf.mxu0  ;;  %10365 = vmatmul.mubr.msk.f32.gmra.mxu0 %vm871_vm3, %v855_v40  ;;  %v13391_v44 = vld [vmem:[%s12551_s19 + $0x10] sm:$0xff] }
 0x19a   : > { %v1860_v36 = vpop.f32.mrf.mxu1  ;;  %10604 = vmatmul.mubr.msk.f32.gmra.mxu1 %vm871_vm3, %v13259_v49  ;;  %10367 = vmatprep.mubr.msk.f32.mxu0 %vm12336_vm0, %v17796_v0 }
 0x19b   : > { %v13335_v61 = vadd.f32 %v1860_v36, %v1225_v28  ;;  %v10222_v63 = vpop.f32.mrf.mxu0  ;;  %10606 = vmatprep.mubr.msk.f32.mxu1 %vm12336_vm0, %v17796_v0 }
 0x19c   : > { %v10461_v3 = vpop.f32.mrf.mxu1 }
 0x19d   : > { %v1240_v7 = vpop.f32.mrf.mxu0  ;;  %10368 = vmatmul.mubr.msk.f32.gmra.mxu0 %vm871_vm3, %v857_v55 }
 0x19e   : > { %v1865_v49 = vpop.f32.mrf.mxu1  ;;  %10607 = vmatmul.mubr.msk.f32.gmra.mxu1 %vm871_vm3, %v13273_v60  ;;  %10370 = vmatprep.mubr.msk.f32.mxu0 %vm12336_vm0, %v17796_v0  ;;  %v861_v60 = vsel %vm704_vm2, %v858_v59, %v860_v12 }
 0x19f   : > { %v13349_v17 = vadd.f32 %v1865_v49, %v1230_v34  ;;  %v10225_v1 = vpop.f32.mrf.mxu0  ;;  %10609 = vmatprep.mubr.msk.f32.mxu1 %vm12336_vm0, %v17796_v0  ;;  %v13375_v34 = vld [vmem:[%s12551_s19 + $0x8] sm:$0xff] }
 0x1a0   : > { %v10464_v18 = vpop.f32.mrf.mxu1  ;;  %v2146_v26 = vrot.slane %v13375_v34, 2 }
 0x1a1   : > { %v1245_v16 = vpop.f32.mrf.mxu0  ;;  %10371 = vmatmul.mubr.msk.f32.gmra.mxu0 %vm871_vm3, %v859_v9 }
 0x1a2   : > { %v1870_v20 = vpop.f32.mrf.mxu1  ;;  %10610 = vmatmul.mubr.msk.f32.gmra.mxu1 %vm871_vm3, %v13287_v10  ;;  %10373 = vmatprep.mubr.msk.f32.mxu0 %vm12336_vm0, %v17796_v0  ;;  %v863_v10 = vsel %vm704_vm2, %v860_v12, %v862_v8  ;;  %v2147_v50 = vsel %vm2144_vm4, %v17790_v39, %v2146_v26 }
 0x1a3   : > { %v13359_v27 = vadd.f32 %v1870_v20, %v1235_v53  ;;  %v10228_v28 = vpop.f32.mrf.mxu0  ;;  %10612 = vmatprep.mubr.msk.f32.mxu1 %vm12336_vm0, %v17796_v0  ;;  %v2148_v53 = vrot.slane %v13391_v44, 2  ;;  %v13419_v20 = vld [vmem:[%s12551_s19 + $0x20] sm:$0xff] }
 0x1a4   : > { %v10467_v15 = vpop.f32.mrf.mxu1 }
 0x1a5   : > { %v1250_v25 = vpop.f32.mrf.mxu0  ;;  %10374 = vmatmul.mubr.msk.f32.gmra.mxu0 %vm871_vm3, %v861_v60  ;;  %v2149_v3 = vsel %vm2144_vm4, %v2146_v26, %v2148_v53  ;;  %v2152_v60 = vrot.slane %v13419_v20, 2 }
 0x1a6   : > { %v1875_v29 = vpop.f32.mrf.mxu1  ;;  %10613 = vmatmul.mubr.msk.f32.gmra.mxu1 %vm871_vm3, %v616_v24  ;;  %10376 = vmatprep.mubr.msk.f32.mxu0 %vm12336_vm0, %v17796_v0 }
 0x1a7   : > { %v13378_v40 = vadd.f32 %v1875_v29, %v1240_v7  ;;  %v10231_v43 = vpop.f32.mrf.mxu0  ;;  %10615 = vmatprep.mubr.msk.f32.mxu1 %vm12336_vm0, %v17796_v0  ;;  %v13405_v7 = vld [vmem:[%s12551_s19 + $0x18] sm:$0xff] }
 0x1a8   : > { %v10470_v24 = vpop.f32.mrf.mxu1  ;;  %v2150_v49 = vrot.slane %v13405_v7, 2  ;;  %v13433_v43 = vld [vmem:[%s12551_s19 + $0x28] sm:$0xff] }
 0x1a9   : > { %v1255_v4 = vpop.f32.mrf.mxu0  ;;  %10377 = vmatmul.mubr.msk.f32.gmra.mxu0 %vm871_vm3, %v863_v10  ;;  %v11960_v10 = vld [vmem:[%s12551_s19 + $0x278] sm:$0xff]  ;;  %v2154_v24 = vrot.slane %v13433_v43, 2 }
 0x1aa   : > { %v1880_v8 = vpop.f32.mrf.mxu1  ;;  %10616 = vmatmul.mubr.msk.f32.gmra.mxu1 %vm871_vm3, %v13312_v37  ;;  %10632 = vmatprep.mubr.msk.f32.mxu0 %vm12336_vm0, %v17796_v0  ;;  %v2153_v26 = vsel %vm2144_vm4, %v2150_v49, %v2152_v60 }
 0x1ab   : > { %v13394_v36 = vadd.f32 %v1880_v8, %v1245_v16  ;;  %v10234_v55 = vpop.f32.mrf.mxu0  ;;  %10618 = vmatprep.mubr.msk.f32.mxu1 %vm12336_vm0, %v17796_v0  ;;  %v2151_v16 = vsel %vm2144_vm4, %v2148_v53, %v2150_v49  ;;  %v3030_v53 = vrot.slane %v13375_v34, 3  ;;  %v13449_v49 = vld [vmem:[%s12551_s19 + $0x30] sm:$0xff] }
 0x1ac   : > { %v10473_v59 = vpop.f32.mrf.mxu1 }
 0x1ad   : > { %v1260_v63 = vpop.f32.mrf.mxu0  ;;  %10633 = vmatmul.mubr.msk.f32.vlgmr.msra.gmra.mxu0 %vm871_vm3, %v2147_v50  ;;  %v17789_v50 = vrot.slane %v13371_v35, 3 }
 0x1ae   : > { %v1885_v37 = vpop.f32.mrf.mxu1  ;;  %10619 = vmatmul.mubr.msk.f32.gmra.mxu1 %vm871_vm3, %v13326_v51  ;;  %10635 = vmatprep.mubr.msk.f32.mxu0 %vm12336_vm0, %v17796_v0 }
 0x1af   : > { %v13408_v9 = vadd.f32 %v1885_v37, %v1250_v25  ;;  %v10237_v12 = vpop.f32.mrf.mxu0  ;;  %10621 = vmatprep.mubr.msk.f32.mxu1 %vm12336_vm0, %v17796_v0 }
 0x1b0   : > { %v10476_v1 = vpop.f32.mrf.mxu1  ;;  %v2156_v12 = vrot.slane %v13449_v49, 2 }
 0x1b1   : > { %v1265_v18 = vpop.f32.mrf.mxu0  ;;  %10636 = vmatmul.mubr.msk.f32.gmra.mxu0 %vm871_vm3, %v2149_v3  ;;  %v11962_v3 = vld [vmem:[%s12551_s19 + $0x280] sm:$0xff] }
 0x1b2   : > { %v1890_v51 = vpop.f32.mrf.mxu1  ;;  %10622 = vmatmul.mubr.msk.f32.gmra.mxu1 %vm871_vm3, %v13340_v54  ;;  %10638 = vmatprep.mubr.msk.f32.mxu0 %vm12336_vm0, %v17796_v0 }
 0x1b3   : > { %v13422_v28 = vadd.f32 %v1890_v51, %v1255_v4  ;;  %v10240_v15 = vpop.f32.mrf.mxu0  ;;  %10624 = vmatprep.mubr.msk.f32.mxu1 %vm12336_vm0, %v17796_v0  ;;  %v3031_v51 = vsel %vm3028_vm5, %v17789_v50, %v3030_v53 }
 0x1b4   : > { %v10479_v25 = vpop.f32.mrf.mxu1 }
 0x1b5   : > { %v1270_v29 = vpop.f32.mrf.mxu0  ;;  %10639 = vmatmul.mubr.msk.f32.gmra.mxu0 %vm871_vm3, %v2151_v16  ;;  %v3032_v16 = vrot.slane %v13391_v44, 3 }
 0x1b6   : > { %v1895_v54 = vpop.f32.mrf.mxu1  ;;  %10625 = vmatmul.mubr.msk.f32.gmra.mxu1 %vm871_vm3, %v11960_v10  ;;  %10641 = vmatprep.mubr.msk.f32.mxu0 %vm12336_vm0, %v17796_v0 }
 0x1b7   : > { %v13436_v4 = vadd.f32 %v1895_v54, %v1260_v63  ;;  %v10243_v8 = vpop.f32.mrf.mxu0  ;;  %10627 = vmatprep.mubr.msk.f32.mxu1 %vm12336_vm0, %v17796_v0  ;;  %v2155_v63 = vsel %vm2144_vm4, %v2152_v60, %v2154_v24  ;;  %v13466_v54 = vld [vmem:[%s12551_s19 + $0x38] sm:$0xff] }
 0x1b8   : > { %v10482_v55 = vpop.f32.mrf.mxu1  ;;  %v2158_v10 = vrot.slane %v13466_v54, 2  ;;  %v3033_v8 = vsel %vm3028_vm5, %v3030_v53, %v3032_v16 }
 0x1b9   : > { %v1275_v59 = vpop.f32.mrf.mxu0  ;;  %10642 = vmatmul.mubr.msk.f32.gmra.mxu0 %vm871_vm3, %v2153_v26  ;;  %v3034_v55 = vrot.slane %v13405_v7, 3 }
 0x1ba   : > { %v1900_v37 = vpop.f32.mrf.mxu1  ;;  %10628 = vmatmul.mubr.msk.f32.gmra.mxu1 %vm871_vm3, %v11962_v3  ;;  %10644 = vmatprep.mubr.msk.f32.mxu0 %vm12336_vm0, %v17796_v0 }
 0x1bb   : > { %v13452_v34 = vadd.f32 %v1900_v37, %v1265_v18  ;;  %v10246_v1 = vpop.f32.mrf.mxu0  ;;  %10877 = vmatprep.mubr.msk.f32.mxu1 %vm12336_vm0, %v17796_v0  ;;  %v2157_v18 = vsel %vm2144_vm4, %v2154_v24, %v2156_v12  ;;  %v13481_v24 = vld [vmem:[%s12551_s19 + $0x40] sm:$0xff] }
 0x1bc   : > { %v10485_v15 = vpop.f32.mrf.mxu1  ;;  %v2160_v1 = vrot.slane %v13481_v24, 2 }
 0x1bd   : > { %v1280_v25 = vpop.f32.mrf.mxu0  ;;  %10645 = vmatmul.mubr.msk.f32.gmra.mxu0 %vm871_vm3, %v2155_v63  ;;  %v3036_v15 = vrot.slane %v13419_v20, 3 }
 0x1be   : > { %v1905_v60 = vpop.f32.mrf.mxu1  ;;  %10878 = vmatmul.mubr.msk.f32.vlgmr.msra.gmra.mxu1 %vm871_vm3, %v3031_v51  ;;  %10647 = vmatprep.mubr.msk.f32.mxu0 %vm12336_vm0, %v17796_v0  ;;  %v3035_v51 = vsel %vm3028_vm5, %v3032_v16, %v3034_v55 }
 0x1bf   : > { %v13469_v26 = vadd.f32 %v1905_v60, %v1270_v29  ;;  %v10249_v44 = vpop.f32.mrf.mxu0  ;;  %10880 = vmatprep.mubr.msk.f32.mxu1 %vm12336_vm0, %v17796_v0  ;;  %v2159_v29 = vsel %vm2144_vm4, %v2156_v12, %v2158_v10  ;;  %v13496_v12 = vld [vmem:[%s12551_s19 + $0x48] sm:$0xff] }
 0x1c0   : > { %v10488_v37 = vpop.f32.mrf.mxu1 }
 0x1c1   : > { %v1285_v3 = vpop.f32.mrf.mxu0  ;;  %10648 = vmatmul.mubr.msk.f32.gmra.mxu0 %vm871_vm3, %v2157_v18  ;;  %v3037_v37 = vsel %vm3028_vm5, %v3034_v55, %v3036_v15 }
 0x1c2   : > { %v1910_v63 = vpop.f32.mrf.mxu1  ;;  %10881 = vmatmul.mubr.msk.f32.gmra.mxu1 %vm871_vm3, %v3033_v8  ;;  %10650 = vmatprep.mubr.msk.f32.mxu0 %vm12336_vm0, %v17796_v0  ;;  %v2162_v8 = vrot.slane %v13496_v12, 2 }
 0x1c3   : > { %v13484_v53 = vadd.f32 %v1910_v63, %v1275_v59  ;;  %v10252_v7 = vpop.f32.mrf.mxu0  ;;  %10883 = vmatprep.mubr.msk.f32.mxu1 %vm12336_vm0, %v17796_v0  ;;  %v2161_v59 = vsel %vm2144_vm4, %v2158_v10, %v2160_v1  ;;  %v3038_v63 = vrot.slane %v13433_v43, 3  ;;  %v13511_v10 = vld [vmem:[%s12551_s19 + $0x50] sm:$0xff] }
 0x1c4   : > { %v10491_v60 = vpop.f32.mrf.mxu1 }
 0x1c5   : > { %v1290_v18 = vpop.f32.mrf.mxu0  ;;  %10651 = vmatmul.mubr.msk.f32.gmra.mxu0 %vm871_vm3, %v2159_v29  ;;  %v2164_v60 = vrot.slane %v13511_v10, 2 }
 0x1c6   : > { %v1915_v44 = vpop.f32.mrf.mxu1  ;;  %10884 = vmatmul.mubr.msk.f32.gmra.mxu1 %vm871_vm3, %v3035_v51  ;;  %10653 = vmatprep.mubr.msk.f32.mxu0 %vm12336_vm0, %v17796_v0 }
 0x1c7   : > { %v13499_v16 = vadd.f32 %v1915_v44, %v1280_v25  ;;  %v10255_v20 = vpop.f32.mrf.mxu0  ;;  %10886 = vmatprep.mubr.msk.f32.mxu1 %vm12336_vm0, %v17796_v0  ;;  %v2163_v25 = vsel %vm2144_vm4, %v2160_v1, %v2162_v8  ;;  %v3039_v44 = vsel %vm3028_vm5, %v3036_v15, %v3038_v63  ;;  %v13526_v1 = vld [vmem:[%s12551_s19 + $0x58] sm:$0xff] }
 0x1c8   : > { %v10494_v29 = vpop.f32.mrf.mxu1 }
 0x1c9   : > { %v1295_v7 = vpop.f32.mrf.mxu0  ;;  %10654 = vmatmul.mubr.msk.f32.gmra.mxu0 %vm871_vm3, %v2161_v59  ;;  %v3040_v59 = vrot.slane %v13449_v49, 3 }
 0x1ca   : > { %v1920_v51 = vpop.f32.mrf.mxu1  ;;  %10887 = vmatmul.mubr.msk.f32.gmra.mxu1 %vm871_vm3, %v3037_v37  ;;  %10656 = vmatprep.mubr.msk.f32.mxu0 %vm12336_vm0, %v17796_v0 }
 0x1cb   : > { %v13514_v55 = vadd.f32 %v1920_v51, %v1285_v3  ;;  %v10258_v43 = vpop.f32.mrf.mxu0  ;;  %10889 = vmatprep.mubr.msk.f32.mxu1 %vm12336_vm0, %v17796_v0  ;;  %v2165_v3 = vsel %vm2144_vm4, %v2162_v8, %v2164_v60  ;;  %v2166_v51 = vrot.slane %v13526_v1, 2  ;;  %v13541_v8 = vld [vmem:[%s12551_s19 + $0x60] sm:$0xff] }
 0x1cc   : > { %v10497_v20 = vpop.f32.mrf.mxu1  ;;  %v3042_v43 = vrot.slane %v13466_v54, 3 }
 0x1cd   : > { %v1300_v37 = vpop.f32.mrf.mxu0  ;;  %10657 = vmatmul.mubr.msk.f32.gmra.mxu0 %vm871_vm3, %v2163_v25  ;;  %v3041_v25 = vsel %vm3028_vm5, %v3038_v63, %v3040_v59 }
 0x1ce   : > { %v1925_v29 = vpop.f32.mrf.mxu1  ;;  %10890 = vmatmul.mubr.msk.f32.gmra.mxu1 %vm871_vm3, %v3039_v44  ;;  %10659 = vmatprep.mubr.msk.f32.mxu0 %vm12336_vm0, %v17796_v0 }
 0x1cf   : > { %v13529_v15 = vadd.f32 %v1925_v29, %v1290_v18  ;;  %v10261_v49 = vpop.f32.mrf.mxu0  ;;  %10892 = vmatprep.mubr.msk.f32.mxu1 %vm12336_vm0, %v17796_v0  ;;  %v2167_v18 = vsel %vm2144_vm4, %v2164_v60, %v2166_v51  ;;  %v2168_v29 = vrot.slane %v13541_v8, 2 }
 0x1d0   : > { %v10500_v44 = vpop.f32.mrf.mxu1  ;;  %v3044_v49 = vrot.slane %v13481_v24, 3 }
 0x1d1   : > { %v1305_v20 = vpop.f32.mrf.mxu0  ;;  %10660 = vmatmul.mubr.msk.f32.gmra.mxu0 %vm871_vm3, %v2165_v3  ;;  %v3043_v3 = vsel %vm3028_vm5, %v3040_v59, %v3042_v43 }
 0x1d2   : > { %v1930_v50 = vpop.f32.mrf.mxu1  ;;  %10893 = vmatmul.mubr.msk.f32.gmra.mxu1 %vm871_vm3, %v3041_v25  ;;  %10662 = vmatprep.mubr.msk.f32.mxu0 %vm12336_vm0, %v17796_v0 }
 0x1d3   : > { %v13544_v63 = vadd.f32 %v1930_v50, %v1295_v7  ;;  %v10264_v54 = vpop.f32.mrf.mxu0  ;;  %10895 = vmatprep.mubr.msk.f32.mxu1 %vm12336_vm0, %v17796_v0  ;;  %v2169_v50 = vsel %vm2144_vm4, %v2166_v51, %v2168_v29  ;;  %v13556_v7 = vld [vmem:[%s12551_s19 + $0x68] sm:$0xff] }
 0x1d4   : > { %v10503_v25 = vpop.f32.mrf.mxu1  ;;  %v2170_v60 = vrot.slane %v13556_v7, 2  ;;  %v3046_v54 = vrot.slane %v13496_v12, 3 }
 0x1d5   : > { %v1310_v44 = vpop.f32.mrf.mxu0  ;;  %10663 = vmatmul.mubr.msk.f32.gmra.mxu0 %vm871_vm3, %v2167_v18  ;;  %v3045_v18 = vsel %vm3028_vm5, %v3042_v43, %v3044_v49 }
 0x1d6   : > { %v1935_v39 = vpop.f32.mrf.mxu1  ;;  %10896 = vmatmul.mubr.msk.f32.gmra.mxu1 %vm871_vm3, %v3043_v3  ;;  %10665 = vmatprep.mubr.msk.f32.mxu0 %vm12336_vm0, %v17796_v0 }
 0x1d7   : > { %v13559_v59 = vadd.f32 %v1935_v39, %v1300_v37  ;;  %v10267_v24 = vpop.f32.mrf.mxu0  ;;  %10898 = vmatprep.mubr.msk.f32.mxu1 %vm12336_vm0, %v17796_v0  ;;  %v2171_v39 = vsel %vm2144_vm4, %v2168_v29, %v2170_v60  ;;  %v13571_v37 = vld [vmem:[%s12551_s19 + $0x70] sm:$0xff] }
 0x1d8   : > { %v10506_v3 = vpop.f32.mrf.mxu1  ;;  %v2172_v51 = vrot.slane %v13571_v37, 2  ;;  %v3048_v24 = vrot.slane %v13511_v10, 3 }
 0x1d9   : > { %v1315_v25 = vpop.f32.mrf.mxu0  ;;  %10666 = vmatmul.mubr.msk.f32.gmra.mxu0 %vm871_vm3, %v2169_v50  ;;  %v3047_v50 = vsel %vm3028_vm5, %v3044_v49, %v3046_v54 }
 0x1da   : > { %v1940_v48 = vpop.f32.mrf.mxu1  ;;  %10899 = vmatmul.mubr.msk.f32.gmra.mxu1 %vm871_vm3, %v3045_v18  ;;  %10668 = vmatprep.mubr.msk.f32.mxu0 %vm12336_vm0, %v17796_v0 }
 0x1db   : > { %v13574_v43 = vadd.f32 %v1940_v48, %v1305_v20  ;;  %v10270_v12 = vpop.f32.mrf.mxu0  ;;  %10901 = vmatprep.mubr.msk.f32.mxu1 %vm12336_vm0, %v17796_v0  ;;  %v2173_v48 = vsel %vm2144_vm4, %v2170_v60, %v2172_v51  ;;  %v13586_v20 = vld [vmem:[%s12551_s19 + $0x78] sm:$0xff] }
 0x1dc   : > { %v10509_v18 = vpop.f32.mrf.mxu1  ;;  %v2174_v29 = vrot.slane %v13586_v20, 2  ;;  %v3050_v12 = vrot.slane %v13526_v1, 3 }
 0x1dd   : > { %17821 = vst [vmem:[#allocation24_spill] sm:$0xff] %v13574_v43  ;;  %v1320_v3 = vpop.f32.mrf.mxu0  ;;  %10669 = vmatmul.mubr.msk.f32.gmra.mxu0 %vm871_vm3, %v2171_v39  ;;  %v3049_v39 = vsel %vm3028_vm5, %v3046_v54, %v3048_v24 }
 0x1de   : > { %v1945_v41 = vpop.f32.mrf.mxu1  ;;  %10902 = vmatmul.mubr.msk.f32.gmra.mxu1 %vm871_vm3, %v3047_v50  ;;  %10671 = vmatprep.mubr.msk.f32.mxu0 %vm12336_vm0, %v17796_v0 }
 0x1df   : > { %v13589_v49 = vadd.f32 %v1945_v41, %v1310_v44  ;;  %v10273_v10 = vpop.f32.mrf.mxu0  ;;  %10904 = vmatprep.mubr.msk.f32.mxu1 %vm12336_vm0, %v17796_v0  ;;  %v2175_v41 = vsel %vm2144_vm4, %v2172_v51, %v2174_v29  ;;  %v13601_v44 = vld [vmem:[%s12551_s19 + $0x80] sm:$0xff]  ;;  %v13616_v51 = vld [vmem:[%s12551_s19 + $0x88] sm:$0xff] }
 0x1e0   : > { %v10512_v50 = vpop.f32.mrf.mxu1  ;;  %v2176_v60 = vrot.slane %v13601_v44, 2  ;;  %v3052_v10 = vrot.slane %v13541_v8, 3 }
 0x1e1   : > { %17822 = vst [vmem:[#allocation25_spill] sm:$0xff] %v13589_v49  ;;  %v1325_v18 = vpop.f32.mrf.mxu0  ;;  %10672 = vmatmul.mubr.msk.f32.gmra.mxu0 %vm871_vm3, %v2173_v48  ;;  %v3051_v48 = vsel %vm3028_vm5, %v3048_v24, %v3050_v12 }
 0x1e2   : > { %v1950_v43 = vpop.f32.mrf.mxu1  ;;  %10905 = vmatmul.mubr.msk.f32.gmra.mxu1 %vm871_vm3, %v3049_v39  ;;  %10674 = vmatprep.mubr.msk.f32.mxu0 %vm12336_vm0, %v17796_v0 }
 0x1e3   : > { %v13604_v54 = vadd.f32 %v1950_v43, %v1315_v25  ;;  %v10276_v1 = vpop.f32.mrf.mxu0  ;;  %10907 = vmatprep.mubr.msk.f32.mxu1 %vm12336_vm0, %v17796_v0  ;;  %v2177_v25 = vsel %vm2144_vm4, %v2174_v29, %v2176_v60  ;;  %v2178_v43 = vrot.slane %v13616_v51, 2  ;;  %v13631_v29 = vld [vmem:[%s12551_s19 + $0x90] sm:$0xff] }
 0x1e4   : > { %v10515_v39 = vpop.f32.mrf.mxu1  ;;  %v3054_v1 = vrot.slane %v13556_v7, 3 }
 0x1e5   : > { %17823 = vst [vmem:[#allocation26_spill] sm:$0xff] %v13604_v54  ;;  %v1330_v50 = vpop.f32.mrf.mxu0  ;;  %10675 = vmatmul.mubr.msk.f32.gmra.mxu0 %vm871_vm3, %v2175_v41  ;;  %v3053_v41 = vsel %vm3028_vm5, %v3050_v12, %v3052_v10 }
 0x1e6   : > { %v1955_v49 = vpop.f32.mrf.mxu1  ;;  %10908 = vmatmul.mubr.msk.f32.gmra.mxu1 %vm871_vm3, %v3051_v48  ;;  %10677 = vmatprep.mubr.msk.f32.mxu0 %vm12336_vm0, %v17796_v0 }
 0x1e7   : > { %v13619_v24 = vadd.f32 %v1955_v49, %v1320_v3  ;;  %v10279_v8 = vpop.f32.mrf.mxu0  ;;  %10910 = vmatprep.mubr.msk.f32.mxu1 %vm12336_vm0, %v17796_v0  ;;  %v2179_v3 = vsel %vm2144_vm4, %v2176_v60, %v2178_v43  ;;  %v2180_v49 = vrot.slane %v13631_v29, 2  ;;  %v13646_v60 = vld [vmem:[%s12551_s19 + $0x98] sm:$0xff] }
 0x1e8   : > { %v10518_v48 = vpop.f32.mrf.mxu1  ;;  %v3056_v8 = vrot.slane %v13571_v37, 3 }
 0x1e9   : > { %17824 = vst [vmem:[#allocation27_spill] sm:$0xff] %v13619_v24  ;;  %v1335_v39 = vpop.f32.mrf.mxu0  ;;  %10678 = vmatmul.mubr.msk.f32.gmra.mxu0 %vm871_vm3, %v2177_v25  ;;  %v3055_v25 = vsel %vm3028_vm5, %v3052_v10, %v3054_v1 }
 0x1ea   : > { %v1960_v54 = vpop.f32.mrf.mxu1  ;;  %10911 = vmatmul.mubr.msk.f32.gmra.mxu1 %vm871_vm3, %v3053_v41  ;;  %10680 = vmatprep.mubr.msk.f32.mxu0 %vm12336_vm0, %v17796_v0 }
 0x1eb   : > { %v13634_v12 = vadd.f32 %v1960_v54, %v1325_v18  ;;  %v10282_v7 = vpop.f32.mrf.mxu0  ;;  %10913 = vmatprep.mubr.msk.f32.mxu1 %vm12336_vm0, %v17796_v0  ;;  %v2181_v18 = vsel %vm2144_vm4, %v2178_v43, %v2180_v49  ;;  %v2182_v54 = vrot.slane %v13646_v60, 2  ;;  %v13661_v43 = vld [vmem:[%s12551_s19 + $0xa0] sm:$0xff] }
 0x1ec   : > { %v10521_v41 = vpop.f32.mrf.mxu1  ;;  %v3058_v7 = vrot.slane %v13586_v20, 3 }
 0x1ed   : > { %17825 = vst [vmem:[#allocation28_spill] sm:$0xff] %v13634_v12  ;;  %v1340_v48 = vpop.f32.mrf.mxu0  ;;  %10681 = vmatmul.mubr.msk.f32.gmra.mxu0 %vm871_vm3, %v2179_v3  ;;  %v3057_v3 = vsel %vm3028_vm5, %v3054_v1, %v3056_v8 }
 0x1ee   : > { %v1965_v24 = vpop.f32.mrf.mxu1  ;;  %10914 = vmatmul.mubr.msk.f32.gmra.mxu1 %vm871_vm3, %v3055_v25  ;;  %10683 = vmatprep.mubr.msk.f32.mxu0 %vm12336_vm0, %v17796_v0 }
 0x1ef   : > { %v13649_v10 = vadd.f32 %v1965_v24, %v1330_v50  ;;  %v10285_v37 = vpop.f32.mrf.mxu0  ;;  %10916 = vmatprep.mubr.msk.f32.mxu1 %vm12336_vm0, %v17796_v0  ;;  %v2183_v50 = vsel %vm2144_vm4, %v2180_v49, %v2182_v54  ;;  %v2184_v24 = vrot.slane %v13661_v43, 2  ;;  %v13676_v49 = vld [vmem:[%s12551_s19 + $0xa8] sm:$0xff] }
 0x1f0   : > { %v10524_v25 = vpop.f32.mrf.mxu1  ;;  %v3060_v37 = vrot.slane %v13601_v44, 3 }
 0x1f1   : > { %17826 = vst [vmem:[#allocation29_spill] sm:$0xff] %v13649_v10  ;;  %v1345_v41 = vpop.f32.mrf.mxu0  ;;  %10684 = vmatmul.mubr.msk.f32.gmra.mxu0 %vm871_vm3, %v2181_v18  ;;  %v3059_v18 = vsel %vm3028_vm5, %v3056_v8, %v3058_v7 }
 0x1f2   : > { %v1970_v12 = vpop.f32.mrf.mxu1  ;;  %10917 = vmatmul.mubr.msk.f32.gmra.mxu1 %vm871_vm3, %v3057_v3  ;;  %10686 = vmatprep.mubr.msk.f32.mxu0 %vm12336_vm0, %v17796_v0 }
 0x1f3   : > { %v13664_v1 = vadd.f32 %v1970_v12, %v1335_v39  ;;  %v10288_v20 = vpop.f32.mrf.mxu0  ;;  %10919 = vmatprep.mubr.msk.f32.mxu1 %vm12336_vm0, %v17796_v0  ;;  %v2185_v39 = vsel %vm2144_vm4, %v2182_v54, %v2184_v24  ;;  %v2186_v12 = vrot.slane %v13676_v49, 2 }
 0x1f4   : > { %v10527_v3 = vpop.f32.mrf.mxu1  ;;  %v3062_v20 = vrot.slane %v13616_v51, 3 }
 0x1f5   : > { %17827 = vst [vmem:[#allocation30_spill] sm:$0xff] %v13664_v1  ;;  %v1350_v25 = vpop.f32.mrf.mxu0  ;;  %10687 = vmatmul.mubr.msk.f32.gmra.mxu0 %vm871_vm3, %v2183_v50  ;;  %v3061_v50 = vsel %vm3028_vm5, %v3058_v7, %v3060_v37  ;;  %v2187_v51 = vsel %vm2144_vm4, %v2184_v24, %v2186_v12  ;;  %v13711_v24 = vld [vmem:[%s12551_s19 + $0xb8] sm:$0xff] }
 0x1f6   : > { %v1975_v10 = vpop.f32.mrf.mxu1  ;;  %10920 = vmatmul.mubr.msk.f32.gmra.mxu1 %vm871_vm3, %v3059_v18  ;;  %10689 = vmatprep.mubr.msk.f32.mxu0 %vm12336_vm0, %v17796_v0  ;;  %v9136_v18 = vld [vmem:[%s17766_s4 + $0x10] sm:$0xf] }
 0x1f7   : > { %v13679_v8 = vadd.f32 %v1975_v10, %v1340_v48  ;;  %v10291_v44 = vpop.f32.mrf.mxu0  ;;  %10922 = vmatprep.mubr.msk.f32.mxu1 %vm12336_vm0, %v17796_v0  ;;  %11121 = vmatpush3.msk.msra.mxu0 %vm1035_vm1, %v9136_v18  ;;  %v13696_v10 = vld [vmem:[%s12551_s19 + $0xb0] sm:$0xff] }
 0x1f8   : > { %v10530_v54 = vpop.f32.mrf.mxu1  ;;  %11456 = vmatprep.subr.mxu0 %v17796_v0  ;;  %v2188_v7 = vrot.slane %v13696_v10, 2 }
 0x1f9   : > { %17828 = vst [vmem:[#allocation31_spill] sm:$0xff] %v13679_v8  ;;  %v1355_v3 = vpop.f32.mrf.mxu0  ;;  %10690 = vmatmul.mubr.msk.f32.gmra.mxu0 %vm871_vm3, %v2185_v39  ;;  %v3063_v39 = vsel %vm3028_vm5, %v3060_v37, %v3062_v20 }
 0x1fa   : > { %v1980_v48 = vpop.f32.mrf.mxu1  ;;  %10923 = vmatmul.mubr.msk.f32.gmra.mxu1 %vm871_vm3, %v3061_v50  ;;  %10692 = vmatprep.mubr.msk.f32.mxu0 %vm12336_vm0, %v17796_v0  ;;  %v3064_v50 = vrot.slane %v13631_v29, 3 }
 0x1fb   : > { %v13699_v44 = vadd.f32 %v1980_v48, %v1345_v41  ;;  %v10294_v18 = vpop.f32.mrf.mxu0  ;;  %10925 = vmatprep.mubr.msk.f32.mxu1 %vm12336_vm0, %v17796_v0  ;;  %v2189_v41 = vsel %vm2144_vm4, %v2186_v12, %v2188_v7  ;;  %v2190_v48 = vrot.slane %v13711_v24, 2 }
 0x1fc   : > { %v10533_v54 = vpop.f32.mrf.mxu1  ;;  %v3066_v18 = vrot.slane %v13646_v60, 3 }
 0x1fd   : > { %17829 = vst [vmem:[#allocation32_spill] sm:$0xff] %v13699_v44  ;;  %v1360_v8 = vpop.f32.mrf.mxu0  ;;  %10693 = vmatmul.mubr.msk.f32.gmra.mxu0 %vm871_vm3, %v2187_v51  ;;  %v3065_v51 = vsel %vm3028_vm5, %v3062_v20, %v3064_v50 }
 0x1fe   : > { %v1985_v1 = vpop.f32.mrf.mxu1  ;;  %10926 = vmatmul.mubr.msk.f32.gmra.mxu1 %vm871_vm3, %v3063_v39  ;;  %10695 = vmatprep.mubr.msk.f32.mxu0 %vm12336_vm0, %v17796_v0 }
 0x1ff   : > { %v13714_v37 = vadd.f32 %v1985_v1, %v1350_v25  ;;  %v10297_v29 = vpop.f32.mrf.mxu0  ;;  %10928 = vmatprep.mubr.msk.f32.mxu1 %vm12336_vm0, %v17796_v0  ;;  %v2191_v1 = vsel %vm2144_vm4, %v2188_v7, %v2190_v48  ;;  %v13726_v25 = vld [vmem:[%s12551_s19 + $0xc0] sm:$0xff]  ;;  %v13741_v7 = vld [vmem:[%s12551_s19 + $0xc8] sm:$0xff] }
 0x200   : > { %v10536_v39 = vpop.f32.mrf.mxu1  ;;  %v2192_v12 = vrot.slane %v13726_v25, 2  ;;  %v3068_v29 = vrot.slane %v13661_v43, 3 }
 0x201   : > { %17830 = vst [vmem:[#allocation33_spill] sm:$0xff] %v13714_v37  ;;  %v1365_v54 = vpop.f32.mrf.mxu0  ;;  %10696 = vmatmul.mubr.msk.f32.gmra.mxu0 %vm871_vm3, %v2189_v41  ;;  %v3067_v41 = vsel %vm3028_vm5, %v3064_v50, %v3066_v18 }
 0x202   : > { %v1990_v44 = vpop.f32.mrf.mxu1  ;;  %10929 = vmatmul.mubr.msk.f32.gmra.mxu1 %vm871_vm3, %v3065_v51  ;;  %10698 = vmatprep.mubr.msk.f32.mxu0 %vm12336_vm0, %v17796_v0 }
 0x203   : > { %v13729_v20 = vadd.f32 %v1990_v44, %v1355_v3  ;;  %v10300_v60 = vpop.f32.mrf.mxu0  ;;  %10931 = vmatprep.mubr.msk.f32.mxu1 %vm12336_vm0, %v17796_v0  ;;  %v2193_v3 = vsel %vm2144_vm4, %v2190_v48, %v2192_v12  ;;  %v2194_v44 = vrot.slane %v13741_v7, 2  ;;  %v13756_v48 = vld [vmem:[%s12551_s19 + $0xd0] sm:$0xff] }
 0x204   : > { %v10539_v51 = vpop.f32.mrf.mxu1  ;;  %v3070_v60 = vrot.slane %v13676_v49, 3 }
 0x205   : > { %17831 = vst [vmem:[#allocation34_spill] sm:$0xff] %v13729_v20  ;;  %v1370_v39 = vpop.f32.mrf.mxu0  ;;  %10699 = vmatmul.mubr.msk.f32.gmra.mxu0 %vm871_vm3, %v2191_v1  ;;  %v3069_v1 = vsel %vm3028_vm5, %v3066_v18, %v3068_v29 }
 0x206   : > { %v1995_v37 = vpop.f32.mrf.mxu1  ;;  %10932 = vmatmul.mubr.msk.f32.gmra.mxu1 %vm871_vm3, %v3067_v41  ;;  %10701 = vmatprep.mubr.msk.f32.mxu0 %vm12336_vm0, %v17796_v0 }
 0x207   : > { %v13744_v50 = vadd.f32 %v1995_v37, %v1360_v8  ;;  %v10303_v43 = vpop.f32.mrf.mxu0  ;;  %10934 = vmatprep.mubr.msk.f32.mxu1 %vm12336_vm0, %v17796_v0  ;;  %v2195_v8 = vsel %vm2144_vm4, %v2192_v12, %v2194_v44  ;;  %v2196_v37 = vrot.slane %v13756_v48, 2  ;;  %v13771_v12 = vld [vmem:[%s12551_s19 + $0xd8] sm:$0xff] }
 0x208   : > { %v10542_v41 = vpop.f32.mrf.mxu1  ;;  %v3072_v43 = vrot.slane %v13696_v10, 3 }
 0x209   : > { %17832 = vst [vmem:[#allocation35_spill] sm:$0xff] %v13744_v50  ;;  %v1375_v51 = vpop.f32.mrf.mxu0  ;;  %10702 = vmatmul.mubr.msk.f32.gmra.mxu0 %vm871_vm3, %v2193_v3  ;;  %v3071_v3 = vsel %vm3028_vm5, %v3068_v29, %v3070_v60 }
 0x20a   : > { %v2000_v20 = vpop.f32.mrf.mxu1  ;;  %10935 = vmatmul.mubr.msk.f32.gmra.mxu1 %vm871_vm3, %v3069_v1  ;;  %10704 = vmatprep.mubr.msk.f32.mxu0 %vm12336_vm0, %v17796_v0 }
 0x20b   : > { %v13759_v18 = vadd.f32 %v2000_v20, %v1365_v54  ;;  %v10306_v49 = vpop.f32.mrf.mxu0  ;;  %10937 = vmatprep.mubr.msk.f32.mxu1 %vm12336_vm0, %v17796_v0  ;;  %v2197_v54 = vsel %vm2144_vm4, %v2194_v44, %v2196_v37  ;;  %v2198_v20 = vrot.slane %v13771_v12, 2  ;;  %v13786_v44 = vld [vmem:[%s12551_s19 + $0xe0] sm:$0xff] }
 0x20c   : > { %v10545_v1 = vpop.f32.mrf.mxu1  ;;  %v3074_v49 = vrot.slane %v13711_v24, 3 }
 0x20d   : > { %17833 = vst [vmem:[#allocation36_spill] sm:$0xff] %v13759_v18  ;;  %v1380_v41 = vpop.f32.mrf.mxu0  ;;  %10705 = vmatmul.mubr.msk.f32.gmra.mxu0 %vm871_vm3, %v2195_v8  ;;  %v3073_v8 = vsel %vm3028_vm5, %v3070_v60, %v3072_v43 }
 0x20e   : > { %v2005_v50 = vpop.f32.mrf.mxu1  ;;  %10938 = vmatmul.mubr.msk.f32.gmra.mxu1 %vm871_vm3, %v3071_v3  ;;  %10707 = vmatprep.mubr.msk.f32.mxu0 %vm12336_vm0, %v17796_v0 }
 0x20f   : > { %v13774_v29 = vadd.f32 %v2005_v50, %v1370_v39  ;;  %v10309_v10 = vpop.f32.mrf.mxu0  ;;  %10940 = vmatprep.mubr.msk.f32.mxu1 %vm12336_vm0, %v17796_v0  ;;  %v2199_v39 = vsel %vm2144_vm4, %v2196_v37, %v2198_v20  ;;  %v2200_v50 = vrot.slane %v13786_v44, 2  ;;  %v13801_v37 = vld [vmem:[%s12551_s19 + $0xe8] sm:$0xff] }
 0x210   : > { %v10548_v3 = vpop.f32.mrf.mxu1  ;;  %v3076_v10 = vrot.slane %v13726_v25, 3 }
 0x211   : > { %17834 = vst [vmem:[#allocation37_spill] sm:$0xff] %v13774_v29  ;;  %v1385_v1 = vpop.f32.mrf.mxu0  ;;  %10708 = vmatmul.mubr.msk.f32.gmra.mxu0 %vm871_vm3, %v2197_v54  ;;  %v3075_v54 = vsel %vm3028_vm5, %v3072_v43, %v3074_v49 }
 0x212   : > { %v2010_v18 = vpop.f32.mrf.mxu1  ;;  %10941 = vmatmul.mubr.msk.f32.gmra.mxu1 %vm871_vm3, %v3073_v8  ;;  %10710 = vmatprep.mubr.msk.f32.mxu0 %vm12336_vm0, %v17796_v0 }
 0x213   : > { %v13789_v60 = vadd.f32 %v2010_v18, %v1375_v51  ;;  %v10312_v24 = vpop.f32.mrf.mxu0  ;;  %10943 = vmatprep.mubr.msk.f32.mxu1 %vm12336_vm0, %v17796_v0  ;;  %v2201_v51 = vsel %vm2144_vm4, %v2198_v20, %v2200_v50  ;;  %v2202_v18 = vrot.slane %v13801_v37, 2  ;;  %v13816_v20 = vld [vmem:[%s12551_s19 + $0xf0] sm:$0xff] }
 0x214   : > { %v10551_v8 = vpop.f32.mrf.mxu1  ;;  %v3078_v24 = vrot.slane %v13741_v7, 3 }
 0x215   : > { %17835 = vst [vmem:[#allocation38_spill] sm:$0xff] %v13789_v60  ;;  %v1390_v3 = vpop.f32.mrf.mxu0  ;;  %10711 = vmatmul.mubr.msk.f32.gmra.mxu0 %vm871_vm3, %v2199_v39  ;;  %v3077_v39 = vsel %vm3028_vm5, %v3074_v49, %v3076_v10 }
 0x216   : > { %v2015_v29 = vpop.f32.mrf.mxu1  ;;  %10944 = vmatmul.mubr.msk.f32.gmra.mxu1 %vm871_vm3, %v3075_v54  ;;  %10713 = vmatprep.mubr.msk.f32.mxu0 %vm12336_vm0, %v17796_v0 }
 0x217   : > { %v13804_v43 = vadd.f32 %v2015_v29, %v1380_v41  ;;  %v10315_v25 = vpop.f32.mrf.mxu0  ;;  %10946 = vmatprep.mubr.msk.f32.mxu1 %vm12336_vm0, %v17796_v0  ;;  %v2203_v41 = vsel %vm2144_vm4, %v2200_v50, %v2202_v18  ;;  %v2204_v29 = vrot.slane %v13816_v20, 2  ;;  %v13831_v50 = vld [vmem:[%s12551_s19 + $0xf8] sm:$0xff] }
 0x218   : > { %v10554_v54 = vpop.f32.mrf.mxu1  ;;  %v3080_v25 = vrot.slane %v13756_v48, 3 }
 0x219   : > { %17836 = vst [vmem:[#allocation39_spill] sm:$0xff] %v13804_v43  ;;  %v1395_v8 = vpop.f32.mrf.mxu0  ;;  %10714 = vmatmul.mubr.msk.f32.gmra.mxu0 %vm871_vm3, %v2201_v51  ;;  %v3079_v51 = vsel %vm3028_vm5, %v3076_v10, %v3078_v24 }
 0x21a   : > { %v2020_v60 = vpop.f32.mrf.mxu1  ;;  %10947 = vmatmul.mubr.msk.f32.gmra.mxu1 %vm871_vm3, %v3077_v39  ;;  %10716 = vmatprep.mubr.msk.f32.mxu0 %vm12336_vm0, %v17796_v0 }
 0x21b   : > { %v13819_v49 = vadd.f32 %v2020_v60, %v1385_v1  ;;  %v10318_v7 = vpop.f32.mrf.mxu0  ;;  %10949 = vmatprep.mubr.msk.f32.mxu1 %vm12336_vm0, %v17796_v0  ;;  %v2205_v1 = vsel %vm2144_vm4, %v2202_v18, %v2204_v29  ;;  %v2206_v60 = vrot.slane %v13831_v50, 2  ;;  %v13846_v18 = vld [vmem:[%s12551_s19 + $0x100] sm:$0xff] }
 0x21c   : > { %v10557_v39 = vpop.f32.mrf.mxu1  ;;  %v3082_v7 = vrot.slane %v13771_v12, 3 }
 0x21d   : > { %17837 = vst [vmem:[#allocation40_spill] sm:$0xff] %v13819_v49  ;;  %v1400_v54 = vpop.f32.mrf.mxu0  ;;  %10717 = vmatmul.mubr.msk.f32.gmra.mxu0 %vm871_vm3, %v2203_v41  ;;  %v3081_v41 = vsel %vm3028_vm5, %v3078_v24, %v3080_v25 }
 0x21e   : > { %v2025_v43 = vpop.f32.mrf.mxu1  ;;  %10950 = vmatmul.mubr.msk.f32.gmra.mxu1 %vm871_vm3, %v3079_v51  ;;  %10719 = vmatprep.mubr.msk.f32.mxu0 %vm12336_vm0, %v17796_v0 }
 0x21f   : > { %v13834_v10 = vadd.f32 %v2025_v43, %v1390_v3  ;;  %v10321_v48 = vpop.f32.mrf.mxu0  ;;  %10952 = vmatprep.mubr.msk.f32.mxu1 %vm12336_vm0, %v17796_v0  ;;  %v2207_v3 = vsel %vm2144_vm4, %v2204_v29, %v2206_v60  ;;  %v2208_v43 = vrot.slane %v13846_v18, 2  ;;  %v13861_v29 = vld [vmem:[%s12551_s19 + $0x108] sm:$0xff] }
 0x220   : > { %v10560_v51 = vpop.f32.mrf.mxu1  ;;  %v3084_v48 = vrot.slane %v13786_v44, 3 }
 0x221   : > { %17838 = vst [vmem:[#allocation41_spill] sm:$0xff] %v13834_v10  ;;  %v1405_v39 = vpop.f32.mrf.mxu0  ;;  %10720 = vmatmul.mubr.msk.f32.gmra.mxu0 %vm871_vm3, %v2205_v1  ;;  %v3083_v1 = vsel %vm3028_vm5, %v3080_v25, %v3082_v7 }
 0x222   : > { %v2030_v49 = vpop.f32.mrf.mxu1  ;;  %10953 = vmatmul.mubr.msk.f32.gmra.mxu1 %vm871_vm3, %v3081_v41  ;;  %10722 = vmatprep.mubr.msk.f32.mxu0 %vm12336_vm0, %v17796_v0 }
 0x223   : > { %v13849_v24 = vadd.f32 %v2030_v49, %v1395_v8  ;;  %v10324_v12 = vpop.f32.mrf.mxu0  ;;  %10955 = vmatprep.mubr.msk.f32.mxu1 %vm12336_vm0, %v17796_v0  ;;  %v2209_v8 = vsel %vm2144_vm4, %v2206_v60, %v2208_v43  ;;  %v2210_v49 = vrot.slane %v13861_v29, 2  ;;  %v13876_v60 = vld [vmem:[%s12551_s19 + $0x110] sm:$0xff] }
 0x224   : > { %v10563_v41 = vpop.f32.mrf.mxu1  ;;  %v3086_v12 = vrot.slane %v13801_v37, 3 }
 0x225   : > { %17839 = vst [vmem:[#allocation42_spill] sm:$0xff] %v13849_v24  ;;  %v1410_v51 = vpop.f32.mrf.mxu0  ;;  %10723 = vmatmul.mubr.msk.f32.gmra.mxu0 %vm871_vm3, %v2207_v3  ;;  %v3085_v3 = vsel %vm3028_vm5, %v3082_v7, %v3084_v48 }
 0x226   : > { %v2035_v10 = vpop.f32.mrf.mxu1  ;;  %10956 = vmatmul.mubr.msk.f32.gmra.mxu1 %vm871_vm3, %v3083_v1  ;;  %10725 = vmatprep.mubr.msk.f32.mxu0 %vm12336_vm0, %v17796_v0 }
 0x227   : > { %v13864_v25 = vadd.f32 %v2035_v10, %v1400_v54  ;;  %v10327_v44 = vpop.f32.mrf.mxu0  ;;  %10958 = vmatprep.mubr.msk.f32.mxu1 %vm12336_vm0, %v17796_v0  ;;  %v2211_v54 = vsel %vm2144_vm4, %v2208_v43, %v2210_v49  ;;  %v2212_v10 = vrot.slane %v13876_v60, 2  ;;  %v13891_v43 = vld [vmem:[%s12551_s19 + $0x118] sm:$0xff] }
 0x228   : > { %v10566_v1 = vpop.f32.mrf.mxu1  ;;  %v3088_v44 = vrot.slane %v13816_v20, 3 }
 0x229   : > { %17840 = vst [vmem:[#allocation43_spill] sm:$0xff] %v13864_v25  ;;  %v1415_v41 = vpop.f32.mrf.mxu0  ;;  %10726 = vmatmul.mubr.msk.f32.gmra.mxu0 %vm871_vm3, %v2209_v8  ;;  %v3087_v8 = vsel %vm3028_vm5, %v3084_v48, %v3086_v12 }
 0x22a   : > { %v2040_v24 = vpop.f32.mrf.mxu1  ;;  %10959 = vmatmul.mubr.msk.f32.gmra.mxu1 %vm871_vm3, %v3085_v3  ;;  %10728 = vmatprep.mubr.msk.f32.mxu0 %vm12336_vm0, %v17796_v0 }
 0x22b   : > { %v13879_v7 = vadd.f32 %v2040_v24, %v1405_v39  ;;  %v10330_v37 = vpop.f32.mrf.mxu0  ;;  %10961 = vmatprep.mubr.msk.f32.mxu1 %vm12336_vm0, %v17796_v0  ;;  %v2213_v39 = vsel %vm2144_vm4, %v2210_v49, %v2212_v10  ;;  %v2214_v24 = vrot.slane %v13891_v43, 2  ;;  %v13906_v49 = vld [vmem:[%s12551_s19 + $0x120] sm:$0xff] }
 0x22c   : > { %v10569_v3 = vpop.f32.mrf.mxu1  ;;  %v3090_v37 = vrot.slane %v13831_v50, 3 }
 0x22d   : > { %17841 = vst [vmem:[#allocation44_spill] sm:$0xff] %v13879_v7  ;;  %v1420_v1 = vpop.f32.mrf.mxu0  ;;  %10729 = vmatmul.mubr.msk.f32.gmra.mxu0 %vm871_vm3, %v2211_v54  ;;  %v3089_v54 = vsel %vm3028_vm5, %v3086_v12, %v3088_v44 }
 0x22e   : > { %v2045_v25 = vpop.f32.mrf.mxu1  ;;  %10962 = vmatmul.mubr.msk.f32.gmra.mxu1 %vm871_vm3, %v3087_v8  ;;  %10731 = vmatprep.mubr.msk.f32.mxu0 %vm12336_vm0, %v17796_v0 }
 0x22f   : > { %v13894_v48 = vadd.f32 %v2045_v25, %v1410_v51  ;;  %v10333_v20 = vpop.f32.mrf.mxu0  ;;  %10964 = vmatprep.mubr.msk.f32.mxu1 %vm12336_vm0, %v17796_v0  ;;  %v2215_v51 = vsel %vm2144_vm4, %v2212_v10, %v2214_v24  ;;  %v2216_v25 = vrot.slane %v13906_v49, 2  ;;  %v13921_v10 = vld [vmem:[%s12551_s19 + $0x128] sm:$0xff] }
 0x230   : > { %v10572_v8 = vpop.f32.mrf.mxu1  ;;  %v3092_v20 = vrot.slane %v13846_v18, 3 }
 0x231   : > { %17842 = vst [vmem:[#allocation45_spill] sm:$0xff] %v13894_v48  ;;  %v1425_v3 = vpop.f32.mrf.mxu0  ;;  %10732 = vmatmul.mubr.msk.f32.gmra.mxu0 %vm871_vm3, %v2213_v39  ;;  %v3091_v39 = vsel %vm3028_vm5, %v3088_v44, %v3090_v37 }
 0x232   : > { %v2050_v7 = vpop.f32.mrf.mxu1  ;;  %10965 = vmatmul.mubr.msk.f32.gmra.mxu1 %vm871_vm3, %v3089_v54  ;;  %10734 = vmatprep.mubr.msk.f32.mxu0 %vm12336_vm0, %v17796_v0 }
 0x233   : > { %v13909_v12 = vadd.f32 %v2050_v7, %v1415_v41  ;;  %v10336_v50 = vpop.f32.mrf.mxu0  ;;  %10967 = vmatprep.mubr.msk.f32.mxu1 %vm12336_vm0, %v17796_v0  ;;  %v2217_v41 = vsel %vm2144_vm4, %v2214_v24, %v2216_v25  ;;  %v2218_v7 = vrot.slane %v13921_v10, 2  ;;  %v13936_v24 = vld [vmem:[%s12551_s19 + $0x130] sm:$0xff] }
 0x234   : > { %v10575_v54 = vpop.f32.mrf.mxu1  ;;  %v3094_v50 = vrot.slane %v13861_v29, 3 }
 0x235   : > { %17843 = vst [vmem:[#allocation46_spill] sm:$0xff] %v13909_v12  ;;  %v1430_v8 = vpop.f32.mrf.mxu0  ;;  %10735 = vmatmul.mubr.msk.f32.gmra.mxu0 %vm871_vm3, %v2215_v51  ;;  %v3093_v51 = vsel %vm3028_vm5, %v3090_v37, %v3092_v20 }
 0x236   : > { %v2055_v48 = vpop.f32.mrf.mxu1  ;;  %10968 = vmatmul.mubr.msk.f32.gmra.mxu1 %vm871_vm3, %v3091_v39  ;;  %10737 = vmatprep.mubr.msk.f32.mxu0 %vm12336_vm0, %v17796_v0 }
 0x237   : > { %v13924_v44 = vadd.f32 %v2055_v48, %v1420_v1  ;;  %v10339_v18 = vpop.f32.mrf.mxu0  ;;  %10970 = vmatprep.mubr.msk.f32.mxu1 %vm12336_vm0, %v17796_v0  ;;  %v2219_v1 = vsel %vm2144_vm4, %v2216_v25, %v2218_v7  ;;  %v2220_v48 = vrot.slane %v13936_v24, 2  ;;  %v13951_v25 = vld [vmem:[%s12551_s19 + $0x138] sm:$0xff] }
 0x238   : > { %v10578_v39 = vpop.f32.mrf.mxu1  ;;  %v3096_v18 = vrot.slane %v13876_v60, 3 }
 0x239   : > { %17844 = vst [vmem:[#allocation47_spill] sm:$0xff] %v13924_v44  ;;  %v1435_v54 = vpop.f32.mrf.mxu0  ;;  %10738 = vmatmul.mubr.msk.f32.gmra.mxu0 %vm871_vm3, %v2217_v41  ;;  %v3095_v41 = vsel %vm3028_vm5, %v3092_v20, %v3094_v50 }
 0x23a   : > { %v2060_v12 = vpop.f32.mrf.mxu1  ;;  %10971 = vmatmul.mubr.msk.f32.gmra.mxu1 %vm871_vm3, %v3093_v51  ;;  %10740 = vmatprep.mubr.msk.f32.mxu0 %vm12336_vm0, %v17796_v0 }
 0x23b   : > { %v13939_v37 = vadd.f32 %v2060_v12, %v1425_v3  ;;  %v10342_v29 = vpop.f32.mrf.mxu0  ;;  %10973 = vmatprep.mubr.msk.f32.mxu1 %vm12336_vm0, %v17796_v0  ;;  %v2221_v3 = vsel %vm2144_vm4, %v2218_v7, %v2220_v48  ;;  %v2222_v12 = vrot.slane %v13951_v25, 2  ;;  %v13966_v7 = vld [vmem:[%s12551_s19 + $0x140] sm:$0xff] }
 0x23c   : > { %v10581_v51 = vpop.f32.mrf.mxu1  ;;  %v3098_v29 = vrot.slane %v13891_v43, 3 }
 0x23d   : > { %17845 = vst [vmem:[#allocation48_spill] sm:$0xff] %v13939_v37  ;;  %v1440_v39 = vpop.f32.mrf.mxu0  ;;  %10741 = vmatmul.mubr.msk.f32.gmra.mxu0 %vm871_vm3, %v2219_v1  ;;  %v3097_v1 = vsel %vm3028_vm5, %v3094_v50, %v3096_v18 }
 0x23e   : > { %v2065_v44 = vpop.f32.mrf.mxu1  ;;  %10974 = vmatmul.mubr.msk.f32.gmra.mxu1 %vm871_vm3, %v3095_v41  ;;  %10743 = vmatprep.mubr.msk.f32.mxu0 %vm12336_vm0, %v17796_v0 }
 0x23f   : > { %v13954_v20 = vadd.f32 %v2065_v44, %v1430_v8  ;;  %v10345_v60 = vpop.f32.mrf.mxu0  ;;  %10976 = vmatprep.mubr.msk.f32.mxu1 %vm12336_vm0, %v17796_v0  ;;  %v2223_v8 = vsel %vm2144_vm4, %v2220_v48, %v2222_v12  ;;  %v2224_v44 = vrot.slane %v13966_v7, 2  ;;  %v13981_v48 = vld [vmem:[%s12551_s19 + $0x148] sm:$0xff] }
 0x240   : > { %v10584_v41 = vpop.f32.mrf.mxu1  ;;  %v3100_v60 = vrot.slane %v13906_v49, 3 }
 0x241   : > { %17846 = vst [vmem:[#allocation49_spill] sm:$0xff] %v13954_v20  ;;  %v1445_v51 = vpop.f32.mrf.mxu0  ;;  %10744 = vmatmul.mubr.msk.f32.gmra.mxu0 %vm871_vm3, %v2221_v3  ;;  %v3099_v3 = vsel %vm3028_vm5, %v3096_v18, %v3098_v29 }
 0x242   : > { %v2070_v37 = vpop.f32.mrf.mxu1  ;;  %10977 = vmatmul.mubr.msk.f32.gmra.mxu1 %vm871_vm3, %v3097_v1  ;;  %10746 = vmatprep.mubr.msk.f32.mxu0 %vm12336_vm0, %v17796_v0 }
 0x243   : > { %v13969_v50 = vadd.f32 %v2070_v37, %v1435_v54  ;;  %v10348_v43 = vpop.f32.mrf.mxu0  ;;  %10979 = vmatprep.mubr.msk.f32.mxu1 %vm12336_vm0, %v17796_v0  ;;  %v2225_v54 = vsel %vm2144_vm4, %v2222_v12, %v2224_v44  ;;  %v2226_v37 = vrot.slane %v13981_v48, 2  ;;  %v13996_v12 = vld [vmem:[%s12551_s19 + $0x150] sm:$0xff] }
 0x244   : > { %v10587_v1 = vpop.f32.mrf.mxu1  ;;  %v3102_v43 = vrot.slane %v13921_v10, 3 }
 0x245   : > { %17847 = vst [vmem:[#allocation50_spill] sm:$0xff] %v13969_v50  ;;  %v1450_v41 = vpop.f32.mrf.mxu0  ;;  %10747 = vmatmul.mubr.msk.f32.gmra.mxu0 %vm871_vm3, %v2223_v8  ;;  %v3101_v8 = vsel %vm3028_vm5, %v3098_v29, %v3100_v60 }
 0x246   : > { %v2075_v20 = vpop.f32.mrf.mxu1  ;;  %10980 = vmatmul.mubr.msk.f32.gmra.mxu1 %vm871_vm3, %v3099_v3  ;;  %10749 = vmatprep.mubr.msk.f32.mxu0 %vm12336_vm0, %v17796_v0 }
 0x247   : > { %v13984_v18 = vadd.f32 %v2075_v20, %v1440_v39  ;;  %v10351_v49 = vpop.f32.mrf.mxu0  ;;  %10982 = vmatprep.mubr.msk.f32.mxu1 %vm12336_vm0, %v17796_v0  ;;  %v2227_v39 = vsel %vm2144_vm4, %v2224_v44, %v2226_v37  ;;  %v2228_v20 = vrot.slane %v13996_v12, 2  ;;  %v14011_v44 = vld [vmem:[%s12551_s19 + $0x158] sm:$0xff] }
 0x248   : > { %v10590_v3 = vpop.f32.mrf.mxu1  ;;  %v3104_v49 = vrot.slane %v13936_v24, 3 }
 0x249   : > { %17848 = vst [vmem:[#allocation51_spill] sm:$0xff] %v13984_v18  ;;  %v1455_v1 = vpop.f32.mrf.mxu0  ;;  %10750 = vmatmul.mubr.msk.f32.gmra.mxu0 %vm871_vm3, %v2225_v54  ;;  %v3103_v54 = vsel %vm3028_vm5, %v3100_v60, %v3102_v43 }
 0x24a   : > { %v2080_v50 = vpop.f32.mrf.mxu1  ;;  %10983 = vmatmul.mubr.msk.f32.gmra.mxu1 %vm871_vm3, %v3101_v8  ;;  %10752 = vmatprep.mubr.msk.f32.mxu0 %vm12336_vm0, %v17796_v0 }
 0x24b   : > { %v13999_v29 = vadd.f32 %v2080_v50, %v1445_v51  ;;  %v10354_v10 = vpop.f32.mrf.mxu0  ;;  %10985 = vmatprep.mubr.msk.f32.mxu1 %vm12336_vm0, %v17796_v0  ;;  %v2229_v51 = vsel %vm2144_vm4, %v2226_v37, %v2228_v20  ;;  %v2230_v50 = vrot.slane %v14011_v44, 2  ;;  %v14026_v37 = vld [vmem:[%s12551_s19 + $0x160] sm:$0xff] }
 0x24c   : > { %v10593_v8 = vpop.f32.mrf.mxu1  ;;  %v3106_v10 = vrot.slane %v13951_v25, 3 }
 0x24d   : > { %17849 = vst [vmem:[#allocation52_spill] sm:$0xff] %v13999_v29  ;;  %v1460_v3 = vpop.f32.mrf.mxu0  ;;  %10753 = vmatmul.mubr.msk.f32.gmra.mxu0 %vm871_vm3, %v2227_v39  ;;  %v3105_v39 = vsel %vm3028_vm5, %v3102_v43, %v3104_v49 }
 0x24e   : > { %v2085_v18 = vpop.f32.mrf.mxu1  ;;  %10986 = vmatmul.mubr.msk.f32.gmra.mxu1 %vm871_vm3, %v3103_v54  ;;  %10755 = vmatprep.mubr.msk.f32.mxu0 %vm12336_vm0, %v17796_v0 }
 0x24f   : > { %v14014_v60 = vadd.f32 %v2085_v18, %v1450_v41  ;;  %v10357_v24 = vpop.f32.mrf.mxu0  ;;  %10988 = vmatprep.mubr.msk.f32.mxu1 %vm12336_vm0, %v17796_v0  ;;  %v2231_v41 = vsel %vm2144_vm4, %v2228_v20, %v2230_v50  ;;  %v2232_v18 = vrot.slane %v14026_v37, 2  ;;  %v14041_v20 = vld [vmem:[%s12551_s19 + $0x168] sm:$0xff] }
 0x250   : > { %v10596_v54 = vpop.f32.mrf.mxu1  ;;  %v3108_v24 = vrot.slane %v13966_v7, 3 }
 0x251   : > { %17850 = vst [vmem:[#allocation53_spill] sm:$0xff] %v14014_v60  ;;  %v1465_v8 = vpop.f32.mrf.mxu0  ;;  %10756 = vmatmul.mubr.msk.f32.gmra.mxu0 %vm871_vm3, %v2229_v51  ;;  %v3107_v51 = vsel %vm3028_vm5, %v3104_v49, %v3106_v10 }
 0x252   : > { %v2090_v29 = vpop.f32.mrf.mxu1  ;;  %10989 = vmatmul.mubr.msk.f32.gmra.mxu1 %vm871_vm3, %v3105_v39  ;;  %10758 = vmatprep.mubr.msk.f32.mxu0 %vm12336_vm0, %v17796_v0 }
 0x253   : > { %v14029_v43 = vadd.f32 %v2090_v29, %v1455_v1  ;;  %v10360_v25 = vpop.f32.mrf.mxu0  ;;  %10991 = vmatprep.mubr.msk.f32.mxu1 %vm12336_vm0, %v17796_v0  ;;  %v2233_v1 = vsel %vm2144_vm4, %v2230_v50, %v2232_v18  ;;  %v2234_v29 = vrot.slane %v14041_v20, 2  ;;  %v14056_v50 = vld [vmem:[%s12551_s19 + $0x170] sm:$0xff] }
 0x254   : > { %v10599_v39 = vpop.f32.mrf.mxu1  ;;  %v3110_v25 = vrot.slane %v13981_v48, 3 }
 0x255   : > { %17851 = vst [vmem:[#allocation54_spill] sm:$0xff] %v14029_v43  ;;  %v1470_v54 = vpop.f32.mrf.mxu0  ;;  %10759 = vmatmul.mubr.msk.f32.gmra.mxu0 %vm871_vm3, %v2231_v41  ;;  %v3109_v41 = vsel %vm3028_vm5, %v3106_v10, %v3108_v24 }
 0x256   : > { %v2095_v60 = vpop.f32.mrf.mxu1  ;;  %10992 = vmatmul.mubr.msk.f32.gmra.mxu1 %vm871_vm3, %v3107_v51  ;;  %10761 = vmatprep.mubr.msk.f32.mxu0 %vm12336_vm0, %v17796_v0 }
 0x257   : > { %v14044_v49 = vadd.f32 %v2095_v60, %v1460_v3  ;;  %v10363_v7 = vpop.f32.mrf.mxu0  ;;  %10994 = vmatprep.mubr.msk.f32.mxu1 %vm12336_vm0, %v17796_v0  ;;  %v2235_v3 = vsel %vm2144_vm4, %v2232_v18, %v2234_v29  ;;  %v2236_v60 = vrot.slane %v14056_v50, 2  ;;  %v14071_v18 = vld [vmem:[%s12551_s19 + $0x178] sm:$0xff] }
 0x258   : > { %v10602_v51 = vpop.f32.mrf.mxu1  ;;  %v3112_v7 = vrot.slane %v13996_v12, 3 }
 0x259   : > { %17852 = vst [vmem:[#allocation55_spill] sm:$0xff] %v14044_v49  ;;  %v1475_v39 = vpop.f32.mrf.mxu0  ;;  %10762 = vmatmul.mubr.msk.f32.gmra.mxu0 %vm871_vm3, %v2233_v1  ;;  %v3111_v1 = vsel %vm3028_vm5, %v3108_v24, %v3110_v25 }
 0x25a   : > { %v2100_v43 = vpop.f32.mrf.mxu1  ;;  %10995 = vmatmul.mubr.msk.f32.gmra.mxu1 %vm871_vm3, %v3109_v41  ;;  %10764 = vmatprep.mubr.msk.f32.mxu0 %vm12336_vm0, %v17796_v0 }
 0x25b   : > { %v14059_v10 = vadd.f32 %v2100_v43, %v1465_v8  ;;  %v10366_v48 = vpop.f32.mrf.mxu0  ;;  %10997 = vmatprep.mubr.msk.f32.mxu1 %vm12336_vm0, %v17796_v0  ;;  %v2237_v8 = vsel %vm2144_vm4, %v2234_v29, %v2236_v60  ;;  %v2238_v43 = vrot.slane %v14071_v18, 2  ;;  %v14086_v29 = vld [vmem:[%s12551_s19 + $0x180] sm:$0xff] }
 0x25c   : > { %v10605_v41 = vpop.f32.mrf.mxu1  ;;  %v3114_v48 = vrot.slane %v14011_v44, 3 }
 0x25d   : > { %17853 = vst [vmem:[#allocation56_spill] sm:$0xff] %v14059_v10  ;;  %v1480_v51 = vpop.f32.mrf.mxu0  ;;  %10765 = vmatmul.mubr.msk.f32.gmra.mxu0 %vm871_vm3, %v2235_v3  ;;  %v3113_v3 = vsel %vm3028_vm5, %v3110_v25, %v3112_v7 }
 0x25e   : > { %v2105_v49 = vpop.f32.mrf.mxu1  ;;  %10998 = vmatmul.mubr.msk.f32.gmra.mxu1 %vm871_vm3, %v3111_v1  ;;  %10767 = vmatprep.mubr.msk.f32.mxu0 %vm12336_vm0, %v17796_v0 }
 0x25f   : > { %v14074_v24 = vadd.f32 %v2105_v49, %v1470_v54  ;;  %v10369_v12 = vpop.f32.mrf.mxu0  ;;  %11000 = vmatprep.mubr.msk.f32.mxu1 %vm12336_vm0, %v17796_v0  ;;  %v2239_v54 = vsel %vm2144_vm4, %v2236_v60, %v2238_v43  ;;  %v2240_v49 = vrot.slane %v14086_v29, 2  ;;  %v14101_v60 = vld [vmem:[%s12551_s19 + $0x188] sm:$0xff] }
 0x260   : > { %v10608_v1 = vpop.f32.mrf.mxu1  ;;  %v3116_v12 = vrot.slane %v14026_v37, 3 }
 0x261   : > { %17854 = vst [vmem:[#allocation57_spill] sm:$0xff] %v14074_v24  ;;  %v1485_v41 = vpop.f32.mrf.mxu0  ;;  %10768 = vmatmul.mubr.msk.f32.gmra.mxu0 %vm871_vm3, %v2237_v8  ;;  %v3115_v8 = vsel %vm3028_vm5, %v3112_v7, %v3114_v48 }
 0x262   : > { %v2110_v10 = vpop.f32.mrf.mxu1  ;;  %11001 = vmatmul.mubr.msk.f32.gmra.mxu1 %vm871_vm3, %v3113_v3  ;;  %10770 = vmatprep.mubr.msk.f32.mxu0 %vm12336_vm0, %v17796_v0 }
 0x263   : > { %v14089_v25 = vadd.f32 %v2110_v10, %v1475_v39  ;;  %v10372_v44 = vpop.f32.mrf.mxu0  ;;  %11003 = vmatprep.mubr.msk.f32.mxu1 %vm12336_vm0, %v17796_v0  ;;  %v2241_v39 = vsel %vm2144_vm4, %v2238_v43, %v2240_v49  ;;  %v2242_v10 = vrot.slane %v14101_v60, 2  ;;  %v14116_v43 = vld [vmem:[%s12551_s19 + $0x190] sm:$0xff] }
 0x264   : > { %v10611_v3 = vpop.f32.mrf.mxu1  ;;  %v3118_v44 = vrot.slane %v14041_v20, 3 }
 0x265   : > { %17855 = vst [vmem:[#allocation58_spill] sm:$0xff] %v14089_v25  ;;  %v1490_v1 = vpop.f32.mrf.mxu0  ;;  %10771 = vmatmul.mubr.msk.f32.gmra.mxu0 %vm871_vm3, %v2239_v54  ;;  %v3117_v54 = vsel %vm3028_vm5, %v3114_v48, %v3116_v12 }
 0x266   : > { %v2115_v24 = vpop.f32.mrf.mxu1  ;;  %11004 = vmatmul.mubr.msk.f32.gmra.mxu1 %vm871_vm3, %v3115_v8  ;;  %10773 = vmatprep.mubr.msk.f32.mxu0 %vm12336_vm0, %v17796_v0 }
 0x267   : > { %v14104_v7 = vadd.f32 %v2115_v24, %v1480_v51  ;;  %v10375_v37 = vpop.f32.mrf.mxu0  ;;  %11006 = vmatprep.mubr.msk.f32.mxu1 %vm12336_vm0, %v17796_v0  ;;  %v2243_v51 = vsel %vm2144_vm4, %v2240_v49, %v2242_v10  ;;  %v2244_v24 = vrot.slane %v14116_v43, 2 }
 0x268   : > { %v10614_v8 = vpop.f32.mrf.mxu1  ;;  %v3120_v37 = vrot.slane %v14056_v50, 3 }
 0x269   : > { %17856 = vst [vmem:[#allocation59_spill] sm:$0xff] %v14104_v7  ;;  %v1495_v3 = vpop.f32.mrf.mxu0  ;;  %10774 = vmatmul.mubr.msk.f32.gmra.mxu0 %vm871_vm3, %v2241_v39  ;;  %v3119_v39 = vsel %vm3028_vm5, %v3116_v12, %v3118_v44 }
 0x26a   : > { %v2120_v25 = vpop.f32.mrf.mxu1  ;;  %11007 = vmatmul.mubr.msk.f32.gmra.mxu1 %vm871_vm3, %v3117_v54  ;;  %10776 = vmatprep.mubr.msk.f32.mxu0 %vm12336_vm0, %v17796_v0 }
 0x26b   : > { %v14119_v48 = vadd.f32 %v2120_v25, %v1485_v41  ;;  %v10378_v20 = vpop.f32.mrf.mxu0  ;;  %11009 = vmatprep.mubr.msk.f32.mxu1 %vm12336_vm0, %v17796_v0  ;;  %v2245_v41 = vsel %vm2144_vm4, %v2242_v10, %v2244_v24  ;;  %v14134_v25 = vld [vmem:[%s12551_s19 + $0x198] sm:$0xff] }
 0x26c   : > { %v10617_v54 = vpop.f32.mrf.mxu1  ;;  %v2246_v50 = vrot.slane %v14134_v25, 2 }
 0x26d   : > { %v2543_v8 = vpop.f32.mrf.mxu0  ;;  %10777 = vmatmul.mubr.msk.f32.gmra.mxu0 %vm871_vm3, %v2243_v51  ;;  %v3122_v51 = vrot.slane %v14071_v18, 3 }
 0x26e   : > { %v2125_v49 = vpop.f32.mrf.mxu1  ;;  %v14127_v7 = vadd.f32 %v2543_v8, %v12999_v58  ;;  %11010 = vmatmul.mubr.msk.f32.gmra.mxu1 %vm871_vm3, %v3119_v39  ;;  %10779 = vmatprep.mubr.msk.f32.mxu0 %vm12336_vm0, %v17796_v0  ;;  %v3121_v58 = vsel %vm3028_vm5, %v3118_v44, %v3120_v37 }
 0x26f   : > { %v14137_v12 = vadd.f32 %v2125_v49, %v1490_v1  ;;  %v10634_v20 = vpop.f32.mrf.mxu0  ;;  %11012 = vmatprep.mubr.msk.f32.mxu1 %vm12336_vm0, %v17796_v0  ;;  %v2247_v1 = vsel %vm2144_vm4, %v2244_v24, %v2246_v50  ;;  %v14152_v49 = vld [vmem:[%s12551_s19 + $0x1a0] sm:$0xff] }
 0x270   : > { %v10620_v39 = vpop.f32.mrf.mxu1  ;;  %v2248_v18 = vrot.slane %v14152_v49, 2 }
 0x271   : > { %v2548_v54 = vpop.f32.mrf.mxu0  ;;  %10780 = vmatmul.mubr.msk.f32.gmra.mxu0 %vm871_vm3, %v2245_v41  ;;  %v3124_v41 = vrot.slane %v14086_v29, 3 }
 0x272   : > { %v2130_v10 = vpop.f32.mrf.mxu1  ;;  %v14145_v8 = vadd.f32 %v2548_v54, %v13016_v5  ;;  %11013 = vmatmul.mubr.msk.f32.gmra.mxu1 %vm871_vm3, %v3121_v58  ;;  %10782 = vmatprep.mubr.msk.f32.mxu0 %vm12336_vm0, %v17796_v0  ;;  %v3123_v5 = vsel %vm3028_vm5, %v3120_v37, %v3122_v51  ;;  %v14172_v37 = vld [vmem:[%s12551_s19 + $0x1a8] sm:$0xff] }
 0x273   : > { %v14155_v44 = vadd.f32 %v2130_v10, %v1495_v3  ;;  %v10637_v20 = vpop.f32.mrf.mxu0  ;;  %11015 = vmatprep.mubr.msk.f32.mxu1 %vm12336_vm0, %v17796_v0  ;;  %v2249_v3 = vsel %vm2144_vm4, %v2246_v50, %v2248_v18  ;;  %v2250_v29 = vrot.slane %v14172_v37, 2 }
 0x274   : > { %v10623_v58 = vpop.f32.mrf.mxu1 }
 0x275   : > { %v2553_v39 = vpop.f32.mrf.mxu0  ;;  %10783 = vmatmul.mubr.msk.f32.gmra.mxu0 %vm871_vm3, %v2247_v1  ;;  %v3125_v1 = vsel %vm3028_vm5, %v3122_v51, %v3124_v41  ;;  %v14190_v51 = vld [vmem:[%s12551_s19 + $0x1b0] sm:$0xff] }
 0x276   : > { %v14162_v24 = vpop.f32.mrf.mxu1  ;;  %v14165_v54 = vadd.f32 %v2553_v39, %v13030_v14  ;;  %11016 = vmatmul.mubr.msk.f32.gmra.mxu1 %vm871_vm3, %v3123_v5  ;;  %10785 = vmatprep.mubr.msk.f32.mxu0 %vm12336_vm0, %v17796_v0  ;;  %v3126_v14 = vrot.slane %v14101_v60, 3  ;;  %v2251_v39 = vsel %vm2144_vm4, %v2248_v18, %v2250_v29  ;;  %v2252_v60 = vrot.slane %v14190_v51, 2 }
 0x277   : > { %17857 = vst [vmem:[#allocation60_spill] sm:$0xff] %v14162_v24  ;;  %v10640_v10 = vpop.f32.mrf.mxu0  ;;  %11018 = vmatprep.mubr.msk.f32.mxu1 %vm12336_vm0, %v17796_v0 }
 0x278   : > { %v10626_v20 = vpop.f32.mrf.mxu1 }
 0x279   : > { %v2558_v5 = vpop.f32.mrf.mxu0  ;;  %10786 = vmatmul.mubr.msk.f32.gmra.mxu0 %vm871_vm3, %v2249_v3  ;;  %v3127_v3 = vsel %vm3028_vm5, %v3124_v41, %v3126_v14 }
 0x27a   : > { %v14180_v58 = vpop.f32.mrf.mxu1  ;;  %v14183_v50 = vadd.f32 %v2558_v5, %v13044_v22  ;;  %11019 = vmatmul.mubr.msk.f32.gmra.mxu1 %vm871_vm3, %v3125_v1  ;;  %10788 = vmatprep.mubr.msk.f32.mxu0 %vm12336_vm0, %v17796_v0  ;;  %v3128_v22 = vrot.slane %v14116_v43, 3 }
 0x27b   : > { %17858 = vst [vmem:[#allocation61_spill] sm:$0xff] %v14180_v58  ;;  %v10643_v10 = vpop.f32.mrf.mxu0  ;;  %11021 = vmatprep.mubr.msk.f32.mxu1 %vm12336_vm0, %v17796_v0  ;;  %v14206_v58 = vld [vmem:[%s12551_s19 + $0x1b8] sm:$0xff] }
 0x27c   : > { %v10629_v20 = vpop.f32.mrf.mxu1  ;;  %v2253_v10 = vsel %vm2144_vm4, %v2250_v29, %v2252_v60  ;;  %v2254_v43 = vrot.slane %v14206_v58, 2 }
 0x27d   : > { %v2563_v1 = vpop.f32.mrf.mxu0  ;;  %10789 = vmatmul.mubr.msk.f32.gmra.mxu0 %vm871_vm3, %v2251_v39 }
 0x27e   : > { %v14199_v5 = vadd.f32 %v2563_v1, %v13058_v30  ;;  %v3427_v18 = vpop.f32.mrf.mxu1  ;;  %11022 = vmatmul.mubr.msk.f32.gmra.mxu1 %vm871_vm3, %v3127_v3  ;;  %10791 = vmatprep.mubr.msk.f32.mxu0 %vm12336_vm0, %v17796_v0  ;;  %v3129_v30 = vsel %vm3028_vm5, %v3126_v14, %v3128_v22  ;;  %v3130_v3 = vrot.slane %v14134_v25, 3 }
 0x27f   : > { %v14210_v41 = vadd.f32 %v3427_v18, %v14127_v7  ;;  %v10646_v39 = vpop.f32.mrf.mxu0  ;;  %11024 = vmatprep.mubr.msk.f32.mxu1 %vm12336_vm0, %v17796_v0  ;;  %v2255_v7 = vsel %vm2144_vm4, %v2252_v60, %v2254_v43  ;;  %v14225_v18 = vld [vmem:[%s12551_s19 + $0x1c0] sm:$0xff] }
 0x280   : > { %v10879_v20 = vpop.f32.mrf.mxu1  ;;  %v2256_v25 = vrot.slane %v14225_v18, 2  ;;  %v3132_v39 = vrot.slane %v14152_v49, 3 }
 0x281   : > { %v2568_v1 = vpop.f32.mrf.mxu0  ;;  %10792 = vmatmul.mubr.msk.f32.gmra.mxu0 %vm871_vm3, %v2253_v10 }
 0x282   : > { %v14218_v29 = vadd.f32 %v2568_v1, %v13072_v38  ;;  %v3432_v24 = vpop.f32.mrf.mxu1  ;;  %11025 = vmatmul.mubr.msk.f32.gmra.mxu1 %vm871_vm3, %v3129_v30  ;;  %10794 = vmatprep.mubr.msk.f32.mxu0 %vm12336_vm0, %v17796_v0  ;;  %v3131_v38 = vsel %vm3028_vm5, %v3128_v22, %v3130_v3 }
 0x283   : > { %v14229_v14 = vadd.f32 %v3432_v24, %v14145_v8  ;;  %v10649_v10 = vpop.f32.mrf.mxu0  ;;  %11027 = vmatprep.mubr.msk.f32.mxu1 %vm12336_vm0, %v17796_v0  ;;  %v2257_v8 = vsel %vm2144_vm4, %v2254_v43, %v2256_v25  ;;  %v14244_v24 = vld [vmem:[%s12551_s19 + $0x1c8] sm:$0xff] }
 0x284   : > { %v10882_v30 = vpop.f32.mrf.mxu1  ;;  %v2258_v49 = vrot.slane %v14244_v24, 2  ;;  %v3134_v10 = vrot.slane %v14172_v37, 3 }
 0x285   : > { %v2573_v20 = vpop.f32.mrf.mxu0  ;;  %10795 = vmatmul.mubr.msk.f32.gmra.mxu0 %vm871_vm3, %v2255_v7 }
 0x286   : > { %v14237_v60 = vadd.f32 %v2573_v20, %v13086_v47  ;;  %v3437_v1 = vpop.f32.mrf.mxu1  ;;  %11028 = vmatmul.mubr.msk.f32.gmra.mxu1 %vm871_vm3, %v3131_v38  ;;  %10797 = vmatprep.mubr.msk.f32.mxu0 %vm12336_vm0, %v17796_v0  ;;  %v3133_v47 = vsel %vm3028_vm5, %v3130_v3, %v3132_v39 }
 0x287   : > { %v14248_v22 = vadd.f32 %v3437_v1, %v14165_v54  ;;  %v10652_v7 = vpop.f32.mrf.mxu0  ;;  %11030 = vmatprep.mubr.msk.f32.mxu1 %vm12336_vm0, %v17796_v0  ;;  %v2259_v54 = vsel %vm2144_vm4, %v2256_v25, %v2258_v49  ;;  %v14263_v1 = vld [vmem:[%s12551_s19 + $0x1d0] sm:$0xff] }
 0x288   : > { %v10885_v38 = vpop.f32.mrf.mxu1  ;;  %v2260_v37 = vrot.slane %v14263_v1, 2  ;;  %v3136_v7 = vrot.slane %v14190_v51, 3 }
 0x289   : > { %v2578_v30 = vpop.f32.mrf.mxu0  ;;  %10798 = vmatmul.mubr.msk.f32.gmra.mxu0 %vm871_vm3, %v2257_v8 }
 0x28a   : > { %v14256_v43 = vadd.f32 %v2578_v30, %v13100_v56  ;;  %v3442_v20 = vpop.f32.mrf.mxu1  ;;  %11031 = vmatmul.mubr.msk.f32.gmra.mxu1 %vm871_vm3, %v3133_v47  ;;  %10800 = vmatprep.mubr.msk.f32.mxu0 %vm12336_vm0, %v17796_v0  ;;  %v3135_v56 = vsel %vm3028_vm5, %v3132_v39, %v3134_v10 }
 0x28b   : > { %v14267_v3 = vadd.f32 %v3442_v20, %v14183_v50  ;;  %v10655_v8 = vpop.f32.mrf.mxu0  ;;  %11033 = vmatprep.mubr.msk.f32.mxu1 %vm12336_vm0, %v17796_v0  ;;  %v2261_v50 = vsel %vm2144_vm4, %v2258_v49, %v2260_v37  ;;  %v14282_v20 = vld [vmem:[%s12551_s19 + $0x1d8] sm:$0xff] }
 0x28c   : > { %v10888_v47 = vpop.f32.mrf.mxu1  ;;  %v2262_v51 = vrot.slane %v14282_v20, 2  ;;  %v3138_v8 = vrot.slane %v14206_v58, 3 }
 0x28d   : > { %v2583_v38 = vpop.f32.mrf.mxu0  ;;  %10801 = vmatmul.mubr.msk.f32.gmra.mxu0 %vm871_vm3, %v2259_v54 }
 0x28e   : > { %v14275_v25 = vadd.f32 %v2583_v38, %v13114_v2  ;;  %v3447_v30 = vpop.f32.mrf.mxu1  ;;  %11034 = vmatmul.mubr.msk.f32.gmra.mxu1 %vm871_vm3, %v3135_v56  ;;  %10803 = vmatprep.mubr.msk.f32.mxu0 %vm12336_vm0, %v17796_v0  ;;  %v3137_v2 = vsel %vm3028_vm5, %v3134_v10, %v3136_v7 }
 0x28f   : > { %v14286_v39 = vadd.f32 %v3447_v30, %v14199_v5  ;;  %v10658_v54 = vpop.f32.mrf.mxu0  ;;  %11036 = vmatprep.mubr.msk.f32.mxu1 %vm12336_vm0, %v17796_v0  ;;  %v2263_v5 = vsel %vm2144_vm4, %v2260_v37, %v2262_v51  ;;  %v14301_v30 = vld [vmem:[%s12551_s19 + $0x1e0] sm:$0xff] }
 0x290   : > { %v10891_v56 = vpop.f32.mrf.mxu1  ;;  %v2264_v58 = vrot.slane %v14301_v30, 2  ;;  %v3140_v54 = vrot.slane %v14225_v18, 3 }
 0x291   : > { %v2588_v47 = vpop.f32.mrf.mxu0  ;;  %10804 = vmatmul.mubr.msk.f32.gmra.mxu0 %vm871_vm3, %v2261_v50 }
 0x292   : > { %v14294_v49 = vadd.f32 %v2588_v47, %v13128_v13  ;;  %v3452_v38 = vpop.f32.mrf.mxu1  ;;  %11037 = vmatmul.mubr.msk.f32.gmra.mxu1 %vm871_vm3, %v3137_v2  ;;  %10806 = vmatprep.mubr.msk.f32.mxu0 %vm12336_vm0, %v17796_v0  ;;  %v3139_v13 = vsel %vm3028_vm5, %v3136_v7, %v3138_v8 }
 0x293   : > { %v14305_v10 = vadd.f32 %v3452_v38, %v14218_v29  ;;  %v10661_v50 = vpop.f32.mrf.mxu0  ;;  %11039 = vmatprep.mubr.msk.f32.mxu1 %vm12336_vm0, %v17796_v0  ;;  %v2265_v29 = vsel %vm2144_vm4, %v2262_v51, %v2264_v58  ;;  %v14320_v38 = vld [vmem:[%s12551_s19 + $0x1e8] sm:$0xff] }
 0x294   : > { %v10894_v2 = vpop.f32.mrf.mxu1  ;;  %v2266_v18 = vrot.slane %v14320_v38, 2  ;;  %v3142_v50 = vrot.slane %v14244_v24, 3 }
 0x295   : > { %v2593_v56 = vpop.f32.mrf.mxu0  ;;  %10807 = vmatmul.mubr.msk.f32.gmra.mxu0 %vm871_vm3, %v2263_v5 }
 0x296   : > { %v14313_v37 = vadd.f32 %v2593_v56, %v13142_v23  ;;  %v3457_v47 = vpop.f32.mrf.mxu1  ;;  %11040 = vmatmul.mubr.msk.f32.gmra.mxu1 %vm871_vm3, %v3139_v13  ;;  %10809 = vmatprep.mubr.msk.f32.mxu0 %vm12336_vm0, %v17796_v0  ;;  %v3141_v23 = vsel %vm3028_vm5, %v3138_v8, %v3140_v54 }
 0x297   : > { %v14324_v7 = vadd.f32 %v3457_v47, %v14237_v60  ;;  %v10664_v5 = vpop.f32.mrf.mxu0  ;;  %11042 = vmatprep.mubr.msk.f32.mxu1 %vm12336_vm0, %v17796_v0  ;;  %v2267_v60 = vsel %vm2144_vm4, %v2264_v58, %v2266_v18  ;;  %v14339_v47 = vld [vmem:[%s12551_s19 + $0x1f0] sm:$0xff] }
 0x298   : > { %v10897_v13 = vpop.f32.mrf.mxu1  ;;  %v2268_v24 = vrot.slane %v14339_v47, 2  ;;  %v3144_v5 = vrot.slane %v14263_v1, 3 }
 0x299   : > { %v2598_v2 = vpop.f32.mrf.mxu0  ;;  %10810 = vmatmul.mubr.msk.f32.gmra.mxu0 %vm871_vm3, %v2265_v29 }
 0x29a   : > { %v14332_v51 = vadd.f32 %v2598_v2, %v13156_v32  ;;  %v3462_v56 = vpop.f32.mrf.mxu1  ;;  %11043 = vmatmul.mubr.msk.f32.gmra.mxu1 %vm871_vm3, %v3141_v23  ;;  %10812 = vmatprep.mubr.msk.f32.mxu0 %vm12336_vm0, %v17796_v0  ;;  %v3143_v32 = vsel %vm3028_vm5, %v3140_v54, %v3142_v50 }
 0x29b   : > { %v14343_v8 = vadd.f32 %v3462_v56, %v14256_v43  ;;  %v10667_v29 = vpop.f32.mrf.mxu0  ;;  %11045 = vmatprep.mubr.msk.f32.mxu1 %vm12336_vm0, %v17796_v0  ;;  %v2269_v43 = vsel %vm2144_vm4, %v2266_v18, %v2268_v24  ;;  %v14358_v56 = vld [vmem:[%s12551_s19 + $0x1f8] sm:$0xff] }
 0x29c   : > { %v10900_v23 = vpop.f32.mrf.mxu1  ;;  %v2270_v1 = vrot.slane %v14358_v56, 2  ;;  %v3146_v29 = vrot.slane %v14282_v20, 3 }
 0x29d   : > { %v2603_v13 = vpop.f32.mrf.mxu0  ;;  %10813 = vmatmul.mubr.msk.f32.gmra.mxu0 %vm871_vm3, %v2267_v60 }
 0x29e   : > { %v14351_v58 = vadd.f32 %v2603_v13, %v13170_v42  ;;  %v3467_v2 = vpop.f32.mrf.mxu1  ;;  %11046 = vmatmul.mubr.msk.f32.gmra.mxu1 %vm871_vm3, %v3143_v32  ;;  %10815 = vmatprep.mubr.msk.f32.mxu0 %vm12336_vm0, %v17796_v0  ;;  %v3145_v42 = vsel %vm3028_vm5, %v3142_v50, %v3144_v5 }
 0x29f   : > { %v14362_v54 = vadd.f32 %v3467_v2, %v14275_v25  ;;  %v10670_v60 = vpop.f32.mrf.mxu0  ;;  %11048 = vmatprep.mubr.msk.f32.mxu1 %vm12336_vm0, %v17796_v0  ;;  %v2271_v25 = vsel %vm2144_vm4, %v2268_v24, %v2270_v1  ;;  %v14377_v2 = vld [vmem:[%s12551_s19 + $0x200] sm:$0xff] }
 0x2a0   : > { %v10903_v32 = vpop.f32.mrf.mxu1  ;;  %v2272_v20 = vrot.slane %v14377_v2, 2  ;;  %v3148_v60 = vrot.slane %v14301_v30, 3 }
 0x2a1   : > { %v2608_v23 = vpop.f32.mrf.mxu0  ;;  %10816 = vmatmul.mubr.msk.f32.gmra.mxu0 %vm871_vm3, %v2269_v43 }
 0x2a2   : > { %v14370_v18 = vadd.f32 %v2608_v23, %v13184_v52  ;;  %v3472_v13 = vpop.f32.mrf.mxu1  ;;  %11049 = vmatmul.mubr.msk.f32.gmra.mxu1 %vm871_vm3, %v3145_v42  ;;  %10818 = vmatprep.mubr.msk.f32.mxu0 %vm12336_vm0, %v17796_v0  ;;  %v3147_v52 = vsel %vm3028_vm5, %v3144_v5, %v3146_v29 }
 0x2a3   : > { %v14381_v50 = vadd.f32 %v3472_v13, %v14294_v49  ;;  %v10673_v43 = vpop.f32.mrf.mxu0  ;;  %11051 = vmatprep.mubr.msk.f32.mxu1 %vm12336_vm0, %v17796_v0  ;;  %v2273_v49 = vsel %vm2144_vm4, %v2270_v1, %v2272_v20  ;;  %v14396_v13 = vld [vmem:[%s12551_s19 + $0x208] sm:$0xff] }
 0x2a4   : > { %v10906_v42 = vpop.f32.mrf.mxu1  ;;  %v2274_v30 = vrot.slane %v14396_v13, 2  ;;  %v3150_v43 = vrot.slane %v14320_v38, 3 }
 0x2a5   : > { %v2613_v32 = vpop.f32.mrf.mxu0  ;;  %10819 = vmatmul.mubr.msk.f32.gmra.mxu0 %vm871_vm3, %v2271_v25 }
 0x2a6   : > { %v14389_v24 = vadd.f32 %v2613_v32, %v13198_v62  ;;  %v3477_v23 = vpop.f32.mrf.mxu1  ;;  %11052 = vmatmul.mubr.msk.f32.gmra.mxu1 %vm871_vm3, %v3147_v52  ;;  %10821 = vmatprep.mubr.msk.f32.mxu0 %vm12336_vm0, %v17796_v0  ;;  %v3149_v62 = vsel %vm3028_vm5, %v3146_v29, %v3148_v60 }
 0x2a7   : > { %v14400_v5 = vadd.f32 %v3477_v23, %v14313_v37  ;;  %v10676_v25 = vpop.f32.mrf.mxu0  ;;  %11054 = vmatprep.mubr.msk.f32.mxu1 %vm12336_vm0, %v17796_v0  ;;  %v2275_v37 = vsel %vm2144_vm4, %v2272_v20, %v2274_v30  ;;  %v14415_v23 = vld [vmem:[%s12551_s19 + $0x210] sm:$0xff] }
 0x2a8   : > { %v10909_v52 = vpop.f32.mrf.mxu1  ;;  %v2276_v38 = vrot.slane %v14415_v23, 2  ;;  %v3152_v25 = vrot.slane %v14339_v47, 3 }
 0x2a9   : > { %v2618_v42 = vpop.f32.mrf.mxu0  ;;  %10822 = vmatmul.mubr.msk.f32.gmra.mxu0 %vm871_vm3, %v2273_v49 }
 0x2aa   : > { %v14408_v1 = vadd.f32 %v2618_v42, %v13212_v11  ;;  %v3482_v32 = vpop.f32.mrf.mxu1  ;;  %11055 = vmatmul.mubr.msk.f32.gmra.mxu1 %vm871_vm3, %v3149_v62  ;;  %10824 = vmatprep.mubr.msk.f32.mxu0 %vm12336_vm0, %v17796_v0  ;;  %v3151_v11 = vsel %vm3028_vm5, %v3148_v60, %v3150_v43 }
 0x2ab   : > { %v14419_v29 = vadd.f32 %v3482_v32, %v14332_v51  ;;  %v10679_v49 = vpop.f32.mrf.mxu0  ;;  %11057 = vmatprep.mubr.msk.f32.mxu1 %vm12336_vm0, %v17796_v0  ;;  %v2277_v51 = vsel %vm2144_vm4, %v2274_v30, %v2276_v38  ;;  %v14434_v32 = vld [vmem:[%s12551_s19 + $0x218] sm:$0xff] }
 0x2ac   : > { %v10912_v62 = vpop.f32.mrf.mxu1  ;;  %v2278_v47 = vrot.slane %v14434_v32, 2  ;;  %v3154_v49 = vrot.slane %v14358_v56, 3 }
 0x2ad   : > { %v2623_v52 = vpop.f32.mrf.mxu0  ;;  %10825 = vmatmul.mubr.msk.f32.gmra.mxu0 %vm871_vm3, %v2275_v37 }
 0x2ae   : > { %v14427_v20 = vadd.f32 %v2623_v52, %v13226_v21  ;;  %v3487_v42 = vpop.f32.mrf.mxu1  ;;  %11058 = vmatmul.mubr.msk.f32.gmra.mxu1 %vm871_vm3, %v3151_v11  ;;  %10827 = vmatprep.mubr.msk.f32.mxu0 %vm12336_vm0, %v17796_v0  ;;  %v3153_v21 = vsel %vm3028_vm5, %v3150_v43, %v3152_v25 }
 0x2af   : > { %v14438_v60 = vadd.f32 %v3487_v42, %v14351_v58  ;;  %v10682_v37 = vpop.f32.mrf.mxu0  ;;  %11060 = vmatprep.mubr.msk.f32.mxu1 %vm12336_vm0, %v17796_v0  ;;  %v2279_v58 = vsel %vm2144_vm4, %v2276_v38, %v2278_v47  ;;  %v14453_v42 = vld [vmem:[%s12551_s19 + $0x220] sm:$0xff] }
 0x2b0   : > { %v10915_v11 = vpop.f32.mrf.mxu1  ;;  %v2280_v56 = vrot.slane %v14453_v42, 2  ;;  %v3156_v37 = vrot.slane %v14377_v2, 3 }
 0x2b1   : > { %v2628_v62 = vpop.f32.mrf.mxu0  ;;  %10828 = vmatmul.mubr.msk.f32.gmra.mxu0 %vm871_vm3, %v2277_v51 }
 0x2b2   : > { %v14446_v30 = vadd.f32 %v2628_v62, %v13240_v33  ;;  %v3492_v52 = vpop.f32.mrf.mxu1  ;;  %11061 = vmatmul.mubr.msk.f32.gmra.mxu1 %vm871_vm3, %v3153_v21  ;;  %10830 = vmatprep.mubr.msk.f32.mxu0 %vm12336_vm0, %v17796_v0  ;;  %v3155_v33 = vsel %vm3028_vm5, %v3152_v25, %v3154_v49 }
 0x2b3   : > { %v14457_v43 = vadd.f32 %v3492_v52, %v14370_v18  ;;  %v10685_v51 = vpop.f32.mrf.mxu0  ;;  %11063 = vmatprep.mubr.msk.f32.mxu1 %vm12336_vm0, %v17796_v0  ;;  %v2281_v18 = vsel %vm2144_vm4, %v2278_v47, %v2280_v56  ;;  %v14472_v52 = vld [vmem:[%s12551_s19 + $0x228] sm:$0xff] }
 0x2b4   : > { %v10918_v21 = vpop.f32.mrf.mxu1  ;;  %v2282_v2 = vrot.slane %v14472_v52, 2  ;;  %v3158_v51 = vrot.slane %v14396_v13, 3 }
 0x2b5   : > { %v2633_v11 = vpop.f32.mrf.mxu0  ;;  %10831 = vmatmul.mubr.msk.f32.gmra.mxu0 %vm871_vm3, %v2279_v58 }
 0x2b6   : > { %v14465_v38 = vadd.f32 %v2633_v11, %v13254_v45  ;;  %v3497_v62 = vpop.f32.mrf.mxu1  ;;  %11064 = vmatmul.mubr.msk.f32.gmra.mxu1 %vm871_vm3, %v3155_v33  ;;  %10833 = vmatprep.mubr.msk.f32.mxu0 %vm12336_vm0, %v17796_v0  ;;  %v3157_v45 = vsel %vm3028_vm5, %v3154_v49, %v3156_v37 }
 0x2b7   : > { %v14476_v25 = vadd.f32 %v3497_v62, %v14389_v24  ;;  %v10688_v58 = vpop.f32.mrf.mxu0  ;;  %11066 = vmatprep.mubr.msk.f32.mxu1 %vm12336_vm0, %v17796_v0  ;;  %v2283_v24 = vsel %vm2144_vm4, %v2280_v56, %v2282_v2  ;;  %v14491_v62 = vld [vmem:[%s12551_s19 + $0x230] sm:$0xff] }
 0x2b8   : > { %v10921_v33 = vpop.f32.mrf.mxu1  ;;  %v2284_v13 = vrot.slane %v14491_v62, 2  ;;  %v3160_v58 = vrot.slane %v14415_v23, 3 }
 0x2b9   : > { %v2638_v21 = vpop.f32.mrf.mxu0  ;;  %10834 = vmatmul.mubr.msk.f32.gmra.mxu0 %vm871_vm3, %v2281_v18 }
 0x2ba   : > { %v14484_v47 = vadd.f32 %v2638_v21, %v13268_v57  ;;  %v3502_v11 = vpop.f32.mrf.mxu1  ;;  %11067 = vmatmul.mubr.msk.f32.gmra.mxu1 %vm871_vm3, %v3157_v45  ;;  %10836 = vmatprep.mubr.msk.f32.mxu0 %vm12336_vm0, %v17796_v0  ;;  %v3159_v57 = vsel %vm3028_vm5, %v3156_v37, %v3158_v51 }
 0x2bb   : > { %v14495_v49 = vadd.f32 %v3502_v11, %v14408_v1  ;;  %v10691_v18 = vpop.f32.mrf.mxu0  ;;  %11069 = vmatprep.mubr.msk.f32.mxu1 %vm12336_vm0, %v17796_v0  ;;  %v2285_v1 = vsel %vm2144_vm4, %v2282_v2, %v2284_v13  ;;  %v14510_v11 = vld [vmem:[%s12551_s19 + $0x238] sm:$0xff] }
 0x2bc   : > { %v10924_v45 = vpop.f32.mrf.mxu1  ;;  %v2286_v23 = vrot.slane %v14510_v11, 2  ;;  %v3162_v18 = vrot.slane %v14434_v32, 3 }
 0x2bd   : > { %v2643_v33 = vpop.f32.mrf.mxu0  ;;  %10837 = vmatmul.mubr.msk.f32.gmra.mxu0 %vm871_vm3, %v2283_v24 }
 0x2be   : > { %v14503_v56 = vadd.f32 %v2643_v33, %v13282_v6  ;;  %v3507_v21 = vpop.f32.mrf.mxu1  ;;  %11070 = vmatmul.mubr.msk.f32.gmra.mxu1 %vm871_vm3, %v3159_v57  ;;  %10839 = vmatprep.mubr.msk.f32.mxu0 %vm12336_vm0, %v17796_v0  ;;  %v3161_v6 = vsel %vm3028_vm5, %v3158_v51, %v3160_v58 }
 0x2bf   : > { %v14514_v37 = vadd.f32 %v3507_v21, %v14427_v20  ;;  %v10694_v24 = vpop.f32.mrf.mxu0  ;;  %11072 = vmatprep.mubr.msk.f32.mxu1 %vm12336_vm0, %v17796_v0  ;;  %v2287_v20 = vsel %vm2144_vm4, %v2284_v13, %v2286_v23  ;;  %v14529_v21 = vld [vmem:[%s12551_s19 + $0x240] sm:$0xff] }
 0x2c0   : > { %v10927_v57 = vpop.f32.mrf.mxu1  ;;  %v2288_v32 = vrot.slane %v14529_v21, 2  ;;  %v3164_v24 = vrot.slane %v14453_v42, 3 }
 0x2c1   : > { %v2648_v45 = vpop.f32.mrf.mxu0  ;;  %10840 = vmatmul.mubr.msk.f32.gmra.mxu0 %vm871_vm3, %v2285_v1 }
 0x2c2   : > { %v14522_v2 = vadd.f32 %v2648_v45, %v13296_v19  ;;  %v3512_v33 = vpop.f32.mrf.mxu1  ;;  %11073 = vmatmul.mubr.msk.f32.gmra.mxu1 %vm871_vm3, %v3161_v6  ;;  %10842 = vmatprep.mubr.msk.f32.mxu0 %vm12336_vm0, %v17796_v0  ;;  %v3163_v19 = vsel %vm3028_vm5, %v3160_v58, %v3162_v18 }
 0x2c3   : > { %v14533_v51 = vadd.f32 %v3512_v33, %v14446_v30  ;;  %v10697_v1 = vpop.f32.mrf.mxu0  ;;  %11075 = vmatprep.mubr.msk.f32.mxu1 %vm12336_vm0, %v17796_v0  ;;  %v2289_v30 = vsel %vm2144_vm4, %v2286_v23, %v2288_v32  ;;  %v14548_v33 = vld [vmem:[%s12551_s19 + $0x248] sm:$0xff] }
 0x2c4   : > { %v10930_v6 = vpop.f32.mrf.mxu1  ;;  %v2290_v42 = vrot.slane %v14548_v33, 2  ;;  %v3166_v1 = vrot.slane %v14472_v52, 3 }
 0x2c5   : > { %v2653_v57 = vpop.f32.mrf.mxu0  ;;  %10843 = vmatmul.mubr.msk.f32.gmra.mxu0 %vm871_vm3, %v2287_v20 }
 0x2c6   : > { %v14541_v13 = vadd.f32 %v2653_v57, %v13307_v31  ;;  %v3517_v45 = vpop.f32.mrf.mxu1  ;;  %11076 = vmatmul.mubr.msk.f32.gmra.mxu1 %vm871_vm3, %v3163_v19  ;;  %10845 = vmatprep.mubr.msk.f32.mxu0 %vm12336_vm0, %v17796_v0  ;;  %v3165_v31 = vsel %vm3028_vm5, %v3162_v18, %v3164_v24 }
 0x2c7   : > { %v14552_v58 = vadd.f32 %v3517_v45, %v14465_v38  ;;  %v10700_v20 = vpop.f32.mrf.mxu0  ;;  %11078 = vmatprep.mubr.msk.f32.mxu1 %vm12336_vm0, %v17796_v0  ;;  %v2291_v38 = vsel %vm2144_vm4, %v2288_v32, %v2290_v42  ;;  %v14567_v45 = vld [vmem:[%s12551_s19 + $0x250] sm:$0xff] }
 0x2c8   : > { %v10933_v19 = vpop.f32.mrf.mxu1  ;;  %v2292_v52 = vrot.slane %v14567_v45, 2  ;;  %v3168_v20 = vrot.slane %v14491_v62, 3 }
 0x2c9   : > { %v2658_v6 = vpop.f32.mrf.mxu0  ;;  %10846 = vmatmul.mubr.msk.f32.gmra.mxu0 %vm871_vm3, %v2289_v30 }
 0x2ca   : > { %v14560_v23 = vadd.f32 %v2658_v6, %v13321_v46  ;;  %v3522_v57 = vpop.f32.mrf.mxu1  ;;  %11079 = vmatmul.mubr.msk.f32.gmra.mxu1 %vm871_vm3, %v3165_v31  ;;  %10848 = vmatprep.mubr.msk.f32.mxu0 %vm12336_vm0, %v17796_v0  ;;  %v3167_v46 = vsel %vm3028_vm5, %v3164_v24, %v3166_v1 }
 0x2cb   : > { %v14571_v18 = vadd.f32 %v3522_v57, %v14484_v47  ;;  %v10703_v30 = vpop.f32.mrf.mxu0  ;;  %11081 = vmatprep.mubr.msk.f32.mxu1 %vm12336_vm0, %v17796_v0  ;;  %v2293_v47 = vsel %vm2144_vm4, %v2290_v42, %v2292_v52  ;;  %v14586_v57 = vld [vmem:[%s12551_s19 + $0x258] sm:$0xff] }
 0x2cc   : > { %v10936_v31 = vpop.f32.mrf.mxu1  ;;  %v2294_v62 = vrot.slane %v14586_v57, 2  ;;  %v3170_v30 = vrot.slane %v14510_v11, 3 }
 0x2cd   : > { %v2663_v19 = vpop.f32.mrf.mxu0  ;;  %10849 = vmatmul.mubr.msk.f32.gmra.mxu0 %vm871_vm3, %v2291_v38 }
 0x2ce   : > { %v14579_v32 = vadd.f32 %v2663_v19, %v13335_v61  ;;  %v3527_v6 = vpop.f32.mrf.mxu1  ;;  %11082 = vmatmul.mubr.msk.f32.gmra.mxu1 %vm871_vm3, %v3167_v46  ;;  %10851 = vmatprep.mubr.msk.f32.mxu0 %vm12336_vm0, %v17796_v0  ;;  %v3169_v61 = vsel %vm3028_vm5, %v3166_v1, %v3168_v20 }
 0x2cf   : > { %v14590_v24 = vadd.f32 %v3527_v6, %v14503_v56  ;;  %v10706_v38 = vpop.f32.mrf.mxu0  ;;  %11084 = vmatprep.mubr.msk.f32.mxu1 %vm12336_vm0, %v17796_v0  ;;  %v2295_v56 = vsel %vm2144_vm4, %v2292_v52, %v2294_v62  ;;  %v14605_v6 = vld [vmem:[%s12551_s19 + $0x260] sm:$0xff] }
 0x2d0   : > { %v10939_v46 = vpop.f32.mrf.mxu1  ;;  %v2296_v11 = vrot.slane %v14605_v6, 2  ;;  %v3172_v38 = vrot.slane %v14529_v21, 3 }
 0x2d1   : > { %v2668_v31 = vpop.f32.mrf.mxu0  ;;  %10852 = vmatmul.mubr.msk.f32.gmra.mxu0 %vm871_vm3, %v2293_v47 }
 0x2d2   : > { %v14598_v42 = vadd.f32 %v2668_v31, %v13349_v17  ;;  %v3532_v19 = vpop.f32.mrf.mxu1  ;;  %11085 = vmatmul.mubr.msk.f32.gmra.mxu1 %vm871_vm3, %v3169_v61  ;;  %10854 = vmatprep.mubr.msk.f32.mxu0 %vm12336_vm0, %v17796_v0  ;;  %v3171_v17 = vsel %vm3028_vm5, %v3168_v20, %v3170_v30 }
 0x2d3   : > { %v14609_v1 = vadd.f32 %v3532_v19, %v14522_v2  ;;  %v10709_v47 = vpop.f32.mrf.mxu0  ;;  %11087 = vmatprep.mubr.msk.f32.mxu1 %vm12336_vm0, %v17796_v0  ;;  %v2297_v2 = vsel %vm2144_vm4, %v2294_v62, %v2296_v11  ;;  %v14624_v19 = vld [vmem:[%s12551_s19 + $0x268] sm:$0xff] }
 0x2d4   : > { %v10942_v61 = vpop.f32.mrf.mxu1  ;;  %v2298_v21 = vrot.slane %v14624_v19, 2  ;;  %v3174_v47 = vrot.slane %v14548_v33, 3 }
 0x2d5   : > { %v2673_v46 = vpop.f32.mrf.mxu0  ;;  %10855 = vmatmul.mubr.msk.f32.gmra.mxu0 %vm871_vm3, %v2295_v56 }
 0x2d6   : > { %v14617_v52 = vadd.f32 %v2673_v46, %v13359_v27  ;;  %v3537_v31 = vpop.f32.mrf.mxu1  ;;  %11088 = vmatmul.mubr.msk.f32.gmra.mxu1 %vm871_vm3, %v3171_v17  ;;  %10857 = vmatprep.mubr.msk.f32.mxu0 %vm12336_vm0, %v17796_v0  ;;  %v3173_v27 = vsel %vm3028_vm5, %v3170_v30, %v3172_v38 }
 0x2d7   : > { %v14628_v20 = vadd.f32 %v3537_v31, %v14541_v13  ;;  %v10712_v56 = vpop.f32.mrf.mxu0  ;;  %11090 = vmatprep.mubr.msk.f32.mxu1 %vm12336_vm0, %v17796_v0  ;;  %v2299_v13 = vsel %vm2144_vm4, %v2296_v11, %v2298_v21  ;;  %v14643_v31 = vld [vmem:[%s12551_s19 + $0x270] sm:$0xff] }
 0x2d8   : > { %v10945_v17 = vpop.f32.mrf.mxu1  ;;  %v2300_v33 = vrot.slane %v14643_v31, 2  ;;  %v3176_v56 = vrot.slane %v14567_v45, 3 }
 0x2d9   : > { %v2678_v61 = vpop.f32.mrf.mxu0  ;;  %10858 = vmatmul.mubr.msk.f32.gmra.mxu0 %vm871_vm3, %v2297_v2 }
 0x2da   : > { %v14636_v62 = vadd.f32 %v2678_v61, %v13378_v40  ;;  %v3542_v46 = vpop.f32.mrf.mxu1  ;;  %11091 = vmatmul.mubr.msk.f32.gmra.mxu1 %vm871_vm3, %v3173_v27  ;;  %10860 = vmatprep.mubr.msk.f32.mxu0 %vm12336_vm0, %v17796_v0  ;;  %v3175_v40 = vsel %vm3028_vm5, %v3172_v38, %v3174_v47 }
 0x2db   : > { %v14647_v30 = vadd.f32 %v3542_v46, %v14560_v23  ;;  %v10715_v2 = vpop.f32.mrf.mxu0  ;;  %11093 = vmatprep.mubr.msk.f32.mxu1 %vm12336_vm0, %v17796_v0  ;;  %v2301_v23 = vsel %vm2144_vm4, %v2298_v21, %v2300_v33  ;;  %v14662_v46 = vld [vmem:[%s12551_s19 + $0x278] sm:$0xff] }
 0x2dc   : > { %v10948_v27 = vpop.f32.mrf.mxu1  ;;  %v2302_v45 = vrot.slane %v14662_v46, 2  ;;  %v3178_v2 = vrot.slane %v14586_v57, 3 }
 0x2dd   : > { %v2683_v17 = vpop.f32.mrf.mxu0  ;;  %10861 = vmatmul.mubr.msk.f32.gmra.mxu0 %vm871_vm3, %v2299_v13 }
 0x2de   : > { %v14655_v11 = vadd.f32 %v2683_v17, %v13394_v36  ;;  %v3547_v61 = vpop.f32.mrf.mxu1  ;;  %11094 = vmatmul.mubr.msk.f32.gmra.mxu1 %vm871_vm3, %v3175_v40  ;;  %10863 = vmatprep.mubr.msk.f32.mxu0 %vm12336_vm0, %v17796_v0  ;;  %v3177_v36 = vsel %vm3028_vm5, %v3174_v47, %v3176_v56 }
 0x2df   : > { %v14666_v38 = vadd.f32 %v3547_v61, %v14579_v32  ;;  %v10718_v13 = vpop.f32.mrf.mxu0  ;;  %11096 = vmatprep.mubr.msk.f32.mxu1 %vm12336_vm0, %v17796_v0  ;;  %v2303_v32 = vsel %vm2144_vm4, %v2300_v33, %v2302_v45  ;;  %v14681_v61 = vld [vmem:[%s12551_s19 + $0x280] sm:$0xff] }
 0x2e0   : > { %v10951_v40 = vpop.f32.mrf.mxu1  ;;  %v2304_v47 = vrot.slane %v14681_v61, 2 }
 0x2e1   : > { %v2688_v27 = vpop.f32.mrf.mxu0  ;;  %10864 = vmatmul.mubr.msk.f32.gmra.mxu0 %vm871_vm3, %v2301_v23  ;;  %v3180_v23 = vrot.slane %v14605_v6, 3 }
 0x2e2   : > { %v14674_v21 = vadd.f32 %v2688_v27, %v13408_v9  ;;  %v3552_v17 = vpop.f32.mrf.mxu1  ;;  %11097 = vmatmul.mubr.msk.f32.gmra.mxu1 %vm871_vm3, %v3177_v36  ;;  %10866 = vmatprep.mubr.msk.f32.mxu0 %vm12336_vm0, %v17796_v0  ;;  %v3179_v9 = vsel %vm3028_vm5, %v3176_v56, %v3178_v2 }
 0x2e3   : > { %v14685_v57 = vadd.f32 %v3552_v17, %v14598_v42  ;;  %v10721_v13 = vpop.f32.mrf.mxu0  ;;  %11099 = vmatprep.mubr.msk.f32.mxu1 %vm12336_vm0, %v17796_v0  ;;  %v2305_v42 = vsel %vm2144_vm4, %v2302_v45, %v2304_v47  ;;  %v3182_v17 = vrot.slane %v14624_v19, 3 }
 0x2e4   : > { %v10954_v36 = vpop.f32.mrf.mxu1 }
 0x2e5   : > { %v2693_v40 = vpop.f32.mrf.mxu0  ;;  %10867 = vmatmul.mubr.msk.f32.gmra.mxu0 %vm871_vm3, %v2303_v32 }
 0x2e6   : > { %v14693_v33 = vadd.f32 %v2693_v40, %v13422_v28  ;;  %v3557_v27 = vpop.f32.mrf.mxu1  ;;  %11100 = vmatmul.mubr.msk.f32.gmra.mxu1 %vm871_vm3, %v3179_v9  ;;  %10869 = vmatprep.mubr.msk.f32.mxu0 %vm12336_vm0, %v17796_v0  ;;  %v3181_v28 = vsel %vm3028_vm5, %v3178_v2, %v3180_v23  ;;  %v14717_v2 = vld [vmem:[%s12551_s19] sm:$0xff]  ;;  %v12039_v40 = vld [vmem:[%s12551_s19 + $0x8] sm:$0xff] }
 0x2e7   : > { %v14700_v56 = vadd.f32 %v3557_v27, %v14617_v52  ;;  %v10724_v6 = vpop.f32.mrf.mxu0  ;;  %11102 = vmatprep.mubr.msk.f32.mxu1 %vm12336_vm0, %v17796_v0  ;;  %v17859_v52 = vrot.slane %v13371_v35, 2  ;;  %v17791_v19 = vrot.slane %v14717_v2, 4  ;;  %v3913_v27 = vrot.slane %v12039_v40, 4 }
 0x2e8   : > { %v10957_v32 = vpop.f32.mrf.mxu1  ;;  %v3183_v6 = vsel %vm3028_vm5, %v3180_v23, %v3182_v17  ;;  %v12040_v23 = vld [vmem:[%s12551_s19 + $0x10] sm:$0xff]  ;;  %v3186_v40 = vrot.slane %v14662_v46, 3 }
 0x2e9   : > { %v2698_v13 = vpop.f32.mrf.mxu0  ;;  %10870 = vmatmul.mubr.msk.f32.gmra.mxu0 %vm871_vm3, %v2305_v42  ;;  %v2308_v36 = vsel %vm2144_vm4, %v2304_v47, %v17859_v52 }
 0x2ea   : > { %v14708_v9 = vadd.f32 %v2698_v13, %v13436_v4  ;;  %v3562_v45 = vpop.f32.mrf.mxu1  ;;  %11103 = vmatmul.mubr.msk.f32.gmra.mxu1 %vm871_vm3, %v3181_v28  ;;  %10872 = vmatprep.mubr.msk.f32.mxu0 %vm12336_vm0, %v17796_v0  ;;  %v3184_v28 = vrot.slane %v14643_v31, 3  ;;  %v3915_v31 = vrot.slane %v12040_v23, 4 }
 0x2eb   : > { %v14722_v4 = vadd.f32 %v3562_v45, %v14636_v62  ;;  %v10727_v42 = vpop.f32.mrf.mxu0  ;;  %11105 = vmatprep.mubr.msk.f32.mxu1 %vm12336_vm0, %v17796_v0  ;;  %v3914_v62 = vsel %vm1035_vm1, %v17791_v19, %v3913_v27 }
 0x2ec   : > { %v10960_v32 = vpop.f32.mrf.mxu1 }
 0x2ed   : > { %v2703_v47 = vpop.f32.mrf.mxu0  ;;  %10873 = vmatmul.mubr.msk.f32.gmra.mxu0 %vm871_vm3, %v2308_v36 }
 0x2ee   : > { %v14730_v13 = vadd.f32 %v2703_v47, %v13452_v34  ;;  %v3567_v52 = vpop.f32.mrf.mxu1  ;;  %11106 = vmatmul.mubr.msk.f32.gmra.mxu1 %vm871_vm3, %v3183_v6  ;;  %11122 = vmatprep.mubr.msk.f32.mxu0 %vm12336_vm0, %v17796_v0  ;;  %v3185_v34 = vsel %vm3028_vm5, %v3182_v17, %v3184_v28 }
 0x2ef   : > { %v14740_v45 = vadd.f32 %v3567_v52, %v14655_v11  ;;  %v10730_v36 = vpop.f32.mrf.mxu0  ;;  %11108 = vmatprep.mubr.msk.f32.mxu1 %vm12336_vm0, %v17796_v0  ;;  %v3916_v11 = vsel %vm1035_vm1, %v3913_v27, %v3915_v31  ;;  %v12041_v52 = vld [vmem:[%s12551_s19 + $0x18] sm:$0xff] }
 0x2f0   : > { %v10963_v42 = vpop.f32.mrf.mxu1  ;;  %v3917_v23 = vrot.slane %v12041_v52, 4 }
 0x2f1   : > { %v2708_v6 = vpop.f32.mrf.mxu0  ;;  %11123 = vmatmul.mubr.msk.f32.vlgmr.msra.gmra.mxu0 %vm871_vm3, %v3914_v62  ;;  %v3188_v62 = vrot.slane %v14681_v61, 3 }
 0x2f2   : > { %v2980_v32 = vadd.f32 %v2708_v6, %v13469_v26  ;;  %v3572_v47 = vpop.f32.mrf.mxu1  ;;  %11109 = vmatmul.mubr.msk.f32.gmra.mxu1 %vm871_vm3, %v3185_v34  ;;  %11125 = vmatprep.mubr.msk.f32.mxu0 %vm12336_vm0, %v17796_v0  ;;  %v3187_v26 = vsel %vm3028_vm5, %v3184_v28, %v3186_v40  ;;  %v12042_v6 = vld [vmem:[%s12551_s19 + $0x20] sm:$0xff] }
 0x2f3   : > { %v14754_v17 = vadd.f32 %v3572_v47, %v14674_v21  ;;  %v10733_v46 = vpop.f32.mrf.mxu0  ;;  %11111 = vmatprep.mubr.msk.f32.mxu1 %vm12336_vm0, %v17796_v0  ;;  %v3918_v21 = vsel %vm1035_vm1, %v3915_v31, %v3917_v23  ;;  %v3919_v47 = vrot.slane %v12042_v6, 4  ;;  %v12043_v31 = vld [vmem:[%s12551_s19 + $0x28] sm:$0xff] }
 0x2f4   : > { %v10966_v36 = vpop.f32.mrf.mxu1 }
 0x2f5   : > { %v2713_v34 = vpop.f32.mrf.mxu0  ;;  %11126 = vmatmul.mubr.msk.f32.gmra.mxu0 %vm871_vm3, %v3916_v11  ;;  %v3921_v36 = vrot.slane %v12043_v31, 4 }
 0x2f6   : > { %v2981_v27 = vadd.f32 %v2713_v34, %v13484_v53  ;;  %v3577_v42 = vpop.f32.mrf.mxu1  ;;  %11112 = vmatmul.mubr.msk.f32.gmra.mxu1 %vm871_vm3, %v3187_v26  ;;  %11128 = vmatprep.mubr.msk.f32.mxu0 %vm12336_vm0, %v17796_v0  ;;  %v3189_v53 = vsel %vm3028_vm5, %v3186_v40, %v3188_v62 }
 0x2f7   : > { %v14768_v28 = vadd.f32 %v3577_v42, %v14693_v33  ;;  %v10736_v61 = vpop.f32.mrf.mxu0  ;;  %11114 = vmatprep.mubr.msk.f32.mxu1 %vm12336_vm0, %v17796_v0  ;;  %v3920_v33 = vsel %vm1035_vm1, %v3917_v23, %v3919_v47 }
 0x2f8   : > { %v10969_v11 = vpop.f32.mrf.mxu1 }
 0x2f9   : > { %v2718_v52 = vpop.f32.mrf.mxu0  ;;  %11129 = vmatmul.mubr.msk.f32.gmra.mxu0 %vm871_vm3, %v3918_v21 }
 0x2fa   : > { %v2982_v46 = vadd.f32 %v2718_v52, %v13499_v16  ;;  %v3582_v26 = vpop.f32.mrf.mxu1  ;;  %11115 = vmatmul.mubr.msk.f32.gmra.mxu1 %vm871_vm3, %v3189_v53  ;;  %11131 = vmatprep.mubr.msk.f32.mxu0 %vm12336_vm0, %v17796_v0  ;;  %v17860_v16 = vrot.slane %v13371_v35, 3  ;;  %v12044_v53 = vld [vmem:[%s12551_s19 + $0x30] sm:$0xff] }
 0x2fb   : > { %v14781_v34 = vadd.f32 %v3582_v26, %v14708_v9  ;;  %v10739_v40 = vpop.f32.mrf.mxu0  ;;  %11117 = vmatprep.mubr.msk.f32.mxu1 %vm12336_vm0, %v17796_v0  ;;  %v3922_v9 = vsel %vm1035_vm1, %v3919_v47, %v3921_v36  ;;  %v3923_v11 = vrot.slane %v12044_v53, 4  ;;  %v12045_v47 = vld [vmem:[%s12551_s19 + $0x38] sm:$0xff] }
 0x2fc   : > { %v3192_v42 = vsel %vm3028_vm5, %v3188_v62, %v17860_v16  ;;  %v10972_v21 = vpop.f32.mrf.mxu1  ;;  %v3925_v40 = vrot.slane %v12045_v47, 4 }
 0x2fd   : > { %v2723_v6 = vpop.f32.mrf.mxu0  ;;  %11132 = vmatmul.mubr.msk.f32.gmra.mxu0 %vm871_vm3, %v3920_v33  ;;  %v3924_v31 = vsel %vm1035_vm1, %v3921_v36, %v3923_v11 }
 0x2fe   : > { %v2983_v61 = vadd.f32 %v2723_v6, %v13514_v55  ;;  %v3587_v23 = vpop.f32.mrf.mxu1  ;;  %11118 = vmatmul.mubr.msk.f32.gmra.mxu1 %vm871_vm3, %v3192_v42  ;;  %11134 = vmatprep.mubr.msk.f32.mxu0 %vm12336_vm0, %v17796_v0 }
 0x2ff   : > { %v14796_v35 = vadd.f32 %v3587_v23, %v14730_v13  ;;  %v10742_v62 = vpop.f32.mrf.mxu0 }
 0x300   : > { %v10975_v52 = vpop.f32.mrf.mxu1 }
 0x301   : > { %v2728_v26 = vpop.f32.mrf.mxu0  ;;  %11135 = vmatmul.mubr.msk.f32.gmra.mxu0 %vm871_vm3, %v3922_v9  ;;  %v12046_v9 = vld [vmem:[%s12551_s19 + $0x40] sm:$0xff] }
 0x302   : > { %v2984_v55 = vadd.f32 %v2728_v26, %v13529_v15  ;;  %v3592_v33 = vpop.f32.mrf.mxu1  ;;  %11137 = vmatprep.mubr.msk.f32.mxu0 %vm12336_vm0, %v17796_v0  ;;  %v3926_v15 = vsel %vm1035_vm1, %v3923_v11, %v3925_v40  ;;  %v3927_v36 = vrot.slane %v12046_v9, 4  ;;  %v12048_v9 = vld [vmem:[%s12551_s19 + $0x50] sm:$0xff] }
 0x303   : > { %v14804_v16 = vadd.f32 %v3592_v33, %v2980_v32  ;;  %v10745_v13 = vpop.f32.mrf.mxu0 }
 0x304   : > { %v10978_v42 = vpop.f32.mrf.mxu1 }
 0x305   : > { %v2733_v21 = vpop.f32.mrf.mxu0  ;;  %11138 = vmatmul.mubr.msk.f32.gmra.mxu0 %vm871_vm3, %v3924_v31  ;;  %v12047_v31 = vld [vmem:[%s12551_s19 + $0x48] sm:$0xff] }
 0x306   : > { %v2985_v6 = vadd.f32 %v2733_v21, %v13544_v63  ;;  %v3597_v23 = vpop.f32.mrf.mxu1  ;;  %11140 = vmatprep.mubr.msk.f32.mxu0 %vm12336_vm0, %v17796_v0  ;;  %v3928_v63 = vsel %vm1035_vm1, %v3925_v40, %v3927_v36  ;;  %v3929_v11 = vrot.slane %v12047_v31, 4  ;;  %v17861_v21 = vld [vmem:[#allocation24_spill] sm:$0xff]  ;;  %v3931_v40 = vrot.slane %v12048_v9, 4  ;;  %v17864_v9 = vld [vmem:[#allocation26_spill] sm:$0xff] }
 0x307   : > { %v14812_v53 = vadd.f32 %v3597_v23, %v2981_v27  ;;  %v10748_v32 = vpop.f32.mrf.mxu0 }
 0x308   : > { %v10981_v62 = vpop.f32.mrf.mxu1 }
 0x309   : > { %v2738_v52 = vpop.f32.mrf.mxu0  ;;  %11141 = vmatmul.mubr.msk.f32.gmra.mxu0 %vm871_vm3, %v3926_v15 }
 0x30a   : > { %v2986_v26 = vadd.f32 %v2738_v52, %v13559_v59  ;;  %v3602_v33 = vpop.f32.mrf.mxu1  ;;  %11143 = vmatprep.mubr.msk.f32.mxu0 %vm12336_vm0, %v17796_v0  ;;  %v3930_v59 = vsel %vm1035_vm1, %v3927_v36, %v3929_v11 }
 0x30b   : > { %v14820_v47 = vadd.f32 %v3602_v33, %v2982_v46  ;;  %v10751_v27 = vpop.f32.mrf.mxu0  ;;  %v17862_v33 = vld [vmem:[#allocation25_spill] sm:$0xff] }
 0x30c   : > { %v10984_v13 = vpop.f32.mrf.mxu1  ;;  %v3932_v27 = vsel %vm1035_vm1, %v3929_v11, %v3931_v40 }
 0x30d   : > { %v2743_v42 = vpop.f32.mrf.mxu0  ;;  %11144 = vmatmul.mubr.msk.f32.gmra.mxu0 %vm871_vm3, %v3928_v63  ;;  %v12049_v13 = vld [vmem:[%s12551_s19 + $0x58] sm:$0xff] }
 0x30e   : > { %v2987_v23 = vadd.f32 %v2743_v42, %v17861_v21  ;;  %v3607_v15 = vpop.f32.mrf.mxu1  ;;  %11146 = vmatprep.mubr.msk.f32.mxu0 %vm12336_vm0, %v17796_v0  ;;  %v3933_v36 = vrot.slane %v12049_v13, 4 }
 0x30f   : > { %v14828_v32 = vadd.f32 %v3607_v15, %v2983_v61  ;;  %v10754_v46 = vpop.f32.mrf.mxu0 }
 0x310   : > { %v10987_v62 = vpop.f32.mrf.mxu1 }
 0x311   : > { %v2748_v52 = vpop.f32.mrf.mxu0  ;;  %11147 = vmatmul.mubr.msk.f32.gmra.mxu0 %vm871_vm3, %v3930_v59  ;;  %v3934_v62 = vsel %vm1035_vm1, %v3931_v40, %v3933_v36 }
 0x312   : > { %v2988_v63 = vadd.f32 %v2748_v52, %v17862_v33  ;;  %v3612_v31 = vpop.f32.mrf.mxu1  ;;  %11149 = vmatprep.mubr.msk.f32.mxu0 %vm12336_vm0, %v17796_v0  ;;  %v12050_v52 = vld [vmem:[%s12551_s19 + $0x60] sm:$0xff] }
 0x313   : > { %v14836_v42 = vadd.f32 %v3612_v31, %v2984_v55  ;;  %v10757_v61 = vpop.f32.mrf.mxu0  ;;  %v3935_v11 = vrot.slane %v12050_v52, 4 }
 0x314   : > { %v10990_v21 = vpop.f32.mrf.mxu1  ;;  %v17866_v61 = vld [vmem:[#allocation27_spill] sm:$0xff] }
 0x315   : > { %17863 = vst [vmem:[#allocation24_spill] sm:$0xff] %v14836_v42  ;;  %v2753_v15 = vpop.f32.mrf.mxu0  ;;  %11150 = vmatmul.mubr.msk.f32.gmra.mxu0 %vm871_vm3, %v3932_v27 }
 0x316   : > { %v2989_v59 = vadd.f32 %v2753_v15, %v17864_v9  ;;  %v3617_v46 = vpop.f32.mrf.mxu1  ;;  %11152 = vmatprep.mubr.msk.f32.mxu0 %vm12336_vm0, %v17796_v0  ;;  %v3936_v15 = vsel %vm1035_vm1, %v3933_v36, %v3935_v11  ;;  %v12051_v9 = vld [vmem:[%s12551_s19 + $0x68] sm:$0xff] }
 0x317   : > { %v14844_v33 = vadd.f32 %v3617_v46, %v2985_v6  ;;  %v10760_v55 = vpop.f32.mrf.mxu0  ;;  %v3937_v40 = vrot.slane %v12051_v9, 4 }
 0x318   : > { %v10993_v31 = vpop.f32.mrf.mxu1  ;;  %v17868_v55 = vld [vmem:[#allocation28_spill] sm:$0xff] }
 0x319   : > { %17865 = vst [vmem:[#allocation25_spill] sm:$0xff] %v14844_v33  ;;  %v2758_v13 = vpop.f32.mrf.mxu0  ;;  %11153 = vmatmul.mubr.msk.f32.gmra.mxu0 %vm871_vm3, %v3934_v62 }
 0x31a   : > { %v2990_v27 = vadd.f32 %v2758_v13, %v17866_v61  ;;  %v3622_v21 = vpop.f32.mrf.mxu1  ;;  %11155 = vmatprep.mubr.msk.f32.mxu0 %vm12336_vm0, %v17796_v0  ;;  %v3938_v13 = vsel %vm1035_vm1, %v3935_v11, %v3937_v40  ;;  %v12052_v61 = vld [vmem:[%s12551_s19 + $0x70] sm:$0xff] }
 0x31b   : > { %v14852_v19 = vadd.f32 %v3622_v21, %v2986_v26  ;;  %v10763_v6 = vpop.f32.mrf.mxu0  ;;  %v3939_v36 = vrot.slane %v12052_v61, 4 }
 0x31c   : > { %v10996_v46 = vpop.f32.mrf.mxu1  ;;  %v17870_v6 = vld [vmem:[#allocation29_spill] sm:$0xff] }
 0x31d   : > { %17867 = vst [vmem:[#allocation26_spill] sm:$0xff] %v14852_v19  ;;  %v2763_v52 = vpop.f32.mrf.mxu0  ;;  %11156 = vmatmul.mubr.msk.f32.gmra.mxu0 %vm871_vm3, %v3936_v15 }
 0x31e   : > { %v2991_v62 = vadd.f32 %v2763_v52, %v17868_v55  ;;  %v3627_v31 = vpop.f32.mrf.mxu1  ;;  %11158 = vmatprep.mubr.msk.f32.mxu0 %vm12336_vm0, %v17796_v0  ;;  %v3940_v52 = vsel %vm1035_vm1, %v3937_v40, %v3939_v36  ;;  %v12053_v55 = vld [vmem:[%s12551_s19 + $0x78] sm:$0xff] }
 0x31f   : > { %v14860_v42 = vadd.f32 %v3627_v31, %v2987_v23  ;;  %v10766_v26 = vpop.f32.mrf.mxu0  ;;  %v3941_v11 = vrot.slane %v12053_v55, 4 }
 0x320   : > { %v10999_v21 = vpop.f32.mrf.mxu1  ;;  %v17872_v26 = vld [vmem:[#allocation30_spill] sm:$0xff] }
 0x321   : > { %17869 = vst [vmem:[#allocation27_spill] sm:$0xff] %v14860_v42  ;;  %v2768_v9 = vpop.f32.mrf.mxu0  ;;  %11159 = vmatmul.mubr.msk.f32.gmra.mxu0 %vm871_vm3, %v3938_v13 }
 0x322   : > { %v2992_v15 = vadd.f32 %v2768_v9, %v17870_v6  ;;  %v3632_v46 = vpop.f32.mrf.mxu1  ;;  %11161 = vmatprep.mubr.msk.f32.mxu0 %vm12336_vm0, %v17796_v0  ;;  %v3942_v9 = vsel %vm1035_vm1, %v3939_v36, %v3941_v11  ;;  %v12054_v6 = vld [vmem:[%s12551_s19 + $0x80] sm:$0xff] }
 0x323   : > { %v14868_v33 = vadd.f32 %v3632_v46, %v2988_v63  ;;  %v10769_v23 = vpop.f32.mrf.mxu0  ;;  %v3943_v40 = vrot.slane %v12054_v6, 4 }
 0x324   : > { %v11002_v31 = vpop.f32.mrf.mxu1  ;;  %v17874_v23 = vld [vmem:[#allocation31_spill] sm:$0xff] }
 0x325   : > { %17871 = vst [vmem:[#allocation28_spill] sm:$0xff] %v14868_v33  ;;  %v2773_v61 = vpop.f32.mrf.mxu0  ;;  %11162 = vmatmul.mubr.msk.f32.gmra.mxu0 %vm871_vm3, %v3940_v52 }
 0x326   : > { %v2993_v13 = vadd.f32 %v2773_v61, %v17872_v26  ;;  %v3637_v21 = vpop.f32.mrf.mxu1  ;;  %11164 = vmatprep.mubr.msk.f32.mxu0 %vm12336_vm0, %v17796_v0  ;;  %v3944_v61 = vsel %vm1035_vm1, %v3941_v11, %v3943_v40  ;;  %v12055_v26 = vld [vmem:[%s12551_s19 + $0x88] sm:$0xff] }
 0x327   : > { %v14876_v19 = vadd.f32 %v3637_v21, %v2989_v59  ;;  %v10772_v63 = vpop.f32.mrf.mxu0  ;;  %v3945_v36 = vrot.slane %v12055_v26, 4 }
 0x328   : > { %v11005_v46 = vpop.f32.mrf.mxu1  ;;  %v17876_v63 = vld [vmem:[#allocation32_spill] sm:$0xff] }
 0x329   : > { %17873 = vst [vmem:[#allocation29_spill] sm:$0xff] %v14876_v19  ;;  %v2778_v55 = vpop.f32.mrf.mxu0  ;;  %11165 = vmatmul.mubr.msk.f32.gmra.mxu0 %vm871_vm3, %v3942_v9 }
 0x32a   : > { %v2994_v52 = vadd.f32 %v2778_v55, %v17874_v23  ;;  %v3642_v31 = vpop.f32.mrf.mxu1  ;;  %11167 = vmatprep.mubr.msk.f32.mxu0 %vm12336_vm0, %v17796_v0  ;;  %v3946_v55 = vsel %vm1035_vm1, %v3943_v40, %v3945_v36  ;;  %v12056_v23 = vld [vmem:[%s12551_s19 + $0x90] sm:$0xff] }
 0x32b   : > { %v14884_v42 = vadd.f32 %v3642_v31, %v2990_v27  ;;  %v10775_v59 = vpop.f32.mrf.mxu0  ;;  %v3947_v11 = vrot.slane %v12056_v23, 4 }
 0x32c   : > { %v11008_v21 = vpop.f32.mrf.mxu1  ;;  %v17878_v59 = vld [vmem:[#allocation33_spill] sm:$0xff] }
 0x32d   : > { %17875 = vst [vmem:[#allocation30_spill] sm:$0xff] %v14884_v42  ;;  %v2783_v6 = vpop.f32.mrf.mxu0  ;;  %11168 = vmatmul.mubr.msk.f32.gmra.mxu0 %vm871_vm3, %v3944_v61 }
 0x32e   : > { %v2995_v9 = vadd.f32 %v2783_v6, %v17876_v63  ;;  %v3647_v46 = vpop.f32.mrf.mxu1  ;;  %11170 = vmatprep.mubr.msk.f32.mxu0 %vm12336_vm0, %v17796_v0  ;;  %v3948_v6 = vsel %vm1035_vm1, %v3945_v36, %v3947_v11  ;;  %v12057_v63 = vld [vmem:[%s12551_s19 + $0x98] sm:$0xff] }
 0x32f   : > { %v14892_v33 = vadd.f32 %v3647_v46, %v2991_v62  ;;  %v10778_v27 = vpop.f32.mrf.mxu0  ;;  %v3949_v40 = vrot.slane %v12057_v63, 4 }
 0x330   : > { %v11011_v31 = vpop.f32.mrf.mxu1  ;;  %v17880_v27 = vld [vmem:[#allocation34_spill] sm:$0xff] }
 0x331   : > { %17877 = vst [vmem:[#allocation31_spill] sm:$0xff] %v14892_v33  ;;  %v2788_v26 = vpop.f32.mrf.mxu0  ;;  %11171 = vmatmul.mubr.msk.f32.gmra.mxu0 %vm871_vm3, %v3946_v55 }
 0x332   : > { %v2996_v61 = vadd.f32 %v2788_v26, %v17878_v59  ;;  %v3652_v21 = vpop.f32.mrf.mxu1  ;;  %11173 = vmatprep.mubr.msk.f32.mxu0 %vm12336_vm0, %v17796_v0  ;;  %v3950_v26 = vsel %vm1035_vm1, %v3947_v11, %v3949_v40  ;;  %v12058_v59 = vld [vmem:[%s12551_s19 + $0xa0] sm:$0xff] }
 0x333   : > { %v14900_v19 = vadd.f32 %v3652_v21, %v2992_v15  ;;  %v10781_v62 = vpop.f32.mrf.mxu0  ;;  %v3951_v36 = vrot.slane %v12058_v59, 4 }
 0x334   : > { %v11014_v46 = vpop.f32.mrf.mxu1  ;;  %v17881_v62 = vld [vmem:[#allocation35_spill] sm:$0xff] }
 0x335   : > { %17879 = vst [vmem:[#allocation32_spill] sm:$0xff] %v14900_v19  ;;  %v2793_v23 = vpop.f32.mrf.mxu0  ;;  %11174 = vmatmul.mubr.msk.f32.gmra.mxu0 %vm871_vm3, %v3948_v6 }
 0x336   : > { %v2997_v55 = vadd.f32 %v2793_v23, %v17880_v27  ;;  %v3657_v31 = vpop.f32.mrf.mxu1  ;;  %11176 = vmatprep.mubr.msk.f32.mxu0 %vm12336_vm0, %v17796_v0  ;;  %v3952_v23 = vsel %vm1035_vm1, %v3949_v40, %v3951_v36  ;;  %v12059_v27 = vld [vmem:[%s12551_s19 + $0xa8] sm:$0xff] }
 0x337   : > { %v14908_v42 = vadd.f32 %v3657_v31, %v2993_v13  ;;  %v10784_v15 = vpop.f32.mrf.mxu0  ;;  %v3953_v11 = vrot.slane %v12059_v27, 4 }
 0x338   : > { %v11017_v21 = vpop.f32.mrf.mxu1  ;;  %v17883_v15 = vld [vmem:[#allocation36_spill] sm:$0xff] }
 0x339   : > { %v2798_v63 = vpop.f32.mrf.mxu0  ;;  %11177 = vmatmul.mubr.msk.f32.gmra.mxu0 %vm871_vm3, %v3950_v26 }
 0x33a   : > { %v2998_v6 = vadd.f32 %v2798_v63, %v17881_v62  ;;  %v3662_v46 = vpop.f32.mrf.mxu1  ;;  %11179 = vmatprep.mubr.msk.f32.mxu0 %vm12336_vm0, %v17796_v0  ;;  %v3954_v63 = vsel %vm1035_vm1, %v3951_v36, %v3953_v11  ;;  %v12060_v62 = vld [vmem:[%s12551_s19 + $0xb0] sm:$0xff] }
 0x33b   : > { %v14916_v33 = vadd.f32 %v3662_v46, %v2994_v52  ;;  %v10787_v13 = vpop.f32.mrf.mxu0  ;;  %v3955_v40 = vrot.slane %v12060_v62, 4 }
 0x33c   : > { %v11020_v31 = vpop.f32.mrf.mxu1  ;;  %v17885_v13 = vld [vmem:[#allocation37_spill] sm:$0xff] }
 0x33d   : > { %17882 = vst [vmem:[#allocation33_spill] sm:$0xff] %v14916_v33  ;;  %v2803_v59 = vpop.f32.mrf.mxu0  ;;  %11180 = vmatmul.mubr.msk.f32.gmra.mxu0 %vm871_vm3, %v3952_v23 }
 0x33e   : > { %v2999_v26 = vadd.f32 %v2803_v59, %v17883_v15  ;;  %v3667_v21 = vpop.f32.mrf.mxu1  ;;  %11182 = vmatprep.mubr.msk.f32.mxu0 %vm12336_vm0, %v17796_v0  ;;  %v3956_v59 = vsel %vm1035_vm1, %v3953_v11, %v3955_v40  ;;  %v12061_v15 = vld [vmem:[%s12551_s19 + $0xb8] sm:$0xff] }
 0x33f   : > { %v14924_v19 = vadd.f32 %v3667_v21, %v2995_v9  ;;  %v10790_v52 = vpop.f32.mrf.mxu0  ;;  %v3957_v36 = vrot.slane %v12061_v15, 4 }
 0x340   : > { %v11023_v46 = vpop.f32.mrf.mxu1  ;;  %v17887_v52 = vld [vmem:[#allocation38_spill] sm:$0xff] }
 0x341   : > { %17884 = vst [vmem:[#allocation34_spill] sm:$0xff] %v14924_v19  ;;  %v2808_v27 = vpop.f32.mrf.mxu0  ;;  %11183 = vmatmul.mubr.msk.f32.gmra.mxu0 %vm871_vm3, %v3954_v63 }
 0x342   : > { %v3000_v23 = vadd.f32 %v2808_v27, %v17885_v13  ;;  %v3672_v31 = vpop.f32.mrf.mxu1  ;;  %11185 = vmatprep.mubr.msk.f32.mxu0 %vm12336_vm0, %v17796_v0  ;;  %v3958_v27 = vsel %vm1035_vm1, %v3955_v40, %v3957_v36  ;;  %v12062_v13 = vld [vmem:[%s12551_s19 + $0xc0] sm:$0xff] }
 0x343   : > { %v14932_v33 = vadd.f32 %v3672_v31, %v2996_v61  ;;  %v10793_v9 = vpop.f32.mrf.mxu0  ;;  %v3959_v11 = vrot.slane %v12062_v13, 4 }
 0x344   : > { %v11026_v21 = vpop.f32.mrf.mxu1  ;;  %v17889_v9 = vld [vmem:[#allocation39_spill] sm:$0xff] }
 0x345   : > { %17886 = vst [vmem:[#allocation35_spill] sm:$0xff] %v14932_v33  ;;  %v2813_v62 = vpop.f32.mrf.mxu0  ;;  %11186 = vmatmul.mubr.msk.f32.gmra.mxu0 %vm871_vm3, %v3956_v59 }
 0x346   : > { %v3001_v63 = vadd.f32 %v2813_v62, %v17887_v52  ;;  %v3677_v46 = vpop.f32.mrf.mxu1  ;;  %11188 = vmatprep.mubr.msk.f32.mxu0 %vm12336_vm0, %v17796_v0  ;;  %v3960_v62 = vsel %vm1035_vm1, %v3957_v36, %v3959_v11  ;;  %v12063_v52 = vld [vmem:[%s12551_s19 + $0xc8] sm:$0xff] }
 0x347   : > { %v14940_v19 = vadd.f32 %v3677_v46, %v2997_v55  ;;  %v10796_v61 = vpop.f32.mrf.mxu0  ;;  %v3961_v40 = vrot.slane %v12063_v52, 4 }
 0x348   : > { %v11029_v31 = vpop.f32.mrf.mxu1  ;;  %v17891_v61 = vld [vmem:[#allocation40_spill] sm:$0xff] }
 0x349   : > { %17888 = vst [vmem:[#allocation36_spill] sm:$0xff] %v14940_v19  ;;  %v2818_v15 = vpop.f32.mrf.mxu0  ;;  %11189 = vmatmul.mubr.msk.f32.gmra.mxu0 %vm871_vm3, %v3958_v27 }
 0x34a   : > { %v3002_v59 = vadd.f32 %v2818_v15, %v17889_v9  ;;  %v3682_v21 = vpop.f32.mrf.mxu1  ;;  %11191 = vmatprep.mubr.msk.f32.mxu0 %vm12336_vm0, %v17796_v0  ;;  %v3962_v15 = vsel %vm1035_vm1, %v3959_v11, %v3961_v40  ;;  %v12064_v9 = vld [vmem:[%s12551_s19 + $0xd0] sm:$0xff] }
 0x34b   : > { %v14948_v33 = vadd.f32 %v3682_v21, %v2998_v6  ;;  %v10799_v55 = vpop.f32.mrf.mxu0  ;;  %v3963_v36 = vrot.slane %v12064_v9, 4 }
 0x34c   : > { %v11032_v46 = vpop.f32.mrf.mxu1  ;;  %v17893_v55 = vld [vmem:[#allocation41_spill] sm:$0xff] }
 0x34d   : > { %17890 = vst [vmem:[#allocation37_spill] sm:$0xff] %v14948_v33  ;;  %v2823_v13 = vpop.f32.mrf.mxu0  ;;  %11192 = vmatmul.mubr.msk.f32.gmra.mxu0 %vm871_vm3, %v3960_v62 }
 0x34e   : > { %v3003_v27 = vadd.f32 %v2823_v13, %v17891_v61  ;;  %v3687_v31 = vpop.f32.mrf.mxu1  ;;  %11194 = vmatprep.mubr.msk.f32.mxu0 %vm12336_vm0, %v17796_v0  ;;  %v3964_v13 = vsel %vm1035_vm1, %v3961_v40, %v3963_v36  ;;  %v12065_v61 = vld [vmem:[%s12551_s19 + $0xd8] sm:$0xff] }
 0x34f   : > { %v14956_v19 = vadd.f32 %v3687_v31, %v2999_v26  ;;  %v10802_v6 = vpop.f32.mrf.mxu0  ;;  %v3965_v11 = vrot.slane %v12065_v61, 4 }
 0x350   : > { %v11035_v21 = vpop.f32.mrf.mxu1  ;;  %v17895_v6 = vld [vmem:[#allocation42_spill] sm:$0xff] }
 0x351   : > { %17892 = vst [vmem:[#allocation38_spill] sm:$0xff] %v14956_v19  ;;  %v2828_v52 = vpop.f32.mrf.mxu0  ;;  %11195 = vmatmul.mubr.msk.f32.gmra.mxu0 %vm871_vm3, %v3962_v15 }
 0x352   : > { %v3004_v62 = vadd.f32 %v2828_v52, %v17893_v55  ;;  %v3692_v46 = vpop.f32.mrf.mxu1  ;;  %11197 = vmatprep.mubr.msk.f32.mxu0 %vm12336_vm0, %v17796_v0  ;;  %v3966_v52 = vsel %vm1035_vm1, %v3963_v36, %v3965_v11  ;;  %v12066_v55 = vld [vmem:[%s12551_s19 + $0xe0] sm:$0xff] }
 0x353   : > { %v14964_v33 = vadd.f32 %v3692_v46, %v3000_v23  ;;  %v10805_v26 = vpop.f32.mrf.mxu0  ;;  %v3967_v40 = vrot.slane %v12066_v55, 4 }
 0x354   : > { %v11038_v31 = vpop.f32.mrf.mxu1  ;;  %v17897_v26 = vld [vmem:[#allocation43_spill] sm:$0xff] }
 0x355   : > { %17894 = vst [vmem:[#allocation39_spill] sm:$0xff] %v14964_v33  ;;  %v2833_v9 = vpop.f32.mrf.mxu0  ;;  %11198 = vmatmul.mubr.msk.f32.gmra.mxu0 %vm871_vm3, %v3964_v13 }
 0x356   : > { %v3005_v15 = vadd.f32 %v2833_v9, %v17895_v6  ;;  %v3697_v21 = vpop.f32.mrf.mxu1  ;;  %11200 = vmatprep.mubr.msk.f32.mxu0 %vm12336_vm0, %v17796_v0  ;;  %v3968_v9 = vsel %vm1035_vm1, %v3965_v11, %v3967_v40  ;;  %v12067_v6 = vld [vmem:[%s12551_s19 + $0xe8] sm:$0xff] }
 0x357   : > { %v14972_v19 = vadd.f32 %v3697_v21, %v3001_v63  ;;  %v10808_v23 = vpop.f32.mrf.mxu0  ;;  %v3969_v36 = vrot.slane %v12067_v6, 4 }
 0x358   : > { %v11041_v46 = vpop.f32.mrf.mxu1  ;;  %v17899_v23 = vld [vmem:[#allocation44_spill] sm:$0xff] }
 0x359   : > { %17896 = vst [vmem:[#allocation40_spill] sm:$0xff] %v14972_v19  ;;  %v2838_v61 = vpop.f32.mrf.mxu0  ;;  %11201 = vmatmul.mubr.msk.f32.gmra.mxu0 %vm871_vm3, %v3966_v52 }
 0x35a   : > { %v3006_v13 = vadd.f32 %v2838_v61, %v17897_v26  ;;  %v3702_v31 = vpop.f32.mrf.mxu1  ;;  %11203 = vmatprep.mubr.msk.f32.mxu0 %vm12336_vm0, %v17796_v0  ;;  %v3970_v61 = vsel %vm1035_vm1, %v3967_v40, %v3969_v36  ;;  %v12068_v26 = vld [vmem:[%s12551_s19 + $0xf0] sm:$0xff] }
 0x35b   : > { %v14980_v33 = vadd.f32 %v3702_v31, %v3002_v59  ;;  %v10811_v63 = vpop.f32.mrf.mxu0  ;;  %v3971_v11 = vrot.slane %v12068_v26, 4 }
 0x35c   : > { %v11044_v21 = vpop.f32.mrf.mxu1  ;;  %v17901_v63 = vld [vmem:[#allocation45_spill] sm:$0xff] }
 0x35d   : > { %17898 = vst [vmem:[#allocation41_spill] sm:$0xff] %v14980_v33  ;;  %v2843_v55 = vpop.f32.mrf.mxu0  ;;  %11204 = vmatmul.mubr.msk.f32.gmra.mxu0 %vm871_vm3, %v3968_v9 }
 0x35e   : > { %v3007_v52 = vadd.f32 %v2843_v55, %v17899_v23  ;;  %v3707_v46 = vpop.f32.mrf.mxu1  ;;  %11206 = vmatprep.mubr.msk.f32.mxu0 %vm12336_vm0, %v17796_v0  ;;  %v3972_v55 = vsel %vm1035_vm1, %v3969_v36, %v3971_v11  ;;  %v12069_v23 = vld [vmem:[%s12551_s19 + $0xf8] sm:$0xff] }
 0x35f   : > { %v14988_v19 = vadd.f32 %v3707_v46, %v3003_v27  ;;  %v10814_v59 = vpop.f32.mrf.mxu0  ;;  %v3973_v40 = vrot.slane %v12069_v23, 4 }
 0x360   : > { %v11047_v31 = vpop.f32.mrf.mxu1  ;;  %v17903_v59 = vld [vmem:[#allocation46_spill] sm:$0xff] }
 0x361   : > { %17900 = vst [vmem:[#allocation42_spill] sm:$0xff] %v14988_v19  ;;  %v2848_v6 = vpop.f32.mrf.mxu0  ;;  %11207 = vmatmul.mubr.msk.f32.gmra.mxu0 %vm871_vm3, %v3970_v61 }
 0x362   : > { %v3008_v9 = vadd.f32 %v2848_v6, %v17901_v63  ;;  %v3712_v21 = vpop.f32.mrf.mxu1  ;;  %11209 = vmatprep.mubr.msk.f32.mxu0 %vm12336_vm0, %v17796_v0  ;;  %v3974_v6 = vsel %vm1035_vm1, %v3971_v11, %v3973_v40  ;;  %v12070_v63 = vld [vmem:[%s12551_s19 + $0x100] sm:$0xff] }
 0x363   : > { %v14996_v33 = vadd.f32 %v3712_v21, %v3004_v62  ;;  %v10817_v27 = vpop.f32.mrf.mxu0  ;;  %v3975_v36 = vrot.slane %v12070_v63, 4 }
 0x364   : > { %v11050_v46 = vpop.f32.mrf.mxu1  ;;  %v17905_v27 = vld [vmem:[#allocation47_spill] sm:$0xff] }
 0x365   : > { %17902 = vst [vmem:[#allocation43_spill] sm:$0xff] %v14996_v33  ;;  %v2853_v26 = vpop.f32.mrf.mxu0  ;;  %11210 = vmatmul.mubr.msk.f32.gmra.mxu0 %vm871_vm3, %v3972_v55 }
 0x366   : > { %v3009_v61 = vadd.f32 %v2853_v26, %v17903_v59  ;;  %v3717_v31 = vpop.f32.mrf.mxu1  ;;  %11212 = vmatprep.mubr.msk.f32.mxu0 %vm12336_vm0, %v17796_v0  ;;  %v3976_v26 = vsel %vm1035_vm1, %v3973_v40, %v3975_v36  ;;  %v12071_v59 = vld [vmem:[%s12551_s19 + $0x108] sm:$0xff] }
 0x367   : > { %v15004_v19 = vadd.f32 %v3717_v31, %v3005_v15  ;;  %v10820_v62 = vpop.f32.mrf.mxu0  ;;  %v3977_v11 = vrot.slane %v12071_v59, 4 }
 0x368   : > { %v11053_v21 = vpop.f32.mrf.mxu1  ;;  %v17907_v62 = vld [vmem:[#allocation48_spill] sm:$0xff] }
 0x369   : > { %17904 = vst [vmem:[#allocation44_spill] sm:$0xff] %v15004_v19  ;;  %v2858_v23 = vpop.f32.mrf.mxu0  ;;  %11213 = vmatmul.mubr.msk.f32.gmra.mxu0 %vm871_vm3, %v3974_v6 }
 0x36a   : > { %v3010_v55 = vadd.f32 %v2858_v23, %v17905_v27  ;;  %v3722_v46 = vpop.f32.mrf.mxu1  ;;  %11215 = vmatprep.mubr.msk.f32.mxu0 %vm12336_vm0, %v17796_v0  ;;  %v3978_v23 = vsel %vm1035_vm1, %v3975_v36, %v3977_v11  ;;  %v12072_v27 = vld [vmem:[%s12551_s19 + $0x110] sm:$0xff] }
 0x36b   : > { %v15012_v33 = vadd.f32 %v3722_v46, %v3006_v13  ;;  %v10823_v15 = vpop.f32.mrf.mxu0  ;;  %v3979_v40 = vrot.slane %v12072_v27, 4 }
 0x36c   : > { %v11056_v31 = vpop.f32.mrf.mxu1  ;;  %v17909_v15 = vld [vmem:[#allocation49_spill] sm:$0xff] }
 0x36d   : > { %17906 = vst [vmem:[#allocation45_spill] sm:$0xff] %v15012_v33  ;;  %v2863_v63 = vpop.f32.mrf.mxu0  ;;  %11216 = vmatmul.mubr.msk.f32.gmra.mxu0 %vm871_vm3, %v3976_v26 }
 0x36e   : > { %v3011_v6 = vadd.f32 %v2863_v63, %v17907_v62  ;;  %v3727_v21 = vpop.f32.mrf.mxu1  ;;  %11218 = vmatprep.mubr.msk.f32.mxu0 %vm12336_vm0, %v17796_v0  ;;  %v3980_v63 = vsel %vm1035_vm1, %v3977_v11, %v3979_v40  ;;  %v12073_v62 = vld [vmem:[%s12551_s19 + $0x118] sm:$0xff] }
 0x36f   : > { %v15020_v19 = vadd.f32 %v3727_v21, %v3007_v52  ;;  %v10826_v13 = vpop.f32.mrf.mxu0  ;;  %v3981_v36 = vrot.slane %v12073_v62, 4 }
 0x370   : > { %v11059_v46 = vpop.f32.mrf.mxu1  ;;  %v17911_v13 = vld [vmem:[#allocation50_spill] sm:$0xff] }
 0x371   : > { %17908 = vst [vmem:[#allocation46_spill] sm:$0xff] %v15020_v19  ;;  %v2868_v59 = vpop.f32.mrf.mxu0  ;;  %11219 = vmatmul.mubr.msk.f32.gmra.mxu0 %vm871_vm3, %v3978_v23 }
 0x372   : > { %v3012_v26 = vadd.f32 %v2868_v59, %v17909_v15  ;;  %v3732_v31 = vpop.f32.mrf.mxu1  ;;  %11221 = vmatprep.mubr.msk.f32.mxu0 %vm12336_vm0, %v17796_v0  ;;  %v3982_v59 = vsel %vm1035_vm1, %v3979_v40, %v3981_v36  ;;  %v12074_v15 = vld [vmem:[%s12551_s19 + $0x120] sm:$0xff] }
 0x373   : > { %v15028_v33 = vadd.f32 %v3732_v31, %v3008_v9  ;;  %v10829_v52 = vpop.f32.mrf.mxu0  ;;  %v3983_v11 = vrot.slane %v12074_v15, 4 }
 0x374   : > { %v11062_v21 = vpop.f32.mrf.mxu1  ;;  %v17913_v52 = vld [vmem:[#allocation51_spill] sm:$0xff] }
 0x375   : > { %17910 = vst [vmem:[#allocation47_spill] sm:$0xff] %v15028_v33  ;;  %v2873_v27 = vpop.f32.mrf.mxu0  ;;  %11222 = vmatmul.mubr.msk.f32.gmra.mxu0 %vm871_vm3, %v3980_v63 }
 0x376   : > { %v3013_v23 = vadd.f32 %v2873_v27, %v17911_v13  ;;  %v3737_v46 = vpop.f32.mrf.mxu1  ;;  %11224 = vmatprep.mubr.msk.f32.mxu0 %vm12336_vm0, %v17796_v0  ;;  %v3984_v27 = vsel %vm1035_vm1, %v3981_v36, %v3983_v11  ;;  %v12075_v13 = vld [vmem:[%s12551_s19 + $0x128] sm:$0xff] }
 0x377   : > { %v15036_v19 = vadd.f32 %v3737_v46, %v3009_v61  ;;  %v10832_v9 = vpop.f32.mrf.mxu0  ;;  %v3985_v40 = vrot.slane %v12075_v13, 4 }
 0x378   : > { %v11065_v31 = vpop.f32.mrf.mxu1  ;;  %v17915_v9 = vld [vmem:[#allocation52_spill] sm:$0xff] }
 0x379   : > { %17912 = vst [vmem:[#allocation48_spill] sm:$0xff] %v15036_v19  ;;  %v2878_v62 = vpop.f32.mrf.mxu0  ;;  %11225 = vmatmul.mubr.msk.f32.gmra.mxu0 %vm871_vm3, %v3982_v59 }
 0x37a   : > { %v3014_v63 = vadd.f32 %v2878_v62, %v17913_v52  ;;  %v3742_v21 = vpop.f32.mrf.mxu1  ;;  %11227 = vmatprep.mubr.msk.f32.mxu0 %vm12336_vm0, %v17796_v0  ;;  %v3986_v62 = vsel %vm1035_vm1, %v3983_v11, %v3985_v40  ;;  %v12076_v52 = vld [vmem:[%s12551_s19 + $0x130] sm:$0xff] }
 0x37b   : > { %v15044_v33 = vadd.f32 %v3742_v21, %v3010_v55  ;;  %v10835_v61 = vpop.f32.mrf.mxu0  ;;  %v3987_v36 = vrot.slane %v12076_v52, 4 }
 0x37c   : > { %v11068_v46 = vpop.f32.mrf.mxu1  ;;  %v17917_v61 = vld [vmem:[#allocation53_spill] sm:$0xff] }
 0x37d   : > { %17914 = vst [vmem:[#allocation49_spill] sm:$0xff] %v15044_v33  ;;  %v2883_v15 = vpop.f32.mrf.mxu0  ;;  %11228 = vmatmul.mubr.msk.f32.gmra.mxu0 %vm871_vm3, %v3984_v27 }
 0x37e   : > { %v3015_v59 = vadd.f32 %v2883_v15, %v17915_v9  ;;  %v3747_v31 = vpop.f32.mrf.mxu1  ;;  %11230 = vmatprep.mubr.msk.f32.mxu0 %vm12336_vm0, %v17796_v0  ;;  %v3988_v15 = vsel %vm1035_vm1, %v3985_v40, %v3987_v36  ;;  %v12077_v9 = vld [vmem:[%s12551_s19 + $0x138] sm:$0xff] }
 0x37f   : > { %v15052_v19 = vadd.f32 %v3747_v31, %v3011_v6  ;;  %v10838_v55 = vpop.f32.mrf.mxu0  ;;  %v3989_v11 = vrot.slane %v12077_v9, 4 }
 0x380   : > { %v11071_v21 = vpop.f32.mrf.mxu1  ;;  %v17919_v55 = vld [vmem:[#allocation54_spill] sm:$0xff] }
 0x381   : > { %17916 = vst [vmem:[#allocation50_spill] sm:$0xff] %v15052_v19  ;;  %v2888_v13 = vpop.f32.mrf.mxu0  ;;  %11231 = vmatmul.mubr.msk.f32.gmra.mxu0 %vm871_vm3, %v3986_v62 }
 0x382   : > { %v3016_v27 = vadd.f32 %v2888_v13, %v17917_v61  ;;  %v3752_v46 = vpop.f32.mrf.mxu1  ;;  %11233 = vmatprep.mubr.msk.f32.mxu0 %vm12336_vm0, %v17796_v0  ;;  %v3990_v13 = vsel %vm1035_vm1, %v3987_v36, %v3989_v11  ;;  %v12078_v61 = vld [vmem:[%s12551_s19 + $0x140] sm:$0xff] }
 0x383   : > { %v15060_v33 = vadd.f32 %v3752_v46, %v3012_v26  ;;  %v10841_v6 = vpop.f32.mrf.mxu0  ;;  %v3991_v40 = vrot.slane %v12078_v61, 4 }
 0x384   : > { %v11074_v31 = vpop.f32.mrf.mxu1  ;;  %v17921_v6 = vld [vmem:[#allocation55_spill] sm:$0xff] }
 0x385   : > { %17918 = vst [vmem:[#allocation51_spill] sm:$0xff] %v15060_v33  ;;  %v2893_v52 = vpop.f32.mrf.mxu0  ;;  %11234 = vmatmul.mubr.msk.f32.gmra.mxu0 %vm871_vm3, %v3988_v15 }
 0x386   : > { %v3017_v62 = vadd.f32 %v2893_v52, %v17919_v55  ;;  %v3757_v21 = vpop.f32.mrf.mxu1  ;;  %11236 = vmatprep.mubr.msk.f32.mxu0 %vm12336_vm0, %v17796_v0  ;;  %v3992_v52 = vsel %vm1035_vm1, %v3989_v11, %v3991_v40  ;;  %v12079_v55 = vld [vmem:[%s12551_s19 + $0x148] sm:$0xff] }
 0x387   : > { %v15068_v19 = vadd.f32 %v3757_v21, %v3013_v23  ;;  %v10844_v26 = vpop.f32.mrf.mxu0  ;;  %v3993_v36 = vrot.slane %v12079_v55, 4 }
 0x388   : > { %v11077_v46 = vpop.f32.mrf.mxu1  ;;  %v17923_v26 = vld [vmem:[#allocation56_spill] sm:$0xff] }
 0x389   : > { %17920 = vst [vmem:[#allocation52_spill] sm:$0xff] %v15068_v19  ;;  %v2898_v9 = vpop.f32.mrf.mxu0  ;;  %11237 = vmatmul.mubr.msk.f32.gmra.mxu0 %vm871_vm3, %v3990_v13 }
 0x38a   : > { %v3018_v15 = vadd.f32 %v2898_v9, %v17921_v6  ;;  %v3762_v31 = vpop.f32.mrf.mxu1  ;;  %11239 = vmatprep.mubr.msk.f32.mxu0 %vm12336_vm0, %v17796_v0  ;;  %v3994_v9 = vsel %vm1035_vm1, %v3991_v40, %v3993_v36  ;;  %v12080_v6 = vld [vmem:[%s12551_s19 + $0x150] sm:$0xff] }
 0x38b   : > { %v15076_v33 = vadd.f32 %v3762_v31, %v3014_v63  ;;  %v10847_v23 = vpop.f32.mrf.mxu0  ;;  %v3995_v11 = vrot.slane %v12080_v6, 4 }
 0x38c   : > { %v11080_v21 = vpop.f32.mrf.mxu1  ;;  %v17925_v23 = vld [vmem:[#allocation57_spill] sm:$0xff] }
 0x38d   : > { %17922 = vst [vmem:[#allocation53_spill] sm:$0xff] %v15076_v33  ;;  %v2903_v61 = vpop.f32.mrf.mxu0  ;;  %11240 = vmatmul.mubr.msk.f32.gmra.mxu0 %vm871_vm3, %v3992_v52 }
 0x38e   : > { %v3019_v13 = vadd.f32 %v2903_v61, %v17923_v26  ;;  %v3767_v46 = vpop.f32.mrf.mxu1  ;;  %11242 = vmatprep.mubr.msk.f32.mxu0 %vm12336_vm0, %v17796_v0  ;;  %v3996_v61 = vsel %vm1035_vm1, %v3993_v36, %v3995_v11  ;;  %v12081_v26 = vld [vmem:[%s12551_s19 + $0x158] sm:$0xff] }
 0x38f   : > { %v15084_v19 = vadd.f32 %v3767_v46, %v3015_v59  ;;  %v10850_v63 = vpop.f32.mrf.mxu0  ;;  %v3997_v40 = vrot.slane %v12081_v26, 4 }
 0x390   : > { %v11083_v31 = vpop.f32.mrf.mxu1  ;;  %v17927_v63 = vld [vmem:[#allocation58_spill] sm:$0xff] }
 0x391   : > { %17924 = vst [vmem:[#allocation54_spill] sm:$0xff] %v15084_v19  ;;  %v2908_v55 = vpop.f32.mrf.mxu0  ;;  %11243 = vmatmul.mubr.msk.f32.gmra.mxu0 %vm871_vm3, %v3994_v9 }
 0x392   : > { %v3020_v52 = vadd.f32 %v2908_v55, %v17925_v23  ;;  %v3772_v21 = vpop.f32.mrf.mxu1  ;;  %11245 = vmatprep.mubr.msk.f32.mxu0 %vm12336_vm0, %v17796_v0  ;;  %v3998_v55 = vsel %vm1035_vm1, %v3995_v11, %v3997_v40  ;;  %v12082_v23 = vld [vmem:[%s12551_s19 + $0x160] sm:$0xff] }
 0x393   : > { %v15092_v33 = vadd.f32 %v3772_v21, %v3016_v27  ;;  %v10853_v59 = vpop.f32.mrf.mxu0  ;;  %v3999_v36 = vrot.slane %v12082_v23, 4 }
 0x394   : > { %v11086_v46 = vpop.f32.mrf.mxu1  ;;  %v17929_v59 = vld [vmem:[#allocation59_spill] sm:$0xff] }
 0x395   : > { %17926 = vst [vmem:[#allocation55_spill] sm:$0xff] %v15092_v33  ;;  %v2913_v6 = vpop.f32.mrf.mxu0  ;;  %11246 = vmatmul.mubr.msk.f32.gmra.mxu0 %vm871_vm3, %v3996_v61 }
 0x396   : > { %v3021_v9 = vadd.f32 %v2913_v6, %v17927_v63  ;;  %v3777_v31 = vpop.f32.mrf.mxu1  ;;  %11248 = vmatprep.mubr.msk.f32.mxu0 %vm12336_vm0, %v17796_v0  ;;  %v4000_v6 = vsel %vm1035_vm1, %v3997_v40, %v3999_v36  ;;  %v12083_v63 = vld [vmem:[%s12551_s19 + $0x168] sm:$0xff] }
 0x397   : > { %v15100_v19 = vadd.f32 %v3777_v31, %v3017_v62  ;;  %v10856_v27 = vpop.f32.mrf.mxu0  ;;  %v4001_v11 = vrot.slane %v12083_v63, 4 }
 0x398   : > { %v11089_v21 = vpop.f32.mrf.mxu1 }
 0x399   : > { %17928 = vst [vmem:[#allocation56_spill] sm:$0xff] %v15100_v19  ;;  %v2918_v26 = vpop.f32.mrf.mxu0  ;;  %11249 = vmatmul.mubr.msk.f32.gmra.mxu0 %vm871_vm3, %v3998_v55  ;;  %v4002_v21 = vsel %vm1035_vm1, %v3999_v36, %v4001_v11 }
 0x39a   : > { %v3022_v61 = vadd.f32 %v2918_v26, %v17929_v59  ;;  %v3782_v46 = vpop.f32.mrf.mxu1  ;;  %11251 = vmatprep.mubr.msk.f32.mxu0 %vm12336_vm0, %v17796_v0  ;;  %v12084_v26 = vld [vmem:[%s12551_s19 + $0x170] sm:$0xff] }
 0x39b   : > { %v15108_v33 = vadd.f32 %v3782_v46, %v3018_v15  ;;  %v10859_v62 = vpop.f32.mrf.mxu0  ;;  %v4003_v40 = vrot.slane %v12084_v26, 4 }
 0x39c   : > { %v11092_v31 = vpop.f32.mrf.mxu1 }
 0x39d   : > { %17930 = vst [vmem:[#allocation57_spill] sm:$0xff] %v15108_v33  ;;  %v2923_v23 = vpop.f32.mrf.mxu0  ;;  %11252 = vmatmul.mubr.msk.f32.gmra.mxu0 %vm871_vm3, %v4000_v6  ;;  %v12085_v31 = vld [vmem:[%s12551_s19 + $0x178] sm:$0xff]  ;;  %v17938_v33 = vld [vmem:[#allocation61_spill] sm:$0xff] }
 0x39e   : > { %v3023_v55 = vadd.f32 %v2923_v23, %v14119_v48  ;;  %v3787_v27 = vpop.f32.mrf.mxu1  ;;  %11254 = vmatprep.mubr.msk.f32.mxu0 %vm12336_vm0, %v17796_v0  ;;  %v4004_v48 = vsel %vm1035_vm1, %v4001_v11, %v4003_v40  ;;  %v4005_v36 = vrot.slane %v12085_v31, 4  ;;  %v17935_v31 = vld [vmem:[#allocation60_spill] sm:$0xff] }
 0x39f   : > { %v15116_v59 = vadd.f32 %v3787_v27, %v3019_v13  ;;  %v10862_v15 = vpop.f32.mrf.mxu0 }
 0x3a0   : > { %v11095_v46 = vpop.f32.mrf.mxu1 }
 0x3a1   : > { %17931 = vst [vmem:[#allocation58_spill] sm:$0xff] %v15116_v59  ;;  %v2928_v63 = vpop.f32.mrf.mxu0  ;;  %11255 = vmatmul.mubr.msk.f32.gmra.mxu0 %vm871_vm3, %v4002_v21  ;;  %v12086_v46 = vld [vmem:[%s12551_s19 + $0x180] sm:$0xff] }
 0x3a2   : > { %v3024_v6 = vadd.f32 %v2928_v63, %v14137_v12  ;;  %v3792_v62 = vpop.f32.mrf.mxu1  ;;  %11257 = vmatprep.mubr.msk.f32.mxu0 %vm12336_vm0, %v17796_v0  ;;  %v4006_v12 = vsel %vm1035_vm1, %v4003_v40, %v4005_v36  ;;  %v4007_v11 = vrot.slane %v12086_v46, 4 }
 0x3a3   : > { %v15124_v23 = vadd.f32 %v3792_v62, %v3020_v52  ;;  %v10865_v13 = vpop.f32.mrf.mxu0  ;;  %v17934_v62 = vld [vmem:[#allocation22_spill] sm:$0xff] }
 0x3a4   : > { %v11098_v27 = vpop.f32.mrf.mxu1  ;;  %v2136_v13 = vadd.f32 %v17935_v31, %v17934_v62  ;;  %v4008_v40 = vsel %vm1035_vm1, %v4005_v36, %v4007_v11 }
 0x3a5   : > { %17932 = vst [vmem:[#allocation59_spill] sm:$0xff] %v15124_v23  ;;  %v2933_v26 = vpop.f32.mrf.mxu0  ;;  %11258 = vmatmul.mubr.msk.f32.gmra.mxu0 %vm871_vm3, %v4004_v48 }
 0x3a6   : > { %v3025_v21 = vadd.f32 %v2933_v26, %v14155_v44  ;;  %v3797_v15 = vpop.f32.mrf.mxu1  ;;  %11260 = vmatprep.mubr.msk.f32.mxu0 %vm12336_vm0, %v17796_v0  ;;  %v12087_v26 = vld [vmem:[%s12551_s19 + $0x188] sm:$0xff] }
 0x3a7   : > { %v15132_v63 = vadd.f32 %v3797_v15, %v3021_v9  ;;  %v10868_v52 = vpop.f32.mrf.mxu0  ;;  %v4009_v46 = vrot.slane %v12087_v26, 4 }
 0x3a8   : > { %v11101_v27 = vpop.f32.mrf.mxu1  ;;  %v17937_v52 = vld [vmem:[#allocation23_spill] sm:$0xff] }
 0x3a9   : > { %17933 = vst [vmem:[#allocation62_spill] sm:$0xff] %v15132_v63  ;;  %v2938_v19 = vpop.f32.mrf.mxu0  ;;  %11261 = vmatmul.mubr.msk.f32.gmra.mxu0 %vm871_vm3, %v4006_v12  ;;  %v2141_v62 = vadd.f32 %v17938_v33, %v17937_v52  ;;  %v4010_v36 = vsel %vm1035_vm1, %v4007_v11, %v4009_v46  ;;  %v12089_v11 = vld [vmem:[%s12551_s19 + $0x198] sm:$0xff] }
 0x3aa   : > { %v3026_v44 = vadd.f32 %v2938_v19, %v2136_v13  ;;  %v3802_v48 = vpop.f32.mrf.mxu1  ;;  %11263 = vmatprep.mubr.msk.f32.mxu0 %vm12336_vm0, %v17796_v0  ;;  %v12088_v13 = vld [vmem:[%s12551_s19 + $0x190] sm:$0xff] }
 0x3ab   : > { %v15141_v9 = vadd.f32 %v3802_v48, %v3022_v61  ;;  %v10871_v15 = vpop.f32.mrf.mxu0  ;;  %v4011_v26 = vrot.slane %v12088_v13, 4 }
 0x3ac   : > { %v11104_v31 = vpop.f32.mrf.mxu1 }
 0x3ad   : > { %17936 = vst [vmem:[#allocation22_spill] sm:$0xff] %v15141_v9  ;;  %v2943_v27 = vpop.f32.mrf.mxu0  ;;  %11264 = vmatmul.mubr.msk.f32.gmra.mxu0 %vm871_vm3, %v4008_v40  ;;  %v4012_v52 = vsel %vm1035_vm1, %v4009_v46, %v4011_v26 }
 0x3ae   : > { %v3027_v19 = vadd.f32 %v2943_v27, %v2141_v62  ;;  %v3807_v12 = vpop.f32.mrf.mxu1  ;;  %11266 = vmatprep.mubr.msk.f32.mxu0 %vm12336_vm0, %v17796_v0  ;;  %v4013_v62 = vrot.slane %v12089_v11, 4 }
 0x3af   : > { %v15150_v61 = vadd.f32 %v3807_v12, %v3023_v55  ;;  %v10874_v48 = vpop.f32.mrf.mxu0 }
 0x3b0   : > { %v11107_v15 = vpop.f32.mrf.mxu1 }
 0x3b1   : > { %17939 = vst [vmem:[#allocation60_spill] sm:$0xff] %v15150_v61  ;;  %v4310_v59 = vpop.f32.mrf.mxu0  ;;  %11267 = vmatmul.mubr.msk.f32.gmra.mxu0 %vm871_vm3, %v4010_v36 }
 0x3b2   : > { %v3812_v33 = vpop.f32.mrf.mxu1  ;;  %v15154_v40 = vadd.f32 %v4310_v59, %v14210_v41  ;;  %11269 = vmatprep.mubr.msk.f32.mxu0 %vm12336_vm0, %v17796_v0  ;;  %v4014_v41 = vsel %vm1035_vm1, %v4011_v26, %v4013_v62  ;;  %v12090_v59 = vld [vmem:[%s12551_s19 + $0x1a0] sm:$0xff]  ;;  %v12091_v26 = vld [vmem:[%s12551_s19 + $0x1a8] sm:$0xff] }
 0x3b3   : > { %v15160_v31 = vadd.f32 %v3812_v33, %v3024_v6  ;;  %v11124_v55 = vpop.f32.mrf.mxu0  ;;  %v4015_v46 = vrot.slane %v12090_v59, 4 }
 0x3b4   : > { %v11110_v27 = vpop.f32.mrf.mxu1  ;;  %v4017_v55 = vrot.slane %v12091_v26, 4 }
 0x3b5   : > { %17940 = vst [vmem:[#allocation23_spill] sm:$0xff] %v15160_v31  ;;  %v4315_v12 = vpop.f32.mrf.mxu0  ;;  %11270 = vmatmul.mubr.msk.f32.gmra.mxu0 %vm871_vm3, %v4012_v52 }
 0x3b6   : > { %v3817_v36 = vpop.f32.mrf.mxu1  ;;  %v15164_v13 = vadd.f32 %v4315_v12, %v14229_v14  ;;  %11272 = vmatprep.mubr.msk.f32.mxu0 %vm12336_vm0, %v17796_v0  ;;  %v4016_v14 = vsel %vm1035_vm1, %v4013_v62, %v4015_v46  ;;  %v12092_v62 = vld [vmem:[%s12551_s19 + $0x1b0] sm:$0xff] }
 0x3b7   : > { %v15170_v48 = vadd.f32 %v3817_v36, %v3025_v21  ;;  %v11127_v6 = vpop.f32.mrf.mxu0 }
 0x3b8   : > { %v11113_v15 = vpop.f32.mrf.mxu1  ;;  %v4019_v6 = vrot.slane %v12092_v62, 4  ;;  %v12095_v62 = vld [vmem:[%s12551_s19 + $0x1c8] sm:$0xff] }
 0x3b9   : > { %v4320_v33 = vpop.f32.mrf.mxu0  ;;  %11273 = vmatmul.mubr.msk.f32.gmra.mxu0 %vm871_vm3, %v4014_v41 }
 0x3ba   : > { %v3822_v52 = vpop.f32.mrf.mxu1  ;;  %v15174_v11 = vadd.f32 %v4320_v33, %v14248_v22  ;;  %11275 = vmatprep.mubr.msk.f32.mxu0 %vm12336_vm0, %v17796_v0  ;;  %v4018_v22 = vsel %vm1035_vm1, %v4015_v46, %v4017_v55  ;;  %v12093_v46 = vld [vmem:[%s12551_s19 + $0x1b8] sm:$0xff] }
 0x3bb   : > { %v15180_v27 = vadd.f32 %v3822_v52, %v3026_v44  ;;  %v11130_v21 = vpop.f32.mrf.mxu0  ;;  %v4021_v26 = vrot.slane %v12093_v46, 4 }
 0x3bc   : > { %v11116_v12 = vpop.f32.mrf.mxu1 }
 0x3bd   : > { %17941 = vst [vmem:[#allocation61_spill] sm:$0xff] %v15180_v27  ;;  %v4325_v36 = vpop.f32.mrf.mxu0  ;;  %11276 = vmatmul.mubr.msk.f32.gmra.mxu0 %vm871_vm3, %v4016_v14  ;;  %v4965_v27 = vld [vmem:[#allocation2 + $0x8] sm:$0xff] }
 0x3be   : > { %v3827_v41 = vpop.f32.mrf.mxu1  ;;  %v15184_v59 = vadd.f32 %v4325_v36, %v14267_v3  ;;  %11278 = vmatprep.mubr.msk.f32.mxu0 %vm12336_vm0, %v17796_v0  ;;  %v4020_v3 = vsel %vm1035_vm1, %v4017_v55, %v4019_v6  ;;  %5254 = vmatprep.mubr.f32.mxu1 %v4965_v27 }
 0x3bf   : > { %v15190_v44 = vadd.f32 %v3827_v41, %v3027_v19  ;;  %v11133_v15 = vpop.f32.mrf.mxu0  ;;  %v12094_v19 = vld [vmem:[%s12551_s19 + $0x1c0] sm:$0xff] }
 0x3c0   : > { %v11119_v33 = vpop.f32.mrf.mxu1  ;;  %v4023_v36 = vrot.slane %v12094_v19, 4  ;;  %v4025_v15 = vrot.slane %v12095_v62, 4  ;;  %v12097_v19 = vld [vmem:[%s12551_s19 + $0x1d8] sm:$0xff] }
 0x3c1   : > { %17942 = vst [vmem:[#allocation63_spill] sm:$0xff] %v15190_v44  ;;  %v4330_v52 = vpop.f32.mrf.mxu0  ;;  %11279 = vmatmul.mubr.msk.f32.gmra.mxu0 %vm871_vm3, %v4018_v22 }
 0x3c2   : > { %v15194_v14 = vadd.f32 %v4330_v52, %v14286_v39  ;;  %11281 = vmatprep.mubr.msk.f32.mxu0 %vm12336_vm0, %v17796_v0  ;;  %v4022_v39 = vsel %vm1035_vm1, %v4019_v6, %v4021_v26  ;;  %v4024_v55 = vsel %vm1035_vm1, %v4021_v26, %v4023_v36  ;;  %v4026_v6 = vsel %vm1035_vm1, %v4023_v36, %v4025_v15 }
 0x3c3   : > { %v11136_v21 = vpop.f32.mrf.mxu0 }
 0x3c5   : > { %v15200_v12 = vpop.f32.mrf.mxu0  ;;  %11282 = vmatmul.mubr.msk.f32.gmra.mxu0 %vm871_vm3, %v4020_v3  ;;  %v12096_v3 = vld [vmem:[%s12551_s19 + $0x1d0] sm:$0xff] }
 0x3c6   : > { %11284 = vmatprep.mubr.msk.f32.mxu0 %vm12336_vm0, %v17796_v0  ;;  %v4027_v46 = vrot.slane %v12096_v3, 4 }
 0x3c7   : > { %v11139_v41 = vpop.f32.mrf.mxu0 }
 0x3c8   : > { %v4028_v26 = vsel %vm1035_vm1, %v4025_v15, %v4027_v46  ;;  %v4029_v41 = vrot.slane %v12097_v19, 4  ;;  %v12099_v19 = vld [vmem:[%s12551_s19 + $0x1e8] sm:$0xff] }
 0x3c9   : > { %v15207_v22 = vpop.f32.mrf.mxu0  ;;  %11285 = vmatmul.mubr.msk.f32.gmra.mxu0 %vm871_vm3, %v4022_v39 }
 0x3ca   : > { %11287 = vmatprep.mubr.msk.f32.mxu0 %vm12336_vm0, %v17796_v0  ;;  %v4030_v36 = vsel %vm1035_vm1, %v4027_v46, %v4029_v41 }
 0x3cb   : > { %v11142_v33 = vpop.f32.mrf.mxu0 }
 0x3cc   : > { %v12098_v33 = vld [vmem:[%s12551_s19 + $0x1e0] sm:$0xff] }
 0x3cd   : > { %v15214_v52 = vpop.f32.mrf.mxu0  ;;  %11288 = vmatmul.mubr.msk.f32.gmra.mxu0 %vm871_vm3, %v4024_v55 }
 0x3ce   : > { %11290 = vmatprep.mubr.msk.f32.mxu0 %vm12336_vm0, %v17796_v0 }
 0x3cf   : > { %v11145_v21 = vpop.f32.mrf.mxu0 }
 0x3d1   : > { %v15221_v39 = vpop.f32.mrf.mxu0  ;;  %11291 = vmatmul.mubr.msk.f32.gmra.mxu0 %vm871_vm3, %v4026_v6  ;;  %v4031_v6 = vrot.slane %v12098_v33, 4  ;;  %v12100_v33 = vld [vmem:[%s12551_s19 + $0x1f0] sm:$0xff] }
 0x3d2   : > { %11293 = vmatprep.mubr.msk.f32.mxu0 %vm12336_vm0, %v17796_v0 }
 0x3d3   : > { %v11148_v55 = vpop.f32.mrf.mxu0  ;;  %v4032_v15 = vsel %vm1035_vm1, %v4029_v41, %v4031_v6 }
 0x3d5   : > { %v15228_v62 = vpop.f32.mrf.mxu0  ;;  %11294 = vmatmul.mubr.msk.f32.gmra.mxu0 %vm871_vm3, %v4028_v26  ;;  %v4033_v26 = vrot.slane %v12099_v19, 4  ;;  %v12101_v19 = vld [vmem:[%s12551_s19 + $0x1f8] sm:$0xff] }
 0x3d6   : > { %11296 = vmatprep.mubr.msk.f32.mxu0 %vm12336_vm0, %v17796_v0 }
 0x3d7   : > { %v11151_v3 = vpop.f32.mrf.mxu0  ;;  %v4034_v46 = vsel %vm1035_vm1, %v4031_v6, %v4033_v26 }
 0x3d9   : > { %v4360_v21 = vpop.f32.mrf.mxu0  ;;  %11297 = vmatmul.mubr.msk.f32.gmra.mxu0 %vm871_vm3, %v4030_v36  ;;  %v4035_v36 = vrot.slane %v12100_v33, 4  ;;  %v12102_v33 = vld [vmem:[%s12551_s19 + $0x200] sm:$0xff] }
 0x3da   : > { %11299 = vmatprep.mubr.msk.f32.mxu0 %vm12336_vm0, %v17796_v0 }
 0x3db   : > { %v11154_v55 = vpop.f32.mrf.mxu0  ;;  %v4036_v41 = vsel %vm1035_vm1, %v4033_v26, %v4035_v36 }
 0x3dd   : > { %v4365_v44 = vpop.f32.mrf.mxu0  ;;  %11300 = vmatmul.mubr.msk.f32.gmra.mxu0 %vm871_vm3, %v4032_v15  ;;  %v4037_v15 = vrot.slane %v12101_v19, 4  ;;  %v12103_v19 = vld [vmem:[%s12551_s19 + $0x208] sm:$0xff] }
 0x3de   : > { %11302 = vmatprep.mubr.msk.f32.mxu0 %vm12336_vm0, %v17796_v0 }
 0x3df   : > { %v11157_v3 = vpop.f32.mrf.mxu0  ;;  %v4038_v6 = vsel %vm1035_vm1, %v4035_v36, %v4037_v15  ;;  %v12104_v36 = vld [vmem:[%s12551_s19 + $0x210] sm:$0xff] }
 0x3e1   : > { %v4370_v23 = vpop.f32.mrf.mxu0  ;;  %11303 = vmatmul.mubr.msk.f32.gmra.mxu0 %vm871_vm3, %v4034_v46  ;;  %v4039_v46 = vrot.slane %v12102_v33, 4  ;;  %v4043_v33 = vrot.slane %v12104_v36, 4 }
 0x3e2   : > { %11305 = vmatprep.mubr.msk.f32.mxu0 %vm12336_vm0, %v17796_v0 }
 0x3e3   : > { %v11160_v55 = vpop.f32.mrf.mxu0  ;;  %v4040_v26 = vsel %vm1035_vm1, %v4037_v15, %v4039_v46 }
 0x3e4   : > { %v4041_v55 = vrot.slane %v12103_v19, 4 }
 0x3e5   : > { %v4375_v63 = vpop.f32.mrf.mxu0  ;;  %11306 = vmatmul.mubr.msk.f32.gmra.mxu0 %vm871_vm3, %v4036_v41 }
 0x3e6   : > { %11308 = vmatprep.mubr.msk.f32.mxu0 %vm12336_vm0, %v17796_v0  ;;  %v4042_v15 = vsel %vm1035_vm1, %v4039_v46, %v4041_v55  ;;  %v4725_v46 = vadd.f32 %v4365_v44, %v14419_v29  ;;  %v12106_v44 = vld [vmem:[%s12551_s19 + $0x220] sm:$0xff] }
 0x3e7   : > { %v11163_v3 = vpop.f32.mrf.mxu0 }
 0x3e9   : > { %v4380_v9 = vpop.f32.mrf.mxu0  ;;  %11309 = vmatmul.mubr.msk.f32.gmra.mxu0 %vm871_vm3, %v4038_v6  ;;  %v4727_v6 = vadd.f32 %v4375_v63, %v14457_v43  ;;  %v12105_v63 = vld [vmem:[%s12551_s19 + $0x218] sm:$0xff] }
 0x3ea   : > { %11311 = vmatprep.mubr.msk.f32.mxu0 %vm12336_vm0, %v17796_v0  ;;  %v4728_v61 = vadd.f32 %v4380_v9, %v14476_v25  ;;  %v15271_v25 = vld [vmem:[%s17767_s5] ss:$0 sm:$0xff] }
 0x3eb   : > { %v11166_v41 = vpop.f32.mrf.mxu0 }
 0x3ec   : > { %v4816_v19 = vadd.f32 %v15271_v25, %v4728_v61  ;;  %v4815_v41 = vadd.f32 %v15271_v25, %v4727_v6  ;;  %v4723_v6 = vadd.f32 %v15228_v62, %v14381_v50 }
 0x3ed   : > { %v4385_v31 = vpop.f32.mrf.mxu0  ;;  %11312 = vmatmul.mubr.msk.f32.gmra.mxu0 %vm871_vm3, %v4040_v26  ;;  %v4726_v26 = vadd.f32 %v4370_v23, %v14438_v60  ;;  %v4724_v23 = vadd.f32 %v4360_v21, %v14400_v5 }
 0x3ee   : > { %v4729_v3 = vadd.f32 %v4385_v31, %v14495_v49  ;;  %11314 = vmatprep.mubr.msk.f32.mxu0 %vm12336_vm0, %v17796_v0  ;;  %v4044_v49 = vsel %vm1035_vm1, %v4041_v55, %v4043_v33  ;;  %v4045_v31 = vrot.slane %v12105_v63, 4  ;;  %v4897_v55 = vmax.f32 %v4816_v19, 0.0 }
 0x3ef   : > { %v11169_v9 = vpop.f32.mrf.mxu0  ;;  %v4814_v61 = vadd.f32 %v15271_v25, %v4726_v26  ;;  %v4896_v5 = vmax.f32 %v4815_v41, 0.0  ;;  %v4812_v19 = vadd.f32 %v15271_v25, %v4724_v23  ;;  %v4811_v63 = vadd.f32 %v15271_v25, %v4723_v6  ;;  %v12109_v6 = vld [vmem:[%s12551_s19 + $0x238] sm:$0xff] }
 0x3f0   : > { %v4817_v27 = vadd.f32 %v15271_v25, %v4729_v3  ;;  %v4046_v29 = vsel %vm1035_vm1, %v4043_v33, %v4045_v31  ;;  %v4722_v33 = vadd.f32 %v15221_v39, %v14362_v54  ;;  %v4719_v23 = vadd.f32 %v15200_v12, %v14305_v10 }
 0x3f1   : > { %v4390_v43 = vpop.f32.mrf.mxu0  ;;  %11315 = vmatmul.mubr.msk.f32.gmra.mxu0 %vm871_vm3, %v4042_v15  ;;  %v4813_v15 = vadd.f32 %v15271_v25, %v4725_v46  ;;  %v4895_v50 = vmax.f32 %v4814_v61, 0.0 }
 0x3f2   : > { %v4898_v36 = vmax.f32 %v4817_v27, 0.0  ;;  %v15282_v9 = vadd.f32 %v4390_v43, %v14514_v37  ;;  %11317 = vmatprep.mubr.msk.f32.mxu0 %vm12336_vm0, %v17796_v0  ;;  %v4047_v37 = vrot.slane %v12106_v44, 4  ;;  %v12107_v27 = vld [vmem:[%s12551_s19 + $0x228] sm:$0xff]  ;;  %v4810_v41 = vadd.f32 %v15271_v25, %v4722_v33 }
 0x3f3   : > { %v11172_v60 = vpop.f32.mrf.mxu0  ;;  %v4049_v43 = vrot.slane %v12107_v27, 4  ;;  %v4894_v54 = vmax.f32 %v4813_v15, 0.0  ;;  %v4053_v15 = vrot.slane %v12109_v6, 4 }
 0x3f4   : > { %5191 = vmatpush1.msra.mxu1 %v4898_v36  ;;  %v12108_v36 = vld [vmem:[%s12551_s19 + $0x230] sm:$0xff] }
 0x3f5   : > { %v4395_v3 = vpop.f32.mrf.mxu0  ;;  %11318 = vmatmul.mubr.msk.f32.gmra.mxu0 %vm871_vm3, %v4044_v49  ;;  %5192 = vmatprep.subr.mxu1 %v17796_v0  ;;  %v4721_v49 = vadd.f32 %v15214_v52, %v14343_v8  ;;  %v4893_v8 = vmax.f32 %v4812_v19, 0.0  ;;  %v4051_v60 = vrot.slane %v12108_v36, 4 }
 0x3f6   : > { %v15296_v21 = vadd.f32 %v4395_v3, %v14533_v51  ;;  %5193 = vmatpush1.msra.mxu1 %v4897_v55  ;;  %11320 = vmatprep.mubr.msk.f32.mxu0 %vm12336_vm0, %v17796_v0  ;;  %v4048_v51 = vsel %vm1035_vm1, %v4045_v31, %v4047_v37  ;;  %v4720_v31 = vadd.f32 %v15207_v22, %v14324_v7  ;;  %v4892_v55 = vmax.f32 %v4811_v63, 0.0 }
 0x3f7   : > { %v11175_v26 = vpop.f32.mrf.mxu0  ;;  %5194 = vmatprep.subr.mxu1 %v17796_v0  ;;  %v4809_v61 = vadd.f32 %v15271_v25, %v4721_v49  ;;  %v4052_v10 = vsel %vm1035_vm1, %v4049_v43, %v4051_v60 }
 0x3f8   : > { %5195 = vmatpush1.msra.mxu1 %v4896_v5  ;;  %v4808_v3 = vadd.f32 %v15271_v25, %v4720_v31  ;;  %v4806_v26 = vadd.f32 %v15271_v25, %v15194_v14  ;;  %v12110_v14 = vld [vmem:[%s12551_s19 + $0x240] sm:$0xff] }
 0x3f9   : > { %v4400_v62 = vpop.f32.mrf.mxu0  ;;  %11321 = vmatmul.mubr.msk.f32.gmra.mxu0 %vm871_vm3, %v4046_v29  ;;  %5196 = vmatprep.subr.mxu1 %v17796_v0  ;;  %v4891_v29 = vmax.f32 %v4810_v41, 0.0  ;;  %v4890_v12 = vmax.f32 %v4809_v61, 0.0 }
 0x3fa   : > { %v15312_v39 = vadd.f32 %v4400_v62, %v14552_v58  ;;  %5197 = vmatpush1.msra.mxu1 %v4895_v50  ;;  %11323 = vmatprep.mubr.msk.f32.mxu0 %vm12336_vm0, %v17796_v0  ;;  %v4050_v58 = vsel %vm1035_vm1, %v4047_v37, %v4049_v43  ;;  %v4889_v33 = vmax.f32 %v4808_v3, 0.0  ;;  %v4054_v62 = vsel %vm1035_vm1, %v4051_v60, %v4053_v15  ;;  %v12112_v60 = vld [vmem:[%s12551_s19 + $0x250] sm:$0xff]  ;;  %v12113_v3 = vld [vmem:[%s12551_s19 + $0x258] sm:$0xff] }
 0x3fb   : > { %v11178_v46 = vpop.f32.mrf.mxu0  ;;  %5198 = vmatprep.subr.mxu1 %v17796_v0  ;;  %v4804_v43 = vadd.f32 %v15271_v25, %v15174_v11  ;;  %v4887_v49 = vmax.f32 %v4806_v26, 0.0  ;;  %v12111_v11 = vld [vmem:[%s12551_s19 + $0x248] sm:$0xff] }
 0x3fc   : > { %5199 = vmatpush1.msra.mxu1 %v4894_v54  ;;  %v4057_v31 = vrot.slane %v12111_v11, 4 }
 0x3fd   : > { %v4405_v52 = vpop.f32.mrf.mxu0  ;;  %11324 = vmatmul.mubr.msk.f32.gmra.mxu0 %vm871_vm3, %v4048_v51  ;;  %5200 = vmatprep.subr.mxu1 %v17796_v0  ;;  %v4055_v51 = vrot.slane %v12110_v14, 4 }
 0x3fe   : > { %v15328_v7 = vadd.f32 %v4405_v52, %v14571_v18  ;;  %5201 = vmatpush1.msra.mxu1 %v4893_v8  ;;  %11326 = vmatprep.mubr.msk.f32.mxu0 %vm12336_vm0, %v17796_v0  ;;  %v4807_v18 = vadd.f32 %v15271_v25, %v4719_v23  ;;  %v4802_v8 = vadd.f32 %v15271_v25, %v15154_v40  ;;  %v4885_v52 = vmax.f32 %v4804_v43, 0.0 }
 0x3ff   : > { %v11181_v22 = vpop.f32.mrf.mxu0  ;;  %5202 = vmatprep.subr.mxu1 %v17796_v0  ;;  %v4056_v46 = vsel %vm1035_vm1, %v4053_v15, %v4055_v51  ;;  %v4058_v36 = vsel %vm1035_vm1, %v4055_v51, %v4057_v31  ;;  %v4059_v23 = vrot.slane %v12112_v60, 4  ;;  %v12116_v51 = vld [vmem:[%s12551_s19 + $0x270] sm:$0xff] }
 0x400   : > { %5203 = vmatpush1.msra.mxu1 %v4892_v55  ;;  %v4888_v50 = vmax.f32 %v4807_v18, 0.0  ;;  %v4883_v40 = vmax.f32 %v4802_v8, 0.0  ;;  %v12118_v8 = vld [vmem:[%s12551_s19 + $0x280] sm:$0xff] }
 0x401   : > { %v4410_v44 = vpop.f32.mrf.mxu0  ;;  %11327 = vmatmul.mubr.msk.f32.gmra.mxu0 %vm871_vm3, %v4050_v58  ;;  %5204 = vmatprep.subr.mxu1 %v17796_v0  ;;  %v4060_v22 = vsel %vm1035_vm1, %v4057_v31, %v4059_v23 }
 0x402   : > { %v15339_v37 = vadd.f32 %v4410_v44, %v14590_v24  ;;  %5205 = vmatpush1.msra.mxu1 %v4891_v29  ;;  %11329 = vmatprep.mubr.msk.f32.mxu0 %vm12336_vm0, %v17796_v0  ;;  %v4805_v24 = vadd.f32 %v15271_v25, %v15184_v59  ;;  %v4803_v59 = vadd.f32 %v15271_v25, %v15164_v13  ;;  %v4061_v29 = vrot.slane %v12113_v3, 4 }
 0x403   : > { %v11184_v5 = vpop.f32.mrf.mxu0  ;;  %5206 = vmatprep.subr.mxu1 %v17796_v0 }
 0x404   : > { %5207 = vmatpush1.msra.mxu1 %v4890_v12  ;;  %v4886_v54 = vmax.f32 %v4805_v24, 0.0  ;;  %v4884_v13 = vmax.f32 %v4803_v59, 0.0  ;;  %v4062_v18 = vsel %vm1035_vm1, %v4059_v23, %v4061_v29  ;;  %v12114_v12 = vld [vmem:[%s12551_s19 + $0x260] sm:$0xff] }
 0x405   : > { %v15347_v19 = vpop.f32.mrf.mxu0  ;;  %11330 = vmatmul.mubr.msk.f32.gmra.mxu0 %vm871_vm3, %v4052_v10  ;;  %5208 = vmatprep.subr.mxu1 %v17796_v0  ;;  %v4063_v6 = vrot.slane %v12114_v12, 4 }
 0x406   : > { %5209 = vmatpush1.msra.mxu1 %v4889_v33  ;;  %11332 = vmatprep.mubr.msk.f32.mxu0 %vm12336_vm0, %v17796_v0  ;;  %v12115_v33 = vld [vmem:[%s12551_s19 + $0x268] sm:$0xff] }
 0x407   : > { %v11187_v27 = vpop.f32.mrf.mxu0  ;;  %5210 = vmatprep.subr.mxu1 %v17796_v0  ;;  %v4064_v26 = vsel %vm1035_vm1, %v4061_v29, %v4063_v6  ;;  %v4065_v24 = vrot.slane %v12115_v33, 4  ;;  %v17943_v29 = vrot.slane %v14717_v2, 4 }
 0x408   : > { %5211 = vmatpush1.msra.mxu1 %v4888_v50  ;;  %v4067_v27 = vrot.slane %v12116_v51, 4 }
 0x409   : > { %v15360_v63 = vpop.f32.mrf.mxu0  ;;  %11333 = vmatmul.mubr.msk.f32.gmra.mxu0 %vm871_vm3, %v4054_v62  ;;  %5212 = vmatprep.subr.mxu1 %v17796_v0  ;;  %v4066_v14 = vsel %vm1035_vm1, %v4063_v6, %v4065_v24 }
 0x40a   : > { %5213 = vmatpush1.msra.mxu1 %v4887_v49  ;;  %11335 = vmatprep.mubr.msk.f32.mxu0 %vm12336_vm0, %v17796_v0  ;;  %v4068_v59 = vsel %vm1035_vm1, %v4065_v24, %v4067_v27 }
 0x40b   : > { %v11190_v41 = vpop.f32.mrf.mxu0  ;;  %5214 = vmatprep.subr.mxu1 %v17796_v0 }
 0x40c   : > { %5215 = vmatpush1.msra.mxu1 %v4886_v54  ;;  %v12117_v54 = vld [vmem:[%s12551_s19 + $0x278] sm:$0xff]  ;;  %s18054_s19 = sld [smem:[#allocation64_spill]] }
 0x40d   : > { %v15373_v58 = vpop.f32.mrf.mxu0  ;;  %11336 = vmatmul.mubr.msk.f32.gmra.mxu0 %vm871_vm3, %v4056_v46  ;;  %5216 = vmatprep.subr.mxu1 %v17796_v0  ;;  %v4069_v46 = vrot.slane %v12117_v54, 4 }
 0x40e   : > { %5217 = vmatpush1.msra.mxu1 %v4885_v52  ;;  %11338 = vmatprep.mubr.msk.f32.mxu0 %vm12336_vm0, %v17796_v0  ;;  %v4071_v52 = vrot.slane %v12118_v8, 4 }
 0x40f   : > { %v11193_v61 = vpop.f32.mrf.mxu0  ;;  %5218 = vmatprep.subr.mxu1 %v17796_v0  ;;  %v4070_v41 = vsel %vm1035_vm1, %v4067_v27, %v4069_v46 }
 0x410   : > { %5219 = vmatpush1.msra.mxu1 %v4884_v13  ;;  %v4072_v60 = vsel %vm1035_vm1, %v4069_v46, %v4071_v52 }
 0x411   : > { %v15382_v55 = vpop.f32.mrf.mxu0  ;;  %11339 = vmatmul.mubr.msk.f32.gmra.mxu0 %vm871_vm3, %v4058_v36  ;;  %5220 = vmatprep.subr.mxu1 %v17796_v0 }
 0x412   : > { %5221 = vmatpush1.msra.mxu1 %v4883_v40  ;;  %11341 = vmatprep.mubr.msk.f32.mxu0 %vm12336_vm0, %v17796_v0  ;;  %s17727_s24 = scalar_lea.hbm %s18054_s19, %s9510_s28 }
 0x413   : > { %v11196_v44 = vpop.f32.mrf.mxu0  ;;  %5222 = vmatprep.subr.mxu1 %v17796_v0 }
 0x414   : > { %v4075_v44 = vsel %vm1035_vm1, %v4071_v52, %v17943_v29 }
 0x415   : > { %v15391_v10 = vpop.f32.mrf.mxu0  ;;  %11342 = vmatmul.mubr.msk.f32.gmra.mxu0 %vm871_vm3, %v4060_v22 }
 0x416   : > { %11344 = vmatprep.mubr.msk.f32.mxu0 %vm12336_vm0, %v17796_v0 }
 0x417   : > { %v11199_v15 = vpop.f32.mrf.mxu0 }
 0x419   : > { %v4440_v5 = vpop.f32.mrf.mxu0  ;;  %11345 = vmatmul.mubr.msk.f32.gmra.mxu0 %vm871_vm3, %v4062_v18 }
 0x41a   : > { %11347 = vmatprep.mubr.msk.f32.mxu0 %vm12336_vm0, %v17796_v0 }
 0x41b   : > { %v11202_v50 = vpop.f32.mrf.mxu0 }
 0x41d   : > { %v4445_v62 = vpop.f32.mrf.mxu0  ;;  %11348 = vmatmul.mubr.msk.f32.gmra.mxu0 %vm871_vm3, %v4064_v26 }
 0x41e   : > { %11350 = vmatprep.mubr.msk.f32.mxu0 %vm12336_vm0, %v17796_v0 }
 0x41f   : > { %v11205_v43 = vpop.f32.mrf.mxu0 }
 0x421   : > { %v4450_v49 = vpop.f32.mrf.mxu0  ;;  %11351 = vmatmul.mubr.msk.f32.gmra.mxu0 %vm871_vm3, %v4066_v14 }
 0x422   : > { %11353 = vmatprep.mubr.msk.f32.mxu0 %vm12336_vm0, %v17796_v0  ;;  %v4742_v12 = vadd.f32 %v4450_v49, %v14740_v45  ;;  %v4740_v45 = vadd.f32 %v4440_v5, %v14700_v56  ;;  %v4738_v56 = vadd.f32 %v15382_v55, %v14666_v38  ;;  %v4736_v38 = vadd.f32 %v15360_v63, %v14628_v20 }
 0x423   : > { %v11208_v11 = vpop.f32.mrf.mxu0 }
 0x424   : > { %v4830_v24 = vadd.f32 %v15271_v25, %v4742_v12  ;;  %v4828_v5 = vadd.f32 %v15271_v25, %v4740_v45  ;;  %v4826_v55 = vadd.f32 %v15271_v25, %v4738_v56  ;;  %v4824_v20 = vadd.f32 %v15271_v25, %v4736_v38 }
 0x425   : > { %v4455_v31 = vpop.f32.mrf.mxu0  ;;  %11354 = vmatmul.mubr.msk.f32.gmra.mxu0 %vm871_vm3, %v4068_v59 }
 0x426   : > { %11356 = vmatprep.mubr.msk.f32.mxu0 %vm12336_vm0, %v17796_v0  ;;  %v4743_v22 = vadd.f32 %v4455_v31, %v14754_v17  ;;  %v4741_v17 = vadd.f32 %v4445_v62, %v14722_v4  ;;  %v4739_v4 = vadd.f32 %v15391_v10, %v14685_v57  ;;  %v4911_v43 = vmax.f32 %v4830_v24, 0.0  ;;  %v4976_v24 = vld [vmem:[#allocation2 + $0x60] sm:$0xff] }
 0x427   : > { %v11211_v13 = vpop.f32.mrf.mxu0  ;;  %v4737_v57 = vadd.f32 %v15373_v58, %v14647_v30  ;;  %v4909_v46 = vmax.f32 %v4828_v5, 0.0  ;;  %v4735_v30 = vadd.f32 %v15347_v19, %v14609_v1  ;;  %v4907_v63 = vmax.f32 %v4826_v55, 0.0  ;;  %v4988_v5 = vld [vmem:[#allocation2 + $0xc0] sm:$0xff] }
 0x428   : > { %v4829_v62 = vadd.f32 %v15271_v25, %v4741_v17  ;;  %v4822_v13 = vadd.f32 %v15271_v25, %v15339_v37  ;;  %v4971_v17 = vld [vmem:[#allocation2 + $0x38] sm:$0xff]  ;;  %v5000_v55 = vld [vmem:[#allocation2 + $0x120] sm:$0xff] }
 0x429   : > { %v4460_v36 = vpop.f32.mrf.mxu0  ;;  %11357 = vmatmul.mubr.msk.f32.gmra.mxu0 %vm871_vm3, %v4070_v41  ;;  %v4823_v52 = vadd.f32 %v15271_v25, %v4735_v30 }
 0x42a   : > { %11359 = vmatprep.mubr.msk.f32.mxu0 %vm12336_vm0, %v17796_v0  ;;  %v4744_v61 = vadd.f32 %v4460_v36, %v14768_v28  ;;  %v4910_v10 = vmax.f32 %v4829_v62, 0.0  ;;  %v4905_v36 = vmax.f32 %v4824_v20, 0.0  ;;  %v4982_v62 = vld [vmem:[#allocation2 + $0x90] sm:$0xff]  ;;  %v5013_v20 = vld [vmem:[#allocation2 + $0x188] sm:$0xff] }
 0x42b   : > { %v11214_v23 = vpop.f32.mrf.mxu0 }
 0x42c   : > { %v4832_v6 = vadd.f32 %v15271_v25, %v4744_v61  ;;  %v4821_v23 = vadd.f32 %v15271_v25, %v15328_v7  ;;  %v4904_v61 = vmax.f32 %v4823_v52, 0.0  ;;  %v17945_v52 = vld [vmem:[#allocation33_spill] sm:$0xff] }
 0x42d   : > { %v4465_v40 = vpop.f32.mrf.mxu0  ;;  %11360 = vmatmul.mubr.msk.f32.gmra.mxu0 %vm871_vm3, %v4072_v60 }
 0x42e   : > { %v4745_v3 = vadd.f32 %v4465_v40, %v14781_v34  ;;  %11362 = vmatprep.mubr.msk.f32.mxu0 %vm12336_vm0, %v17796_v0  ;;  %v4831_v34 = vadd.f32 %v15271_v25, %v4743_v22  ;;  %v4913_v50 = vmax.f32 %v4832_v6, 0.0  ;;  %v4820_v40 = vadd.f32 %v15271_v25, %v15312_v39 }
 0x42f   : > { %v11217_v18 = vpop.f32.mrf.mxu0  ;;  %v4903_v22 = vmax.f32 %v4822_v13, 0.0  ;;  %v4902_v29 = vmax.f32 %v4821_v23, 0.0  ;;  %v17946_v13 = vld [vmem:[#allocation31_spill] sm:$0xff] }
 0x430   : > { %v4833_v28 = vadd.f32 %v15271_v25, %v4745_v3  ;;  %v4819_v3 = vadd.f32 %v15271_v25, %v15296_v21  ;;  %v4901_v18 = vmax.f32 %v4820_v40, 0.0 }
 0x431   : > { %v4470_v15 = vpop.f32.mrf.mxu0  ;;  %11363 = vmatmul.mubr.msk.f32.gmra.mxu0 %vm871_vm3, %v4075_v44  ;;  %v4818_v44 = vadd.f32 %v15271_v25, %v15282_v9 }
 0x432   : > { %v4914_v26 = vmax.f32 %v4833_v28, 0.0  ;;  %v15438_v33 = vadd.f32 %v4470_v15, %v14796_v35  ;;  %11472 = vmatprep.mubr.msk.f32.mxu0 %vm12336_vm0, %v17796_v0  ;;  %v4912_v35 = vmax.f32 %v4831_v34, 0.0  ;;  %v4900_v12 = vmax.f32 %v4819_v3, 0.0  ;;  %v4964_v28 = vld [vmem:[#allocation2] sm:$0xff]  ;;  %v4970_v34 = vld [vmem:[#allocation2 + $0x30] sm:$0xff] }
 0x433   : > { %v11220_v2 = vpop.f32.mrf.mxu0  ;;  %v4899_v21 = vmax.f32 %v4818_v44, 0.0  ;;  %v17948_v44 = vld [vmem:[#allocation34_spill] sm:$0xff] }
 0x434   : > { %5223 = vmatpush2.msra.mxu1 %v4914_v26  ;;  %v4977_v2 = vld [vmem:[#allocation2 + $0x68] sm:$0xff] }
 0x435   : > { %v4475_v14 = vpop.f32.mrf.mxu0  ;;  %5224 = vmatprep.subr.mxu1 %v17796_v0 }
 0x436   : > { %v15449_v51 = vadd.f32 %v4475_v14, %v14804_v16  ;;  %5225 = vmatpush2.msra.mxu1 %v4913_v50  ;;  %v4827_v16 = vadd.f32 %v15271_v25, %v4739_v4  ;;  %v4983_v14 = vld [vmem:[#allocation2 + $0x98] sm:$0xff] }
 0x437   : > { %v11223_v27 = vpop.f32.mrf.mxu0  ;;  %5226 = vmatprep.subr.mxu1 %v17796_v0 }
 0x438   : > { %5227 = vmatpush2.msra.mxu1 %v4912_v35  ;;  %v4908_v58 = vmax.f32 %v4827_v16, 0.0  ;;  %v4989_v27 = vld [vmem:[#allocation2 + $0xc8] sm:$0xff]  ;;  %v4994_v16 = vld [vmem:[#allocation2 + $0xf0] sm:$0xff] }
 0x439   : > { %v4480_v49 = vpop.f32.mrf.mxu0  ;;  %5228 = vmatprep.subr.mxu1 %v17796_v0 }
 0x43a   : > { %v15460_v59 = vadd.f32 %v4480_v49, %v14812_v53  ;;  %5229 = vmatpush2.msra.mxu1 %v4911_v43  ;;  %v4825_v53 = vadd.f32 %v15271_v25, %v4737_v57  ;;  %v4995_v49 = vld [vmem:[#allocation2 + $0xf8] sm:$0xff] }
 0x43b   : > { %v11226_v54 = vpop.f32.mrf.mxu0  ;;  %5230 = vmatprep.subr.mxu1 %v17796_v0 }
 0x43c   : > { %5231 = vmatpush2.msra.mxu1 %v4910_v10  ;;  %v4906_v1 = vmax.f32 %v4825_v53, 0.0  ;;  %v5001_v54 = vld [vmem:[#allocation2 + $0x128] sm:$0xff] }
 0x43d   : > { %v4485_v11 = vpop.f32.mrf.mxu0  ;;  %5232 = vmatprep.subr.mxu1 %v17796_v0 }
 0x43e   : > { %v15471_v31 = vadd.f32 %v4485_v11, %v14820_v47  ;;  %5233 = vmatpush2.msra.mxu1 %v4909_v46  ;;  %v5007_v11 = vld [vmem:[#allocation2 + $0x158] sm:$0xff] }
 0x43f   : > { %v11229_v41 = vpop.f32.mrf.mxu0  ;;  %5234 = vmatprep.subr.mxu1 %v17796_v0 }
 0x440   : > { %5235 = vmatpush2.msra.mxu1 %v4908_v58  ;;  %v5006_v58 = vld [vmem:[#allocation2 + $0x150] sm:$0xff] }
 0x441   : > { %v4490_v8 = vpop.f32.mrf.mxu0  ;;  %5236 = vmatprep.subr.mxu1 %v17796_v0 }
 0x442   : > { %v15478_v19 = vadd.f32 %v4490_v8, %v14828_v32  ;;  %5237 = vmatpush2.msra.mxu1 %v4907_v63  ;;  %v17944_v63 = vld [vmem:[#allocation32_spill] sm:$0xff] }
 0x443   : > { %v11232_v47 = vpop.f32.mrf.mxu0  ;;  %5238 = vmatprep.subr.mxu1 %v17796_v0 }
 0x444   : > { %5239 = vmatpush2.msra.mxu1 %v4906_v1 }
 0x445   : > { %v15483_v60 = vpop.f32.mrf.mxu0  ;;  %5240 = vmatprep.subr.mxu1 %v17796_v0 }
 0x446   : > { %5241 = vmatpush2.msra.mxu1 %v4905_v36 }
 0x447   : > { %v11235_v32 = vpop.f32.mrf.mxu0  ;;  %5242 = vmatprep.subr.mxu1 %v17796_v0 }
 0x448   : > { %5243 = vmatpush2.msra.mxu1 %v4904_v61  ;;  %v5012_v32 = vld [vmem:[#allocation2 + $0x180] sm:$0xff] }
 0x449   : > { %v15491_v37 = vpop.f32.mrf.mxu0  ;;  %5244 = vmatprep.subr.mxu1 %v17796_v0 }
 0x44a   : > { %5245 = vmatpush2.msra.mxu1 %v4903_v22  ;;  %v17947_v22 = vld [vmem:[#allocation30_spill] sm:$0xff] }
 0x44b   : > { %v11238_v7 = vpop.f32.mrf.mxu0  ;;  %5246 = vmatprep.subr.mxu1 %v17796_v0 }
 0x44c   : > { %5247 = vmatpush2.msra.mxu1 %v4902_v29 }
 0x44d   : > { %v15499_v39 = vpop.f32.mrf.mxu0  ;;  %5248 = vmatprep.subr.mxu1 %v17796_v0 }
 0x44e   : > { %5249 = vmatpush2.msra.mxu1 %v4901_v18 }
 0x44f   : > { %v11241_v6 = vpop.f32.mrf.mxu0  ;;  %5250 = vmatprep.subr.mxu1 %v17796_v0 }
 0x450   : > { %5251 = vmatpush2.msra.mxu1 %v4900_v12  ;;  %v17949_v6 = vld [vmem:[#allocation29_spill] sm:$0xff] }
 0x451   : > { %v15503_v15 = vpop.f32.mrf.mxu0  ;;  %5252 = vmatprep.subr.mxu1 %v17796_v0 }
 0x452   : > { %5253 = vmatpush2.msra.mxu1 %v4899_v21 }
 0x453   : > { %v11244_v9 = vpop.f32.mrf.mxu0  ;;  %5255 = vmatmul.mubr.f32.vlgmr.msra.gmra.mxu1 %v4964_v28  ;;  %5380 = vmatprep.subr.mxu1 %v17796_v0 }
 0x454   : > { %5259 = vmatprep.mubr.f32.mxu1 %v4971_v17  ;;  %v5018_v9 = vld [vmem:[#allocation2 + $0x1b0] sm:$0xff] }
 0x455   : > { %v15507_v26 = vpop.f32.mrf.mxu0 }
 0x457   : > { %v11247_v45 = vpop.f32.mrf.mxu0  ;;  %5260 = vmatmul.mubr.f32.gmra.mxu1 %v4970_v34 }
 0x458   : > { %5264 = vmatprep.mubr.f32.mxu1 %v4977_v2  ;;  %v5025_v2 = vld [vmem:[#allocation2 + $0x1e8] sm:$0xff]  ;;  %v17950_v45 = vld [vmem:[#allocation28_spill] sm:$0xff] }
 0x459   : > { %v4520_v50 = vpop.f32.mrf.mxu0 }
 0x45a   : > { %v4756_v21 = vadd.f32 %v4520_v50, %v17949_v6 }
 0x45b   : > { %v11250_v4 = vpop.f32.mrf.mxu0  ;;  %5265 = vmatmul.mubr.f32.gmra.mxu1 %v4976_v24  ;;  %v4755_v24 = vadd.f32 %v15507_v26, %v17950_v45  ;;  %v5024_v26 = vld [vmem:[#allocation2 + $0x1e0] sm:$0xff] }
 0x45c   : > { %5269 = vmatprep.mubr.f32.mxu1 %v4983_v14 }
 0x45d   : > { %v4525_v35 = vpop.f32.mrf.mxu0 }
 0x45e   : > { %v4757_v3 = vadd.f32 %v4525_v35, %v17947_v22  ;;  %v17958_v22 = vld [vmem:[#allocation38_spill] sm:$0xff] }
 0x45f   : > { %v11253_v56 = vpop.f32.mrf.mxu0  ;;  %5270 = vmatmul.mubr.f32.gmra.mxu1 %v4982_v62  ;;  %v17951_v62 = vld [vmem:[#allocation35_spill] sm:$0xff] }
 0x460   : > { %5274 = vmatprep.mubr.f32.mxu1 %v4989_v27  ;;  %v4845_v14 = vadd.f32 %v15271_v25, %v4757_v3  ;;  %v17952_v27 = vld [vmem:[#allocation27_spill] sm:$0xff] }
 0x461   : > { %v4530_v43 = vpop.f32.mrf.mxu0  ;;  %v4754_v56 = vadd.f32 %v15503_v15, %v17952_v27 }
 0x462   : > { %v4758_v36 = vadd.f32 %v4530_v43, %v17946_v13 }
 0x463   : > { %v11256_v57 = vpop.f32.mrf.mxu0  ;;  %5275 = vmatmul.mubr.f32.gmra.mxu1 %v4988_v5  ;;  %v4844_v5 = vadd.f32 %v15271_v25, %v4756_v21  ;;  %v5049_v21 = vld [vmem:[#allocation2 + $0x2a8] sm:$0xff] }
 0x464   : > { %5279 = vmatprep.mubr.f32.mxu1 %v4995_v49  ;;  %v4846_v28 = vadd.f32 %v15271_v25, %v4758_v36  ;;  %v5031_v57 = vld [vmem:[#allocation2 + $0x218] sm:$0xff] }
 0x465   : > { %v4535_v10 = vpop.f32.mrf.mxu0 }
 0x466   : > { %v4759_v8 = vadd.f32 %v4535_v10, %v17944_v63  ;;  %v4927_v43 = vmax.f32 %v4846_v28, 0.0  ;;  %v17956_v63 = vld [vmem:[#allocation24_spill] sm:$0xff]  ;;  %v4837_v28 = vadd.f32 %v15271_v25, %v15471_v31  ;;  %v4835_v31 = vadd.f32 %v15271_v25, %v15449_v51 }
 0x467   : > { %v11259_v38 = vpop.f32.mrf.mxu0  ;;  %5280 = vmatmul.mubr.f32.gmra.mxu1 %v4994_v16  ;;  %v17953_v16 = vld [vmem:[#allocation26_spill] sm:$0xff] }
 0x468   : > { %5284 = vmatprep.mubr.f32.mxu1 %v5001_v54  ;;  %v4847_v29 = vadd.f32 %v15271_v25, %v4759_v8  ;;  %v4753_v10 = vadd.f32 %v15499_v39, %v17953_v16  ;;  %v4843_v54 = vadd.f32 %v15271_v25, %v4755_v24  ;;  %v4926_v38 = vmax.f32 %v4845_v14, 0.0  ;;  %v5030_v39 = vld [vmem:[#allocation2 + $0x210] sm:$0xff]  ;;  %v5055_v24 = vld [vmem:[#allocation2 + $0x2d8] sm:$0xff] }
 0x469   : > { %v4540_v46 = vpop.f32.mrf.mxu0  ;;  %v4751_v8 = vadd.f32 %v15483_v60, %v17956_v63  ;;  %v5043_v60 = vld [vmem:[#allocation2 + $0x278] sm:$0xff]  ;;  %v4918_v14 = vmax.f32 %v4837_v28, 0.0  ;;  %v5066_v16 = vld [vmem:[#allocation2 + $0x330] sm:$0xff] }
 0x46a   : > { %v4760_v53 = vadd.f32 %v4540_v46, %v14908_v42  ;;  %v5019_v42 = vld [vmem:[#allocation2 + $0x1b8] sm:$0xff]  ;;  %v4928_v4 = vmax.f32 %v4847_v29, 0.0 }
 0x46b   : > { %v11262_v30 = vpop.f32.mrf.mxu0  ;;  %5285 = vmatmul.mubr.f32.gmra.mxu1 %v5000_v55  ;;  %v17954_v55 = vld [vmem:[#allocation36_spill] sm:$0xff] }
 0x46c   : > { %5289 = vmatprep.mubr.f32.mxu1 %v5007_v11  ;;  %v4848_v23 = vadd.f32 %v15271_v25, %v4760_v53  ;;  %v17955_v11 = vld [vmem:[#allocation25_spill] sm:$0xff]  ;;  %v4842_v53 = vadd.f32 %v15271_v25, %v4754_v56 }
 0x46d   : > { %v4545_v41 = vpop.f32.mrf.mxu0  ;;  %v4752_v30 = vadd.f32 %v15491_v37, %v17955_v11  ;;  %v5061_v56 = vld [vmem:[#allocation2 + $0x308] sm:$0xff]  ;;  %v5079_v11 = vld [vmem:[#allocation2 + $0x398] sm:$0xff] }
 0x46e   : > { %v4761_v1 = vadd.f32 %v4545_v41, %v17945_v52  ;;  %v4929_v17 = vmax.f32 %v4848_v23, 0.0  ;;  %v4841_v52 = vadd.f32 %v15271_v25, %v4753_v10  ;;  %v4923_v23 = vmax.f32 %v4842_v53, 0.0  ;;  %v5078_v53 = vld [vmem:[#allocation2 + $0x390] sm:$0xff] }
 0x46f   : > { %v11265_v47 = vpop.f32.mrf.mxu0  ;;  %5290 = vmatmul.mubr.f32.gmra.mxu1 %v5006_v58  ;;  %v4925_v58 = vmax.f32 %v4844_v5, 0.0  ;;  %v4840_v36 = vadd.f32 %v15271_v25, %v4752_v30  ;;  %v4916_v5 = vmax.f32 %v4835_v31, 0.0 }
 0x470   : > { %v4849_v61 = vadd.f32 %v15271_v25, %v4761_v1  ;;  %5294 = vmatprep.mubr.f32.mxu1 %v5013_v20  ;;  %v5037_v20 = vld [vmem:[#allocation2 + $0x248] sm:$0xff]  ;;  %v4924_v1 = vmax.f32 %v4843_v54, 0.0 }
 0x471   : > { %v4550_v40 = vpop.f32.mrf.mxu0  ;;  %v17957_v47 = vld [vmem:[#allocation37_spill] sm:$0xff] }
 0x472   : > { %v4930_v7 = vmax.f32 %v4849_v61, 0.0  ;;  %v15518_v18 = vadd.f32 %v4550_v40, %v17948_v44  ;;  %v5036_v61 = vld [vmem:[#allocation2 + $0x240] sm:$0xff]  ;;  %v4839_v40 = vadd.f32 %v15271_v25, %v4751_v8  ;;  %v4921_v44 = vmax.f32 %v4840_v36, 0.0  ;;  %v5073_v54 = vld [vmem:[#allocation2 + $0x368] sm:$0xff]  ;;  %v5091_v8 = vld [vmem:[#allocation2 + $0x3f8] sm:$0xff] }
 0x473   : > { %v11268_v12 = vpop.f32.mrf.mxu0  ;;  %5295 = vmatmul.mubr.f32.gmra.mxu1 %v5012_v32 }
 0x474   : > { %5381 = vmatpush1.msra.mxu1 %v4930_v7  ;;  %5299 = vmatprep.mubr.f32.mxu1 %v5019_v42  ;;  %v4922_v42 = vmax.f32 %v4841_v52, 0.0  ;;  %v4838_v7 = vadd.f32 %v15271_v25, %v15478_v19  ;;  %v5042_v12 = vld [vmem:[#allocation2 + $0x270] sm:$0xff]  ;;  %v4836_v19 = vadd.f32 %v15271_v25, %v15460_v59  ;;  %v4834_v59 = vadd.f32 %v15271_v25, %v15438_v33 }
 0x475   : > { %v4555_v34 = vpop.f32.mrf.mxu0  ;;  %5382 = vmatprep.subr.mxu1 %v17796_v0 }
 0x476   : > { %v15527_v35 = vadd.f32 %v4555_v34, %v17951_v62  ;;  %5383 = vmatpush1.msra.mxu1 %v4929_v17  ;;  %v4920_v17 = vmax.f32 %v4839_v40, 0.0  ;;  %v4919_v34 = vmax.f32 %v4838_v7, 0.0  ;;  %v4917_v62 = vmax.f32 %v4836_v19, 0.0  ;;  %v17959_v40 = vld [vmem:[#allocation48_spill] sm:$0xff]  ;;  %v5109_v7 = vld [vmem:[#allocation2 + $0x488] sm:$0xff] }
 0x477   : > { %v11271_v50 = vpop.f32.mrf.mxu0  ;;  %5384 = vmatprep.subr.mxu1 %v17796_v0  ;;  %5300 = vmatmul.mubr.f32.gmra.mxu1 %v5018_v9 }
 0x478   : > { %5385 = vmatpush1.msra.mxu1 %v4928_v4  ;;  %5304 = vmatprep.mubr.f32.mxu1 %v5025_v2  ;;  %v5048_v2 = vld [vmem:[#allocation2 + $0x2a0] sm:$0xff]  ;;  %v5054_v50 = vld [vmem:[#allocation2 + $0x2d0] sm:$0xff] }
 0x479   : > { %v4560_v49 = vpop.f32.mrf.mxu0  ;;  %5386 = vmatprep.subr.mxu1 %v17796_v0 }
 0x47a   : > { %v15538_v46 = vadd.f32 %v4560_v49, %v17954_v55  ;;  %5387 = vmatpush1.msra.mxu1 %v4927_v43  ;;  %v4915_v43 = vmax.f32 %v4834_v59, 0.0  ;;  %v5067_v49 = vld [vmem:[#allocation2 + $0x338] sm:$0xff]  ;;  %v5072_v55 = vld [vmem:[#allocation2 + $0x360] sm:$0xff] }
 0x47b   : > { %v11274_v15 = vpop.f32.mrf.mxu0  ;;  %5388 = vmatprep.subr.mxu1 %v17796_v0  ;;  %5305 = vmatmul.mubr.f32.gmra.mxu1 %v5024_v26  ;;  %v5060_v26 = vld [vmem:[#allocation2 + $0x300] sm:$0xff] }
 0x47c   : > { %5389 = vmatpush1.msra.mxu1 %v4926_v38  ;;  %5309 = vmatprep.mubr.f32.mxu1 %v5031_v57 }
 0x47d   : > { %v4565_v41 = vpop.f32.mrf.mxu0  ;;  %5390 = vmatprep.subr.mxu1 %v17796_v0 }
 0x47e   : > { %v15549_v13 = vadd.f32 %v4565_v41, %v17957_v47  ;;  %5391 = vmatpush1.msra.mxu1 %v4925_v58 }
 0x47f   : > { %v11277_v37 = vpop.f32.mrf.mxu0  ;;  %5392 = vmatprep.subr.mxu1 %v17796_v0  ;;  %5310 = vmatmul.mubr.f32.gmra.mxu1 %v5030_v39  ;;  %v5085_v39 = vld [vmem:[#allocation2 + $0x3c8] sm:$0xff] }
 0x480   : > { %5393 = vmatpush1.msra.mxu1 %v4924_v1  ;;  %5314 = vmatprep.mubr.f32.mxu1 %v5037_v20  ;;  %v5084_v20 = vld [vmem:[#allocation2 + $0x3c0] sm:$0xff]  ;;  %v5090_v1 = vld [vmem:[#allocation2 + $0x3f0] sm:$0xff]  ;;  %v5097_v37 = vld [vmem:[#allocation2 + $0x428] sm:$0xff] }
 0x481   : > { %v4570_v32 = vpop.f32.mrf.mxu0  ;;  %5394 = vmatprep.subr.mxu1 %v17796_v0 }
 0x482   : > { %v15556_v3 = vadd.f32 %v4570_v32, %v17958_v22  ;;  %5395 = vmatpush1.msra.mxu1 %v4923_v23  ;;  %v5096_v23 = vld [vmem:[#allocation2 + $0x420] sm:$0xff]  ;;  %v5103_v32 = vld [vmem:[#allocation2 + $0x458] sm:$0xff]  ;;  %v5102_v22 = vld [vmem:[#allocation2 + $0x450] sm:$0xff] }
 0x483   : > { %v11280_v29 = vpop.f32.mrf.mxu0  ;;  %5396 = vmatprep.subr.mxu1 %v17796_v0  ;;  %5315 = vmatmul.mubr.f32.gmra.mxu1 %v5036_v61 }
 0x484   : > { %5397 = vmatpush1.msra.mxu1 %v4922_v42  ;;  %5319 = vmatprep.mubr.f32.mxu1 %v5043_v60 }
 0x485   : > { %v15561_v6 = vpop.f32.mrf.mxu0  ;;  %5398 = vmatprep.subr.mxu1 %v17796_v0 }
 0x486   : > { %5399 = vmatpush1.msra.mxu1 %v4921_v44  ;;  %v17960_v44 = vld [vmem:[#allocation47_spill] sm:$0xff] }
 0x487   : > { %v11283_v9 = vpop.f32.mrf.mxu0  ;;  %5400 = vmatprep.subr.mxu1 %v17796_v0  ;;  %5320 = vmatmul.mubr.f32.gmra.mxu1 %v5042_v12 }
 0x488   : > { %5401 = vmatpush1.msra.mxu1 %v4920_v17  ;;  %5324 = vmatprep.mubr.f32.mxu1 %v5049_v21  ;;  %v17961_v21 = vld [vmem:[#allocation49_spill] sm:$0xff]  ;;  %v17962_v9 = vld [vmem:[#allocation46_spill] sm:$0xff] }
 0x489   : > { %v15569_v45 = vpop.f32.mrf.mxu0  ;;  %5402 = vmatprep.subr.mxu1 %v17796_v0 }
 0x48a   : > { %5403 = vmatpush1.msra.mxu1 %v4919_v34 }
 0x48b   : > { %v11286_v4 = vpop.f32.mrf.mxu0  ;;  %5404 = vmatprep.subr.mxu1 %v17796_v0  ;;  %5325 = vmatmul.mubr.f32.gmra.mxu1 %v5048_v2 }
 0x48c   : > { %5405 = vmatpush1.msra.mxu1 %v4918_v14  ;;  %5329 = vmatprep.mubr.f32.mxu1 %v5055_v24  ;;  %v5108_v24 = vld [vmem:[#allocation2 + $0x480] sm:$0xff]  ;;  %v4967_v14 = vld [vmem:[#allocation2 + $0x18] sm:$0xff]  ;;  %v17963_v4 = vld [vmem:[#allocation45_spill] sm:$0xff] }
 0x48d   : > { %v15577_v27 = vpop.f32.mrf.mxu0  ;;  %5406 = vmatprep.subr.mxu1 %v17796_v0 }
 0x48e   : > { %5407 = vmatpush1.msra.mxu1 %v4917_v62 }
 0x48f   : > { %v11289_v51 = vpop.f32.mrf.mxu0  ;;  %5408 = vmatprep.subr.mxu1 %v17796_v0  ;;  %5330 = vmatmul.mubr.f32.gmra.mxu1 %v5054_v50 }
 0x490   : > { %5409 = vmatpush1.msra.mxu1 %v4916_v5  ;;  %5334 = vmatprep.mubr.f32.mxu1 %v5061_v56  ;;  %v17964_v56 = vld [vmem:[#allocation50_spill] sm:$0xff] }
 0x491   : > { %v15581_v33 = vpop.f32.mrf.mxu0  ;;  %5410 = vmatprep.subr.mxu1 %v17796_v0 }
 0x492   : > { %5411 = vmatpush1.msra.mxu1 %v4915_v43  ;;  %v17965_v43 = vld [vmem:[#allocation44_spill] sm:$0xff] }
 0x493   : > { %v11292_v57 = vpop.f32.mrf.mxu0  ;;  %5335 = vmatmul.mubr.f32.gmra.mxu1 %v5060_v26  ;;  %5412 = vmatprep.subr.mxu1 %v17796_v0 }
 0x494   : > { %5339 = vmatprep.mubr.f32.mxu1 %v5067_v49 }
 0x495   : > { %v15585_v10 = vpop.f32.mrf.mxu0 }
 0x497   : > { %v11295_v38 = vpop.f32.mrf.mxu0  ;;  %5340 = vmatmul.mubr.f32.gmra.mxu1 %v5066_v16 }
 0x498   : > { %5344 = vmatprep.mubr.f32.mxu1 %v5073_v54  ;;  %v17966_v54 = vld [vmem:[#allocation43_spill] sm:$0xff] }
 0x499   : > { %v4600_v15 = vpop.f32.mrf.mxu0  ;;  %v4771_v38 = vadd.f32 %v15585_v10, %v17966_v54  ;;  %v4973_v54 = vld [vmem:[#allocation2 + $0x48] sm:$0xff] }
 0x49a   : > { %v4772_v26 = vadd.f32 %v4600_v15, %v17965_v43  ;;  %v17967_v15 = vld [vmem:[#allocation51_spill] sm:$0xff] }
 0x49b   : > { %v11298_v30 = vpop.f32.mrf.mxu0  ;;  %5345 = vmatmul.mubr.f32.gmra.mxu1 %v5072_v55  ;;  %v15606_v55 = vld [vmem:[%s17767_s5] ss:$0 sm:$0xff] }
 0x49c   : > { %5349 = vmatprep.mubr.f32.mxu1 %v5079_v11  ;;  %v4860_v10 = vadd.f32 %v15606_v55, %v4772_v26 }
 0x49d   : > { %v4605_v58 = vpop.f32.mrf.mxu0 }
 0x49e   : > { %v4773_v59 = vadd.f32 %v4605_v58, %v17963_v4  ;;  %v17968_v58 = vld [vmem:[#allocation42_spill] sm:$0xff] }
 0x49f   : > { %v11301_v41 = vpop.f32.mrf.mxu0  ;;  %5350 = vmatmul.mubr.f32.gmra.mxu1 %v5078_v53 }
 0x4a0   : > { %5354 = vmatprep.mubr.f32.mxu1 %v5085_v39  ;;  %v4861_v11 = vadd.f32 %v15606_v55, %v4773_v59  ;;  %v4770_v39 = vadd.f32 %v15581_v33, %v17968_v58  ;;  %v17971_v33 = vld [vmem:[#allocation40_spill] sm:$0xff]  ;;  %v4852_v59 = vadd.f32 %v15606_v55, %v15538_v46 }
 0x4a1   : > { %v4610_v63 = vpop.f32.mrf.mxu0 }
 0x4a2   : > { %v4774_v19 = vadd.f32 %v4610_v63, %v17962_v9  ;;  %v17969_v63 = vld [vmem:[#allocation41_spill] sm:$0xff]  ;;  %v4933_v43 = vmax.f32 %v4852_v59, 0.0  ;;  %v17978_v59 = vld [vmem:[#allocation22_spill] sm:$0xff] }
 0x4a3   : > { %v11304_v52 = vpop.f32.mrf.mxu0  ;;  %5355 = vmatmul.mubr.f32.gmra.mxu1 %v5084_v20 }
 0x4a4   : > { %5359 = vmatprep.mubr.f32.mxu1 %v5091_v8  ;;  %v4862_v49 = vadd.f32 %v15271_v25, %v4774_v19  ;;  %v4769_v8 = vadd.f32 %v15577_v27, %v17969_v63  ;;  %v4859_v52 = vadd.f32 %v15606_v55, %v4771_v38  ;;  %v17972_v27 = vld [vmem:[#allocation39_spill] sm:$0xff]  ;;  %v4972_v38 = vld [vmem:[#allocation2 + $0x40] sm:$0xff] }
 0x4a5   : > { %v4615_v47 = vpop.f32.mrf.mxu0  ;;  %v4991_v63 = vld [vmem:[#allocation2 + $0xd8] sm:$0xff] }
 0x4a6   : > { %v4775_v12 = vadd.f32 %v4615_v47, %v17960_v44  ;;  %v4943_v41 = vmax.f32 %v4862_v49, 0.0  ;;  %v17970_v47 = vld [vmem:[#allocation52_spill] sm:$0xff] }
 0x4a7   : > { %v11307_v36 = vpop.f32.mrf.mxu0  ;;  %5360 = vmatmul.mubr.f32.gmra.mxu1 %v5090_v1  ;;  %v4942_v1 = vmax.f32 %v4861_v11, 0.0 }
 0x4a8   : > { %5364 = vmatprep.mubr.f32.mxu1 %v5097_v37  ;;  %v4863_v62 = vadd.f32 %v15271_v25, %v4775_v12 }
 0x4a9   : > { %v4620_v61 = vpop.f32.mrf.mxu0 }
 0x4aa   : > { %v4776_v42 = vadd.f32 %v4620_v61, %v17959_v40  ;;  %v4944_v30 = vmax.f32 %v4863_v62, 0.0  ;;  %v4858_v61 = vadd.f32 %v15606_v55, %v4770_v39  ;;  %v4767_v40 = vadd.f32 %v15561_v6, %v17972_v27  ;;  %v4985_v39 = vld [vmem:[#allocation2 + $0xa8] sm:$0xff] }
 0x4ab   : > { %v11310_v60 = vpop.f32.mrf.mxu0  ;;  %5365 = vmatmul.mubr.f32.gmra.mxu1 %v5096_v23  ;;  %v4768_v23 = vadd.f32 %v15569_v45, %v17971_v33  ;;  %v4996_v33 = vld [vmem:[#allocation2 + $0x100] sm:$0xff] }
 0x4ac   : > { %5369 = vmatprep.mubr.f32.mxu1 %v5103_v32  ;;  %v4864_v34 = vadd.f32 %v15271_v25, %v4776_v42  ;;  %v4941_v32 = vmax.f32 %v4860_v10, 0.0  ;;  %v4857_v42 = vadd.f32 %v15606_v55, %v4769_v8  ;;  %v4939_v12 = vmax.f32 %v4858_v61, 0.0  ;;  %v5003_v61 = vld [vmem:[#allocation2 + $0x138] sm:$0xff] }
 0x4ad   : > { %v4625_v29 = vpop.f32.mrf.mxu0  ;;  %v4856_v45 = vadd.f32 %v15606_v55, %v4768_v23 }
 0x4ae   : > { %v4777_v28 = vadd.f32 %v4625_v29, %v17961_v21  ;;  %v4945_v57 = vmax.f32 %v4864_v34, 0.0  ;;  %v17973_v29 = vld [vmem:[#allocation53_spill] sm:$0xff]  ;;  %v4938_v6 = vmax.f32 %v4857_v42, 0.0  ;;  %v4854_v34 = vadd.f32 %v15606_v55, %v15556_v3 }
 0x4af   : > { %v11313_v17 = vpop.f32.mrf.mxu0  ;;  %5370 = vmatmul.mubr.f32.gmra.mxu1 %v5102_v22  ;;  %v4940_v22 = vmax.f32 %v4859_v52, 0.0  ;;  %v4990_v52 = vld [vmem:[#allocation2 + $0xd0] sm:$0xff] }
 0x4b0   : > { %v4865_v2 = vadd.f32 %v15271_v25, %v4777_v28  ;;  %5374 = vmatprep.mubr.f32.mxu1 %v5109_v7  ;;  %v4855_v28 = vadd.f32 %v15606_v55, %v4767_v40  ;;  %v17974_v17 = vld [vmem:[#allocation54_spill] sm:$0xff]  ;;  %v4935_v62 = vmax.f32 %v4854_v34, 0.0  ;;  %v5009_v40 = vld [vmem:[#allocation2 + $0x168] sm:$0xff] }
 0x4b1   : > { %v4630_v31 = vpop.f32.mrf.mxu0 }
 0x4b2   : > { %v4946_v50 = vmax.f32 %v4865_v2, 0.0  ;;  %v15596_v5 = vadd.f32 %v4630_v31, %v17964_v56  ;;  %v4937_v2 = vmax.f32 %v4856_v45, 0.0  ;;  %v4853_v31 = vadd.f32 %v15606_v55, %v15549_v13  ;;  %v5015_v45 = vld [vmem:[#allocation2 + $0x198] sm:$0xff] }
 0x4b3   : > { %v11316_v51 = vpop.f32.mrf.mxu0  ;;  %5375 = vmatmul.mubr.f32.gmra.mxu1 %v5108_v24 }
 0x4b4   : > { %5413 = vmatpush2.msra.mxu1 %v4946_v50  ;;  %5444 = vmatprep.mubr.f32.mxu1 %v4967_v14  ;;  %v4936_v14 = vmax.f32 %v4855_v28, 0.0  ;;  %v4851_v50 = vadd.f32 %v15606_v55, %v15527_v35  ;;  %v4934_v56 = vmax.f32 %v4853_v31, 0.0  ;;  %v4850_v51 = vadd.f32 %v15606_v55, %v15518_v18  ;;  %v17976_v28 = vld [vmem:[#allocation61_spill] sm:$0xff] }
 0x4b5   : > { %v4635_v16 = vpop.f32.mrf.mxu0  ;;  %5414 = vmatprep.subr.mxu1 %v17796_v0 }
 0x4b6   : > { %v15610_v53 = vadd.f32 %v4635_v16, %v17967_v15  ;;  %5415 = vmatpush2.msra.mxu1 %v4945_v57  ;;  %v4932_v26 = vmax.f32 %v4851_v50, 0.0  ;;  %v4931_v35 = vmax.f32 %v4850_v51, 0.0  ;;  %v4966_v57 = vld [vmem:[#allocation2 + $0x10] sm:$0xff] }
 0x4b7   : > { %v11319_v25 = vpop.f32.mrf.mxu0  ;;  %5416 = vmatprep.subr.mxu1 %v17796_v0  ;;  %v17979_v51 = vld [vmem:[#allocation62_spill] sm:$0xff] }
 0x4b8   : > { %5417 = vmatpush2.msra.mxu1 %v4944_v30  ;;  %v4979_v30 = vld [vmem:[#allocation2 + $0x78] sm:$0xff]  ;;  %v4978_v25 = vld [vmem:[#allocation2 + $0x70] sm:$0xff] }
 0x4b9   : > { %v4640_v20 = vpop.f32.mrf.mxu0  ;;  %5418 = vmatprep.subr.mxu1 %v17796_v0 }
 0x4ba   : > { %v15621_v37 = vadd.f32 %v4640_v20, %v17970_v47  ;;  %5419 = vmatpush2.msra.mxu1 %v4943_v41  ;;  %v4984_v41 = vld [vmem:[#allocation2 + $0xa0] sm:$0xff]  ;;  %v4997_v47 = vld [vmem:[#allocation2 + $0x108] sm:$0xff] }
 0x4bb   : > { %v11322_v36 = vpop.f32.mrf.mxu0  ;;  %5420 = vmatprep.subr.mxu1 %v17796_v0 }
 0x4bc   : > { %5421 = vmatpush2.msra.mxu1 %v4942_v1 }
 0x4bd   : > { %v4645_v60 = vpop.f32.mrf.mxu0  ;;  %5422 = vmatprep.subr.mxu1 %v17796_v0 }
 0x4be   : > { %v15632_v7 = vadd.f32 %v4645_v60, %v17973_v29  ;;  %5423 = vmatpush2.msra.mxu1 %v4941_v32  ;;  %v5002_v60 = vld [vmem:[#allocation2 + $0x130] sm:$0xff]  ;;  %v5008_v29 = vld [vmem:[#allocation2 + $0x160] sm:$0xff] }
 0x4bf   : > { %v11325_v44 = vpop.f32.mrf.mxu0  ;;  %5424 = vmatprep.subr.mxu1 %v17796_v0 }
 0x4c0   : > { %5425 = vmatpush2.msra.mxu1 %v4940_v22 }
 0x4c1   : > { %v4650_v21 = vpop.f32.mrf.mxu0  ;;  %5426 = vmatprep.subr.mxu1 %v17796_v0 }
 0x4c2   : > { %v15639_v9 = vadd.f32 %v4650_v21, %v17974_v17  ;;  %5427 = vmatpush2.msra.mxu1 %v4939_v12  ;;  %v17975_v12 = vld [vmem:[#allocation23_spill] sm:$0xff] }
 0x4c3   : > { %v11328_v19 = vpop.f32.mrf.mxu0  ;;  %5428 = vmatprep.subr.mxu1 %v17796_v0 }
 0x4c4   : > { %5429 = vmatpush2.msra.mxu1 %v4938_v6  ;;  %v17977_v19 = vld [vmem:[#allocation60_spill] sm:$0xff] }
 0x4c5   : > { %v15644_v24 = vpop.f32.mrf.mxu0  ;;  %5430 = vmatprep.subr.mxu1 %v17796_v0 }
 0x4c6   : > { %5431 = vmatpush2.msra.mxu1 %v4937_v2 }
 0x4c7   : > { %v11331_v4 = vpop.f32.mrf.mxu0  ;;  %5432 = vmatprep.subr.mxu1 %v17796_v0 }
 0x4c8   : > { %5433 = vmatpush2.msra.mxu1 %v4936_v14  ;;  %v5014_v14 = vld [vmem:[#allocation2 + $0x190] sm:$0xff] }
 0x4c9   : > { %v15652_v3 = vpop.f32.mrf.mxu0  ;;  %5434 = vmatprep.subr.mxu1 %v17796_v0 }
 0x4ca   : > { %5435 = vmatpush2.msra.mxu1 %v4935_v62 }
 0x4cb   : > { %v11334_v13 = vpop.f32.mrf.mxu0  ;;  %5436 = vmatprep.subr.mxu1 %v17796_v0 }
 0x4cc   : > { %5437 = vmatpush2.msra.mxu1 %v4934_v56 }
 0x4cd   : > { %v15660_v46 = vpop.f32.mrf.mxu0  ;;  %5438 = vmatprep.subr.mxu1 %v17796_v0 }
 0x4ce   : > { %5439 = vmatpush2.msra.mxu1 %v4933_v43 }
 0x4cf   : > { %v11337_v49 = vpop.f32.mrf.mxu0  ;;  %5440 = vmatprep.subr.mxu1 %v17796_v0 }
 0x4d0   : > { %5441 = vmatpush2.msra.mxu1 %v4932_v26 }
 0x4d1   : > { %v15664_v16 = vpop.f32.mrf.mxu0  ;;  %5442 = vmatprep.subr.mxu1 %v17796_v0 }
 0x4d2   : > { %5443 = vmatpush2.msra.mxu1 %v4931_v35  ;;  %v5020_v35 = vld [vmem:[#allocation2 + $0x1c0] sm:$0xff] }
 0x4d3   : > { %v11340_v18 = vpop.f32.mrf.mxu0  ;;  %5445 = vmatmul.mubr.f32.vlgmr.msra.gmra.mxu1 %v4966_v57  ;;  %5570 = vmatprep.subr.mxu1 %v17796_v0  ;;  %v5027_v57 = vld [vmem:[#allocation2 + $0x1f8] sm:$0xff] }
 0x4d4   : > { %5449 = vmatprep.mubr.f32.mxu1 %v4973_v54  ;;  %v17980_v54 = vld [vmem:[#allocation59_spill] sm:$0xff] }
 0x4d5   : > { %v15668_v11 = vpop.f32.mrf.mxu0 }
 0x4d6   : > { %v4787_v18 = vadd.f32 %v15668_v11, %v17980_v54  ;;  %v17982_v11 = vld [vmem:[#allocation57_spill] sm:$0xff]  ;;  %v5080_v54 = vld [vmem:[#allocation2 + $0x3a0] sm:$0xff] }
 0x4d7   : > { %v11343_v15 = vpop.f32.mrf.mxu0  ;;  %5450 = vmatmul.mubr.f32.gmra.mxu1 %v4972_v38 }
 0x4d8   : > { %5454 = vmatprep.mubr.f32.mxu1 %v4979_v30  ;;  %v17981_v15 = vld [vmem:[#allocation58_spill] sm:$0xff] }
 0x4d9   : > { %v4680_v58 = vpop.f32.mrf.mxu0 }
 0x4da   : > { %v4788_v43 = vadd.f32 %v4680_v58, %v17979_v51 }
 0x4db   : > { %v11346_v10 = vpop.f32.mrf.mxu0  ;;  %5455 = vmatmul.mubr.f32.gmra.mxu1 %v4978_v25  ;;  %v4786_v25 = vadd.f32 %v15664_v16, %v17981_v15  ;;  %v17983_v16 = vld [vmem:[#allocation56_spill] sm:$0xff]  ;;  %v5086_v15 = vld [vmem:[#allocation2 + $0x3d0] sm:$0xff] }
 0x4dc   : > { %5459 = vmatprep.mubr.f32.mxu1 %v4985_v39  ;;  %v4876_v58 = vadd.f32 %v15606_v55, %v4788_v43  ;;  %v5026_v10 = vld [vmem:[#allocation2 + $0x1f0] sm:$0xff] }
 0x4dd   : > { %v4685_v20 = vpop.f32.mrf.mxu0 }
 0x4de   : > { %v4789_v62 = vadd.f32 %v4685_v20, %v17978_v59  ;;  %v4785_v20 = vadd.f32 %v15660_v46, %v17982_v11  ;;  %v17984_v46 = vld [vmem:[#allocation55_spill] sm:$0xff] }
 0x4df   : > { %v11349_v8 = vpop.f32.mrf.mxu0  ;;  %5460 = vmatmul.mubr.f32.gmra.mxu1 %v4984_v41  ;;  %v5033_v41 = vld [vmem:[#allocation2 + $0x228] sm:$0xff] }
 0x4e0   : > { %5464 = vmatprep.mubr.f32.mxu1 %v4991_v63  ;;  %v4877_v38 = vadd.f32 %v15606_v55, %v4789_v62  ;;  %v4875_v63 = vadd.f32 %v15606_v55, %v4787_v18  ;;  %v5062_v62 = vld [vmem:[#allocation2 + $0x310] sm:$0xff]  ;;  %v5087_v18 = vld [vmem:[#allocation2 + $0x3d8] sm:$0xff] }
 0x4e1   : > { %v4690_v1 = vpop.f32.mrf.mxu0 }
 0x4e2   : > { %v4790_v34 = vadd.f32 %v4690_v1, %v17977_v19  ;;  %v4958_v8 = vmax.f32 %v4877_v38, 0.0  ;;  %v4874_v1 = vadd.f32 %v15606_v55, %v4786_v25  ;;  %v4867_v19 = vadd.f32 %v15606_v55, %v15610_v53  ;;  %v5093_v25 = vld [vmem:[#allocation2 + $0x408] sm:$0xff] }
 0x4e3   : > { %v11352_v36 = vpop.f32.mrf.mxu0  ;;  %5465 = vmatmul.mubr.f32.gmra.mxu1 %v4990_v52  ;;  %v4784_v52 = vadd.f32 %v15652_v3, %v17983_v16 }
 0x4e4   : > { %5469 = vmatprep.mubr.f32.mxu1 %v4997_v47  ;;  %v4878_v26 = vadd.f32 %v15606_v55, %v4790_v34  ;;  %v4957_v47 = vmax.f32 %v4876_v58, 0.0  ;;  %v5032_v36 = vld [vmem:[#allocation2 + $0x220] sm:$0xff]  ;;  %v4948_v59 = vmax.f32 %v4867_v19, 0.0 }
 0x4e5   : > { %v4695_v23 = vpop.f32.mrf.mxu0  ;;  %v4872_v3 = vadd.f32 %v15606_v55, %v4784_v52  ;;  %v4992_v19 = vld [vmem:[#allocation2 + $0xe0] sm:$0xff] }
 0x4e6   : > { %v4791_v21 = vadd.f32 %v4695_v23, %v17975_v12  ;;  %v4959_v39 = vmax.f32 %v4878_v26, 0.0  ;;  %v4783_v23 = vadd.f32 %v15644_v24, %v17984_v46  ;;  %v4870_v24 = vadd.f32 %v15606_v55, %v15639_v9  ;;  %v5050_v9 = vld [vmem:[#allocation2 + $0x2b0] sm:$0xff] }
 0x4e7   : > { %v11355_v32 = vpop.f32.mrf.mxu0  ;;  %5470 = vmatmul.mubr.f32.gmra.mxu1 %v4996_v33  ;;  %v5039_v33 = vld [vmem:[#allocation2 + $0x258] sm:$0xff]  ;;  %v4869_v12 = vadd.f32 %v15606_v55, %v15632_v7  ;;  %v5074_v26 = vld [vmem:[#allocation2 + $0x370] sm:$0xff] }
 0x4e8   : > { %5474 = vmatprep.mubr.f32.mxu1 %v5003_v61  ;;  %v4879_v50 = vadd.f32 %v15606_v55, %v4791_v21  ;;  %v4873_v61 = vadd.f32 %v15606_v55, %v4785_v20  ;;  %v4956_v32 = vmax.f32 %v4875_v63, 0.0  ;;  %v17985_v7 = vld [vmem:[#allocation63_spill] sm:$0xff]  ;;  %v5098_v63 = vld [vmem:[#allocation2 + $0x430] sm:$0xff] }
 0x4e9   : > { %v4700_v27 = vpop.f32.mrf.mxu0  ;;  %v4950_v34 = vmax.f32 %v4869_v12, 0.0  ;;  %v5110_v46 = vld [vmem:[#allocation2 + $0x490] sm:$0xff] }
 0x4ea   : > { %v4792_v22 = vadd.f32 %v4700_v27, %v15170_v48  ;;  %v5021_v48 = vld [vmem:[#allocation2 + $0x1c8] sm:$0xff]  ;;  %v4960_v30 = vmax.f32 %v4879_v50, 0.0  ;;  %v5038_v27 = vld [vmem:[#allocation2 + $0x250] sm:$0xff] }
 0x4eb   : > { %v11358_v42 = vpop.f32.mrf.mxu0  ;;  %5475 = vmatmul.mubr.f32.gmra.mxu1 %v5002_v60  ;;  %v4955_v60 = vmax.f32 %v4874_v1, 0.0  ;;  %v5104_v1 = vld [vmem:[#allocation2 + $0x460] sm:$0xff] }
 0x4ec   : > { %5479 = vmatprep.mubr.f32.mxu1 %v5009_v40  ;;  %v4880_v2 = vadd.f32 %v15606_v55, %v4792_v22  ;;  %v5045_v40 = vld [vmem:[#allocation2 + $0x288] sm:$0xff]  ;;  %v4871_v42 = vadd.f32 %v15606_v55, %v4783_v23  ;;  %v4954_v22 = vmax.f32 %v4873_v61, 0.0 }
 0x4ed   : > { %v4705_v44 = vpop.f32.mrf.mxu0  ;;  %v4969_v23 = vld [vmem:[#allocation2 + $0x28] sm:$0xff] }
 0x4ee   : > { %v4793_v6 = vadd.f32 %v4705_v44, %v17976_v28  ;;  %v4961_v49 = vmax.f32 %v4880_v2, 0.0  ;;  %v5044_v44 = vld [vmem:[#allocation2 + $0x280] sm:$0xff]  ;;  %v4952_v21 = vmax.f32 %v4871_v42, 0.0  ;;  %v4868_v28 = vadd.f32 %v15606_v55, %v15621_v37  ;;  %v4974_v42 = vld [vmem:[#allocation2 + $0x50] sm:$0xff] }
 0x4ef   : > { %v11361_v17 = vpop.f32.mrf.mxu0  ;;  %5480 = vmatmul.mubr.f32.gmra.mxu1 %v5008_v29  ;;  %v4953_v29 = vmax.f32 %v4872_v3, 0.0  ;;  %v4866_v37 = vadd.f32 %v15606_v55, %v15596_v5  ;;  %v5069_v5 = vld [vmem:[#allocation2 + $0x348] sm:$0xff]  ;;  %v4968_v3 = vld [vmem:[#allocation2 + $0x20] sm:$0xff] }
 0x4f0   : > { %v4881_v31 = vadd.f32 %v15606_v55, %v4793_v6  ;;  %5484 = vmatprep.mubr.f32.mxu1 %v5015_v45  ;;  %v5051_v45 = vld [vmem:[#allocation2 + $0x2b8] sm:$0xff]  ;;  %v4951_v6 = vmax.f32 %v4870_v24, 0.0  ;;  %v5057_v17 = vld [vmem:[#allocation2 + $0x2e8] sm:$0xff] }
 0x4f1   : > { %v15676_v4 = vpop.f32.mrf.mxu0 }
 0x4f2   : > { %v4962_v56 = vmax.f32 %v4881_v31, 0.0  ;;  %v4794_v2 = vadd.f32 %v15676_v4, %v17985_v7  ;;  %v4949_v31 = vmax.f32 %v4868_v28, 0.0  ;;  %v4947_v4 = vmax.f32 %v4866_v37, 0.0  ;;  %v4986_v28 = vld [vmem:[#allocation2 + $0xb0] sm:$0xff] }
 0x4f3   : > { %5485 = vmatmul.mubr.f32.gmra.mxu1 %v5014_v14  ;;  %v11364_v13 = vpop.f32.mrf.mxu0  ;;  %v5056_v14 = vld [vmem:[#allocation2 + $0x2e0] sm:$0xff]  ;;  %v4998_v37 = vld [vmem:[#allocation2 + $0x110] sm:$0xff] }
 0x4f4   : > { %5571 = vmatpush1.msra.mxu1 %v4962_v56  ;;  %5489 = vmatprep.mubr.f32.mxu1 %v5021_v48  ;;  %v5063_v48 = vld [vmem:[#allocation2 + $0x318] sm:$0xff]  ;;  %v4882_v53 = vadd.f32 %v15606_v55, %v4794_v2  ;;  %v5068_v55 = vld [vmem:[#allocation2 + $0x340] sm:$0xff] }
 0x4f5   : > { %5572 = vmatprep.subr.mxu1 %v17796_v0  ;;  %v5075_v13 = vld [vmem:[#allocation2 + $0x378] sm:$0xff] }
 0x4f6   : > { %5573 = vmatpush1.msra.mxu1 %v4961_v49  ;;  %v4963_v50 = vmax.f32 %v4882_v53, 0.0  ;;  %v5081_v49 = vld [vmem:[#allocation2 + $0x3a8] sm:$0xff]  ;;  %v5011_v53 = vld [vmem:[#allocation2 + $0x178] sm:$0xff] }
 0x4f7   : > { %5490 = vmatmul.mubr.f32.gmra.mxu1 %v5020_v35  ;;  %5574 = vmatprep.subr.mxu1 %v17796_v0 }
 0x4f8   : > { %5575 = vmatpush1.msra.mxu1 %v4960_v30  ;;  %5494 = vmatprep.mubr.f32.mxu1 %v5027_v57 }
 0x4f9   : > { %5576 = vmatprep.subr.mxu1 %v17796_v0 }
 0x4fa   : > { %5577 = vmatpush1.msra.mxu1 %v4959_v39 }
 0x4fb   : > { %5495 = vmatmul.mubr.f32.gmra.mxu1 %v5026_v10  ;;  %5578 = vmatprep.subr.mxu1 %v17796_v0  ;;  %v5092_v10 = vld [vmem:[#allocation2 + $0x400] sm:$0xff] }
 0x4fc   : > { %5579 = vmatpush1.msra.mxu1 %v4958_v8  ;;  %5499 = vmatprep.mubr.f32.mxu1 %v5033_v41  ;;  %v5099_v41 = vld [vmem:[#allocation2 + $0x438] sm:$0xff]  ;;  %v5105_v8 = vld [vmem:[#allocation2 + $0x468] sm:$0xff] }
 0x4fd   : > { %5580 = vmatprep.subr.mxu1 %v17796_v0 }
 0x4fe   : > { %5581 = vmatpush1.msra.mxu1 %v4957_v47  ;;  %v5111_v47 = vld [vmem:[#allocation2 + $0x498] sm:$0xff] }
 0x4ff   : > { %5500 = vmatmul.mubr.f32.gmra.mxu1 %v5032_v36  ;;  %5582 = vmatprep.subr.mxu1 %v17796_v0 }
 0x500   : > { %5583 = vmatpush1.msra.mxu1 %v4956_v32  ;;  %5504 = vmatprep.mubr.f32.mxu1 %v5039_v33 }
 0x501   : > { %5584 = vmatprep.subr.mxu1 %v17796_v0 }
 0x502   : > { %5585 = vmatpush1.msra.mxu1 %v4955_v60  ;;  %v4975_v60 = vld [vmem:[#allocation2 + $0x58] sm:$0xff] }
 0x503   : > { %5505 = vmatmul.mubr.f32.gmra.mxu1 %v5038_v27  ;;  %5586 = vmatprep.subr.mxu1 %v17796_v0 }
 0x504   : > { %5587 = vmatpush1.msra.mxu1 %v4954_v22  ;;  %5509 = vmatprep.mubr.f32.mxu1 %v5045_v40  ;;  %v4981_v22 = vld [vmem:[#allocation2 + $0x88] sm:$0xff] }
 0x505   : > { %5588 = vmatprep.subr.mxu1 %v17796_v0 }
 0x506   : > { %5589 = vmatpush1.msra.mxu1 %v4953_v29 }
 0x507   : > { %5510 = vmatmul.mubr.f32.gmra.mxu1 %v5044_v44  ;;  %5590 = vmatprep.subr.mxu1 %v17796_v0  ;;  %v4980_v44 = vld [vmem:[#allocation2 + $0x80] sm:$0xff] }
 0x508   : > { %5591 = vmatpush1.msra.mxu1 %v4952_v21  ;;  %5514 = vmatprep.mubr.f32.mxu1 %v5051_v45  ;;  %v4987_v45 = vld [vmem:[#allocation2 + $0xb8] sm:$0xff] }
 0x509   : > { %5592 = vmatprep.subr.mxu1 %v17796_v0 }
 0x50a   : > { %5593 = vmatpush1.msra.mxu1 %v4951_v6  ;;  %v4993_v6 = vld [vmem:[#allocation2 + $0xe8] sm:$0xff] }
 0x50b   : > { %5515 = vmatmul.mubr.f32.gmra.mxu1 %v5050_v9  ;;  %5594 = vmatprep.subr.mxu1 %v17796_v0 }
 0x50c   : > { %5595 = vmatpush1.msra.mxu1 %v4950_v34  ;;  %5519 = vmatprep.mubr.f32.mxu1 %v5057_v17  ;;  %v4999_v34 = vld [vmem:[#allocation2 + $0x118] sm:$0xff] }
 0x50d   : > { %5596 = vmatprep.subr.mxu1 %v17796_v0 }
 0x50e   : > { %5597 = vmatpush1.msra.mxu1 %v4949_v31  ;;  %v5005_v31 = vld [vmem:[#allocation2 + $0x148] sm:$0xff] }
 0x50f   : > { %5520 = vmatmul.mubr.f32.gmra.mxu1 %v5056_v14  ;;  %5598 = vmatprep.subr.mxu1 %v17796_v0 }
 0x510   : > { %5599 = vmatpush1.msra.mxu1 %v4948_v59  ;;  %5524 = vmatprep.mubr.f32.mxu1 %v5063_v48  ;;  %v5004_v59 = vld [vmem:[#allocation2 + $0x140] sm:$0xff] }
 0x511   : > { %5600 = vmatprep.subr.mxu1 %v17796_v0 }
 0x512   : > { %5601 = vmatpush1.msra.mxu1 %v4947_v4 }
 0x513   : > { %5525 = vmatmul.mubr.f32.gmra.mxu1 %v5062_v62  ;;  %5632 = vmatprep.subr.mxu1 %v17796_v0  ;;  %v15728_v56 = vpop.f32.mrf.mxu1 }
 0x514   : > { %5633 = vmatpush2.msra.mxu1 %v4963_v50  ;;  %5529 = vmatprep.mubr.f32.mxu1 %v5069_v5  ;;  %v5010_v5 = vld [vmem:[#allocation2 + $0x170] sm:$0xff]  ;;  %v5017_v50 = vld [vmem:[#allocation2 + $0x1a8] sm:$0xff] }
 0x515   : > { %v5258_v51 = vpop.f32.mrf.mxu1  ;;  %11365 = vmatprep.subr.mxu1 %v17796_v0 }
 0x516   : > { %v5016_v51 = vld [vmem:[#allocation2 + $0x1a0] sm:$0xff] }
 0x517   : > { %5530 = vmatmul.mubr.f32.gmra.mxu1 %v5068_v55  ;;  %v15731_v43 = vpop.f32.mrf.mxu1 }
 0x518   : > { %5534 = vmatprep.mubr.f32.mxu1 %v5075_v13 }
 0x519   : > { %v5263_v35 = vpop.f32.mrf.mxu1 }
 0x51b   : > { %5535 = vmatmul.mubr.f32.gmra.mxu1 %v5074_v26  ;;  %v15733_v57 = vpop.f32.mrf.mxu1  ;;  %v5023_v26 = vld [vmem:[#allocation2 + $0x1d8] sm:$0xff] }
 0x51c   : > { %5539 = vmatprep.mubr.f32.mxu1 %v5081_v49 }
 0x51d   : > { %v5268_v38 = vpop.f32.mrf.mxu1 }
 0x51f   : > { %5540 = vmatmul.mubr.f32.gmra.mxu1 %v5080_v54  ;;  %v15735_v30 = vpop.f32.mrf.mxu1  ;;  %v5022_v54 = vld [vmem:[#allocation2 + $0x1d0] sm:$0xff] }
 0x520   : > { %5544 = vmatprep.mubr.f32.mxu1 %v5087_v18  ;;  %v5029_v18 = vld [vmem:[#allocation2 + $0x208] sm:$0xff] }
 0x521   : > { %v5273_v58 = vpop.f32.mrf.mxu1 }
 0x522   : > { %v5035_v58 = vld [vmem:[#allocation2 + $0x238] sm:$0xff] }
 0x523   : > { %5545 = vmatmul.mubr.f32.gmra.mxu1 %v5086_v15  ;;  %v15737_v39 = vpop.f32.mrf.mxu1 }
 0x524   : > { %5549 = vmatprep.mubr.f32.mxu1 %v5093_v25  ;;  %v5028_v25 = vld [vmem:[#allocation2 + $0x200] sm:$0xff] }
 0x525   : > { %v5278_v11 = vpop.f32.mrf.mxu1 }
 0x526   : > { %v5034_v11 = vld [vmem:[#allocation2 + $0x230] sm:$0xff] }
 0x527   : > { %5550 = vmatmul.mubr.f32.gmra.mxu1 %v5092_v10  ;;  %v15739_v20 = vpop.f32.mrf.mxu1 }
 0x528   : > { %5554 = vmatprep.mubr.f32.mxu1 %v5099_v41 }
 0x529   : > { %v5283_v16 = vpop.f32.mrf.mxu1 }
 0x52b   : > { %5555 = vmatmul.mubr.f32.gmra.mxu1 %v5098_v63  ;;  %v15741_v52 = vpop.f32.mrf.mxu1  ;;  %v5041_v63 = vld [vmem:[#allocation2 + $0x268] sm:$0xff] }
 0x52c   : > { %5559 = vmatprep.mubr.f32.mxu1 %v5105_v8 }
 0x52d   : > { %v5288_v36 = vpop.f32.mrf.mxu1 }
 0x52f   : > { %5560 = vmatmul.mubr.f32.gmra.mxu1 %v5104_v1  ;;  %v15743_v33 = vpop.f32.mrf.mxu1  ;;  %v5040_v1 = vld [vmem:[#allocation2 + $0x260] sm:$0xff] }
 0x530   : > { %5564 = vmatprep.mubr.f32.mxu1 %v5111_v47  ;;  %v5047_v47 = vld [vmem:[#allocation2 + $0x298] sm:$0xff] }
 0x531   : > { %v5293_v61 = vpop.f32.mrf.mxu1 }
 0x532   : > { %v5767_v61 = vld [vmem:[#allocation7 + $0x38] sm:$0xff] }
 0x533   : > { %5565 = vmatmul.mubr.f32.gmra.mxu1 %v5110_v46  ;;  %v15745_v32 = vpop.f32.mrf.mxu1  ;;  %11457 = vmatpush3.msra.mxu0 %v5767_v61  ;;  %v5107_v61 = vld [vmem:[#allocation2 + $0x478] sm:$0xff] }
 0x534   : > { %9220 = vmatprep.mubr.msk.f32.mxu1 %vm5114_vm6, %v4969_v23  ;;  %v5046_v23 = vld [vmem:[#allocation2 + $0x290] sm:$0xff]  ;;  %11458 = vmatprep.subr.mxu0 %v17796_v0 }
 0x535   : > { %v5298_v27 = vpop.f32.mrf.mxu1 }
 0x537   : > { %5635 = vmatmul.mubr.f32.vlgmr.msra.gmra.mxu1 %v4968_v3  ;;  %v15748_v40 = vpop.f32.mrf.mxu1  ;;  %v5053_v3 = vld [vmem:[#allocation2 + $0x2c8] sm:$0xff] }
 0x538   : > { %9221 = vmatprep.mubr.msk.f32.mxu1 %vm5114_vm6, %v4975_v60 }
 0x539   : > { %v5303_v24 = vpop.f32.mrf.mxu1 }
 0x53b   : > { %5640 = vmatmul.mubr.f32.gmra.mxu1 %v4974_v42  ;;  %v15751_v29 = vpop.f32.mrf.mxu1  ;;  %v5052_v42 = vld [vmem:[#allocation2 + $0x2c0] sm:$0xff] }
 0x53c   : > { %9222 = vmatprep.mubr.msk.f32.mxu1 %vm5114_vm6, %v4981_v22  ;;  %v5059_v22 = vld [vmem:[#allocation2 + $0x2f8] sm:$0xff] }
 0x53d   : > { %v5308_v12 = vpop.f32.mrf.mxu1 }
 0x53e   : > { %v5765_v12 = vld [vmem:[#allocation7 + $0x28] sm:$0xff] }
 0x53f   : > { %5645 = vmatmul.mubr.f32.gmra.mxu1 %v4980_v44  ;;  %v15754_v21 = vpop.f32.mrf.mxu1  ;;  %v5766_v44 = vld [vmem:[#allocation7 + $0x30] sm:$0xff] }
 0x540   : > { %9223 = vmatprep.mubr.msk.f32.mxu1 %vm5114_vm6, %v4987_v45  ;;  %11459 = vmatpush3.msra.mxu0 %v5766_v44 }
 0x541   : > { %v5313_v9 = vpop.f32.mrf.mxu1  ;;  %11460 = vmatprep.subr.mxu0 %v17796_v0 }
 0x542   : > { %11461 = vmatpush3.msra.mxu0 %v5765_v12 }
 0x543   : > { %5650 = vmatmul.mubr.f32.gmra.mxu1 %v4986_v28  ;;  %v15757_v17 = vpop.f32.mrf.mxu1  ;;  %v5058_v28 = vld [vmem:[#allocation2 + $0x2f0] sm:$0xff]  ;;  %11462 = vmatprep.subr.mxu0 %v17796_v0 }
 0x544   : > { %9224 = vmatprep.mubr.msk.f32.mxu1 %vm5114_vm6, %v4993_v6  ;;  %v5065_v6 = vld [vmem:[#allocation2 + $0x328] sm:$0xff] }
 0x545   : > { %v5318_v7 = vpop.f32.mrf.mxu1 }
 0x547   : > { %5655 = vmatmul.mubr.f32.gmra.mxu1 %v4992_v19  ;;  %v15760_v2 = vpop.f32.mrf.mxu1  ;;  %v5764_v19 = vld [vmem:[#allocation7 + $0x20] sm:$0xff] }
 0x548   : > { %9225 = vmatprep.mubr.msk.f32.mxu1 %vm5114_vm6, %v4999_v34  ;;  %v5853_v34 = vld [vmem:[#allocation7 + $0x78] sm:$0xff]  ;;  %11463 = vmatpush3.msra.mxu0 %v5764_v19 }
 0x549   : > { %v5323_v14 = vpop.f32.mrf.mxu1  ;;  %11366 = vmatpush3.msra.mxu1 %v5853_v34  ;;  %11464 = vmatprep.subr.mxu0 %v17796_v0 }
 0x54a   : > { %11367 = vmatprep.subr.mxu1 %v17796_v0  ;;  %v5852_v14 = vld [vmem:[#allocation7 + $0x70] sm:$0xff] }
 0x54b   : > { %5660 = vmatmul.mubr.f32.gmra.mxu1 %v4998_v37  ;;  %v15763_v48 = vpop.f32.mrf.mxu1  ;;  %v5763_v37 = vld [vmem:[#allocation7 + $0x18] sm:$0xff] }
 0x54c   : > { %9226 = vmatprep.mubr.msk.f32.mxu1 %vm5114_vm6, %v5005_v31  ;;  %v5064_v31 = vld [vmem:[#allocation2 + $0x320] sm:$0xff]  ;;  %11465 = vmatpush3.msra.mxu0 %v5763_v37 }
 0x54d   : > { %v5328_v4 = vpop.f32.mrf.mxu1  ;;  %11368 = vmatpush3.msra.mxu1 %v5852_v14  ;;  %11466 = vmatprep.subr.mxu0 %v17796_v0 }
 0x54e   : > { %v5762_v4 = vld [vmem:[#allocation7 + $0x10] sm:$0xff]  ;;  %11369 = vmatprep.subr.mxu1 %v17796_v0 }
 0x54f   : > { %5665 = vmatmul.mubr.f32.gmra.mxu1 %v5004_v59  ;;  %v15766_v62 = vpop.f32.mrf.mxu1  ;;  %v5071_v59 = vld [vmem:[#allocation2 + $0x358] sm:$0xff]  ;;  %11467 = vmatpush3.msra.mxu0 %v5762_v4 }
 0x550   : > { %9227 = vmatprep.mubr.msk.f32.mxu1 %vm5114_vm6, %v5011_v53  ;;  %11468 = vmatprep.subr.mxu0 %v17796_v0 }
 0x551   : > { %v5333_v55 = vpop.f32.mrf.mxu1 }
 0x552   : > { %v5070_v55 = vld [vmem:[#allocation2 + $0x350] sm:$0xff] }
 0x553   : > { %5670 = vmatmul.mubr.f32.gmra.mxu1 %v5010_v5  ;;  %v15769_v13 = vpop.f32.mrf.mxu1  ;;  %v5851_v5 = vld [vmem:[#allocation7 + $0x68] sm:$0xff] }
 0x554   : > { %9228 = vmatprep.mubr.msk.f32.mxu1 %vm5114_vm6, %v5017_v50  ;;  %v5761_v50 = vld [vmem:[#allocation7 + $0x8] sm:$0xff]  ;;  %11370 = vmatpush3.msra.mxu1 %v5851_v5 }
 0x555   : > { %v5338_v49 = vpop.f32.mrf.mxu1  ;;  %11371 = vmatprep.subr.mxu1 %v17796_v0  ;;  %11469 = vmatpush3.msra.mxu0 %v5761_v50 }
 0x556   : > { %v5760_v49 = vld [vmem:[#allocation7] sm:$0xff]  ;;  %11470 = vmatprep.subr.mxu0 %v17796_v0 }
 0x557   : > { %5675 = vmatmul.mubr.f32.gmra.mxu1 %v5016_v51  ;;  %v15772_v35 = vpop.f32.mrf.mxu1  ;;  %v5850_v51 = vld [vmem:[#allocation7 + $0x60] sm:$0xff]  ;;  %11471 = vmatpush3.msra.mxu0 %v5760_v49 }
 0x558   : > { %9229 = vmatprep.mubr.msk.f32.mxu1 %vm5114_vm6, %v5023_v26  ;;  %v5077_v26 = vld [vmem:[#allocation2 + $0x388] sm:$0xff]  ;;  %11372 = vmatpush3.msra.mxu1 %v5850_v51 }
 0x559   : > { %v5343_v38 = vpop.f32.mrf.mxu1  ;;  %11373 = vmatprep.subr.mxu1 %v17796_v0  ;;  %11638 = vmatprep.subr.mxu0 %v17796_v0 }
 0x55a   : > { %v5083_v38 = vld [vmem:[#allocation2 + $0x3b8] sm:$0xff] }
 0x55b   : > { %5680 = vmatmul.mubr.f32.gmra.mxu1 %v5022_v54  ;;  %v15775_v15 = vpop.f32.mrf.mxu1  ;;  %v5849_v54 = vld [vmem:[#allocation7 + $0x58] sm:$0xff] }
 0x55c   : > { %9230 = vmatprep.mubr.msk.f32.mxu1 %vm5114_vm6, %v5029_v18  ;;  %v5076_v18 = vld [vmem:[#allocation2 + $0x380] sm:$0xff]  ;;  %11374 = vmatpush3.msra.mxu1 %v5849_v54 }
 0x55d   : > { %v5348_v10 = vpop.f32.mrf.mxu1  ;;  %11375 = vmatprep.subr.mxu1 %v17796_v0 }
 0x55e   : > { %v5082_v10 = vld [vmem:[#allocation2 + $0x3b0] sm:$0xff] }
 0x55f   : > { %5685 = vmatmul.mubr.f32.gmra.mxu1 %v5028_v25  ;;  %v15778_v41 = vpop.f32.mrf.mxu1  ;;  %v5848_v25 = vld [vmem:[#allocation7 + $0x50] sm:$0xff] }
 0x560   : > { %9231 = vmatprep.mubr.msk.f32.mxu1 %vm5114_vm6, %v5035_v58  ;;  %v5847_v58 = vld [vmem:[#allocation7 + $0x48] sm:$0xff]  ;;  %11376 = vmatpush3.msra.mxu1 %v5848_v25 }
 0x561   : > { %v5353_v8 = vpop.f32.mrf.mxu1  ;;  %11377 = vmatprep.subr.mxu1 %v17796_v0 }
 0x562   : > { %11378 = vmatpush3.msra.mxu1 %v5847_v58  ;;  %v5088_v8 = vld [vmem:[#allocation2 + $0x3e0] sm:$0xff] }
 0x563   : > { %5690 = vmatmul.mubr.f32.gmra.mxu1 %v5034_v11  ;;  %v15781_v16 = vpop.f32.mrf.mxu1  ;;  %v5089_v11 = vld [vmem:[#allocation2 + $0x3e8] sm:$0xff]  ;;  %11379 = vmatprep.subr.mxu1 %v17796_v0 }
 0x564   : > { %9232 = vmatprep.mubr.msk.f32.mxu1 %vm5114_vm6, %v5041_v63  ;;  %v5846_v63 = vld [vmem:[#allocation7 + $0x40] sm:$0xff] }
 0x565   : > { %v5358_v36 = vpop.f32.mrf.mxu1  ;;  %11380 = vmatpush3.msra.mxu1 %v5846_v63 }
 0x566   : > { %11547 = vmatprep.subr.mxu1 %v17796_v0  ;;  %v5101_v36 = vld [vmem:[#allocation2 + $0x448] sm:$0xff] }
 0x567   : > { %5695 = vmatmul.mubr.f32.gmra.mxu1 %v5040_v1  ;;  %v15784_v46 = vpop.f32.mrf.mxu1  ;;  %v5095_v1 = vld [vmem:[#allocation2 + $0x418] sm:$0xff] }
 0x568   : > { %9233 = vmatprep.mubr.msk.f32.mxu1 %vm5114_vm6, %v5047_v47  ;;  %v5094_v47 = vld [vmem:[#allocation2 + $0x410] sm:$0xff] }
 0x569   : > { %v5363_v60 = vpop.f32.mrf.mxu1 }
 0x56a   : > { %v5113_v60 = vld [vmem:[#allocation2 + $0x4a8] sm:$0xff] }
 0x56b   : > { %5700 = vmatmul.mubr.f32.gmra.mxu1 %v5046_v23  ;;  %v15788_v27 = vpop.f32.mrf.mxu1  ;;  %v5100_v23 = vld [vmem:[#allocation2 + $0x440] sm:$0xff] }
 0x56c   : > { %9234 = vmatprep.mubr.msk.f32.mxu1 %vm5114_vm6, %v5053_v3  ;;  %v5106_v3 = vld [vmem:[#allocation2 + $0x470] sm:$0xff] }
 0x56d   : > { %v5368_v24 = vpop.f32.mrf.mxu1 }
 0x56f   : > { %5705 = vmatmul.mubr.f32.gmra.mxu1 %v5052_v42  ;;  %v15791_v45 = vpop.f32.mrf.mxu1 }
 0x570   : > { %9235 = vmatprep.mubr.msk.f32.mxu1 %vm5114_vm6, %v5059_v22  ;;  %v5112_v22 = vld [vmem:[#allocation2 + $0x4a0] sm:$0xff] }
 0x571   : > { %v5373_v9 = vpop.f32.mrf.mxu1 }
 0x573   : > { %5710 = vmatmul.mubr.f32.gmra.mxu1 %v5058_v28  ;;  %v15796_v7 = vpop.f32.mrf.mxu1 }
 0x574   : > { %9236 = vmatprep.mubr.msk.f32.mxu1 %vm5114_vm6, %v5065_v6 }
 0x575   : > { %v5378_v53 = vpop.f32.mrf.mxu1 }
 0x577   : > { %5715 = vmatmul.mubr.f32.gmra.mxu1 %v5064_v31 }
 0x578   : > { %9237 = vmatprep.mubr.msk.f32.mxu1 %vm5114_vm6, %v5071_v59 }
 0x57b   : > { %5720 = vmatmul.mubr.f32.gmra.mxu1 %v5070_v55 }
 0x57c   : > { %9238 = vmatprep.mubr.msk.f32.mxu1 %vm5114_vm6, %v5077_v26 }
 0x57f   : > { %5725 = vmatmul.mubr.f32.gmra.mxu1 %v5076_v18 }
 0x580   : > { %9239 = vmatprep.mubr.msk.f32.mxu1 %vm5114_vm6, %v5083_v38 }
 0x583   : > { %5730 = vmatmul.mubr.f32.gmra.mxu1 %v5082_v10 }
 0x584   : > { %9240 = vmatprep.mubr.msk.f32.mxu1 %vm5114_vm6, %v5089_v11 }
 0x587   : > { %5735 = vmatmul.mubr.f32.gmra.mxu1 %v5088_v8 }
 0x588   : > { %9241 = vmatprep.mubr.msk.f32.mxu1 %vm5114_vm6, %v5095_v1 }
 0x58b   : > { %5740 = vmatmul.mubr.f32.gmra.mxu1 %v5094_v47 }
 0x58c   : > { %9242 = vmatprep.mubr.msk.f32.mxu1 %vm5114_vm6, %v5101_v36 }
 0x58f   : > { %5745 = vmatmul.mubr.f32.gmra.mxu1 %v5100_v23 }
 0x590   : > { %9243 = vmatprep.mubr.msk.f32.mxu1 %vm5114_vm6, %v5107_v61 }
 0x593   : > { %v5446_v42 = vpop.f32.mrf.mxu1  ;;  %5750 = vmatmul.mubr.f32.gmra.mxu1 %v5106_v3 }
 0x594   : > { %9244 = vmatprep.mubr.msk.f32.mxu1 %vm5114_vm6, %v5113_v60 }
 0x595   : > { %v5448_v24 = vpop.f32.mrf.mxu1 }
 0x597   : > { %v5451_v44 = vpop.f32.mrf.mxu1  ;;  %5755 = vmatmul.mubr.f32.gmra.mxu1 %v5112_v22 }
 0x598   : > { %11381 = vmatprep.mubr.msk.f32.mxu1 %vm12336_vm0, %v17796_v0 }
 0x599   : > { %v5453_v12 = vpop.f32.mrf.mxu1 }
 0x59b   : > { %v15822_v28 = vpop.f32.mrf.mxu1 }
 0x59d   : > { %v5458_v6 = vpop.f32.mrf.mxu1 }
 0x59f   : > { %v15824_v9 = vpop.f32.mrf.mxu1 }
 0x5a1   : > { %v5463_v19 = vpop.f32.mrf.mxu1 }
 0x5a3   : > { %v15826_v34 = vpop.f32.mrf.mxu1 }
 0x5a5   : > { %v5468_v37 = vpop.f32.mrf.mxu1 }
 0x5a7   : > { %v15828_v31 = vpop.f32.mrf.mxu1 }
 0x5a9   : > { %v5473_v14 = vpop.f32.mrf.mxu1 }
 0x5ab   : > { %v15830_v59 = vpop.f32.mrf.mxu1 }
 0x5ad   : > { %v5478_v53 = vpop.f32.mrf.mxu1 }
 0x5af   : > { %v15832_v4 = vpop.f32.mrf.mxu1 }
 0x5b1   : > { %v5483_v5 = vpop.f32.mrf.mxu1 }
 0x5b3   : > { %v15834_v50 = vpop.f32.mrf.mxu1 }
 0x5b5   : > { %v5488_v55 = vpop.f32.mrf.mxu1 }
 0x5b7   : > { %v15836_v51 = vpop.f32.mrf.mxu1 }
 0x5b9   : > { %v5493_v26 = vpop.f32.mrf.mxu1 }
 0x5bb   : > { %v15838_v49 = vpop.f32.mrf.mxu1 }
 0x5bd   : > { %v5498_v54 = vpop.f32.mrf.mxu1 }
 0x5bf   : > { %v15840_v18 = vpop.f32.mrf.mxu1 }
 0x5c1   : > { %v5503_v38 = vpop.f32.mrf.mxu1 }
 0x5c3   : > { %v15842_v25 = vpop.f32.mrf.mxu1 }
 0x5c5   : > { %v5508_v58 = vpop.f32.mrf.mxu1 }
 0x5c6   : > { %v5447_v58 = vadd.f32 %v5446_v42, %v15728_v56  ;;  %v6721_v56 = vld [vmem:[#allocation7 + $0xe8] sm:$0xff] }
 0x5c7   : > { %v15844_v10 = vpop.f32.mrf.mxu1 }
 0x5c9   : > { %v5513_v11 = vpop.f32.mrf.mxu1 }
 0x5cb   : > { %v15846_v63 = vpop.f32.mrf.mxu1 }
 0x5cd   : > { %v5518_v8 = vpop.f32.mrf.mxu1 }
 0x5cf   : > { %v15848_v1 = vpop.f32.mrf.mxu1 }
 0x5d1   : > { %v5523_v47 = vpop.f32.mrf.mxu1 }
 0x5d2   : > { %v6723_v47 = vld [vmem:[#allocation7 + $0xf8] sm:$0xff] }
 0x5d3   : > { %v15850_v36 = vpop.f32.mrf.mxu1 }
 0x5d5   : > { %v5528_v23 = vpop.f32.mrf.mxu1 }
 0x5d7   : > { %v15852_v61 = vpop.f32.mrf.mxu1 }
 0x5d9   : > { %v5533_v3 = vpop.f32.mrf.mxu1 }
 0x5da   : > { %v5452_v3 = vadd.f32 %v5451_v44, %v15731_v43 }
 0x5db   : > { %v15854_v60 = vpop.f32.mrf.mxu1 }
 0x5dd   : > { %v5538_v22 = vpop.f32.mrf.mxu1 }
 0x5de   : > { %v6722_v22 = vld [vmem:[#allocation7 + $0xf0] sm:$0xff] }
 0x5df   : > { %v15856_v24 = vpop.f32.mrf.mxu1 }
 0x5e1   : > { %v5543_v12 = vpop.f32.mrf.mxu1 }
 0x5e3   : > { %v15858_v6 = vpop.f32.mrf.mxu1 }
 0x5e5   : > { %v5548_v19 = vpop.f32.mrf.mxu1 }
 0x5e7   : > { %v15860_v37 = vpop.f32.mrf.mxu1 }
 0x5e9   : > { %v5553_v14 = vpop.f32.mrf.mxu1 }
 0x5ea   : > { %v5457_v14 = vadd.f32 %v15822_v28, %v15733_v57  ;;  %v6396_v28 = vld [vmem:[#allocation7 + $0xb8] sm:$0xff] }
 0x5eb   : > { %v15862_v53 = vpop.f32.mrf.mxu1 }
 0x5ed   : > { %v5558_v5 = vpop.f32.mrf.mxu1 }
 0x5ee   : > { %v6720_v5 = vld [vmem:[#allocation7 + $0xe0] sm:$0xff] }
 0x5ef   : > { %v15864_v55 = vpop.f32.mrf.mxu1 }
 0x5f1   : > { %v5563_v26 = vpop.f32.mrf.mxu1 }
 0x5f3   : > { %v15866_v54 = vpop.f32.mrf.mxu1 }
 0x5f5   : > { %v5568_v38 = vpop.f32.mrf.mxu1 }
 0x5f7   : > { %v5636_v11 = vpop.f32.mrf.mxu1 }
 0x5f8   : > { %v15869_v8 = vadd.f32 %v5636_v11, %v5447_v58  ;;  %v5462_v58 = vadd.f32 %v15824_v9, %v15735_v30 }
 0x5f9   : > { %v5638_v23 = vpop.f32.mrf.mxu1 }
 0x5fa   : > { %11473 = vmatmul.mubr.msk.f32.vlgmr.msra.gmra.mxu0 %vm5854_vm7, %v15869_v8  ;;  %v17794_v43 = vrot.slane %v15869_v8, 1 }
 0x5fb   : > { %v5641_v12 = vpop.f32.mrf.mxu1  ;;  %11475 = vmatprep.mubr.msk.f32.mxu0 %vm12336_vm0, %v17796_v0  ;;  %11639 = vmatpush3.msra.mxu0 %v6723_v47 }
 0x5fc   : > { %v15876_v19 = vadd.f32 %v5641_v12, %v5452_v3  ;;  %11640 = vmatprep.subr.mxu0 %v17796_v0  ;;  %v6719_v3 = vld [vmem:[#allocation7 + $0xd8] sm:$0xff] }
 0x5fd   : > { %v5643_v42 = vpop.f32.mrf.mxu1  ;;  %11641 = vmatpush3.msra.mxu0 %v6722_v22 }
 0x5fe   : > { %v5794_v44 = vrot.slane %v15876_v19, 1  ;;  %11476 = vmatmul.mubr.msk.f32.gmra.mxu0 %vm5854_vm7, %v15876_v19  ;;  %11642 = vmatprep.subr.mxu0 %v17796_v0  ;;  %v17795_v11 = vrot.slane %v15876_v19, 3  ;;  %v17792_v42 = vrot.slane %v15876_v19, 2  ;;  %v17793_v30 = vrot.slane %v15876_v19, 4 }
 0x5ff   : > { %v5646_v26 = vpop.f32.mrf.mxu1  ;;  %11478 = vmatprep.mubr.msk.f32.mxu0 %vm12336_vm0, %v17796_v0  ;;  %11643 = vmatpush3.msra.mxu0 %v6721_v56 }
 0x600   : > { %v5647_v38 = vadd.f32 %v5646_v26, %v5457_v14  ;;  %v5795_v57 = vsel %vm704_vm2, %v17794_v43, %v5794_v44  ;;  %11644 = vmatprep.subr.mxu0 %v17796_v0  ;;  %v6395_v26 = vld [vmem:[#allocation7 + $0xb0] sm:$0xff] }
 0x601   : > { %v5648_v47 = vpop.f32.mrf.mxu1  ;;  %11382 = vmatmul.mubr.msk.f32.vlgmr.msra.gmra.mxu1 %vm5854_vm7, %v5795_v57  ;;  %11645 = vmatpush3.msra.mxu0 %v6720_v5  ;;  %v5467_v57 = vadd.f32 %v15826_v34, %v15737_v39  ;;  %v6718_v34 = vld [vmem:[#allocation7 + $0xd0] sm:$0xff] }
 0x602   : > { %11479 = vmatmul.mubr.msk.f32.gmra.mxu0 %vm5854_vm7, %v5647_v38  ;;  %11384 = vmatprep.mubr.msk.f32.mxu1 %vm12336_vm0, %v17796_v0  ;;  %v5796_v23 = vrot.slane %v5647_v38, 1  ;;  %v6666_v22 = vrot.slane %v5647_v38, 3  ;;  %v6339_v12 = vrot.slane %v5647_v38, 2  ;;  %v6993_v56 = vrot.slane %v5647_v38, 4 }
 0x603   : > { %v5651_v9 = vpop.f32.mrf.mxu1  ;;  %11481 = vmatprep.mubr.msk.f32.mxu0 %vm12336_vm0, %v17796_v0  ;;  %11548 = vmatpush3.msra.mxu1 %v6396_v28 }
 0x604   : > { %v5652_v14 = vadd.f32 %v5651_v9, %v5462_v58  ;;  %v5797_v5 = vsel %vm704_vm2, %v5794_v44, %v5796_v23  ;;  %11646 = vmatprep.subr.mxu0 %v17796_v0  ;;  %11549 = vmatprep.subr.mxu1 %v17796_v0  ;;  %v15909_v38 = vsel %vm3028_vm5, %v17795_v11, %v6666_v22 }
 0x605   : > { %v5653_v47 = vpop.f32.mrf.mxu1  ;;  %11385 = vmatmul.mubr.msk.f32.gmra.mxu1 %vm5854_vm7, %v5797_v5  ;;  %11647 = vmatpush3.msra.mxu0 %v6719_v3  ;;  %v15917_v44 = vsel %vm2144_vm4, %v17792_v42, %v6339_v12  ;;  %v15922_v28 = vsel %vm1035_vm1, %v17793_v30, %v6993_v56  ;;  %v6394_v30 = vld [vmem:[#allocation7 + $0xa8] sm:$0xff]  ;;  %v5472_v11 = vadd.f32 %v15828_v31, %v15739_v20 }
 0x606   : > { %17986 = vst [vmem:[#allocation32_spill] sm:$0xff] %v15922_v28  ;;  %11482 = vmatmul.mubr.msk.f32.gmra.mxu0 %vm5854_vm7, %v5652_v14  ;;  %11387 = vmatprep.mubr.msk.f32.mxu1 %vm12336_vm0, %v17796_v0  ;;  %v5798_v39 = vrot.slane %v5652_v14, 1  ;;  %v6668_v58 = vrot.slane %v5652_v14, 3  ;;  %v6341_v9 = vrot.slane %v5652_v14, 2  ;;  %v6995_v3 = vrot.slane %v5652_v14, 4 }
 0x607   : > { %v5656_v5 = vpop.f32.mrf.mxu1  ;;  %11484 = vmatprep.mubr.msk.f32.mxu0 %vm12336_vm0, %v17796_v0  ;;  %11550 = vmatpush3.msra.mxu1 %v6395_v26 }
 0x608   : > { %v5657_v47 = vadd.f32 %v5656_v5, %v5467_v57  ;;  %v5799_v42 = vsel %vm704_vm2, %v5796_v23, %v5798_v39  ;;  %11648 = vmatprep.subr.mxu0 %v17796_v0  ;;  %11551 = vmatprep.subr.mxu1 %v17796_v0  ;;  %v15933_v43 = vsel %vm3028_vm5, %v6666_v22, %v6668_v58  ;;  %v6717_v57 = vld [vmem:[#allocation7 + $0xc8] sm:$0xff] }
 0x609   : > { %v5658_v14 = vpop.f32.mrf.mxu1  ;;  %11388 = vmatmul.mubr.msk.f32.gmra.mxu1 %vm5854_vm7, %v5799_v42  ;;  %11649 = vmatpush3.msra.mxu0 %v6718_v34  ;;  %v15939_v26 = vsel %vm2144_vm4, %v6339_v12, %v6341_v9  ;;  %v15942_v23 = vsel %vm1035_vm1, %v6993_v56, %v6995_v3  ;;  %v6393_v56 = vld [vmem:[#allocation7 + $0xa0] sm:$0xff] }
 0x60a   : > { %17987 = vst [vmem:[#allocation33_spill] sm:$0xff] %v15942_v23  ;;  %11485 = vmatmul.mubr.msk.f32.gmra.mxu0 %vm5854_vm7, %v5657_v47  ;;  %11390 = vmatprep.mubr.msk.f32.mxu1 %vm12336_vm0, %v17796_v0  ;;  %v5800_v22 = vrot.slane %v5657_v47, 1  ;;  %v6670_v5 = vrot.slane %v5657_v47, 3  ;;  %v6343_v28 = vrot.slane %v5657_v47, 2  ;;  %v6997_v20 = vrot.slane %v5657_v47, 4 }
 0x60b   : > { %v5661_v31 = vpop.f32.mrf.mxu1  ;;  %11487 = vmatprep.mubr.msk.f32.mxu0 %vm12336_vm0, %v17796_v0  ;;  %11552 = vmatpush3.msra.mxu1 %v6394_v30  ;;  %v5477_v14 = vadd.f32 %v15830_v59, %v15741_v52 }
 0x60c   : > { %v5662_v12 = vadd.f32 %v5661_v31, %v5472_v11  ;;  %v5801_v42 = vsel %vm704_vm2, %v5798_v39, %v5800_v22  ;;  %11650 = vmatprep.subr.mxu0 %v17796_v0  ;;  %11553 = vmatprep.subr.mxu1 %v17796_v0  ;;  %v15953_v34 = vsel %vm3028_vm5, %v6668_v58, %v6670_v5  ;;  %v6716_v58 = vld [vmem:[#allocation7 + $0xc0] sm:$0xff] }
 0x60d   : > { %v5663_v47 = vpop.f32.mrf.mxu1  ;;  %11391 = vmatmul.mubr.msk.f32.gmra.mxu1 %vm5854_vm7, %v5801_v42  ;;  %11651 = vmatpush3.msra.mxu0 %v6717_v57  ;;  %v15959_v30 = vsel %vm2144_vm4, %v6341_v9, %v6343_v28  ;;  %v15962_v11 = vsel %vm1035_vm1, %v6995_v3, %v6997_v20  ;;  %v6392_v3 = vld [vmem:[#allocation7 + $0x98] sm:$0xff] }
 0x60e   : > { %17988 = vst [vmem:[#allocation31_spill] sm:$0xff] %v15962_v11  ;;  %11488 = vmatmul.mubr.msk.f32.gmra.mxu0 %vm5854_vm7, %v5662_v12  ;;  %11393 = vmatprep.mubr.msk.f32.mxu1 %vm12336_vm0, %v17796_v0  ;;  %v5802_v39 = vrot.slane %v5662_v12, 1  ;;  %v6672_v31 = vrot.slane %v5662_v12, 3  ;;  %v6345_v23 = vrot.slane %v5662_v12, 2  ;;  %v6999_v52 = vrot.slane %v5662_v12, 4 }
 0x60f   : > { %v5666_v59 = vpop.f32.mrf.mxu1  ;;  %11490 = vmatprep.mubr.msk.f32.mxu0 %vm12336_vm0, %v17796_v0  ;;  %11554 = vmatpush3.msra.mxu1 %v6393_v56  ;;  %v5482_v47 = vadd.f32 %v15832_v4, %v15743_v33 }
 0x610   : > { %v5667_v9 = vadd.f32 %v5666_v59, %v5477_v14  ;;  %v5803_v57 = vsel %vm704_vm2, %v5800_v22, %v5802_v39  ;;  %11652 = vmatprep.subr.mxu0 %v17796_v0  ;;  %11555 = vmatprep.subr.mxu1 %v17796_v0  ;;  %v15973_v42 = vsel %vm3028_vm5, %v6670_v5, %v6672_v31 }
 0x611   : > { %v5668_v12 = vpop.f32.mrf.mxu1  ;;  %11394 = vmatmul.mubr.msk.f32.gmra.mxu1 %vm5854_vm7, %v5803_v57  ;;  %11653 = vmatpush3.msra.mxu0 %v6716_v58  ;;  %v15979_v56 = vsel %vm2144_vm4, %v6343_v28, %v6345_v23  ;;  %v15982_v22 = vsel %vm1035_vm1, %v6997_v20, %v6999_v52  ;;  %v6391_v20 = vld [vmem:[#allocation7 + $0x90] sm:$0xff] }
 0x612   : > { %11491 = vmatmul.mubr.msk.f32.gmra.mxu0 %vm5854_vm7, %v5667_v9  ;;  %11396 = vmatprep.mubr.msk.f32.mxu1 %vm12336_vm0, %v17796_v0  ;;  %v5804_v5 = vrot.slane %v5667_v9, 1  ;;  %v6674_v14 = vrot.slane %v5667_v9, 3  ;;  %v6347_v59 = vrot.slane %v5667_v9, 2  ;;  %v7001_v11 = vrot.slane %v5667_v9, 4 }
 0x613   : > { %v5671_v33 = vpop.f32.mrf.mxu1  ;;  %11493 = vmatprep.mubr.msk.f32.mxu0 %vm12336_vm0, %v17796_v0  ;;  %11556 = vmatpush3.msra.mxu1 %v6392_v3  ;;  %v5487_v9 = vadd.f32 %v15834_v50, %v15745_v32 }
 0x614   : > { %v5672_v4 = vadd.f32 %v5671_v33, %v5482_v47  ;;  %v5805_v28 = vsel %vm704_vm2, %v5802_v39, %v5804_v5  ;;  %11557 = vmatprep.subr.mxu1 %v17796_v0  ;;  %v15992_v58 = vsel %vm3028_vm5, %v6672_v31, %v6674_v14  ;;  %v15995_v57 = vsel %vm2144_vm4, %v6345_v23, %v6347_v59 }
 0x615   : > { %v5673_v12 = vpop.f32.mrf.mxu1  ;;  %11397 = vmatmul.mubr.msk.f32.gmra.mxu1 %vm5854_vm7, %v5805_v28  ;;  %v16001_v3 = vsel %vm1035_vm1, %v6999_v52, %v7001_v11  ;;  %7410 = vmatprep.subr.mxu0 %v17796_v0  ;;  %v6390_v52 = vld [vmem:[#allocation7 + $0x88] sm:$0xff] }
 0x616   : > { %17989 = vst [vmem:[#allocation30_spill] sm:$0xff] %v16001_v3  ;;  %11494 = vmatmul.mubr.msk.f32.gmra.mxu0 %vm5854_vm7, %v5672_v4  ;;  %11399 = vmatprep.mubr.msk.f32.mxu1 %vm12336_vm0, %v17796_v0  ;;  %v5806_v39 = vrot.slane %v5672_v4, 1  ;;  %v6676_v31 = vrot.slane %v5672_v4, 3  ;;  %v6349_v23 = vrot.slane %v5672_v4, 2  ;;  %v7003_v47 = vrot.slane %v5672_v4, 4 }
 0x617   : > { %v5676_v33 = vpop.f32.mrf.mxu1  ;;  %11496 = vmatprep.mubr.msk.f32.mxu0 %vm12336_vm0, %v17796_v0  ;;  %11558 = vmatpush3.msra.mxu1 %v6391_v20  ;;  %v5492_v4 = vadd.f32 %v15836_v51, %v15748_v40 }
 0x618   : > { %v5677_v32 = vadd.f32 %v5676_v33, %v5487_v9  ;;  %v5807_v50 = vsel %vm704_vm2, %v5804_v5, %v5806_v39  ;;  %11559 = vmatprep.subr.mxu1 %v17796_v0  ;;  %v16012_v28 = vsel %vm3028_vm5, %v6674_v14, %v6676_v31  ;;  %v16015_v12 = vsel %vm2144_vm4, %v6347_v59, %v6349_v23 }
 0x619   : > { %v5678_v3 = vpop.f32.mrf.mxu1  ;;  %11400 = vmatmul.mubr.msk.f32.gmra.mxu1 %vm5854_vm7, %v5807_v50  ;;  %v16021_v20 = vsel %vm1035_vm1, %v7001_v11, %v7003_v47  ;;  %v6389_v11 = vld [vmem:[#allocation7 + $0x80] sm:$0xff] }
 0x61a   : > { %17990 = vst [vmem:[#allocation34_spill] sm:$0xff] %v16021_v20  ;;  %11497 = vmatmul.mubr.msk.f32.gmra.mxu0 %vm5854_vm7, %v5677_v32  ;;  %11402 = vmatprep.mubr.msk.f32.mxu1 %vm12336_vm0, %v17796_v0  ;;  %v5808_v5 = vrot.slane %v5677_v32, 1  ;;  %v6678_v14 = vrot.slane %v5677_v32, 3  ;;  %v6351_v9 = vrot.slane %v5677_v32, 2  ;;  %v7005_v33 = vrot.slane %v5677_v32, 4 }
 0x61b   : > { %v5681_v59 = vpop.f32.mrf.mxu1  ;;  %11499 = vmatprep.mubr.msk.f32.mxu0 %vm12336_vm0, %v17796_v0  ;;  %11560 = vmatpush3.msra.mxu1 %v6390_v52  ;;  %v5497_v32 = vadd.f32 %v15838_v49, %v15751_v29 }
 0x61c   : > { %v5682_v40 = vadd.f32 %v5681_v59, %v5492_v4  ;;  %v5809_v51 = vsel %vm704_vm2, %v5806_v39, %v5808_v5  ;;  %11561 = vmatprep.subr.mxu1 %v17796_v0  ;;  %v16031_v3 = vsel %vm3028_vm5, %v6676_v31, %v6678_v14  ;;  %v16034_v50 = vsel %vm2144_vm4, %v6349_v23, %v6351_v9 }
 0x61d   : > { %v5683_v20 = vpop.f32.mrf.mxu1  ;;  %11403 = vmatmul.mubr.msk.f32.gmra.mxu1 %vm5854_vm7, %v5809_v51  ;;  %v16040_v52 = vsel %vm1035_vm1, %v7003_v47, %v7005_v33  ;;  %v5502_v51 = vadd.f32 %v15840_v18, %v15754_v21 }
 0x61e   : > { %17991 = vst [vmem:[#allocation29_spill] sm:$0xff] %v16040_v52  ;;  %11500 = vmatmul.mubr.msk.f32.gmra.mxu0 %vm5854_vm7, %v5682_v40  ;;  %11405 = vmatprep.mubr.msk.f32.mxu1 %vm12336_vm0, %v17796_v0  ;;  %v5810_v39 = vrot.slane %v5682_v40, 1  ;;  %v6680_v31 = vrot.slane %v5682_v40, 3  ;;  %v6353_v4 = vrot.slane %v5682_v40, 2  ;;  %v7007_v59 = vrot.slane %v5682_v40, 4 }
 0x61f   : > { %v5686_v23 = vpop.f32.mrf.mxu1  ;;  %11502 = vmatprep.mubr.msk.f32.mxu0 %vm12336_vm0, %v17796_v0  ;;  %11562 = vmatpush3.msra.mxu1 %v6389_v11 }
 0x620   : > { %v5687_v29 = vadd.f32 %v5686_v23, %v5497_v32  ;;  %v5811_v49 = vsel %vm704_vm2, %v5808_v5, %v5810_v39  ;;  %v16049_v47 = vsel %vm3028_vm5, %v6678_v14, %v6680_v31  ;;  %v16052_v20 = vsel %vm2144_vm4, %v6351_v9, %v6353_v4  ;;  %11729 = vmatprep.subr.mxu1 %v17796_v0 }
 0x621   : > { %v5688_v40 = vpop.f32.mrf.mxu1  ;;  %11406 = vmatmul.mubr.msk.f32.gmra.mxu1 %vm5854_vm7, %v5811_v49  ;;  %v16059_v52 = vsel %vm1035_vm1, %v7005_v33, %v7007_v59  ;;  %v5507_v49 = vadd.f32 %v15842_v25, %v15757_v17 }
 0x622   : > { %11503 = vmatmul.mubr.msk.f32.gmra.mxu0 %vm5854_vm7, %v5687_v29  ;;  %11408 = vmatprep.mubr.msk.f32.mxu1 %vm12336_vm0, %v17796_v0  ;;  %v5812_v5 = vrot.slane %v5687_v29, 1  ;;  %v6682_v14 = vrot.slane %v5687_v29, 3  ;;  %v6355_v9 = vrot.slane %v5687_v29, 2  ;;  %v7009_v11 = vrot.slane %v5687_v29, 4 }
 0x623   : > { %v5691_v32 = vpop.f32.mrf.mxu1  ;;  %11505 = vmatprep.mubr.msk.f32.mxu0 %vm12336_vm0, %v17796_v0 }
 0x624   : > { %v5692_v21 = vadd.f32 %v5691_v32, %v5502_v51  ;;  %v5813_v18 = vsel %vm704_vm2, %v5810_v39, %v5812_v5  ;;  %v16068_v23 = vsel %vm3028_vm5, %v6680_v31, %v6682_v14  ;;  %v16071_v33 = vsel %vm2144_vm4, %v6353_v4, %v6355_v9 }
 0x625   : > { %v5693_v40 = vpop.f32.mrf.mxu1  ;;  %11409 = vmatmul.mubr.msk.f32.gmra.mxu1 %vm5854_vm7, %v5813_v18  ;;  %v16077_v29 = vsel %vm1035_vm1, %v7007_v59, %v7009_v11 }
 0x626   : > { %17992 = vst [vmem:[#allocation28_spill] sm:$0xff] %v16077_v29  ;;  %11506 = vmatmul.mubr.msk.f32.gmra.mxu0 %vm5854_vm7, %v5692_v21  ;;  %11411 = vmatprep.mubr.msk.f32.mxu1 %vm12336_vm0, %v17796_v0  ;;  %v5814_v39 = vrot.slane %v5692_v21, 1  ;;  %v6684_v31 = vrot.slane %v5692_v21, 3  ;;  %v6357_v51 = vrot.slane %v5692_v21, 2  ;;  %v7011_v32 = vrot.slane %v5692_v21, 4 }
 0x627   : > { %v5696_v4 = vpop.f32.mrf.mxu1  ;;  %11508 = vmatprep.mubr.msk.f32.mxu0 %vm12336_vm0, %v17796_v0  ;;  %v5512_v40 = vadd.f32 %v15844_v10, %v15760_v2 }
 0x628   : > { %v5697_v17 = vadd.f32 %v5696_v4, %v5507_v49  ;;  %v5815_v25 = vsel %vm704_vm2, %v5812_v5, %v5814_v39  ;;  %v16086_v18 = vsel %vm3028_vm5, %v6682_v14, %v6684_v31  ;;  %v16089_v59 = vsel %vm2144_vm4, %v6355_v9, %v6357_v51 }
 0x629   : > { %v5698_v29 = vpop.f32.mrf.mxu1  ;;  %11412 = vmatmul.mubr.msk.f32.gmra.mxu1 %vm5854_vm7, %v5815_v25  ;;  %v16095_v21 = vsel %vm1035_vm1, %v7009_v11, %v7011_v32  ;;  %v5517_v25 = vadd.f32 %v15846_v63, %v15763_v48 }
 0x62a   : > { %17993 = vst [vmem:[#allocation35_spill] sm:$0xff] %v16095_v21  ;;  %11509 = vmatmul.mubr.msk.f32.gmra.mxu0 %vm5854_vm7, %v5697_v17  ;;  %11414 = vmatprep.mubr.msk.f32.mxu1 %vm12336_vm0, %v17796_v0  ;;  %v5816_v5 = vrot.slane %v5697_v17, 1  ;;  %v6686_v14 = vrot.slane %v5697_v17, 3  ;;  %v6359_v49 = vrot.slane %v5697_v17, 2  ;;  %v7013_v4 = vrot.slane %v5697_v17, 4 }
 0x62b   : > { %v5701_v9 = vpop.f32.mrf.mxu1  ;;  %11511 = vmatprep.mubr.msk.f32.mxu0 %vm12336_vm0, %v17796_v0 }
 0x62c   : > { %v5702_v2 = vadd.f32 %v5701_v9, %v5512_v40  ;;  %v5817_v10 = vsel %vm704_vm2, %v5814_v39, %v5816_v5  ;;  %v16104_v29 = vsel %vm3028_vm5, %v6684_v31, %v6686_v14  ;;  %v16107_v11 = vsel %vm2144_vm4, %v6357_v51, %v6359_v49 }
 0x62d   : > { %v5703_v21 = vpop.f32.mrf.mxu1  ;;  %11415 = vmatmul.mubr.msk.f32.gmra.mxu1 %vm5854_vm7, %v5817_v10  ;;  %v16113_v17 = vsel %vm1035_vm1, %v7011_v32, %v7013_v4  ;;  %v5522_v10 = vadd.f32 %v15848_v1, %v15766_v62 }
 0x62e   : > { %17994 = vst [vmem:[#allocation27_spill] sm:$0xff] %v16113_v17  ;;  %11512 = vmatmul.mubr.msk.f32.gmra.mxu0 %vm5854_vm7, %v5702_v2  ;;  %11417 = vmatprep.mubr.msk.f32.mxu1 %vm12336_vm0, %v17796_v0  ;;  %v5818_v39 = vrot.slane %v5702_v2, 1  ;;  %v6688_v31 = vrot.slane %v5702_v2, 3  ;;  %v6361_v40 = vrot.slane %v5702_v2, 2  ;;  %v7015_v9 = vrot.slane %v5702_v2, 4 }
 0x62f   : > { %v5706_v51 = vpop.f32.mrf.mxu1  ;;  %11514 = vmatprep.mubr.msk.f32.mxu0 %vm12336_vm0, %v17796_v0 }
 0x630   : > { %v5707_v48 = vadd.f32 %v5706_v51, %v5517_v25  ;;  %v5819_v63 = vsel %vm704_vm2, %v5816_v5, %v5818_v39  ;;  %v16122_v21 = vsel %vm3028_vm5, %v6686_v14, %v6688_v31  ;;  %v16125_v32 = vsel %vm2144_vm4, %v6359_v49, %v6361_v40 }
 0x631   : > { %v5708_v17 = vpop.f32.mrf.mxu1  ;;  %11418 = vmatmul.mubr.msk.f32.gmra.mxu1 %vm5854_vm7, %v5819_v63  ;;  %v16131_v2 = vsel %vm1035_vm1, %v7013_v4, %v7015_v9  ;;  %v5527_v63 = vadd.f32 %v15850_v36, %v15769_v13 }
 0x632   : > { %17995 = vst [vmem:[#allocation26_spill] sm:$0xff] %v16131_v2  ;;  %11515 = vmatmul.mubr.msk.f32.gmra.mxu0 %vm5854_vm7, %v5707_v48  ;;  %11420 = vmatprep.mubr.msk.f32.mxu1 %vm12336_vm0, %v17796_v0  ;;  %v5820_v5 = vrot.slane %v5707_v48, 1  ;;  %v6690_v14 = vrot.slane %v5707_v48, 3  ;;  %v6363_v25 = vrot.slane %v5707_v48, 2  ;;  %v7017_v51 = vrot.slane %v5707_v48, 4 }
 0x633   : > { %v5711_v49 = vpop.f32.mrf.mxu1  ;;  %11517 = vmatprep.mubr.msk.f32.mxu0 %vm12336_vm0, %v17796_v0 }
 0x634   : > { %v5712_v62 = vadd.f32 %v5711_v49, %v5522_v10  ;;  %v5821_v1 = vsel %vm704_vm2, %v5818_v39, %v5820_v5  ;;  %v16140_v17 = vsel %vm3028_vm5, %v6688_v31, %v6690_v14  ;;  %v16143_v4 = vsel %vm2144_vm4, %v6361_v40, %v6363_v25 }
 0x635   : > { %v5713_v2 = vpop.f32.mrf.mxu1  ;;  %11421 = vmatmul.mubr.msk.f32.gmra.mxu1 %vm5854_vm7, %v5821_v1  ;;  %v16149_v48 = vsel %vm1035_vm1, %v7015_v9, %v7017_v51  ;;  %v5532_v1 = vadd.f32 %v15852_v61, %v15772_v35 }
 0x636   : > { %17996 = vst [vmem:[#allocation36_spill] sm:$0xff] %v16149_v48  ;;  %11518 = vmatmul.mubr.msk.f32.gmra.mxu0 %vm5854_vm7, %v5712_v62  ;;  %11423 = vmatprep.mubr.msk.f32.mxu1 %vm12336_vm0, %v17796_v0  ;;  %v5822_v39 = vrot.slane %v5712_v62, 1  ;;  %v6692_v31 = vrot.slane %v5712_v62, 3  ;;  %v6365_v10 = vrot.slane %v5712_v62, 2  ;;  %v7019_v49 = vrot.slane %v5712_v62, 4 }
 0x637   : > { %v5716_v40 = vpop.f32.mrf.mxu1  ;;  %11520 = vmatprep.mubr.msk.f32.mxu0 %vm12336_vm0, %v17796_v0 }
 0x638   : > { %v5717_v13 = vadd.f32 %v5716_v40, %v5527_v63  ;;  %v5823_v36 = vsel %vm704_vm2, %v5820_v5, %v5822_v39  ;;  %v16158_v2 = vsel %vm3028_vm5, %v6690_v14, %v6692_v31  ;;  %v16161_v9 = vsel %vm2144_vm4, %v6363_v25, %v6365_v10 }
 0x639   : > { %v5718_v48 = vpop.f32.mrf.mxu1  ;;  %11424 = vmatmul.mubr.msk.f32.gmra.mxu1 %vm5854_vm7, %v5823_v36  ;;  %v16167_v62 = vsel %vm1035_vm1, %v7017_v51, %v7019_v49  ;;  %v5537_v36 = vadd.f32 %v15854_v60, %v15775_v15 }
 0x63a   : > { %17997 = vst [vmem:[#allocation25_spill] sm:$0xff] %v16167_v62  ;;  %11521 = vmatmul.mubr.msk.f32.gmra.mxu0 %vm5854_vm7, %v5717_v13  ;;  %11426 = vmatprep.mubr.msk.f32.mxu1 %vm12336_vm0, %v17796_v0  ;;  %v5824_v5 = vrot.slane %v5717_v13, 1  ;;  %v6694_v14 = vrot.slane %v5717_v13, 3  ;;  %v6367_v63 = vrot.slane %v5717_v13, 2  ;;  %v7021_v40 = vrot.slane %v5717_v13, 4 }
 0x63b   : > { %v5721_v25 = vpop.f32.mrf.mxu1  ;;  %11523 = vmatprep.mubr.msk.f32.mxu0 %vm12336_vm0, %v17796_v0 }
 0x63c   : > { %v5722_v35 = vadd.f32 %v5721_v25, %v5532_v1  ;;  %v5825_v61 = vsel %vm704_vm2, %v5822_v39, %v5824_v5  ;;  %v16176_v48 = vsel %vm3028_vm5, %v6692_v31, %v6694_v14  ;;  %v16179_v51 = vsel %vm2144_vm4, %v6365_v10, %v6367_v63 }
 0x63d   : > { %v5723_v62 = vpop.f32.mrf.mxu1  ;;  %11427 = vmatmul.mubr.msk.f32.gmra.mxu1 %vm5854_vm7, %v5825_v61  ;;  %v16185_v13 = vsel %vm1035_vm1, %v7019_v49, %v7021_v40  ;;  %v5542_v61 = vadd.f32 %v15856_v24, %v15778_v41 }
 0x63e   : > { %17998 = vst [vmem:[#allocation24_spill] sm:$0xff] %v16185_v13  ;;  %11524 = vmatmul.mubr.msk.f32.gmra.mxu0 %vm5854_vm7, %v5722_v35  ;;  %11429 = vmatprep.mubr.msk.f32.mxu1 %vm12336_vm0, %v17796_v0  ;;  %v5826_v39 = vrot.slane %v5722_v35, 1  ;;  %v6696_v31 = vrot.slane %v5722_v35, 3  ;;  %v6369_v1 = vrot.slane %v5722_v35, 2  ;;  %v7023_v25 = vrot.slane %v5722_v35, 4 }
 0x63f   : > { %v5726_v10 = vpop.f32.mrf.mxu1  ;;  %11526 = vmatprep.mubr.msk.f32.mxu0 %vm12336_vm0, %v17796_v0 }
 0x640   : > { %v5727_v15 = vadd.f32 %v5726_v10, %v5537_v36  ;;  %v5827_v60 = vsel %vm704_vm2, %v5824_v5, %v5826_v39  ;;  %v16194_v62 = vsel %vm3028_vm5, %v6694_v14, %v6696_v31  ;;  %v16197_v49 = vsel %vm2144_vm4, %v6367_v63, %v6369_v1 }
 0x641   : > { %v5728_v13 = vpop.f32.mrf.mxu1  ;;  %11430 = vmatmul.mubr.msk.f32.gmra.mxu1 %vm5854_vm7, %v5827_v60  ;;  %v16203_v35 = vsel %vm1035_vm1, %v7021_v40, %v7023_v25  ;;  %v5547_v60 = vadd.f32 %v15858_v6, %v15781_v16 }
 0x642   : > { %17999 = vst [vmem:[#allocation37_spill] sm:$0xff] %v16203_v35  ;;  %11527 = vmatmul.mubr.msk.f32.gmra.mxu0 %vm5854_vm7, %v5727_v15  ;;  %11432 = vmatprep.mubr.msk.f32.mxu1 %vm12336_vm0, %v17796_v0  ;;  %v5828_v5 = vrot.slane %v5727_v15, 1  ;;  %v6698_v14 = vrot.slane %v5727_v15, 3  ;;  %v6371_v36 = vrot.slane %v5727_v15, 2  ;;  %v7025_v10 = vrot.slane %v5727_v15, 4 }
 0x643   : > { %v5731_v63 = vpop.f32.mrf.mxu1  ;;  %11529 = vmatprep.mubr.msk.f32.mxu0 %vm12336_vm0, %v17796_v0 }
 0x644   : > { %v5732_v41 = vadd.f32 %v5731_v63, %v5542_v61  ;;  %v5829_v24 = vsel %vm704_vm2, %v5826_v39, %v5828_v5  ;;  %v16212_v13 = vsel %vm3028_vm5, %v6696_v31, %v6698_v14  ;;  %v16215_v40 = vsel %vm2144_vm4, %v6369_v1, %v6371_v36 }
 0x645   : > { %v5733_v35 = vpop.f32.mrf.mxu1  ;;  %11433 = vmatmul.mubr.msk.f32.gmra.mxu1 %vm5854_vm7, %v5829_v24  ;;  %v16221_v15 = vsel %vm1035_vm1, %v7023_v25, %v7025_v10  ;;  %v5552_v24 = vadd.f32 %v15860_v37, %v15784_v46 }
 0x646   : > { %18000 = vst [vmem:[#allocation38_spill] sm:$0xff] %v16221_v15  ;;  %11530 = vmatmul.mubr.msk.f32.gmra.mxu0 %vm5854_vm7, %v5732_v41  ;;  %11435 = vmatprep.mubr.msk.f32.mxu1 %vm12336_vm0, %v17796_v0  ;;  %v5830_v39 = vrot.slane %v5732_v41, 1  ;;  %v6700_v31 = vrot.slane %v5732_v41, 3  ;;  %v6373_v61 = vrot.slane %v5732_v41, 2  ;;  %v7027_v63 = vrot.slane %v5732_v41, 4 }
 0x647   : > { %v5736_v1 = vpop.f32.mrf.mxu1  ;;  %11532 = vmatprep.mubr.msk.f32.mxu0 %vm12336_vm0, %v17796_v0 }
 0x648   : > { %v5737_v16 = vadd.f32 %v5736_v1, %v5547_v60  ;;  %v5831_v6 = vsel %vm704_vm2, %v5828_v5, %v5830_v39  ;;  %v16230_v35 = vsel %vm3028_vm5, %v6698_v14, %v6700_v31  ;;  %v16233_v25 = vsel %vm2144_vm4, %v6371_v36, %v6373_v61 }
 0x649   : > { %v5738_v15 = vpop.f32.mrf.mxu1  ;;  %11436 = vmatmul.mubr.msk.f32.gmra.mxu1 %vm5854_vm7, %v5831_v6  ;;  %v16239_v41 = vsel %vm1035_vm1, %v7025_v10, %v7027_v63  ;;  %v5557_v6 = vadd.f32 %v15862_v53, %v15788_v27 }
 0x64a   : > { %18001 = vst [vmem:[#allocation48_spill] sm:$0xff] %v16239_v41  ;;  %11533 = vmatmul.mubr.msk.f32.gmra.mxu0 %vm5854_vm7, %v5737_v16  ;;  %11438 = vmatprep.mubr.msk.f32.mxu1 %vm12336_vm0, %v17796_v0  ;;  %v5832_v5 = vrot.slane %v5737_v16, 1  ;;  %v6702_v14 = vrot.slane %v5737_v16, 3  ;;  %v6375_v60 = vrot.slane %v5737_v16, 2  ;;  %v7029_v1 = vrot.slane %v5737_v16, 4 }
 0x64b   : > { %v5741_v36 = vpop.f32.mrf.mxu1  ;;  %11535 = vmatprep.mubr.msk.f32.mxu0 %vm12336_vm0, %v17796_v0 }
 0x64c   : > { %v5742_v46 = vadd.f32 %v5741_v36, %v5552_v24  ;;  %v5833_v37 = vsel %vm704_vm2, %v5830_v39, %v5832_v5  ;;  %v16248_v15 = vsel %vm3028_vm5, %v6700_v31, %v6702_v14  ;;  %v16251_v10 = vsel %vm2144_vm4, %v6373_v61, %v6375_v60 }
 0x64d   : > { %v5743_v41 = vpop.f32.mrf.mxu1  ;;  %11439 = vmatmul.mubr.msk.f32.gmra.mxu1 %vm5854_vm7, %v5833_v37  ;;  %v16257_v16 = vsel %vm1035_vm1, %v7027_v63, %v7029_v1  ;;  %v5562_v37 = vadd.f32 %v15864_v55, %v15791_v45 }
 0x64e   : > { %18002 = vst [vmem:[#allocation47_spill] sm:$0xff] %v16257_v16  ;;  %11536 = vmatmul.mubr.msk.f32.gmra.mxu0 %vm5854_vm7, %v5742_v46  ;;  %11441 = vmatprep.mubr.msk.f32.mxu1 %vm12336_vm0, %v17796_v0  ;;  %v5834_v39 = vrot.slane %v5742_v46, 1  ;;  %v6704_v31 = vrot.slane %v5742_v46, 3  ;;  %v6377_v24 = vrot.slane %v5742_v46, 2  ;;  %v7031_v36 = vrot.slane %v5742_v46, 4 }
 0x64f   : > { %v5746_v61 = vpop.f32.mrf.mxu1  ;;  %11538 = vmatprep.mubr.msk.f32.mxu0 %vm12336_vm0, %v17796_v0 }
 0x650   : > { %v5747_v27 = vadd.f32 %v5746_v61, %v5557_v6  ;;  %v5835_v53 = vsel %vm704_vm2, %v5832_v5, %v5834_v39  ;;  %v16266_v41 = vsel %vm3028_vm5, %v6702_v14, %v6704_v31  ;;  %v16269_v63 = vsel %vm2144_vm4, %v6375_v60, %v6377_v24 }
 0x651   : > { %v5748_v16 = vpop.f32.mrf.mxu1  ;;  %11442 = vmatmul.mubr.msk.f32.gmra.mxu1 %vm5854_vm7, %v5835_v53  ;;  %v16275_v46 = vsel %vm1035_vm1, %v7029_v1, %v7031_v36  ;;  %v5567_v53 = vadd.f32 %v15866_v54, %v15796_v7 }
 0x652   : > { %18003 = vst [vmem:[#allocation49_spill] sm:$0xff] %v16275_v46  ;;  %11539 = vmatmul.mubr.msk.f32.gmra.mxu0 %vm5854_vm7, %v5747_v27  ;;  %11444 = vmatprep.mubr.msk.f32.mxu1 %vm12336_vm0, %v17796_v0  ;;  %v5836_v5 = vrot.slane %v5747_v27, 1  ;;  %v6706_v14 = vrot.slane %v5747_v27, 3  ;;  %v6379_v6 = vrot.slane %v5747_v27, 2  ;;  %v7033_v61 = vrot.slane %v5747_v27, 4 }
 0x653   : > { %v5751_v60 = vpop.f32.mrf.mxu1  ;;  %11541 = vmatprep.mubr.msk.f32.mxu0 %vm12336_vm0, %v17796_v0 }
 0x654   : > { %v5752_v45 = vadd.f32 %v5751_v60, %v5562_v37  ;;  %v5837_v55 = vsel %vm704_vm2, %v5834_v39, %v5836_v5  ;;  %v16284_v16 = vsel %vm3028_vm5, %v6704_v31, %v6706_v14  ;;  %v16287_v1 = vsel %vm2144_vm4, %v6377_v24, %v6379_v6 }
 0x655   : > { %v5753_v46 = vpop.f32.mrf.mxu1  ;;  %11445 = vmatmul.mubr.msk.f32.gmra.mxu1 %vm5854_vm7, %v5837_v55  ;;  %v16293_v27 = vsel %vm1035_vm1, %v7031_v36, %v7033_v61 }
 0x656   : > { %18004 = vst [vmem:[#allocation46_spill] sm:$0xff] %v16293_v27  ;;  %11542 = vmatmul.mubr.msk.f32.gmra.mxu0 %vm5854_vm7, %v5752_v45  ;;  %11447 = vmatprep.mubr.msk.f32.mxu1 %vm12336_vm0, %v17796_v0  ;;  %v5838_v39 = vrot.slane %v5752_v45, 1  ;;  %v6708_v31 = vrot.slane %v5752_v45, 3  ;;  %v6381_v37 = vrot.slane %v5752_v45, 2  ;;  %v7035_v60 = vrot.slane %v5752_v45, 4 }
 0x657   : > { %v5756_v24 = vpop.f32.mrf.mxu1  ;;  %11544 = vmatprep.mubr.msk.f32.mxu0 %vm12336_vm0, %v17796_v0 }
 0x658   : > { %v16300_v7 = vadd.f32 %v5756_v24, %v5567_v53  ;;  %v5839_v54 = vsel %vm704_vm2, %v5836_v5, %v5838_v39  ;;  %v16304_v36 = vsel %vm3028_vm5, %v6706_v14, %v6708_v31  ;;  %v16307_v46 = vsel %vm2144_vm4, %v6379_v6, %v6381_v37 }
 0x659   : > { %11448 = vmatmul.mubr.msk.f32.gmra.mxu1 %vm5854_vm7, %v5839_v54  ;;  %v5758_v55 = vpop.f32.mrf.mxu1  ;;  %v16311_v27 = vsel %vm1035_vm1, %v7033_v61, %v7035_v60  ;;  %v6663_v53 = vrot.slane %v15869_v8, 3  ;;  %v18005_v54 = vrot.slane %v15876_v19, 3 }
 0x65a   : > { %11545 = vmatmul.mubr.msk.f32.gmra.mxu0 %vm5854_vm7, %v16300_v7  ;;  %11450 = vmatprep.mubr.msk.f32.mxu1 %vm12336_vm0, %v17796_v0  ;;  %v5840_v5 = vrot.slane %v16300_v7, 1  ;;  %v6710_v14 = vrot.slane %v16300_v7, 3  ;;  %v6383_v45 = vrot.slane %v16300_v7, 2 }
 0x65b   : > { %11654 = vmatprep.mubr.msk.f32.mxu0 %vm12336_vm0, %v17796_v0  ;;  %v6665_v55 = vsel %vm3028_vm5, %v6663_v53, %v18005_v54 }
 0x65c   : > { %v5841_v61 = vsel %vm704_vm2, %v5838_v39, %v5840_v5  ;;  %v16328_v24 = vsel %vm3028_vm5, %v6708_v31, %v6710_v14  ;;  %v16339_v6 = vsel %vm2144_vm4, %v6381_v37, %v6383_v45  ;;  %v18006_v39 = vrot.slane %v16300_v7, 4 }
 0x65d   : > { %11451 = vmatmul.mubr.msk.f32.gmra.mxu1 %vm5854_vm7, %v5841_v61  ;;  %v18007_v31 = vmov 0.0   ;;  %v18008_v61 = vrot.slane %v15869_v8, 1  ;;  %v6336_v37 = vrot.slane %v15869_v8, 2 }
 0x65e   : > { %v16344_v0 = vsel %vm1035_vm1, %v7035_v60, %v18006_v39  ;;  %11655 = vmatmul.mubr.msk.f32.vlgmr.msra.gmra.mxu0 %vm5854_vm7, %v6665_v55  ;;  %11453 = vmatprep.mubr.msk.f32.mxu1 %vm12336_vm0, %v18007_v31  ;;  %v18009_v60 = vrot.slane %v15876_v19, 2 }
 0x65f   : > { %11657 = vmatprep.mubr.msk.f32.mxu0 %vm12336_vm0, %v18007_v31  ;;  %v5844_v54 = vsel %vm704_vm2, %v5840_v5, %v18008_v61  ;;  %v7050_v5 = vld [vmem:[#allocation7 + $0x138] sm:$0xff] }
 0x660   : > { %v6338_v55 = vsel %vm2144_vm4, %v6336_v37, %v18009_v60 }
 0x661   : > { %11454 = vmatmul.mubr.msk.f32.gmra.mxu1 %vm5854_vm7, %v5844_v54 }
 0x662   : > { %11658 = vmatmul.mubr.msk.f32.gmra.mxu0 %vm5854_vm7, %v15909_v38  ;;  %11563 = vmatprep.mubr.msk.f32.mxu1 %vm12336_vm0, %v18007_v31  ;;  %v7049_v38 = vld [vmem:[#allocation7 + $0x130] sm:$0xff] }
 0x663   : > { %11660 = vmatprep.mubr.msk.f32.mxu0 %vm12336_vm0, %v18007_v31 }
 0x665   : > { %11564 = vmatmul.mubr.msk.f32.vlgmr.msra.gmra.mxu1 %vm5854_vm7, %v6338_v55  ;;  %v18014_v55 = vld [vmem:[#allocation30_spill] sm:$0xff] }
 0x666   : > { %11661 = vmatmul.mubr.msk.f32.gmra.mxu0 %vm5854_vm7, %v15933_v43  ;;  %11566 = vmatprep.mubr.msk.f32.mxu1 %vm12336_vm0, %v18007_v31  ;;  %v7048_v43 = vld [vmem:[#allocation7 + $0x128] sm:$0xff] }
 0x667   : > { %11663 = vmatprep.mubr.msk.f32.mxu0 %vm12336_vm0, %v18007_v31  ;;  %11730 = vmatpush3.msra.mxu1 %v7050_v5 }
 0x668   : > { %11731 = vmatprep.subr.mxu1 %v18007_v31 }
 0x669   : > { %11567 = vmatmul.mubr.msk.f32.gmra.mxu1 %vm5854_vm7, %v15917_v44  ;;  %v7047_v44 = vld [vmem:[#allocation7 + $0x120] sm:$0xff] }
 0x66a   : > { %11664 = vmatmul.mubr.msk.f32.gmra.mxu0 %vm5854_vm7, %v15953_v34  ;;  %11569 = vmatprep.mubr.msk.f32.mxu1 %vm12336_vm0, %v18007_v31  ;;  %v7045_v34 = vld [vmem:[#allocation7 + $0x110] sm:$0xff] }
 0x66b   : > { %11666 = vmatprep.mubr.msk.f32.mxu0 %vm12336_vm0, %v18007_v31  ;;  %11732 = vmatpush3.msra.mxu1 %v7049_v38 }
 0x66c   : > { %11733 = vmatprep.subr.mxu1 %v18007_v31 }
 0x66d   : > { %11570 = vmatmul.mubr.msk.f32.gmra.mxu1 %vm5854_vm7, %v15939_v26  ;;  %v7046_v26 = vld [vmem:[#allocation7 + $0x118] sm:$0xff] }
 0x66e   : > { %11667 = vmatmul.mubr.msk.f32.gmra.mxu0 %vm5854_vm7, %v15973_v42  ;;  %11572 = vmatprep.mubr.msk.f32.mxu1 %vm12336_vm0, %v18007_v31  ;;  %v7043_v42 = vld [vmem:[#allocation7 + $0x100] sm:$0xff] }
 0x66f   : > { %11669 = vmatprep.mubr.msk.f32.mxu0 %vm12336_vm0, %v18007_v31  ;;  %11734 = vmatpush3.msra.mxu1 %v7048_v43 }
 0x670   : > { %11735 = vmatprep.subr.mxu1 %v18007_v31 }
 0x671   : > { %11573 = vmatmul.mubr.msk.f32.gmra.mxu1 %vm5854_vm7, %v15959_v30  ;;  %v7044_v30 = vld [vmem:[#allocation7 + $0x108] sm:$0xff] }
 0x672   : > { %11670 = vmatmul.mubr.msk.f32.gmra.mxu0 %vm5854_vm7, %v15992_v58  ;;  %11575 = vmatprep.mubr.msk.f32.mxu1 %vm12336_vm0, %v18007_v31 }
 0x673   : > { %11672 = vmatprep.mubr.msk.f32.mxu0 %vm12336_vm0, %v18007_v31  ;;  %11736 = vmatpush3.msra.mxu1 %v7047_v44 }
 0x674   : > { %11737 = vmatprep.subr.mxu1 %v18007_v31 }
 0x675   : > { %11576 = vmatmul.mubr.msk.f32.gmra.mxu1 %vm5854_vm7, %v15979_v56 }
 0x676   : > { %11673 = vmatmul.mubr.msk.f32.gmra.mxu0 %vm5854_vm7, %v16012_v28  ;;  %11578 = vmatprep.mubr.msk.f32.mxu1 %vm12336_vm0, %v18007_v31 }
 0x677   : > { %11675 = vmatprep.mubr.msk.f32.mxu0 %vm12336_vm0, %v18007_v31  ;;  %11738 = vmatpush3.msra.mxu1 %v7046_v26  ;;  %v18015_v26 = vld [vmem:[#allocation34_spill] sm:$0xff] }
 0x678   : > { %11739 = vmatprep.subr.mxu1 %v18007_v31 }
 0x679   : > { %11579 = vmatmul.mubr.msk.f32.gmra.mxu1 %vm5854_vm7, %v15995_v57  ;;  %v6714_v57 = vsel %vm3028_vm5, %v6710_v14, %v6663_v53 }
 0x67a   : > { %11676 = vmatmul.mubr.msk.f32.gmra.mxu0 %vm5854_vm7, %v16031_v3  ;;  %11581 = vmatprep.mubr.msk.f32.mxu1 %vm12336_vm0, %v18007_v31 }
 0x67b   : > { %11678 = vmatprep.mubr.msk.f32.mxu0 %vm12336_vm0, %v18007_v31  ;;  %11740 = vmatpush3.msra.mxu1 %v7045_v34 }
 0x67c   : > { %11741 = vmatprep.subr.mxu1 %v18007_v31 }
 0x67d   : > { %11582 = vmatmul.mubr.msk.f32.gmra.mxu1 %vm5854_vm7, %v16015_v12 }
 0x67e   : > { %11679 = vmatmul.mubr.msk.f32.gmra.mxu0 %vm5854_vm7, %v16049_v47  ;;  %11584 = vmatprep.mubr.msk.f32.mxu1 %vm12336_vm0, %v18007_v31 }
 0x67f   : > { %11681 = vmatprep.mubr.msk.f32.mxu0 %vm12336_vm0, %v18007_v31  ;;  %11742 = vmatpush3.msra.mxu1 %v7044_v30 }
 0x680   : > { %11743 = vmatprep.subr.mxu1 %v18007_v31 }
 0x681   : > { %11585 = vmatmul.mubr.msk.f32.gmra.mxu1 %vm5854_vm7, %v16034_v50 }
 0x682   : > { %11682 = vmatmul.mubr.msk.f32.gmra.mxu0 %vm5854_vm7, %v16068_v23  ;;  %11587 = vmatprep.mubr.msk.f32.mxu1 %vm12336_vm0, %v18007_v31 }
 0x683   : > { %11684 = vmatprep.mubr.msk.f32.mxu0 %vm12336_vm0, %v18007_v31  ;;  %11744 = vmatpush3.msra.mxu1 %v7043_v42 }
 0x685   : > { %11588 = vmatmul.mubr.msk.f32.gmra.mxu1 %vm5854_vm7, %v16052_v20 }
 0x686   : > { %11685 = vmatmul.mubr.msk.f32.gmra.mxu0 %vm5854_vm7, %v16086_v18  ;;  %11590 = vmatprep.mubr.msk.f32.mxu1 %vm12336_vm0, %v18007_v31 }
 0x687   : > { %11687 = vmatprep.mubr.msk.f32.mxu0 %vm12336_vm0, %v18007_v31 }
 0x689   : > { %11591 = vmatmul.mubr.msk.f32.gmra.mxu1 %vm5854_vm7, %v16071_v33  ;;  %v6387_v33 = vsel %vm2144_vm4, %v6383_v45, %v6336_v37 }
 0x68a   : > { %11688 = vmatmul.mubr.msk.f32.gmra.mxu0 %vm5854_vm7, %v16104_v29  ;;  %11593 = vmatprep.mubr.msk.f32.mxu1 %vm12336_vm0, %v18007_v31 }
 0x68b   : > { %11690 = vmatprep.mubr.msk.f32.mxu0 %vm12336_vm0, %v18007_v31 }
 0x68d   : > { %11594 = vmatmul.mubr.msk.f32.gmra.mxu1 %vm5854_vm7, %v16089_v59  ;;  %v6990_v59 = vrot.slane %v15869_v8, 4 }
 0x68e   : > { %11691 = vmatmul.mubr.msk.f32.gmra.mxu0 %vm5854_vm7, %v16122_v21  ;;  %11596 = vmatprep.mubr.msk.f32.mxu1 %vm12336_vm0, %v18007_v31 }
 0x68f   : > { %11693 = vmatprep.mubr.msk.f32.mxu0 %vm12336_vm0, %v18007_v31 }
 0x691   : > { %11597 = vmatmul.mubr.msk.f32.gmra.mxu1 %vm5854_vm7, %v16107_v11 }
 0x692   : > { %11694 = vmatmul.mubr.msk.f32.gmra.mxu0 %vm5854_vm7, %v16140_v17  ;;  %11599 = vmatprep.mubr.msk.f32.mxu1 %vm12336_vm0, %v18007_v31  ;;  %v18010_v17 = vrot.slane %v15876_v19, 4 }
 0x693   : > { %11696 = vmatprep.mubr.msk.f32.mxu0 %vm12336_vm0, %v18007_v31 }
 0x695   : > { %11600 = vmatmul.mubr.msk.f32.gmra.mxu1 %vm5854_vm7, %v16125_v32 }
 0x696   : > { %11697 = vmatmul.mubr.msk.f32.gmra.mxu0 %vm5854_vm7, %v16158_v2  ;;  %11602 = vmatprep.mubr.msk.f32.mxu1 %vm12336_vm0, %v18007_v31 }
 0x697   : > { %11699 = vmatprep.mubr.msk.f32.mxu0 %vm12336_vm0, %v18007_v31 }
 0x699   : > { %11603 = vmatmul.mubr.msk.f32.gmra.mxu1 %vm5854_vm7, %v16143_v4  ;;  %v6992_v4 = vsel %vm1035_vm1, %v6990_v59, %v18010_v17 }
 0x69a   : > { %11700 = vmatmul.mubr.msk.f32.gmra.mxu0 %vm5854_vm7, %v16176_v48  ;;  %11605 = vmatprep.mubr.msk.f32.mxu1 %vm12336_vm0, %v18007_v31 }
 0x69b   : > { %11702 = vmatprep.mubr.msk.f32.mxu0 %vm12336_vm0, %v18007_v31 }
 0x69d   : > { %11606 = vmatmul.mubr.msk.f32.gmra.mxu1 %vm5854_vm7, %v16161_v9 }
 0x69e   : > { %11703 = vmatmul.mubr.msk.f32.gmra.mxu0 %vm5854_vm7, %v16194_v62  ;;  %11608 = vmatprep.mubr.msk.f32.mxu1 %vm12336_vm0, %v18007_v31 }
 0x69f   : > { %11705 = vmatprep.mubr.msk.f32.mxu0 %vm12336_vm0, %v18007_v31 }
 0x6a1   : > { %11609 = vmatmul.mubr.msk.f32.gmra.mxu1 %vm5854_vm7, %v16179_v51 }
 0x6a2   : > { %11706 = vmatmul.mubr.msk.f32.gmra.mxu0 %vm5854_vm7, %v16212_v13  ;;  %11611 = vmatprep.mubr.msk.f32.mxu1 %vm12336_vm0, %v18007_v31  ;;  %v18011_v13 = vld [vmem:[#allocation32_spill] sm:$0xff] }
 0x6a3   : > { %11708 = vmatprep.mubr.msk.f32.mxu0 %vm12336_vm0, %v18007_v31 }
 0x6a5   : > { %11612 = vmatmul.mubr.msk.f32.gmra.mxu1 %vm5854_vm7, %v16197_v49 }
 0x6a6   : > { %11709 = vmatmul.mubr.msk.f32.gmra.mxu0 %vm5854_vm7, %v16230_v35  ;;  %11614 = vmatprep.mubr.msk.f32.mxu1 %vm12336_vm0, %v18007_v31 }
 0x6a7   : > { %11711 = vmatprep.mubr.msk.f32.mxu0 %vm12336_vm0, %v18007_v31 }
 0x6a9   : > { %11615 = vmatmul.mubr.msk.f32.gmra.mxu1 %vm5854_vm7, %v16215_v40 }
 0x6aa   : > { %11712 = vmatmul.mubr.msk.f32.gmra.mxu0 %vm5854_vm7, %v16248_v15  ;;  %11617 = vmatprep.mubr.msk.f32.mxu1 %vm12336_vm0, %v18007_v31 }
 0x6ab   : > { %11714 = vmatprep.mubr.msk.f32.mxu0 %vm12336_vm0, %v18007_v31 }
 0x6ad   : > { %11618 = vmatmul.mubr.msk.f32.gmra.mxu1 %vm5854_vm7, %v16233_v25 }
 0x6ae   : > { %11715 = vmatmul.mubr.msk.f32.gmra.mxu0 %vm5854_vm7, %v16266_v41  ;;  %11620 = vmatprep.mubr.msk.f32.mxu1 %vm12336_vm0, %v18007_v31 }
 0x6af   : > { %11717 = vmatprep.mubr.msk.f32.mxu0 %vm12336_vm0, %v18007_v31 }
 0x6b1   : > { %11621 = vmatmul.mubr.msk.f32.gmra.mxu1 %vm5854_vm7, %v16251_v10  ;;  %v18012_v10 = vld [vmem:[#allocation33_spill] sm:$0xff] }
 0x6b2   : > { %11718 = vmatmul.mubr.msk.f32.gmra.mxu0 %vm5854_vm7, %v16284_v16  ;;  %11623 = vmatprep.mubr.msk.f32.mxu1 %vm12336_vm0, %v18007_v31 }
 0x6b3   : > { %11720 = vmatprep.mubr.msk.f32.mxu0 %vm12336_vm0, %v18007_v31 }
 0x6b5   : > { %11624 = vmatmul.mubr.msk.f32.gmra.mxu1 %vm5854_vm7, %v16269_v63 }
 0x6b6   : > { %11721 = vmatmul.mubr.msk.f32.gmra.mxu0 %vm5854_vm7, %v16304_v36  ;;  %11626 = vmatprep.mubr.msk.f32.mxu1 %vm12336_vm0, %v18007_v31 }
 0x6b7   : > { %11723 = vmatprep.mubr.msk.f32.mxu0 %vm12336_vm0, %v18007_v31 }
 0x6b9   : > { %11627 = vmatmul.mubr.msk.f32.gmra.mxu1 %vm5854_vm7, %v16287_v1 }
 0x6ba   : > { %v6212_v56 = vpop.f32.mrf.mxu0  ;;  %11724 = vmatmul.mubr.msk.f32.gmra.mxu0 %vm5854_vm7, %v16328_v24  ;;  %11629 = vmatprep.mubr.msk.f32.mxu1 %vm12336_vm0, %v18007_v31 }
 0x6bb   : > { %11726 = vmatprep.mubr.msk.f32.mxu0 %vm12336_vm0, %v18007_v31 }
 0x6bc   : > { %v11474_v58 = vpop.f32.mrf.mxu0 }
 0x6bd   : > { %11630 = vmatmul.mubr.msk.f32.gmra.mxu1 %vm5854_vm7, %v16307_v46  ;;  %v18013_v46 = vld [vmem:[#allocation31_spill] sm:$0xff] }
 0x6be   : > { %v6217_v28 = vpop.f32.mrf.mxu0  ;;  %11727 = vmatmul.mubr.msk.f32.gmra.mxu0 %vm5854_vm7, %v6714_v57  ;;  %11632 = vmatprep.mubr.msk.f32.mxu1 %vm12336_vm0, %v18007_v31  ;;  %v18016_v57 = vld [vmem:[#allocation29_spill] sm:$0xff] }
 0x6c0   : > { %v11477_v12 = vpop.f32.mrf.mxu0 }
 0x6c1   : > { %v5972_v3 = vpop.f32.mrf.mxu1  ;;  %11633 = vmatmul.mubr.msk.f32.gmra.mxu1 %vm5854_vm7, %v16339_v6 }
 0x6c2   : > { %v16561_v50 = vadd.f32 %v6212_v56, %v5972_v3  ;;  %v6222_v47 = vpop.f32.mrf.mxu0  ;;  %11635 = vmatprep.mubr.msk.f32.mxu1 %vm12336_vm0, %v18007_v31 }
 0x6c3   : > { %v11383_v20 = vpop.f32.mrf.mxu1 }
 0x6c4   : > { %v11480_v23 = vpop.f32.mrf.mxu0 }
 0x6c5   : > { %v5977_v18 = vpop.f32.mrf.mxu1  ;;  %11636 = vmatmul.mubr.msk.f32.gmra.mxu1 %vm5854_vm7, %v6387_v33 }
 0x6c6   : > { %v16572_v29 = vadd.f32 %v6217_v28, %v5977_v18  ;;  %v6227_v11 = vpop.f32.mrf.mxu0  ;;  %11745 = vmatprep.mubr.msk.f32.mxu1 %vm12336_vm0, %v18007_v31 }
 0x6c7   : > { %v11386_v21 = vpop.f32.mrf.mxu1 }
 0x6c8   : > { %v11483_v32 = vpop.f32.mrf.mxu0 }
 0x6c9   : > { %v5982_v2 = vpop.f32.mrf.mxu1  ;;  %11746 = vmatmul.mubr.msk.f32.vlgmr.msra.gmra.mxu1 %vm5854_vm7, %v6992_v4  ;;  %v18017_v32 = vld [vmem:[#allocation28_spill] sm:$0xff] }
 0x6ca   : > { %v16582_v9 = vadd.f32 %v6222_v47, %v5982_v2  ;;  %v6232_v48 = vpop.f32.mrf.mxu0  ;;  %11748 = vmatprep.mubr.msk.f32.mxu1 %vm12336_vm0, %v18007_v31 }
 0x6cb   : > { %v11389_v51 = vpop.f32.mrf.mxu1 }
 0x6cc   : > { %v11486_v62 = vpop.f32.mrf.mxu0  ;;  %v18018_v51 = vld [vmem:[#allocation35_spill] sm:$0xff] }
 0x6cd   : > { %v5987_v49 = vpop.f32.mrf.mxu1  ;;  %11749 = vmatmul.mubr.msk.f32.gmra.mxu1 %vm5854_vm7, %v18011_v13 }
 0x6ce   : > { %v16588_v19 = vadd.f32 %v6227_v11, %v5987_v49  ;;  %v6237_v40 = vpop.f32.mrf.mxu0  ;;  %11751 = vmatprep.mubr.msk.f32.mxu1 %vm12336_vm0, %v18007_v31 }
 0x6cf   : > { %v11392_v35 = vpop.f32.mrf.mxu1 }
 0x6d0   : > { %v11489_v25 = vpop.f32.mrf.mxu0 }
 0x6d1   : > { %v5992_v15 = vpop.f32.mrf.mxu1  ;;  %11752 = vmatmul.mubr.msk.f32.gmra.mxu1 %vm5854_vm7, %v18012_v10  ;;  %v18019_v25 = vld [vmem:[#allocation27_spill] sm:$0xff] }
 0x6d2   : > { %v16594_v41 = vadd.f32 %v6232_v48, %v5992_v15  ;;  %v6242_v63 = vpop.f32.mrf.mxu0  ;;  %11754 = vmatprep.mubr.msk.f32.mxu1 %vm12336_vm0, %v18007_v31 }
 0x6d3   : > { %v11395_v16 = vpop.f32.mrf.mxu1 }
 0x6d4   : > { %v11492_v1 = vpop.f32.mrf.mxu0 }
 0x6d5   : > { %v5997_v36 = vpop.f32.mrf.mxu1  ;;  %11755 = vmatmul.mubr.msk.f32.gmra.mxu1 %vm5854_vm7, %v18013_v46 }
 0x6d6   : > { %v16600_v14 = vadd.f32 %v6237_v40, %v5997_v36  ;;  %v6247_v45 = vpop.f32.mrf.mxu0  ;;  %11757 = vmatprep.mubr.msk.f32.mxu1 %vm12336_vm0, %v18007_v31  ;;  %v18020_v36 = vld [vmem:[#allocation26_spill] sm:$0xff] }
 0x6d7   : > { %v11398_v6 = vpop.f32.mrf.mxu1 }
 0x6d8   : > { %v11495_v53 = vpop.f32.mrf.mxu0 }
 0x6d9   : > { %v6002_v24 = vpop.f32.mrf.mxu1  ;;  %11758 = vmatmul.mubr.msk.f32.gmra.mxu1 %vm5854_vm7, %v15982_v22 }
 0x6da   : > { %v16606_v39 = vadd.f32 %v6242_v63, %v6002_v24  ;;  %v6252_v61 = vpop.f32.mrf.mxu0  ;;  %11760 = vmatprep.mubr.msk.f32.mxu1 %vm12336_vm0, %v18007_v31 }
 0x6db   : > { %v11401_v54 = vpop.f32.mrf.mxu1 }
 0x6dc   : > { %v11498_v37 = vpop.f32.mrf.mxu0 }
 0x6dd   : > { %v6007_v60 = vpop.f32.mrf.mxu1  ;;  %11761 = vmatmul.mubr.msk.f32.gmra.mxu1 %vm5854_vm7, %v18014_v55 }
 0x6de   : > { %v16612_v5 = vadd.f32 %v6247_v45, %v6007_v60  ;;  %v6257_v38 = vpop.f32.mrf.mxu0  ;;  %11763 = vmatprep.mubr.msk.f32.mxu1 %vm12336_vm0, %v18007_v31 }
 0x6df   : > { %v11404_v43 = vpop.f32.mrf.mxu1 }
 0x6e0   : > { %v11501_v22 = vpop.f32.mrf.mxu0  ;;  %v18022_v43 = vld [vmem:[#allocation25_spill] sm:$0xff] }
 0x6e1   : > { %v6012_v44 = vpop.f32.mrf.mxu1  ;;  %11764 = vmatmul.mubr.msk.f32.gmra.mxu1 %vm5854_vm7, %v18015_v26 }
 0x6e2   : > { %v16618_v34 = vadd.f32 %v6252_v61, %v6012_v44  ;;  %v6262_v30 = vpop.f32.mrf.mxu0  ;;  %11766 = vmatprep.mubr.msk.f32.mxu1 %vm12336_vm0, %v18007_v31  ;;  %v18021_v61 = vld [vmem:[#allocation36_spill] sm:$0xff] }
 0x6e3   : > { %v11407_v42 = vpop.f32.mrf.mxu1 }
 0x6e4   : > { %v11504_v56 = vpop.f32.mrf.mxu0 }
 0x6e5   : > { %v6017_v58 = vpop.f32.mrf.mxu1  ;;  %11767 = vmatmul.mubr.msk.f32.gmra.mxu1 %vm5854_vm7, %v18016_v57  ;;  %v18023_v56 = vld [vmem:[#allocation24_spill] sm:$0xff] }
 0x6e6   : > { %v16624_v28 = vadd.f32 %v6257_v38, %v6017_v58  ;;  %v6267_v12 = vpop.f32.mrf.mxu0  ;;  %11769 = vmatprep.mubr.msk.f32.mxu1 %vm12336_vm0, %v18007_v31 }
 0x6e7   : > { %v11410_v3 = vpop.f32.mrf.mxu1 }
 0x6e8   : > { %v11507_v47 = vpop.f32.mrf.mxu0 }
 0x6e9   : > { %v6022_v20 = vpop.f32.mrf.mxu1  ;;  %11770 = vmatmul.mubr.msk.f32.gmra.mxu1 %vm5854_vm7, %v16059_v52 }
 0x6ea   : > { %v16630_v23 = vadd.f32 %v6262_v30, %v6022_v20  ;;  %v6272_v33 = vpop.f32.mrf.mxu0  ;;  %11772 = vmatprep.mubr.msk.f32.mxu1 %vm12336_vm0, %v18007_v31  ;;  %v18024_v20 = vld [vmem:[#allocation37_spill] sm:$0xff] }
 0x6eb   : > { %v11413_v18 = vpop.f32.mrf.mxu1 }
 0x6ec   : > { %v11510_v11 = vpop.f32.mrf.mxu0 }
 0x6ed   : > { %v6027_v21 = vpop.f32.mrf.mxu1  ;;  %11773 = vmatmul.mubr.msk.f32.gmra.mxu1 %vm5854_vm7, %v18017_v32 }
 0x6ee   : > { %v16636_v17 = vadd.f32 %v6267_v12, %v6027_v21  ;;  %v6277_v4 = vpop.f32.mrf.mxu0  ;;  %11775 = vmatprep.mubr.msk.f32.mxu1 %vm12336_vm0, %v18007_v31 }
 0x6ef   : > { %v11416_v2 = vpop.f32.mrf.mxu1 }
 0x6f0   : > { %v11513_v52 = vpop.f32.mrf.mxu0 }
 0x6f1   : > { %v6032_v48 = vpop.f32.mrf.mxu1  ;;  %11776 = vmatmul.mubr.msk.f32.gmra.mxu1 %vm5854_vm7, %v18018_v51 }
 0x6f2   : > { %v16642_v62 = vadd.f32 %v6272_v33, %v6032_v48  ;;  %v6282_v49 = vpop.f32.mrf.mxu0  ;;  %11778 = vmatprep.mubr.msk.f32.mxu1 %vm12336_vm0, %v18007_v31 }
 0x6f3   : > { %v11419_v13 = vpop.f32.mrf.mxu1 }
 0x6f4   : > { %v11516_v40 = vpop.f32.mrf.mxu0  ;;  %v18026_v13 = vld [vmem:[#allocation48_spill] sm:$0xff] }
 0x6f5   : > { %v6037_v35 = vpop.f32.mrf.mxu1  ;;  %11779 = vmatmul.mubr.msk.f32.gmra.mxu1 %vm5854_vm7, %v18019_v25 }
 0x6f6   : > { %v16648_v15 = vadd.f32 %v6277_v4, %v6037_v35  ;;  %v6287_v10 = vpop.f32.mrf.mxu0  ;;  %11781 = vmatprep.mubr.msk.f32.mxu1 %vm12336_vm0, %v18007_v31  ;;  %v18025_v4 = vld [vmem:[#allocation38_spill] sm:$0xff] }
 0x6f7   : > { %v11422_v63 = vpop.f32.mrf.mxu1 }
 0x6f8   : > { %v11519_v16 = vpop.f32.mrf.mxu0 }
 0x6f9   : > { %v6042_v1 = vpop.f32.mrf.mxu1  ;;  %11782 = vmatmul.mubr.msk.f32.gmra.mxu1 %vm5854_vm7, %v18020_v36  ;;  %v18027_v16 = vld [vmem:[#allocation47_spill] sm:$0xff] }
 0x6fa   : > { %v16654_v46 = vadd.f32 %v6282_v49, %v6042_v1  ;;  %v6292_v45 = vpop.f32.mrf.mxu0  ;;  %11784 = vmatprep.mubr.msk.f32.mxu1 %vm12336_vm0, %v18007_v31 }
 0x6fb   : > { %v11425_v6 = vpop.f32.mrf.mxu1 }
 0x6fc   : > { %v11522_v53 = vpop.f32.mrf.mxu0 }
 0x6fd   : > { %v6047_v24 = vpop.f32.mrf.mxu1  ;;  %11785 = vmatmul.mubr.msk.f32.gmra.mxu1 %vm5854_vm7, %v18021_v61 }
 0x6fe   : > { %v16660_v54 = vadd.f32 %v6287_v10, %v6047_v24  ;;  %v6297_v37 = vpop.f32.mrf.mxu0  ;;  %11787 = vmatprep.mubr.msk.f32.mxu1 %vm12336_vm0, %v18007_v31  ;;  %v18028_v24 = vld [vmem:[#allocation49_spill] sm:$0xff] }
 0x6ff   : > { %v11428_v60 = vpop.f32.mrf.mxu1 }
 0x700   : > { %v11525_v55 = vpop.f32.mrf.mxu0 }
 0x701   : > { %v6052_v38 = vpop.f32.mrf.mxu1  ;;  %11788 = vmatmul.mubr.msk.f32.gmra.mxu1 %vm5854_vm7, %v18022_v43  ;;  %v18029_v43 = vld [vmem:[#allocation46_spill] sm:$0xff] }
 0x702   : > { %v16666_v22 = vadd.f32 %v6292_v45, %v6052_v38  ;;  %v6302_v44 = vpop.f32.mrf.mxu0  ;;  %11790 = vmatprep.mubr.msk.f32.mxu1 %vm12336_vm0, %v18007_v31 }
 0x703   : > { %v11431_v26 = vpop.f32.mrf.mxu1 }
 0x704   : > { %v11528_v30 = vpop.f32.mrf.mxu0 }
 0x705   : > { %v6057_v42 = vpop.f32.mrf.mxu1  ;;  %11791 = vmatmul.mubr.msk.f32.gmra.mxu1 %vm5854_vm7, %v18023_v56 }
 0x706   : > { %v16672_v58 = vadd.f32 %v6297_v37, %v6057_v42  ;;  %v6307_v57 = vpop.f32.mrf.mxu0  ;;  %11793 = vmatprep.mubr.msk.f32.mxu1 %vm12336_vm0, %v18007_v31 }
 0x707   : > { %v11434_v12 = vpop.f32.mrf.mxu1 }
 0x708   : > { %v11531_v3 = vpop.f32.mrf.mxu0 }
 0x709   : > { %v6062_v47 = vpop.f32.mrf.mxu1  ;;  %11794 = vmatmul.mubr.msk.f32.gmra.mxu1 %vm5854_vm7, %v18024_v20 }
 0x70a   : > { %v16678_v33 = vadd.f32 %v6302_v44, %v6062_v47  ;;  %v6312_v18 = vpop.f32.mrf.mxu0  ;;  %11796 = vmatprep.mubr.msk.f32.mxu1 %vm12336_vm0, %v18007_v31 }
 0x70b   : > { %v11437_v11 = vpop.f32.mrf.mxu1 }
 0x70c   : > { %v11534_v21 = vpop.f32.mrf.mxu0 }
 0x70d   : > { %v6067_v32 = vpop.f32.mrf.mxu1  ;;  %11797 = vmatmul.mubr.msk.f32.gmra.mxu1 %vm5854_vm7, %v18025_v4 }
 0x70e   : > { %v16684_v2 = vadd.f32 %v6307_v57, %v6067_v32  ;;  %v6317_v52 = vpop.f32.mrf.mxu0  ;;  %11799 = vmatprep.mubr.msk.f32.mxu1 %vm12336_vm0, %v18007_v31  ;;  %v18030_v32 = vrot.slane %v16300_v7, 4 }
 0x70f   : > { %v11440_v48 = vpop.f32.mrf.mxu1 }
 0x710   : > { %v11537_v51 = vpop.f32.mrf.mxu0  ;;  %v7041_v4 = vsel %vm1035_vm1, %v18030_v32, %v6990_v59 }
 0x711   : > { %v6072_v49 = vpop.f32.mrf.mxu1  ;;  %11800 = vmatmul.mubr.msk.f32.gmra.mxu1 %vm5854_vm7, %v18026_v13 }
 0x712   : > { %v16690_v40 = vadd.f32 %v6312_v18, %v6072_v49  ;;  %v6322_v35 = vpop.f32.mrf.mxu0  ;;  %11802 = vmatprep.mubr.msk.f32.mxu1 %vm12336_vm0, %v18007_v31 }
 0x713   : > { %v11443_v25 = vpop.f32.mrf.mxu1 }
 0x714   : > { %v11540_v10 = vpop.f32.mrf.mxu0 }
 0x715   : > { %v6077_v63 = vpop.f32.mrf.mxu1  ;;  %11803 = vmatmul.mubr.msk.f32.gmra.mxu1 %vm5854_vm7, %v18027_v16 }
 0x716   : > { %v16696_v1 = vadd.f32 %v6317_v52, %v6077_v63  ;;  %v6327_v36 = vpop.f32.mrf.mxu0  ;;  %11805 = vmatprep.mubr.msk.f32.mxu1 %vm12336_vm0, %v18007_v31 }
 0x717   : > { %v11446_v45 = vpop.f32.mrf.mxu1 }
 0x718   : > { %v11543_v6 = vpop.f32.mrf.mxu0 }
 0x719   : > { %v6082_v53 = vpop.f32.mrf.mxu1  ;;  %11806 = vmatmul.mubr.msk.f32.gmra.mxu1 %vm5854_vm7, %v18028_v24 }
 0x71a   : > { %v16702_v61 = vadd.f32 %v6322_v35, %v6082_v53  ;;  %v6332_v37 = vpop.f32.mrf.mxu0  ;;  %11808 = vmatprep.mubr.msk.f32.mxu1 %vm12336_vm0, %v18007_v31 }
 0x71b   : > { %v11449_v60 = vpop.f32.mrf.mxu1 }
 0x71c   : > { %v11546_v55 = vpop.f32.mrf.mxu0 }
 0x71d   : > { %v6087_v38 = vpop.f32.mrf.mxu1  ;;  %11809 = vmatmul.mubr.msk.f32.gmra.mxu1 %vm5854_vm7, %v18029_v43 }
 0x71e   : > { %v16708_v44 = vadd.f32 %v6327_v36, %v6087_v38  ;;  %v6841_v26 = vpop.f32.mrf.mxu0  ;;  %11811 = vmatprep.mubr.msk.f32.mxu1 %vm12336_vm0, %v18007_v31 }
 0x71f   : > { %v11452_v30 = vpop.f32.mrf.mxu1 }
 0x720   : > { %v11656_v42 = vpop.f32.mrf.mxu0 }
 0x721   : > { %v6092_v56 = vpop.f32.mrf.mxu1  ;;  %11812 = vmatmul.mubr.msk.f32.gmra.mxu1 %vm5854_vm7, %v16311_v27 }
 0x722   : > { %v16714_v57 = vadd.f32 %v6332_v37, %v6092_v56  ;;  %v6846_v12 = vpop.f32.mrf.mxu0  ;;  %11814 = vmatprep.mubr.msk.f32.mxu1 %vm12336_vm0, %v18007_v31 }
 0x723   : > { %v11455_v3 = vpop.f32.mrf.mxu1 }
 0x724   : > { %v11659_v47 = vpop.f32.mrf.mxu0 }
 0x725   : > { %v6514_v20 = vpop.f32.mrf.mxu1  ;;  %11815 = vmatmul.mubr.msk.f32.gmra.mxu1 %vm5854_vm7, %v16344_v0 }
 0x726   : > { %v6638_v18 = vadd.f32 %v6514_v20, %v16561_v50  ;;  %v6851_v11 = vpop.f32.mrf.mxu0  ;;  %11817 = vmatprep.mubr.msk.f32.mxu1 %vm12336_vm0, %v18007_v31 }
 0x727   : > { %v11565_v21 = vpop.f32.mrf.mxu1 }
 0x728   : > { %v11662_v27 = vpop.f32.mrf.mxu0  ;;  %v16728_v52 = vadd.f32 %v6841_v26, %v6638_v18 }
 0x729   : > { %v6519_v48 = vpop.f32.mrf.mxu1  ;;  %11818 = vmatmul.mubr.msk.f32.gmra.mxu1 %vm5854_vm7, %v7041_v4 }
 0x72a   : > { %v6639_v0 = vadd.f32 %v6519_v48, %v16572_v29  ;;  %v6856_v50 = vpop.f32.mrf.mxu0  ;;  %7937 = vmatprep.mubr.f32.mxu1 %v18007_v31 }
 0x72b   : > { %v11568_v51 = vpop.f32.mrf.mxu1 }
 0x72c   : > { %v11665_v49 = vpop.f32.mrf.mxu0  ;;  %v16733_v13 = vadd.f32 %v6846_v12, %v6639_v0 }
 0x72d   : > { %v6524_v35 = vpop.f32.mrf.mxu1 }
 0x72e   : > { %v6640_v8 = vadd.f32 %v6524_v35, %v16582_v9  ;;  %v6861_v7 = vpop.f32.mrf.mxu0 }
 0x72f   : > { %v11571_v25 = vpop.f32.mrf.mxu1 }
 0x730   : > { %v11668_v59 = vpop.f32.mrf.mxu0  ;;  %v16736_v10 = vadd.f32 %v6851_v11, %v6640_v8 }
 0x731   : > { %v6529_v63 = vpop.f32.mrf.mxu1 }
 0x732   : > { %v6641_v16 = vadd.f32 %v6529_v63, %v16588_v19  ;;  %v6866_v36 = vpop.f32.mrf.mxu0 }
 0x733   : > { %v11574_v29 = vpop.f32.mrf.mxu1 }
 0x734   : > { %v11671_v45 = vpop.f32.mrf.mxu0  ;;  %v16739_v6 = vadd.f32 %v6856_v50, %v6641_v16 }
 0x735   : > { %v6534_v53 = vpop.f32.mrf.mxu1 }
 0x736   : > { %v6642_v24 = vadd.f32 %v6534_v53, %v16594_v41  ;;  %v6871_v37 = vpop.f32.mrf.mxu0 }
 0x737   : > { %v11577_v60 = vpop.f32.mrf.mxu1 }
 0x738   : > { %v11674_v55 = vpop.f32.mrf.mxu0  ;;  %v16742_v9 = vadd.f32 %v6861_v7, %v6642_v24 }
 0x739   : > { %v6539_v38 = vpop.f32.mrf.mxu1 }
 0x73a   : > { %v6643_v43 = vadd.f32 %v6539_v38, %v16600_v14  ;;  %v6876_v26 = vpop.f32.mrf.mxu0 }
 0x73b   : > { %v11580_v30 = vpop.f32.mrf.mxu1 }
 0x73c   : > { %v11677_v42 = vpop.f32.mrf.mxu0  ;;  %v16745_v19 = vadd.f32 %v6866_v36, %v6643_v43 }
 0x73d   : > { %v6544_v56 = vpop.f32.mrf.mxu1 }
 0x73e   : > { %v6644_v12 = vadd.f32 %v6544_v56, %v16606_v39  ;;  %v6881_v3 = vpop.f32.mrf.mxu0 }
 0x73f   : > { %v11583_v47 = vpop.f32.mrf.mxu1 }
 0x740   : > { %v11680_v20 = vpop.f32.mrf.mxu0  ;;  %v16748_v41 = vadd.f32 %v6871_v37, %v6644_v12 }
 0x741   : > { %v6549_v18 = vpop.f32.mrf.mxu1 }
 0x742   : > { %v6645_v11 = vadd.f32 %v6549_v18, %v16612_v5  ;;  %v6886_v21 = vpop.f32.mrf.mxu0 }
 0x743   : > { %v11586_v27 = vpop.f32.mrf.mxu1 }
 0x744   : > { %v11683_v32 = vpop.f32.mrf.mxu0  ;;  %v16751_v14 = vadd.f32 %v6876_v26, %v6645_v11 }
 0x745   : > { %v6554_v4 = vpop.f32.mrf.mxu1 }
 0x746   : > { %v6646_v48 = vadd.f32 %v6554_v4, %v16618_v34  ;;  %v6891_v0 = vpop.f32.mrf.mxu0 }
 0x747   : > { %v11589_v50 = vpop.f32.mrf.mxu1 }
 0x748   : > { %v11686_v51 = vpop.f32.mrf.mxu0  ;;  %v16754_v39 = vadd.f32 %v6881_v3, %v6646_v48 }
 0x749   : > { %v6559_v49 = vpop.f32.mrf.mxu1 }
 0x74a   : > { %v6647_v35 = vadd.f32 %v6559_v49, %v16624_v28  ;;  %v6896_v8 = vpop.f32.mrf.mxu0 }
 0x74b   : > { %v11592_v7 = vpop.f32.mrf.mxu1 }
 0x74c   : > { %v11689_v25 = vpop.f32.mrf.mxu0  ;;  %v16757_v5 = vadd.f32 %v6886_v21, %v6647_v35 }
 0x74d   : > { %v6564_v59 = vpop.f32.mrf.mxu1 }
 0x74e   : > { %v6648_v63 = vadd.f32 %v6564_v59, %v16630_v23  ;;  %v6901_v16 = vpop.f32.mrf.mxu0 }
 0x74f   : > { %v11595_v36 = vpop.f32.mrf.mxu1 }
 0x750   : > { %v11692_v29 = vpop.f32.mrf.mxu0  ;;  %v16760_v34 = vadd.f32 %v6891_v0, %v6648_v63 }
 0x751   : > { %v6569_v45 = vpop.f32.mrf.mxu1 }
 0x752   : > { %v6649_v53 = vadd.f32 %v6569_v45, %v16636_v17  ;;  %v6906_v24 = vpop.f32.mrf.mxu0 }
 0x753   : > { %v11598_v37 = vpop.f32.mrf.mxu1 }
 0x754   : > { %v11695_v60 = vpop.f32.mrf.mxu0  ;;  %v16763_v28 = vadd.f32 %v6896_v8, %v6649_v53 }
 0x755   : > { %v6574_v55 = vpop.f32.mrf.mxu1 }
 0x756   : > { %v6650_v38 = vadd.f32 %v6574_v55, %v16642_v62  ;;  %v6911_v43 = vpop.f32.mrf.mxu0 }
 0x757   : > { %v11601_v26 = vpop.f32.mrf.mxu1 }
 0x758   : > { %v11698_v30 = vpop.f32.mrf.mxu0  ;;  %v16766_v23 = vadd.f32 %v6901_v16, %v6650_v38 }
 0x759   : > { %v6579_v42 = vpop.f32.mrf.mxu1 }
 0x75a   : > { %v6651_v56 = vadd.f32 %v6579_v42, %v16648_v15  ;;  %v6916_v12 = vpop.f32.mrf.mxu0 }
 0x75b   : > { %v11604_v3 = vpop.f32.mrf.mxu1 }
 0x75c   : > { %v11701_v47 = vpop.f32.mrf.mxu0  ;;  %v16769_v17 = vadd.f32 %v6906_v24, %v6651_v56 }
 0x75d   : > { %v6584_v20 = vpop.f32.mrf.mxu1 }
 0x75e   : > { %v6652_v18 = vadd.f32 %v6584_v20, %v16654_v46  ;;  %v6921_v11 = vpop.f32.mrf.mxu0 }
 0x75f   : > { %v11607_v21 = vpop.f32.mrf.mxu1 }
 0x760   : > { %v11704_v27 = vpop.f32.mrf.mxu0  ;;  %v16772_v62 = vadd.f32 %v6911_v43, %v6652_v18 }
 0x761   : > { %v6589_v32 = vpop.f32.mrf.mxu1 }
 0x762   : > { %v6653_v4 = vadd.f32 %v6589_v32, %v16660_v54  ;;  %v6926_v48 = vpop.f32.mrf.mxu0 }
 0x763   : > { %v11610_v0 = vpop.f32.mrf.mxu1 }
 0x764   : > { %v11707_v50 = vpop.f32.mrf.mxu0  ;;  %v16775_v15 = vadd.f32 %v6916_v12, %v6653_v4 }
 0x765   : > { %v6594_v51 = vpop.f32.mrf.mxu1  ;;  %v7375_v50 = vld [vmem:[#allocation5 + $0x8] sm:$0xff] }
 0x766   : > { %v6654_v49 = vadd.f32 %v6594_v51, %v16666_v22  ;;  %v6931_v35 = vpop.f32.mrf.mxu0  ;;  %9371 = vmatprep.mubr.msk.f32.mxu0 %vm7388_vm8, %v7375_v50 }
 0x767   : > { %v11613_v8 = vpop.f32.mrf.mxu1 }
 0x768   : > { %v11710_v7 = vpop.f32.mrf.mxu0  ;;  %v16778_v46 = vadd.f32 %v6921_v11, %v6654_v49 }
 0x769   : > { %v6599_v25 = vpop.f32.mrf.mxu1 }
 0x76a   : > { %v6655_v59 = vadd.f32 %v6599_v25, %v16672_v58  ;;  %v6936_v63 = vpop.f32.mrf.mxu0 }
 0x76b   : > { %v11616_v16 = vpop.f32.mrf.mxu1 }
 0x76c   : > { %v11713_v36 = vpop.f32.mrf.mxu0  ;;  %v16781_v54 = vadd.f32 %v6926_v48, %v6655_v59 }
 0x76d   : > { %v6604_v29 = vpop.f32.mrf.mxu1 }
 0x76e   : > { %v6656_v45 = vadd.f32 %v6604_v29, %v16678_v33  ;;  %v6941_v53 = vpop.f32.mrf.mxu0 }
 0x76f   : > { %v11619_v24 = vpop.f32.mrf.mxu1 }
 0x770   : > { %v11716_v37 = vpop.f32.mrf.mxu0  ;;  %v16784_v22 = vadd.f32 %v6931_v35, %v6656_v45 }
 0x771   : > { %v6609_v60 = vpop.f32.mrf.mxu1 }
 0x772   : > { %v6657_v55 = vadd.f32 %v6609_v60, %v16684_v2  ;;  %v6946_v38 = vpop.f32.mrf.mxu0 }
 0x773   : > { %v11622_v43 = vpop.f32.mrf.mxu1 }
 0x774   : > { %v11719_v26 = vpop.f32.mrf.mxu0  ;;  %v16787_v58 = vadd.f32 %v6936_v63, %v6657_v55 }
 0x775   : > { %v6614_v30 = vpop.f32.mrf.mxu1 }
 0x776   : > { %v6658_v42 = vadd.f32 %v6614_v30, %v16690_v40  ;;  %v6951_v56 = vpop.f32.mrf.mxu0 }
 0x777   : > { %v11625_v12 = vpop.f32.mrf.mxu1 }
 0x778   : > { %v11722_v3 = vpop.f32.mrf.mxu0  ;;  %v16790_v33 = vadd.f32 %v6941_v53, %v6658_v42 }
 0x779   : > { %v6619_v47 = vpop.f32.mrf.mxu1 }
 0x77a   : > { %v6659_v20 = vadd.f32 %v6619_v47, %v16696_v1  ;;  %v6956_v18 = vpop.f32.mrf.mxu0 }
 0x77b   : > { %v11628_v11 = vpop.f32.mrf.mxu1 }
 0x77c   : > { %v11725_v21 = vpop.f32.mrf.mxu0  ;;  %v16793_v2 = vadd.f32 %v6946_v38, %v6659_v20 }
 0x77d   : > { %v6624_v27 = vpop.f32.mrf.mxu1 }
 0x77e   : > { %v6660_v32 = vadd.f32 %v6624_v27, %v16702_v61  ;;  %v6961_v4 = vpop.f32.mrf.mxu0 }
 0x77f   : > { %v11631_v48 = vpop.f32.mrf.mxu1 }
 0x780   : > { %v11728_v0 = vpop.f32.mrf.mxu0  ;;  %v16796_v40 = vadd.f32 %v6951_v56, %v6660_v32 }
 0x781   : > { %v6629_v51 = vpop.f32.mrf.mxu1 }
 0x782   : > { %v6661_v1 = vadd.f32 %v6629_v51, %v16708_v44 }
 0x783   : > { %v11634_v49 = vpop.f32.mrf.mxu1 }
 0x784   : > { %v16800_v35 = vadd.f32 %v6956_v18, %v6661_v1  ;;  %v16828_v49 = vld [vmem:[%s17769_s7] ss:$0 sm:$0xff] }
 0x785   : > { %v6634_v8 = vpop.f32.mrf.mxu1 }
 0x786   : > { %v6662_v7 = vadd.f32 %v6634_v8, %v16714_v57 }
 0x787   : > { %v11637_v25 = vpop.f32.mrf.mxu1 }
 0x788   : > { %v16803_v61 = vadd.f32 %v6961_v4, %v6662_v7 }
 0x789   : > { %v7168_v59 = vpop.f32.mrf.mxu1 }
 0x78a   : > { %v16806_v63 = vadd.f32 %v7168_v59, %v16728_v52 }
 0x78b   : > { %v11747_v16 = vpop.f32.mrf.mxu1 }
 0x78d   : > { %v7173_v36 = vpop.f32.mrf.mxu1 }
 0x78e   : > { %v16809_v29 = vadd.f32 %v7173_v36, %v16733_v13 }
 0x78f   : > { %v11750_v45 = vpop.f32.mrf.mxu1 }
 0x791   : > { %v7178_v44 = vpop.f32.mrf.mxu1 }
 0x792   : > { %v16812_v53 = vadd.f32 %v7178_v44, %v16736_v10 }
 0x793   : > { %v11753_v24 = vpop.f32.mrf.mxu1 }
 0x795   : > { %v7183_v37 = vpop.f32.mrf.mxu1 }
 0x796   : > { %v16815_v57 = vadd.f32 %v7183_v37, %v16739_v6 }
 0x797   : > { %v11756_v60 = vpop.f32.mrf.mxu1 }
 0x799   : > { %v7188_v55 = vpop.f32.mrf.mxu1 }
 0x79a   : > { %v16818_v52 = vadd.f32 %v7188_v55, %v16742_v9 }
 0x79b   : > { %v11759_v38 = vpop.f32.mrf.mxu1 }
 0x79d   : > { %v16820_v43 = vpop.f32.mrf.mxu1 }
 0x79f   : > { %v11762_v13 = vpop.f32.mrf.mxu1 }
 0x7a1   : > { %v7198_v26 = vpop.f32.mrf.mxu1 }
 0x7a3   : > { %v11765_v30 = vpop.f32.mrf.mxu1 }
 0x7a5   : > { %v7203_v42 = vpop.f32.mrf.mxu1 }
 0x7a7   : > { %v11768_v56 = vpop.f32.mrf.mxu1 }
 0x7a8   : > { %v7299_v56 = vadd.f32 %v7203_v42, %v16751_v14  ;;  %v7297_v14 = vadd.f32 %v16820_v43, %v16745_v19  ;;  %v7328_v19 = vadd.f32 %v16828_v49, %v16818_v52  ;;  %v7325_v52 = vadd.f32 %v16828_v49, %v16809_v29 }
 0x7a9   : > { %v7208_v10 = vpop.f32.mrf.mxu1 }
 0x7aa   : > { %v7300_v38 = vadd.f32 %v7208_v10, %v16754_v39  ;;  %v7331_v42 = vadd.f32 %v16828_v49, %v7299_v56 }
 0x7ab   : > { %v11771_v12 = vpop.f32.mrf.mxu1 }
 0x7ac   : > { %v7332_v39 = vadd.f32 %v16828_v49, %v7300_v38 }
 0x7ad   : > { %v7213_v3 = vpop.f32.mrf.mxu1 }
 0x7af   : > { %v11774_v47 = vpop.f32.mrf.mxu1 }
 0x7b0   : > { %v7298_v47 = vadd.f32 %v7198_v26, %v16748_v41  ;;  %v7357_v26 = vmax.f32 %v7332_v39, 0.0  ;;  %v7377_v39 = vld [vmem:[#allocation5 + $0x18] sm:$0xff] }
 0x7b1   : > { %v7218_v20 = vpop.f32.mrf.mxu1 }
 0x7b2   : > { %v7302_v45 = vadd.f32 %v7218_v20, %v16760_v34  ;;  %v7330_v41 = vadd.f32 %v16828_v49, %v7298_v47  ;;  %v9409_v47 = vld [vmem:[%s17770_s8 + $0x1f8] sm:$0xff] }
 0x7b3   : > { %v11777_v6 = vpop.f32.mrf.mxu1 }
 0x7b4   : > { %v7334_v34 = vadd.f32 %v16828_v49, %v7302_v45  ;;  %v7355_v43 = vmax.f32 %v7330_v41, 0.0  ;;  %v9403_v41 = vld [vmem:[%s17770_s8 + $0x1c8] sm:$0xff] }
 0x7b5   : > { %v7223_v18 = vpop.f32.mrf.mxu1 }
 0x7b6   : > { %v7359_v10 = vmax.f32 %v7334_v34, 0.0 }
 0x7b7   : > { %v11780_v11 = vpop.f32.mrf.mxu1 }
 0x7b9   : > { %v7228_v21 = vpop.f32.mrf.mxu1 }
 0x7ba   : > { %v7304_v7 = vadd.f32 %v7228_v21, %v16766_v23  ;;  %v7301_v23 = vadd.f32 %v7213_v3, %v16757_v5  ;;  %v7329_v21 = vadd.f32 %v16828_v49, %v7297_v14  ;;  %v7376_v14 = vld [vmem:[#allocation5 + $0x10] sm:$0xff] }
 0x7bb   : > { %v11783_v27 = vpop.f32.mrf.mxu1 }
 0x7bc   : > { %v7336_v44 = vadd.f32 %v16828_v49, %v7304_v7  ;;  %v7333_v5 = vadd.f32 %v16828_v49, %v7301_v23  ;;  %v7356_v27 = vmax.f32 %v7331_v42, 0.0  ;;  %v9405_v42 = vld [vmem:[%s17770_s8 + $0x1d8] sm:$0xff] }
 0x7bd   : > { %v7233_v9 = vpop.f32.mrf.mxu1 }
 0x7be   : > { %v7305_v51 = vadd.f32 %v7233_v9, %v16769_v17  ;;  %v7361_v13 = vmax.f32 %v7336_v44, 0.0  ;;  %v7358_v6 = vmax.f32 %v7333_v5, 0.0 }
 0x7bf   : > { %v11786_v32 = vpop.f32.mrf.mxu1 }
 0x7c0   : > { %v7337_v17 = vadd.f32 %v16828_v49, %v7305_v51  ;;  %v7353_v51 = vmax.f32 %v7328_v19, 0.0  ;;  %v9399_v19 = vld [vmem:[%s17770_s8 + $0x1a8] sm:$0xff] }
 0x7c1   : > { %v7238_v4 = vpop.f32.mrf.mxu1 }
 0x7c2   : > { %v7306_v0 = vadd.f32 %v7238_v4, %v16772_v62  ;;  %v7303_v62 = vadd.f32 %v7223_v18, %v16763_v28  ;;  %v7362_v55 = vmax.f32 %v7337_v17, 0.0  ;;  %v7327_v4 = vadd.f32 %v16828_v49, %v16815_v57 }
 0x7c3   : > { %v11789_v48 = vpop.f32.mrf.mxu1  ;;  %v7324_v57 = vadd.f32 %v16828_v49, %v16806_v63 }
 0x7c4   : > { %v7338_v25 = vadd.f32 %v16828_v49, %v7306_v0  ;;  %v7335_v60 = vadd.f32 %v16828_v49, %v7303_v62  ;;  %v7354_v48 = vmax.f32 %v7329_v21, 0.0  ;;  %v9401_v21 = vld [vmem:[%s17770_s8 + $0x1b8] sm:$0xff] }
 0x7c5   : > { %v7243_v50 = vpop.f32.mrf.mxu1  ;;  %v7349_v17 = vmax.f32 %v7324_v57, 0.0  ;;  %v9391_v57 = vld [vmem:[%s17770_s8 + $0x168] sm:$0xff] }
 0x7c6   : > { %v7307_v1 = vadd.f32 %v7243_v50, %v16775_v15  ;;  %v7363_v24 = vmax.f32 %v7338_v25, 0.0  ;;  %v7360_v12 = vmax.f32 %v7335_v60, 0.0  ;;  %v7326_v50 = vadd.f32 %v16828_v49, %v16812_v53 }
 0x7c7   : > { %v11792_v8 = vpop.f32.mrf.mxu1  ;;  %v7350_v53 = vmax.f32 %v7325_v52, 0.0  ;;  %v9393_v52 = vld [vmem:[%s17770_s8 + $0x178] sm:$0xff] }
 0x7c8   : > { %v7339_v59 = vadd.f32 %v16828_v49, %v7307_v1  ;;  %v7352_v8 = vmax.f32 %v7327_v4, 0.0  ;;  %v7351_v25 = vmax.f32 %v7326_v50, 0.0  ;;  %v9397_v4 = vld [vmem:[%s17770_s8 + $0x198] sm:$0xff]  ;;  %v9395_v50 = vld [vmem:[%s17770_s8 + $0x188] sm:$0xff] }
 0x7c9   : > { %v16833_v16 = vpop.f32.mrf.mxu1 }
 0x7ca   : > { %v7364_v36 = vmax.f32 %v7339_v59, 0.0  ;;  %v7308_v56 = vadd.f32 %v16833_v16, %v16778_v46  ;;  %v7374_v16 = vld [vmem:[#allocation5] sm:$0xff] }
 0x7cb   : > { %v11795_v15 = vpop.f32.mrf.mxu1 }
 0x7cc   : > { %7411 = vmatpush1.msra.mxu0 %v7364_v36 }
 0x7cd   : > { %v16839_v37 = vpop.f32.mrf.mxu1  ;;  %7412 = vmatprep.subr.mxu0 %v18007_v31 }
 0x7ce   : > { %7413 = vmatpush1.msra.mxu0 %v7363_v24 }
 0x7cf   : > { %v11798_v28 = vpop.f32.mrf.mxu1  ;;  %7414 = vmatprep.subr.mxu0 %v18007_v31 }
 0x7d0   : > { %7415 = vmatpush1.msra.mxu0 %v7362_v55 }
 0x7d1   : > { %v16847_v30 = vpop.f32.mrf.mxu1  ;;  %7416 = vmatprep.subr.mxu0 %v18007_v31 }
 0x7d2   : > { %7417 = vmatpush1.msra.mxu0 %v7361_v13 }
 0x7d3   : > { %v11801_v3 = vpop.f32.mrf.mxu1  ;;  %7418 = vmatprep.subr.mxu0 %v18007_v31 }
 0x7d4   : > { %7419 = vmatpush1.msra.mxu0 %v7360_v12 }
 0x7d5   : > { %v16855_v20 = vpop.f32.mrf.mxu1  ;;  %7420 = vmatprep.subr.mxu0 %v18007_v31 }
 0x7d6   : > { %7421 = vmatpush1.msra.mxu0 %v7359_v10  ;;  %v9407_v10 = vld [vmem:[%s17770_s8 + $0x1e8] sm:$0xff] }
 0x7d7   : > { %v11804_v18 = vpop.f32.mrf.mxu1  ;;  %7422 = vmatprep.subr.mxu0 %v18007_v31 }
 0x7d8   : > { %7423 = vmatpush1.msra.mxu0 %v7358_v6  ;;  %v7379_v6 = vld [vmem:[#allocation5 + $0x28] sm:$0xff]  ;;  %v9404_v18 = vld [vmem:[%s17770_s8 + $0x1d0] sm:$0xff] }
 0x7d9   : > { %v7268_v11 = vpop.f32.mrf.mxu1  ;;  %7424 = vmatprep.subr.mxu0 %v18007_v31 }
 0x7da   : > { %7425 = vmatpush1.msra.mxu0 %v7357_v26  ;;  %v9402_v26 = vld [vmem:[%s17770_s8 + $0x1c0] sm:$0xff] }
 0x7db   : > { %v11807_v9 = vpop.f32.mrf.mxu1  ;;  %7426 = vmatprep.subr.mxu0 %v18007_v31 }
 0x7dc   : > { %7427 = vmatpush1.msra.mxu0 %v7356_v27  ;;  %v7381_v27 = vld [vmem:[#allocation5 + $0x38] sm:$0xff]  ;;  %v9400_v9 = vld [vmem:[%s17770_s8 + $0x1b0] sm:$0xff] }
 0x7dd   : > { %v7273_v32 = vpop.f32.mrf.mxu1  ;;  %7428 = vmatprep.subr.mxu0 %v18007_v31 }
 0x7de   : > { %7429 = vmatpush1.msra.mxu0 %v7355_v43  ;;  %v7313_v44 = vadd.f32 %v7273_v32, %v16793_v2  ;;  %v7310_v2 = vadd.f32 %v16847_v30, %v16784_v22  ;;  %v9398_v43 = vld [vmem:[%s17770_s8 + $0x1a0] sm:$0xff] }
 0x7df   : > { %v11810_v0 = vpop.f32.mrf.mxu1  ;;  %7430 = vmatprep.subr.mxu0 %v18007_v31  ;;  %v7380_v32 = vld [vmem:[#allocation5 + $0x30] sm:$0xff] }
 0x7e0   : > { %7431 = vmatpush1.msra.mxu0 %v7354_v48  ;;  %v7342_v22 = vadd.f32 %v16828_v49, %v7310_v2  ;;  %v7383_v48 = vld [vmem:[#allocation5 + $0x48] sm:$0xff]  ;;  %v9396_v0 = vld [vmem:[%s17770_s8 + $0x190] sm:$0xff]  ;;  %v9431_v2 = vld [vmem:[%s17770_s8 + $0x2a8] sm:$0xff] }
 0x7e1   : > { %v7278_v1 = vpop.f32.mrf.mxu1  ;;  %7432 = vmatprep.subr.mxu0 %v18007_v31 }
 0x7e2   : > { %7433 = vmatpush1.msra.mxu0 %v7353_v51  ;;  %v7314_v15 = vadd.f32 %v7278_v1, %v16796_v40  ;;  %v7311_v40 = vadd.f32 %v16855_v20, %v16787_v58  ;;  %v9406_v20 = vld [vmem:[%s17770_s8 + $0x1e0] sm:$0xff]  ;;  %v7382_v1 = vld [vmem:[#allocation5 + $0x40] sm:$0xff] }
 0x7e3   : > { %v11813_v7 = vpop.f32.mrf.mxu1  ;;  %7434 = vmatprep.subr.mxu0 %v18007_v31  ;;  %v9394_v51 = vld [vmem:[%s17770_s8 + $0x180] sm:$0xff] }
 0x7e4   : > { %7435 = vmatpush1.msra.mxu0 %v7352_v8  ;;  %v7346_v60 = vadd.f32 %v16828_v49, %v7314_v15  ;;  %v7343_v58 = vadd.f32 %v16828_v49, %v7311_v40  ;;  %v7385_v8 = vld [vmem:[#allocation5 + $0x58] sm:$0xff]  ;;  %v9392_v7 = vld [vmem:[%s17770_s8 + $0x170] sm:$0xff]  ;;  %v9434_v40 = vld [vmem:[%s17770_s8 + $0x2c0] sm:$0xff] }
 0x7e5   : > { %v7283_v59 = vpop.f32.mrf.mxu1  ;;  %7436 = vmatprep.subr.mxu0 %v18007_v31  ;;  %v7386_v15 = vld [vmem:[#allocation5 + $0x60] sm:$0xff] }
 0x7e6   : > { %7437 = vmatpush1.msra.mxu0 %v7351_v25  ;;  %v7315_v29 = vadd.f32 %v7283_v59, %v16800_v35  ;;  %v7312_v35 = vadd.f32 %v7268_v11, %v16790_v33  ;;  %v7371_v34 = vmax.f32 %v7346_v60, 0.0  ;;  %v7309_v33 = vadd.f32 %v16839_v37, %v16781_v54  ;;  %v7378_v11 = vld [vmem:[#allocation5 + $0x20] sm:$0xff]  ;;  %v9390_v25 = vld [vmem:[%s17770_s8 + $0x160] sm:$0xff] }
 0x7e7   : > { %v11816_v62 = vpop.f32.mrf.mxu1  ;;  %7438 = vmatprep.subr.mxu0 %v18007_v31  ;;  %v7368_v12 = vmax.f32 %v7343_v58, 0.0  ;;  %v7340_v54 = vadd.f32 %v16828_v49, %v7308_v56  ;;  %v7367_v37 = vmax.f32 %v7342_v22, 0.0  ;;  %v7384_v59 = vld [vmem:[#allocation5 + $0x50] sm:$0xff]  ;;  %v9436_v60 = vld [vmem:[%s17770_s8 + $0x2d0] sm:$0xff]  ;;  %v9427_v58 = vld [vmem:[%s17770_s8 + $0x288] sm:$0xff] }
 0x7e8   : > { %7439 = vmatpush1.msra.mxu0 %v7350_v53  ;;  %v7347_v24 = vadd.f32 %v16828_v49, %v7315_v29  ;;  %v7344_v38 = vadd.f32 %v16828_v49, %v7312_v35  ;;  %v7341_v5 = vadd.f32 %v16828_v49, %v7309_v33  ;;  %v9389_v53 = vld [vmem:[%s17770_s8 + $0x158] sm:$0xff]  ;;  %v9387_v29 = vld [vmem:[%s17770_s8 + $0x148] sm:$0xff]  ;;  %v9428_v33 = vld [vmem:[%s17770_s8 + $0x290] sm:$0xff] }
 0x7e9   : > { %v7288_v36 = vpop.f32.mrf.mxu1  ;;  %7440 = vmatprep.subr.mxu0 %v18007_v31  ;;  %v7365_v46 = vmax.f32 %v7340_v54, 0.0  ;;  %v7387_v62 = vld [vmem:[#allocation5 + $0x68] sm:$0xff]  ;;  %v9424_v22 = vld [vmem:[%s17770_s8 + $0x270] sm:$0xff] }
 0x7ea   : > { %v7316_v63 = vadd.f32 %v7288_v36, %v16803_v61  ;;  %7441 = vmatpush1.msra.mxu0 %v7349_v17  ;;  %v7345_v61 = vadd.f32 %v16828_v49, %v7313_v44  ;;  %v7372_v28 = vmax.f32 %v7347_v24, 0.0  ;;  %v7369_v30 = vmax.f32 %v7344_v38, 0.0  ;;  %v9388_v17 = vld [vmem:[%s17770_s8 + $0x150] sm:$0xff]  ;;  %v9386_v36 = vld [vmem:[%s17770_s8 + $0x140] sm:$0xff]  ;;  %v9439_v24 = vld [vmem:[%s17770_s8 + $0x2e8] sm:$0xff] }
 0x7eb   : > { %v11819_v45 = vpop.f32.mrf.mxu1  ;;  %7456 = vmatprep.subr.mxu0 %v18007_v31  ;;  %v7366_v3 = vmax.f32 %v7341_v5, 0.0  ;;  %v9440_v44 = vld [vmem:[%s17770_s8 + $0x2f0] sm:$0xff]  ;;  %v9437_v35 = vld [vmem:[%s17770_s8 + $0x2d8] sm:$0xff]  ;;  %v9430_v38 = vld [vmem:[%s17770_s8 + $0x2a0] sm:$0xff] }
 0x7ec   : > { %v7348_v23 = vadd.f32 %v16828_v49, %v7316_v63  ;;  %v7370_v13 = vmax.f32 %v7345_v61, 0.0  ;;  %v9408_v49 = vld [vmem:[%s17770_s8 + $0x1f0] sm:$0xff]  ;;  %v9385_v63 = vld [vmem:[%s17770_s8 + $0x138] sm:$0xff]  ;;  %v9422_v5 = vld [vmem:[%s17770_s8 + $0x260] sm:$0xff] }
 0x7ed   : > { %v9441_v45 = vld [vmem:[%s17770_s8 + $0x2f8] sm:$0xff]  ;;  %v9420_v54 = vld [vmem:[%s17770_s8 + $0x250] sm:$0xff] }
 0x7ee   : > { %v7373_v55 = vmax.f32 %v7348_v23, 0.0  ;;  %7873 = vmatprep.subr.mxu1 %v9441_v45  ;;  %v9438_v23 = vld [vmem:[%s17770_s8 + $0x2e0] sm:$0xff]  ;;  %v9433_v61 = vld [vmem:[%s17770_s8 + $0x2b8] sm:$0xff] }
 0x7ef   : > { %7874 = vmatpush1.msra.mxu1 %v9440_v44  ;;  %v9425_v56 = vld [vmem:[%s17770_s8 + $0x278] sm:$0xff] }
 0x7f0   : > { %7457 = vmatpush2.msra.mxu0 %v7373_v55  ;;  %7875 = vmatprep.subr.mxu1 %v9439_v24  ;;  %v9435_v55 = vld [vmem:[%s17770_s8 + $0x2c8] sm:$0xff]  ;;  %v7537_v45 = vld [vmem:[%s17770_s8 + $0xd8] sm:$0xff] }
 0x7f1   : > { %7458 = vmatprep.subr.mxu0 %v18007_v31  ;;  %7876 = vmatpush1.msra.mxu1 %v9438_v23 }
 0x7f2   : > { %7459 = vmatpush2.msra.mxu0 %v7372_v28  ;;  %7877 = vmatprep.subr.mxu1 %v9437_v35  ;;  %v9432_v28 = vld [vmem:[%s17770_s8 + $0x2b0] sm:$0xff] }
 0x7f3   : > { %7460 = vmatprep.subr.mxu0 %v18007_v31  ;;  %7878 = vmatpush1.msra.mxu1 %v9436_v60  ;;  %v7536_v35 = vld [vmem:[%s17770_s8 + $0xd0] sm:$0xff] }
 0x7f4   : > { %7461 = vmatpush2.msra.mxu0 %v7371_v34  ;;  %7879 = vmatprep.subr.mxu1 %v9435_v55  ;;  %v9429_v34 = vld [vmem:[%s17770_s8 + $0x298] sm:$0xff]  ;;  %v7535_v55 = vld [vmem:[%s17770_s8 + $0xc8] sm:$0xff] }
 0x7f5   : > { %7462 = vmatprep.subr.mxu0 %v18007_v31  ;;  %7880 = vmatpush1.msra.mxu1 %v9434_v40 }
 0x7f6   : > { %7463 = vmatpush2.msra.mxu0 %v7370_v13  ;;  %7881 = vmatprep.subr.mxu1 %v9433_v61  ;;  %v9426_v13 = vld [vmem:[%s17770_s8 + $0x280] sm:$0xff] }
 0x7f7   : > { %7464 = vmatprep.subr.mxu0 %v18007_v31  ;;  %7882 = vmatpush1.msra.mxu1 %v9432_v28  ;;  %v9502_v61 = vld [vmem:[%s17770_s8 + $0x4e0] sm:$0xff] }
 0x7f8   : > { %7465 = vmatpush2.msra.mxu0 %v7369_v30  ;;  %7883 = vmatprep.subr.mxu1 %v9431_v2  ;;  %v9423_v30 = vld [vmem:[%s17770_s8 + $0x268] sm:$0xff]  ;;  %v7534_v2 = vld [vmem:[%s17770_s8 + $0xc0] sm:$0xff] }
 0x7f9   : > { %7466 = vmatprep.subr.mxu0 %v18007_v31  ;;  %7884 = vmatpush1.msra.mxu1 %v9430_v38 }
 0x7fa   : > { %7467 = vmatpush2.msra.mxu0 %v7368_v12  ;;  %7885 = vmatprep.subr.mxu1 %v9429_v34  ;;  %v9421_v12 = vld [vmem:[%s17770_s8 + $0x258] sm:$0xff] }
 0x7fb   : > { %7468 = vmatprep.subr.mxu0 %v18007_v31  ;;  %7886 = vmatpush1.msra.mxu1 %v9428_v33  ;;  %v9501_v34 = vld [vmem:[%s17770_s8 + $0x4d8] sm:$0xff] }
 0x7fc   : > { %7469 = vmatpush2.msra.mxu0 %v7367_v37  ;;  %7887 = vmatprep.subr.mxu1 %v9427_v58  ;;  %v9419_v37 = vld [vmem:[%s17770_s8 + $0x248] sm:$0xff]  ;;  %v7533_v58 = vld [vmem:[%s17770_s8 + $0xb8] sm:$0xff] }
 0x7fd   : > { %7470 = vmatprep.subr.mxu0 %v18007_v31  ;;  %7888 = vmatpush1.msra.mxu1 %v9426_v13 }
 0x7fe   : > { %7471 = vmatpush2.msra.mxu0 %v7366_v3  ;;  %7889 = vmatprep.subr.mxu1 %v9425_v56  ;;  %v9418_v3 = vld [vmem:[%s17770_s8 + $0x240] sm:$0xff] }
 0x7ff   : > { %7472 = vmatprep.subr.mxu0 %v18007_v31  ;;  %7890 = vmatpush1.msra.mxu1 %v9424_v22 }
 0x800   : > { %7473 = vmatpush2.msra.mxu0 %v7365_v46  ;;  %7891 = vmatprep.subr.mxu1 %v9423_v30  ;;  %v9417_v46 = vld [vmem:[%s17770_s8 + $0x238] sm:$0xff]  ;;  %v7532_v30 = vld [vmem:[%s17770_s8 + $0xb0] sm:$0xff] }
 0x801   : > { %7475 = vmatmul.mubr.f32.vlgmr.msra.gmra.mxu0 %v7374_v16  ;;  %7604 = vmatprep.subr.mxu0 %v9409_v47  ;;  %v9384_v16 = vld [vmem:[%s17770_s8 + $0x130] sm:$0xff] }
 0x802   : > { %9372 = vmatprep.mubr.msk.f32.mxu0 %vm7388_vm8, %v7377_v39  ;;  %7605 = vmatpush1.msra.mxu0 %v9408_v49  ;;  %v9416_v47 = vld [vmem:[%s17770_s8 + $0x230] sm:$0xff]  ;;  %v9383_v39 = vld [vmem:[%s17770_s8 + $0x128] sm:$0xff] }
 0x803   : > { %7606 = vmatprep.subr.mxu0 %v9407_v10  ;;  %7892 = vmatpush1.msra.mxu1 %v9422_v5  ;;  %v9415_v49 = vld [vmem:[%s17770_s8 + $0x228] sm:$0xff]  ;;  %v9382_v10 = vld [vmem:[%s17770_s8 + $0x120] sm:$0xff] }
 0x804   : > { %7607 = vmatpush1.msra.mxu0 %v9406_v20  ;;  %7893 = vmatprep.subr.mxu1 %v9421_v12  ;;  %v9381_v20 = vld [vmem:[%s17770_s8 + $0x118] sm:$0xff]  ;;  %v7531_v12 = vld [vmem:[%s17770_s8 + $0xa8] sm:$0xff] }
 0x805   : > { %7480 = vmatmul.mubr.f32.gmra.mxu0 %v7376_v14  ;;  %7608 = vmatprep.subr.mxu0 %v9405_v42  ;;  %v9414_v14 = vld [vmem:[%s17770_s8 + $0x220] sm:$0xff]  ;;  %v9413_v42 = vld [vmem:[%s17770_s8 + $0x218] sm:$0xff] }
 0x806   : > { %9373 = vmatprep.mubr.msk.f32.mxu0 %vm7388_vm8, %v7379_v6  ;;  %7609 = vmatpush1.msra.mxu0 %v9404_v18  ;;  %v9380_v6 = vld [vmem:[%s17770_s8 + $0x110] sm:$0xff] }
 0x807   : > { %7610 = vmatprep.subr.mxu0 %v9403_v41  ;;  %7894 = vmatpush1.msra.mxu1 %v9420_v54  ;;  %v9412_v18 = vld [vmem:[%s17770_s8 + $0x210] sm:$0xff]  ;;  %v9379_v41 = vld [vmem:[%s17770_s8 + $0x108] sm:$0xff] }
 0x808   : > { %7611 = vmatpush1.msra.mxu0 %v9402_v26  ;;  %7895 = vmatprep.subr.mxu1 %v9419_v37  ;;  %v9378_v26 = vld [vmem:[%s17770_s8 + $0x100] sm:$0xff]  ;;  %v9500_v37 = vld [vmem:[%s17770_s8 + $0x4d0] sm:$0xff] }
 0x809   : > { %7485 = vmatmul.mubr.f32.gmra.mxu0 %v7378_v11  ;;  %7612 = vmatprep.subr.mxu0 %v9401_v21  ;;  %v7541_v11 = vld [vmem:[%s17770_s8 + $0xf8] sm:$0xff]  ;;  %v9411_v21 = vld [vmem:[%s17770_s8 + $0x208] sm:$0xff] }
 0x80a   : > { %9374 = vmatprep.mubr.msk.f32.mxu0 %vm7388_vm8, %v7381_v27  ;;  %7613 = vmatpush1.msra.mxu0 %v9400_v9  ;;  %v9410_v27 = vld [vmem:[%s17770_s8 + $0x200] sm:$0xff]  ;;  %v9505_v9 = vld [vmem:[%s17770_s8 + $0x4f8] sm:$0xff] }
 0x80b   : > { %7614 = vmatprep.subr.mxu0 %v9399_v19  ;;  %7896 = vmatpush1.msra.mxu1 %v9418_v3 }
 0x80c   : > { %7615 = vmatpush1.msra.mxu0 %v9398_v43  ;;  %7897 = vmatprep.subr.mxu1 %v9417_v46  ;;  %v7530_v46 = vld [vmem:[%s17770_s8 + $0xa0] sm:$0xff] }
 0x80d   : > { %7490 = vmatmul.mubr.f32.gmra.mxu0 %v7380_v32  ;;  %7616 = vmatprep.subr.mxu0 %v9397_v4 }
 0x80e   : > { %9375 = vmatprep.mubr.msk.f32.mxu0 %vm7388_vm8, %v7383_v48  ;;  %7617 = vmatpush1.msra.mxu0 %v9396_v0 }
 0x80f   : > { %7618 = vmatprep.subr.mxu0 %v9395_v50  ;;  %7898 = vmatpush1.msra.mxu1 %v9416_v47  ;;  %v9499_v47 = vld [vmem:[%s17770_s8 + $0x4c8] sm:$0xff] }
 0x810   : > { %7619 = vmatpush1.msra.mxu0 %v9394_v51  ;;  %7899 = vmatprep.subr.mxu1 %v9415_v49  ;;  %v7529_v49 = vld [vmem:[%s17770_s8 + $0x98] sm:$0xff] }
 0x811   : > { %7495 = vmatmul.mubr.f32.gmra.mxu0 %v7382_v1  ;;  %7620 = vmatprep.subr.mxu0 %v9393_v52 }
 0x812   : > { %9376 = vmatprep.mubr.msk.f32.mxu0 %vm7388_vm8, %v7385_v8  ;;  %7621 = vmatpush1.msra.mxu0 %v9392_v7  ;;  %v7540_v7 = vld [vmem:[%s17770_s8 + $0xf0] sm:$0xff] }
 0x813   : > { %7622 = vmatprep.subr.mxu0 %v9391_v57  ;;  %7900 = vmatpush1.msra.mxu1 %v9414_v14 }
 0x814   : > { %7623 = vmatpush1.msra.mxu0 %v9390_v25  ;;  %7901 = vmatprep.subr.mxu1 %v9413_v42  ;;  %v7528_v42 = vld [vmem:[%s17770_s8 + $0x90] sm:$0xff] }
 0x815   : > { %7500 = vmatmul.mubr.f32.gmra.mxu0 %v7384_v59  ;;  %7624 = vmatprep.subr.mxu0 %v9389_v53  ;;  %v7539_v59 = vld [vmem:[%s17770_s8 + $0xe8] sm:$0xff] }
 0x816   : > { %9377 = vmatprep.mubr.msk.f32.mxu0 %vm7388_vm8, %v7387_v62  ;;  %7625 = vmatpush1.msra.mxu0 %v9388_v17  ;;  %v9504_v62 = vld [vmem:[%s17770_s8 + $0x4f0] sm:$0xff] }
 0x817   : > { %7626 = vmatprep.subr.mxu0 %v9387_v29  ;;  %7902 = vmatpush1.msra.mxu1 %v9412_v18  ;;  %v7527_v18 = vld [vmem:[%s17770_s8 + $0x88] sm:$0xff] }
 0x818   : > { %7627 = vmatpush1.msra.mxu0 %v9386_v36  ;;  %7903 = vmatprep.subr.mxu1 %v9411_v21  ;;  %v7538_v36 = vld [vmem:[%s17770_s8 + $0xe0] sm:$0xff] }
 0x819   : > { %7505 = vmatmul.mubr.f32.gmra.mxu0 %v7386_v15  ;;  %7628 = vmatprep.subr.mxu0 %v9385_v63  ;;  %v9503_v63 = vld [vmem:[%s17770_s8 + $0x4e8] sm:$0xff]  ;;  %v7526_v21 = vld [vmem:[%s17770_s8 + $0x80] sm:$0xff] }
 0x81a   : > { %7668 = vmatprep.mubr.f32.mxu0 %v18007_v31  ;;  %7629 = vmatpush1.msra.mxu0 %v9384_v16 }
 0x81b   : > { %7630 = vmatprep.subr.mxu0 %v9383_v39  ;;  %7904 = vmatpush1.msra.mxu1 %v9410_v27 }
 0x81c   : > { %7631 = vmatpush1.msra.mxu0 %v9382_v10  ;;  %8225 = vmatprep.subr.mxu1 %v9505_v9  ;;  %v9498_v9 = vld [vmem:[%s17770_s8 + $0x4c0] sm:$0xff] }
 0x81d   : > { %7632 = vmatprep.subr.mxu0 %v9381_v20 }
 0x81e   : > { %7633 = vmatpush1.msra.mxu0 %v9380_v6 }
 0x81f   : > { %7634 = vmatprep.subr.mxu0 %v9379_v41 }
 0x820   : > { %7635 = vmatpush1.msra.mxu0 %v9378_v26 }
 0x821   : > { %7711 = vmatprep.subr.mxu0 %v7541_v11 }
 0x8c1   : > { %v17119_v19 = vpop.f32.mrf.mxu0 }
 0x8c2   : > { %v7549_v32 = vrot.slane %v17119_v19, 1  ;;  %v7818_v4 = vrot.slane %v17119_v19, 2  ;;  %v7994_v48 = vrot.slane %v17119_v19, 3  ;;  %v8170_v0 = vrot.slane %v17119_v19, 4 }
 0x8c3   : > { %v7478_v43 = vpop.f32.mrf.mxu0 }
 0x8c5   : > { %v17125_v50 = vpop.f32.mrf.mxu0 }
 0x8c6   : > { %v7550_v51 = vrot.slane %v17125_v50, 1  ;;  %v7819_v1 = vrot.slane %v17125_v50, 2  ;;  %v7995_v52 = vrot.slane %v17125_v50, 3  ;;  %v8171_v8 = vrot.slane %v17125_v50, 4 }
 0x8c7   : > { %v7483_v57 = vpop.f32.mrf.mxu0 }
 0x8c8   : > { %v7551_v25 = vsel %vm704_vm2, %v7549_v32, %v7550_v51  ;;  %v7820_v53 = vsel %vm2144_vm4, %v7818_v4, %v7819_v1  ;;  %v17151_v17 = vsel %vm3028_vm5, %v7994_v48, %v7995_v52  ;;  %v17156_v29 = vsel %vm1035_vm1, %v8170_v0, %v8171_v8  ;;  %v7524_v57 = vld [vmem:[%s17770_s8 + $0x70] sm:$0xff] }
 0x8c9   : > { %7669 = vmatmul.mubr.f32.vlgmr.msra.gmra.mxu0 %v7551_v25  ;;  %v17161_v15 = vpop.f32.mrf.mxu0  ;;  %7938 = vmatmul.mubr.f32.vlgmr.msra.gmra.mxu1 %v7820_v53 }
 0x8ca   : > { %7712 = vmatpush1.msra.mxu0 %v7540_v7  ;;  %7674 = vmatprep.mubr.f32.mxu0 %v18007_v31  ;;  %v7552_v44 = vrot.slane %v17161_v15, 1  ;;  %v7997_v24 = vrot.slane %v17161_v15, 3  ;;  %v8173_v23 = vrot.slane %v17161_v15, 4  ;;  %v7821_v26 = vrot.slane %v17161_v15, 2 }
 0x8cb   : > { %7713 = vmatprep.subr.mxu0 %v7539_v59  ;;  %v7488_v60 = vpop.f32.mrf.mxu0  ;;  %8226 = vmatpush1.msra.mxu1 %v9504_v62  ;;  %v7523_v59 = vld [vmem:[%s17770_s8 + $0x68] sm:$0xff] }
 0x8cc   : > { %7714 = vmatpush1.msra.mxu0 %v7538_v36  ;;  %v7553_v40 = vsel %vm704_vm2, %v7550_v51, %v7552_v44  ;;  %8227 = vmatprep.subr.mxu1 %v9503_v63  ;;  %v17184_v28 = vsel %vm3028_vm5, %v7995_v52, %v7997_v24  ;;  %v17195_v33 = vsel %vm1035_vm1, %v8171_v8, %v8173_v23  ;;  %v7525_v51 = vld [vmem:[%s17770_s8 + $0x78] sm:$0xff]  ;;  %v7522_v63 = vld [vmem:[%s17770_s8 + $0x60] sm:$0xff] }
 0x8cd   : > { %7715 = vmatprep.subr.mxu0 %v7537_v45  ;;  %v17189_v38 = vpop.f32.mrf.mxu0  ;;  %7675 = vmatmul.mubr.f32.gmra.mxu0 %v7553_v40  ;;  %v7822_v62 = vsel %vm2144_vm4, %v7819_v1, %v7821_v26  ;;  %v7521_v1 = vld [vmem:[%s17770_s8 + $0x58] sm:$0xff] }
 0x8ce   : > { %7716 = vmatpush1.msra.mxu0 %v7536_v35  ;;  %7680 = vmatprep.mubr.f32.mxu0 %v18007_v31  ;;  %v7554_v13 = vrot.slane %v17189_v38, 1  ;;  %v7999_v56 = vrot.slane %v17189_v38, 3  ;;  %v8175_v22 = vrot.slane %v17189_v38, 4 }
 0x8cf   : > { %7717 = vmatprep.subr.mxu0 %v7535_v55  ;;  %v7493_v5 = vpop.f32.mrf.mxu0  ;;  %8228 = vmatpush1.msra.mxu1 %v9502_v61  ;;  %v7520_v55 = vld [vmem:[%s17770_s8 + $0x50] sm:$0xff]  ;;  %v7519_v61 = vld [vmem:[%s17770_s8 + $0x48] sm:$0xff] }
 0x8d0   : > { %7718 = vmatpush1.msra.mxu0 %v7534_v2  ;;  %v7555_v54 = vsel %vm704_vm2, %v7552_v44, %v7554_v13  ;;  %8229 = vmatprep.subr.mxu1 %v9501_v34  ;;  %v17215_v3 = vsel %vm3028_vm5, %v7997_v24, %v7999_v56  ;;  %v17226_v39 = vsel %vm1035_vm1, %v8173_v23, %v8175_v22  ;;  %v9497_v44 = vld [vmem:[%s17770_s8 + $0x4b8] sm:$0xff]  ;;  %v9496_v34 = vld [vmem:[%s17770_s8 + $0x4b0] sm:$0xff]  ;;  %v7823_v5 = vrot.slane %v17189_v38, 2 }
 0x8d1   : > { %7719 = vmatprep.subr.mxu0 %v7533_v58  ;;  %v17220_v16 = vpop.f32.mrf.mxu0  ;;  %7681 = vmatmul.mubr.f32.gmra.mxu0 %v7555_v54  ;;  %v7518_v58 = vld [vmem:[%s17770_s8 + $0x40] sm:$0xff] }
 0x8d2   : > { %7720 = vmatpush1.msra.mxu0 %v7532_v30  ;;  %7686 = vmatprep.mubr.f32.mxu0 %v18007_v31  ;;  %v7556_v10 = vrot.slane %v17220_v16, 1  ;;  %v8001_v20 = vrot.slane %v17220_v16, 3  ;;  %v8177_v14 = vrot.slane %v17220_v16, 4  ;;  %v7517_v30 = vld [vmem:[%s17770_s8 + $0x38] sm:$0xff] }
 0x8d3   : > { %7721 = vmatprep.subr.mxu0 %v7531_v12  ;;  %v7498_v6 = vpop.f32.mrf.mxu0  ;;  %8230 = vmatpush1.msra.mxu1 %v9500_v37  ;;  %v7516_v37 = vld [vmem:[%s17770_s8 + $0x30] sm:$0xff] }
 0x8d4   : > { %7722 = vmatpush1.msra.mxu0 %v7530_v46  ;;  %v7557_v41 = vsel %vm704_vm2, %v7554_v13, %v7556_v10  ;;  %8231 = vmatprep.subr.mxu1 %v9499_v47  ;;  %v17244_v11 = vsel %vm3028_vm5, %v7999_v56, %v8001_v20  ;;  %v17255_v43 = vsel %vm1035_vm1, %v8175_v22, %v8177_v14  ;;  %v9495_v13 = vld [vmem:[%s17770_s8 + $0x4a8] sm:$0xff]  ;;  %v9494_v47 = vld [vmem:[%s17770_s8 + $0x4a0] sm:$0xff] }
 0x8d5   : > { %7723 = vmatprep.subr.mxu0 %v7529_v49  ;;  %v17249_v27 = vpop.f32.mrf.mxu0  ;;  %7687 = vmatmul.mubr.f32.gmra.mxu0 %v7557_v41  ;;  %v7515_v46 = vld [vmem:[%s17770_s8 + $0x28] sm:$0xff]  ;;  %v7513_v49 = vld [vmem:[%s17770_s8 + $0x18] sm:$0xff]  ;;  %v7510_v6 = vld [vmem:[%s17770_s8] sm:$0xff] }
 0x8d6   : > { %7724 = vmatpush1.msra.mxu0 %v7528_v42  ;;  %7692 = vmatprep.mubr.f32.mxu0 %v18007_v31  ;;  %v7558_v52 = vrot.slane %v17249_v27, 1  ;;  %v8003_v8 = vrot.slane %v17249_v27, 3  ;;  %v8179_v7 = vrot.slane %v17249_v27, 4  ;;  %v9492_v42 = vld [vmem:[%s17770_s8 + $0x490] sm:$0xff]  ;;  %v9473_v41 = vld [vmem:[%s17770_s8 + $0x3f8] sm:$0xff] }
 0x8d7   : > { %7725 = vmatprep.subr.mxu0 %v7527_v18  ;;  %v7503_v25 = vpop.f32.mrf.mxu0  ;;  %7943 = vmatprep.mubr.f32.mxu1 %v18007_v31  ;;  %v9491_v18 = vld [vmem:[%s17770_s8 + $0x488] sm:$0xff] }
 0x8d8   : > { %7726 = vmatpush1.msra.mxu0 %v7526_v21  ;;  %v7559_v53 = vsel %vm704_vm2, %v7556_v10, %v7558_v52  ;;  %8232 = vmatpush1.msra.mxu1 %v9498_v9  ;;  %v17278_v36 = vsel %vm3028_vm5, %v8001_v20, %v8003_v8  ;;  %v17289_v24 = vsel %vm1035_vm1, %v8177_v14, %v8179_v7  ;;  %v7512_v10 = vld [vmem:[%s17770_s8 + $0x10] sm:$0xff]  ;;  %v9493_v20 = vld [vmem:[%s17770_s8 + $0x498] sm:$0xff]  ;;  %v7511_v14 = vld [vmem:[%s17770_s8 + $0x8] sm:$0xff]  ;;  %v7825_v9 = vrot.slane %v17220_v16, 2 }
 0x8d9   : > { %7727 = vmatprep.subr.mxu0 %v7525_v51  ;;  %v17283_v45 = vpop.f32.mrf.mxu0  ;;  %7693 = vmatmul.mubr.f32.gmra.mxu0 %v7559_v53  ;;  %v9471_v21 = vld [vmem:[%s17770_s8 + $0x3e8] sm:$0xff]  ;;  %v9470_v51 = vld [vmem:[%s17770_s8 + $0x3e0] sm:$0xff]  ;;  %v9489_v53 = vld [vmem:[%s17770_s8 + $0x478] sm:$0xff] }
 0x8da   : > { %7728 = vmatpush1.msra.mxu0 %v7524_v57  ;;  %7698 = vmatprep.mubr.f32.mxu0 %v18007_v31  ;;  %v7560_v23 = vrot.slane %v17283_v45, 1  ;;  %v8005_v35 = vrot.slane %v17283_v45, 3  ;;  %v8181_v60 = vrot.slane %v17283_v45, 4  ;;  %v9467_v57 = vld [vmem:[%s17770_s8 + $0x3c8] sm:$0xff]  ;;  %v7826_v25 = vsel %vm2144_vm4, %v7823_v5, %v7825_v9 }
 0x8db   : > { %7729 = vmatprep.subr.mxu0 %v7523_v59  ;;  %7944 = vmatmul.mubr.f32.gmra.mxu1 %v7822_v62  ;;  %v7508_v40 = vpop.f32.mrf.mxu0  ;;  %v9466_v59 = vld [vmem:[%s17770_s8 + $0x3c0] sm:$0xff]  ;;  %v9465_v62 = vld [vmem:[%s17770_s8 + $0x3b8] sm:$0xff] }
 0x8dc   : > { %7730 = vmatpush1.msra.mxu0 %v7522_v63  ;;  %v7561_v2 = vsel %vm704_vm2, %v7558_v52, %v7560_v23  ;;  %8233 = vmatprep.subr.mxu1 %v9497_v44  ;;  %v17315_v56 = vsel %vm3028_vm5, %v8003_v8, %v8005_v35  ;;  %v17318_v22 = vsel %vm1035_vm1, %v8179_v7, %v8181_v60  ;;  %v9490_v52 = vld [vmem:[%s17770_s8 + $0x480] sm:$0xff]  ;;  %v9469_v8 = vld [vmem:[%s17770_s8 + $0x3d8] sm:$0xff]  ;;  %v9468_v7 = vld [vmem:[%s17770_s8 + $0x3d0] sm:$0xff] }
 0x8dd   : > { %7731 = vmatprep.subr.mxu0 %v7521_v1  ;;  %7699 = vmatmul.mubr.f32.gmra.mxu0 %v7561_v2  ;;  %v17328_v12 = vsel %vm3028_vm5, %v8005_v35, %v7994_v48  ;;  %v17333_v54 = vsel %vm1035_vm1, %v8181_v60, %v8170_v0  ;;  %v7570_v48 = vsel %vm704_vm2, %v7560_v23, %v7549_v32  ;;  %v7514_v0 = vld [vmem:[%s17770_s8 + $0x20] sm:$0xff]  ;;  %v9464_v63 = vld [vmem:[%s17770_s8 + $0x3b0] sm:$0xff]  ;;  %v9487_v23 = vld [vmem:[%s17770_s8 + $0x468] sm:$0xff] }
 0x8de   : > { %7732 = vmatpush1.msra.mxu0 %v7520_v55  ;;  %7704 = vmatprep.mubr.f32.mxu0 %v18007_v31  ;;  %v7824_v32 = vsel %vm2144_vm4, %v7821_v26, %v7823_v5  ;;  %v9472_v26 = vld [vmem:[%s17770_s8 + $0x3f0] sm:$0xff]  ;;  %v9462_v1 = vld [vmem:[%s17770_s8 + $0x3a0] sm:$0xff]  ;;  %v9461_v35 = vld [vmem:[%s17770_s8 + $0x398] sm:$0xff]  ;;  %v7827_v55 = vrot.slane %v17249_v27, 2 }
 0x8df   : > { %7733 = vmatprep.subr.mxu0 %v7519_v61  ;;  %8234 = vmatpush1.msra.mxu1 %v9496_v34  ;;  %v9488_v44 = vld [vmem:[%s17770_s8 + $0x470] sm:$0xff]  ;;  %v9458_v40 = vld [vmem:[%s17770_s8 + $0x380] sm:$0xff]  ;;  %v9457_v2 = vld [vmem:[%s17770_s8 + $0x378] sm:$0xff] }
 0x8e0   : > { %7734 = vmatpush1.msra.mxu0 %v7518_v58  ;;  %8235 = vmatprep.subr.mxu1 %v9495_v13  ;;  %v9460_v60 = vld [vmem:[%s17770_s8 + $0x390] sm:$0xff]  ;;  %v9486_v61 = vld [vmem:[%s17770_s8 + $0x460] sm:$0xff]  ;;  %v9455_v58 = vld [vmem:[%s17770_s8 + $0x368] sm:$0xff] }
 0x8e1   : > { %7735 = vmatprep.subr.mxu0 %v7517_v30  ;;  %7705 = vmatmul.mubr.f32.gmra.mxu0 %v7570_v48  ;;  %v9456_v34 = vld [vmem:[%s17770_s8 + $0x370] sm:$0xff]  ;;  %v9485_v13 = vld [vmem:[%s17770_s8 + $0x458] sm:$0xff]  ;;  %v9454_v30 = vld [vmem:[%s17770_s8 + $0x360] sm:$0xff]  ;;  %v7829_v48 = vrot.slane %v17283_v45, 2 }
 0x8e2   : > { %7736 = vmatpush1.msra.mxu0 %v7516_v37  ;;  %7775 = vmatprep.mubr.f32.mxu0 %v18007_v31  ;;  %v9453_v5 = vld [vmem:[%s17770_s8 + $0x358] sm:$0xff]  ;;  %v9484_v37 = vld [vmem:[%s17770_s8 + $0x450] sm:$0xff] }
 0x8e3   : > { %7737 = vmatprep.subr.mxu0 %v7515_v46  ;;  %7949 = vmatprep.mubr.f32.mxu1 %v18007_v31  ;;  %v9452_v46 = vld [vmem:[%s17770_s8 + $0x350] sm:$0xff] }
 0x8e4   : > { %7738 = vmatpush1.msra.mxu0 %v7514_v0  ;;  %8236 = vmatpush1.msra.mxu1 %v9494_v47  ;;  %v9451_v0 = vld [vmem:[%s17770_s8 + $0x348] sm:$0xff]  ;;  %v9450_v47 = vld [vmem:[%s17770_s8 + $0x340] sm:$0xff] }
 0x8e5   : > { %7739 = vmatprep.subr.mxu0 %v7513_v49  ;;  %7950 = vmatmul.mubr.f32.gmra.mxu1 %v7824_v32  ;;  %v9449_v49 = vld [vmem:[%s17770_s8 + $0x338] sm:$0xff]  ;;  %v9482_v32 = vld [vmem:[%s17770_s8 + $0x440] sm:$0xff] }
 0x8e6   : > { %7740 = vmatpush1.msra.mxu0 %v7512_v10  ;;  %8237 = vmatprep.subr.mxu1 %v9493_v20  ;;  %v9448_v10 = vld [vmem:[%s17770_s8 + $0x330] sm:$0xff]  ;;  %v7830_v20 = vsel %vm2144_vm4, %v7827_v55, %v7829_v48 }
 0x8e7   : > { %7741 = vmatprep.subr.mxu0 %v7511_v14  ;;  %8238 = vmatpush1.msra.mxu1 %v9492_v42  ;;  %v9447_v14 = vld [vmem:[%s17770_s8 + $0x328] sm:$0xff]  ;;  %v9481_v42 = vld [vmem:[%s17770_s8 + $0x438] sm:$0xff] }
 0x8e8   : > { %7742 = vmatpush1.msra.mxu0 %v7510_v6  ;;  %8239 = vmatprep.subr.mxu1 %v9491_v18  ;;  %v9480_v6 = vld [vmem:[%s17770_s8 + $0x430] sm:$0xff]  ;;  %v9445_v18 = vld [vmem:[%s17770_s8 + $0x318] sm:$0xff] }
 0x8e9   : > { %8049 = vmatprep.subr.mxu0 %v9473_v41  ;;  %7776 = vmatmul.mubr.f32.vlgmr.msra.gmra.mxu0 %v17119_v19  ;;  %v9479_v41 = vld [vmem:[%s17770_s8 + $0x428] sm:$0xff]  ;;  %v9474_v19 = vld [vmem:[%s17770_s8 + $0x400] sm:$0xff] }
 0x8ea   : > { %8050 = vmatpush1.msra.mxu0 %v9472_v26  ;;  %7781 = vmatprep.mubr.f32.mxu0 %v18007_v31  ;;  %v9444_v26 = vld [vmem:[%s17770_s8 + $0x310] sm:$0xff] }
 0x8eb   : > { %8051 = vmatprep.subr.mxu0 %v9471_v21  ;;  %7955 = vmatprep.mubr.f32.mxu1 %v18007_v31  ;;  %v9478_v21 = vld [vmem:[%s17770_s8 + $0x420] sm:$0xff] }
 0x8ec   : > { %8052 = vmatpush1.msra.mxu0 %v9470_v51  ;;  %8240 = vmatpush1.msra.mxu1 %v9490_v52  ;;  %v9477_v51 = vld [vmem:[%s17770_s8 + $0x418] sm:$0xff]  ;;  %v7839_v52 = vsel %vm2144_vm4, %v7829_v48, %v7818_v4 }
 0x8ed   : > { %8053 = vmatprep.subr.mxu0 %v9469_v8  ;;  %7782 = vmatmul.mubr.f32.gmra.mxu0 %v17125_v50  ;;  %v9463_v50 = vld [vmem:[%s17770_s8 + $0x3a8] sm:$0xff]  ;;  %v9476_v8 = vld [vmem:[%s17770_s8 + $0x410] sm:$0xff]  ;;  %v8493_v4 = vld [vmem:[#allocation8 + $0xf8] sm:$0xff] }
 0x8ee   : > { %8054 = vmatpush1.msra.mxu0 %v9468_v7  ;;  %7787 = vmatprep.mubr.f32.mxu0 %v18007_v31  ;;  %v9475_v7 = vld [vmem:[%s17770_s8 + $0x408] sm:$0xff] }
 0x8ef   : > { %8055 = vmatprep.subr.mxu0 %v9467_v57  ;;  %7956 = vmatmul.mubr.f32.gmra.mxu1 %v7826_v25  ;;  %v8486_v57 = vld [vmem:[#allocation8 + $0xc0] sm:$0xff] }
 0x8f0   : > { %8056 = vmatpush1.msra.mxu0 %v9466_v59  ;;  %8241 = vmatprep.subr.mxu1 %v9489_v53  ;;  %v8470_v25 = vld [vmem:[#allocation8 + $0x40] sm:$0xff]  ;;  %v8485_v53 = vld [vmem:[#allocation8 + $0xb8] sm:$0xff] }
 0x8f1   : > { %8057 = vmatprep.subr.mxu0 %v9465_v62  ;;  %7788 = vmatmul.mubr.f32.gmra.mxu0 %v17161_v15  ;;  %v9459_v15 = vld [vmem:[%s17770_s8 + $0x388] sm:$0xff]  ;;  %v8469_v62 = vld [vmem:[#allocation8 + $0x38] sm:$0xff] }
 0x8f2   : > { %8058 = vmatpush1.msra.mxu0 %v9464_v63  ;;  %7793 = vmatprep.mubr.f32.mxu0 %v18007_v31 }
 0x8f3   : > { %8059 = vmatprep.subr.mxu0 %v9463_v50  ;;  %8242 = vmatpush1.msra.mxu1 %v9488_v44  ;;  %v8484_v50 = vld [vmem:[#allocation8 + $0xb0] sm:$0xff] }
 0x8f4   : > { %8060 = vmatpush1.msra.mxu0 %v9462_v1  ;;  %8243 = vmatprep.subr.mxu1 %v9487_v23  ;;  %v8468_v44 = vld [vmem:[#allocation8 + $0x30] sm:$0xff]  ;;  %v8483_v23 = vld [vmem:[#allocation8 + $0xa8] sm:$0xff] }
 0x8f5   : > { %8061 = vmatprep.subr.mxu0 %v9461_v35  ;;  %7794 = vmatmul.mubr.f32.gmra.mxu0 %v17189_v38  ;;  %v7828_v38 = vsel %vm2144_vm4, %v7825_v9, %v7827_v55  ;;  %v9443_v9 = vld [vmem:[%s17770_s8 + $0x308] sm:$0xff]  ;;  %v8482_v55 = vld [vmem:[#allocation8 + $0xa0] sm:$0xff] }
 0x8f6   : > { %8062 = vmatpush1.msra.mxu0 %v9460_v60  ;;  %7799 = vmatprep.mubr.f32.mxu0 %v18007_v31  ;;  %v8467_v35 = vld [vmem:[#allocation8 + $0x28] sm:$0xff] }
 0x8f7   : > { %8063 = vmatprep.subr.mxu0 %v9459_v15  ;;  %7961 = vmatprep.mubr.f32.mxu1 %v18007_v31  ;;  %v8466_v15 = vld [vmem:[#allocation8 + $0x20] sm:$0xff] }
 0x8f8   : > { %8064 = vmatpush1.msra.mxu0 %v9458_v40  ;;  %8244 = vmatpush1.msra.mxu1 %v9486_v61  ;;  %v8481_v61 = vld [vmem:[#allocation8 + $0x98] sm:$0xff] }
 0x8f9   : > { %8065 = vmatprep.subr.mxu0 %v9457_v2  ;;  %7800 = vmatmul.mubr.f32.gmra.mxu0 %v17220_v16  ;;  %v9483_v16 = vld [vmem:[%s17770_s8 + $0x448] sm:$0xff]  ;;  %v8465_v2 = vld [vmem:[#allocation8 + $0x18] sm:$0xff] }
 0x8fa   : > { %8066 = vmatpush1.msra.mxu0 %v9456_v34  ;;  %7962 = vmatmul.mubr.f32.gmra.mxu1 %v7828_v38  ;;  %v8480_v38 = vld [vmem:[#allocation8 + $0x90] sm:$0xff] }
 0x8fb   : > { %8067 = vmatprep.subr.mxu0 %v9455_v58  ;;  %8245 = vmatprep.subr.mxu1 %v9485_v13  ;;  %v8464_v58 = vld [vmem:[#allocation8 + $0x10] sm:$0xff] }
 0x8fc   : > { %8068 = vmatpush1.msra.mxu0 %v9454_v30  ;;  %7805 = vmatprep.mubr.f32.mxu0 %v18007_v31 }
 0x8fd   : > { %8069 = vmatprep.subr.mxu0 %v9453_v5  ;;  %8246 = vmatpush1.msra.mxu1 %v9484_v37 }
 0x8fe   : > { %8070 = vmatpush1.msra.mxu0 %v9452_v46  ;;  %8247 = vmatprep.subr.mxu1 %v9483_v16 }
 0x8ff   : > { %8071 = vmatprep.subr.mxu0 %v9451_v0  ;;  %7806 = vmatmul.mubr.f32.gmra.mxu0 %v17249_v27  ;;  %v9446_v27 = vld [vmem:[%s17770_s8 + $0x320] sm:$0xff] }
 0x900   : > { %8072 = vmatpush1.msra.mxu0 %v9450_v47  ;;  %7967 = vmatprep.mubr.f32.mxu1 %v18007_v31 }
 0x901   : > { %8073 = vmatprep.subr.mxu0 %v9449_v49  ;;  %8248 = vmatpush1.msra.mxu1 %v9482_v32 }
 0x902   : > { %8074 = vmatpush1.msra.mxu0 %v9448_v10  ;;  %7968 = vmatmul.mubr.f32.gmra.mxu1 %v7830_v20 }
 0x903   : > { %8075 = vmatprep.subr.mxu0 %v9447_v14  ;;  %8249 = vmatprep.subr.mxu1 %v9481_v42 }
 0x904   : > { %7811 = vmatprep.mubr.f32.mxu0 %v18007_v31  ;;  %8076 = vmatpush1.msra.mxu0 %v9446_v27 }
 0x905   : > { %8250 = vmatpush1.msra.mxu1 %v9480_v6  ;;  %7812 = vmatmul.mubr.f32.gmra.mxu0 %v17283_v45  ;;  %v9442_v45 = vld [vmem:[%s17770_s8 + $0x300] sm:$0xff] }
 0x906   : > { %8077 = vmatprep.subr.mxu0 %v9445_v18  ;;  %8251 = vmatprep.subr.mxu1 %v9479_v41 }
 0x907   : > { %7973 = vmatprep.mubr.f32.mxu1 %v18007_v31  ;;  %8078 = vmatpush1.msra.mxu0 %v9444_v26 }
 0x908   : > { %8252 = vmatpush1.msra.mxu1 %v9478_v21  ;;  %8079 = vmatprep.subr.mxu0 %v9443_v9 }
 0x909   : > { %7974 = vmatmul.mubr.f32.gmra.mxu1 %v7839_v52  ;;  %8253 = vmatprep.subr.mxu1 %v9477_v51 }
 0x90a   : > { %8080 = vmatpush1.msra.mxu0 %v9442_v45  ;;  %8113 = vmatprep.mubr.f32.mxu0 %v18007_v31 }
 0x90b   : > { %8254 = vmatpush1.msra.mxu1 %v9476_v8  ;;  %8114 = vmatmul.mubr.f32.vlgmr.msra.gmra.mxu0 %v17151_v17  ;;  %v8477_v17 = vld [vmem:[#allocation8 + $0x78] sm:$0xff] }
 0x90c   : > { %8255 = vmatprep.subr.mxu1 %v9475_v7  ;;  %8289 = vmatprep.mubr.f32.mxu1 %v18007_v31 }
 0x90d   : > { %8256 = vmatpush1.msra.mxu1 %v9474_v19  ;;  %8119 = vmatprep.mubr.f32.mxu0 %v18007_v31 }
 0x90e   : > { %8290 = vmatmul.mubr.f32.vlgmr.msra.gmra.mxu1 %v17156_v29  ;;  %v8492_v29 = vld [vmem:[#allocation8 + $0xf0] sm:$0xff]  ;;  %10088 = vmatprep.subr.mxu1 %v8493_v4 }
 0x90f   : > { %8120 = vmatmul.mubr.f32.gmra.mxu0 %v17184_v28  ;;  %8295 = vmatprep.mubr.f32.mxu1 %v18007_v31  ;;  %v8476_v28 = vld [vmem:[#allocation8 + $0x70] sm:$0xff] }
 0x910   : > { %8125 = vmatprep.mubr.f32.mxu0 %v18007_v31  ;;  %10089 = vmatpush3.msra.mxu1 %v8477_v17 }
 0x911   : > { %10090 = vmatprep.subr.mxu1 %v8492_v29 }
 0x912   : > { %8296 = vmatmul.mubr.f32.gmra.mxu1 %v17195_v33  ;;  %v8491_v33 = vld [vmem:[#allocation8 + $0xe8] sm:$0xff] }
 0x913   : > { %8126 = vmatmul.mubr.f32.gmra.mxu0 %v17215_v3  ;;  %8301 = vmatprep.mubr.f32.mxu1 %v18007_v31  ;;  %v8475_v3 = vld [vmem:[#allocation8 + $0x68] sm:$0xff] }
 0x914   : > { %8131 = vmatprep.mubr.f32.mxu0 %v18007_v31  ;;  %10091 = vmatpush3.msra.mxu1 %v8476_v28 }
 0x915   : > { %10092 = vmatprep.subr.mxu1 %v8491_v33 }
 0x916   : > { %8302 = vmatmul.mubr.f32.gmra.mxu1 %v17226_v39  ;;  %v8490_v39 = vld [vmem:[#allocation8 + $0xe0] sm:$0xff] }
 0x917   : > { %8132 = vmatmul.mubr.f32.gmra.mxu0 %v17244_v11  ;;  %8307 = vmatprep.mubr.f32.mxu1 %v18007_v31  ;;  %v8474_v11 = vld [vmem:[#allocation8 + $0x60] sm:$0xff] }
 0x918   : > { %8137 = vmatprep.mubr.f32.mxu0 %v18007_v31  ;;  %10093 = vmatpush3.msra.mxu1 %v8475_v3 }
 0x919   : > { %10094 = vmatprep.subr.mxu1 %v8490_v39 }
 0x91a   : > { %8308 = vmatmul.mubr.f32.gmra.mxu1 %v17255_v43  ;;  %v8489_v43 = vld [vmem:[#allocation8 + $0xd8] sm:$0xff] }
 0x91b   : > { %8138 = vmatmul.mubr.f32.gmra.mxu0 %v17278_v36  ;;  %8313 = vmatprep.mubr.f32.mxu1 %v18007_v31  ;;  %v8473_v36 = vld [vmem:[#allocation8 + $0x58] sm:$0xff] }
 0x91c   : > { %8143 = vmatprep.mubr.f32.mxu0 %v18007_v31  ;;  %10095 = vmatpush3.msra.mxu1 %v8474_v11 }
 0x91d   : > { %10096 = vmatprep.subr.mxu1 %v8489_v43 }
 0x91e   : > { %8314 = vmatmul.mubr.f32.gmra.mxu1 %v17289_v24  ;;  %v8488_v24 = vld [vmem:[#allocation8 + $0xd0] sm:$0xff] }
 0x91f   : > { %8144 = vmatmul.mubr.f32.gmra.mxu0 %v17315_v56  ;;  %8319 = vmatprep.mubr.f32.mxu1 %v18007_v31  ;;  %v8472_v56 = vld [vmem:[#allocation8 + $0x50] sm:$0xff] }
 0x920   : > { %8149 = vmatprep.mubr.f32.mxu0 %v18007_v31  ;;  %10097 = vmatpush3.msra.mxu1 %v8473_v36 }
 0x921   : > { %10098 = vmatprep.subr.mxu1 %v8488_v24 }
 0x922   : > { %8320 = vmatmul.mubr.f32.gmra.mxu1 %v17318_v22  ;;  %v8487_v22 = vld [vmem:[#allocation8 + $0xc8] sm:$0xff] }
 0x923   : > { %8150 = vmatmul.mubr.f32.gmra.mxu0 %v17328_v12  ;;  %8325 = vmatprep.mubr.f32.mxu1 %v18007_v31  ;;  %v8471_v12 = vld [vmem:[#allocation8 + $0x48] sm:$0xff] }
 0x924   : > { %8455 = vmatprep.mubr.f32.mxu0 %v18007_v31  ;;  %10099 = vmatpush3.msra.mxu1 %v8472_v56 }
 0x925   : > { %10100 = vmatprep.subr.mxu1 %v8487_v22 }
 0x926   : > { %8326 = vmatmul.mubr.f32.gmra.mxu1 %v17333_v54 }
 0x927   : > { %10101 = vmatpush3.msra.mxu1 %v8471_v12 }
 0x928   : > { %10102 = vmatprep.subr.mxu1 %v8486_v57 }
 0x929   : > { %10103 = vmatpush3.msra.mxu1 %v8470_v25 }
 0x92a   : > { %10104 = vmatprep.subr.mxu1 %v8485_v53  ;;  %v8348_v53 = vlaneseq }
 0x92b   : > { %10105 = vmatpush3.msra.mxu1 %v8469_v62 }
 0x92c   : > { %10106 = vmatprep.subr.mxu1 %v8484_v50 }
 0x92d   : > { %10107 = vmatpush3.msra.mxu1 %v8468_v44 }
 0x92e   : > { %10108 = vmatprep.subr.mxu1 %v8483_v23 }
 0x92f   : > { %10109 = vmatpush3.msra.mxu1 %v8467_v35  ;;  %v8349_v35 = vshrl.u32 %v8348_v53, 7 }
 0x930   : > { %10110 = vmatprep.subr.mxu1 %v8482_v55 }
 0x931   : > { %10111 = vmatpush3.msra.mxu1 %v8466_v15  ;;  %v8354_v31 = vsub.s32 1, %v8349_v35 }
 0x932   : > { %10112 = vmatprep.subr.mxu1 %v8481_v61 }
 0x933   : > { %10113 = vmatpush3.msra.mxu1 %v8465_v2 }
 0x934   : > { %10114 = vmatprep.subr.mxu1 %v8480_v38 }
 0x935   : > { %10115 = vmatpush3.msra.mxu1 %v8464_v58  ;;  %v8350_v58 = vsub.s32 0, %v8349_v35 }
 0x989   : > { %v17578_v54 = vpop.f32.mrf.mxu0  ;;  %v17596_v5 = vpop.f32.mrf.mxu1 }
 0x98a   : > { %18031 = vst [vmem:[#allocation45_spill] sm:$0xff] %v17596_v5 }
 0x98b   : > { %v17580_v59 = vpop.f32.mrf.mxu0  ;;  %v17598_v16 = vpop.f32.mrf.mxu1 }
 0x98d   : > { %v17582_v63 = vpop.f32.mrf.mxu0 }
 0x98f   : > { %v17584_v1 = vpop.f32.mrf.mxu0 }
 0x991   : > { %v17586_v60 = vpop.f32.mrf.mxu0 }
 0x993   : > { %v17588_v40 = vpop.f32.mrf.mxu0 }
 0x995   : > { %v17590_v34 = vpop.f32.mrf.mxu0 }
 0x997   : > { %v17592_v13 = vpop.f32.mrf.mxu0 }
 0x999   : > { %v17594_v30 = vpop.f32.mrf.mxu0 }
 0x99b   : > { %v7696_v37 = vpop.f32.mrf.mxu0  ;;  %v17600_v0 = vpop.f32.mrf.mxu1 }
 0x99d   : > { %v7700_v46 = vpop.f32.mrf.mxu0  ;;  %v17602_v49 = vpop.f32.mrf.mxu1 }
 0x99f   : > { %v7702_v48 = vpop.f32.mrf.mxu0 }
 0x9a1   : > { %v7706_v47 = vpop.f32.mrf.mxu0 }
 0x9a3   : > { %v7708_v32 = vpop.f32.mrf.mxu0 }
 0x9a5   : > { %v17606_v20 = vpop.f32.mrf.mxu1 }
 0x9a7   : > { %v17610_v27 = vpop.f32.mrf.mxu1 }
 0x9a9   : > { %v17604_v10 = vpop.f32.mrf.mxu0 }
 0x9ab   : > { %v7779_v14 = vpop.f32.mrf.mxu0 }
 0x9ad   : > { %v17608_v42 = vpop.f32.mrf.mxu0 }
 0x9af   : > { %v17612_v6 = vpop.f32.mrf.mxu0  ;;  %v17614_v41 = vpop.f32.mrf.mxu1 }
 0x9b1   : > { %v7789_v18 = vpop.f32.mrf.mxu0  ;;  %v17616_v9 = vpop.f32.mrf.mxu1 }
 0x9b3   : > { %v7791_v26 = vpop.f32.mrf.mxu0 }
 0x9b5   : > { %v7795_v21 = vpop.f32.mrf.mxu0 }
 0x9b7   : > { %v7797_v51 = vpop.f32.mrf.mxu0 }
 0x9b9   : > { %v7801_v45 = vpop.f32.mrf.mxu0 }
 0x9ba   : > { %v7963_v52 = vpop.f32.mrf.mxu1  ;;  %v7802_v53 = vadd.f32 %v7801_v45, %v17594_v30  ;;  %v7792_v30 = vadd.f32 %v7791_v26, %v17588_v40  ;;  %v7784_v40 = vadd.f32 %v17608_v42, %v17582_v63 }
 0x9bb   : > { %v7803_v8 = vpop.f32.mrf.mxu0 }
 0x9bc   : > { %v7965_v7 = vpop.f32.mrf.mxu1 }
 0x9bf   : > { %v7807_v19 = vpop.f32.mrf.mxu0 }
 0x9c1   : > { %v7809_v4 = vpop.f32.mrf.mxu0 }
 0x9c2   : > { %v7969_v17 = vpop.f32.mrf.mxu1  ;;  %v7810_v38 = vadd.f32 %v7809_v4, %v7702_v48 }
 0x9c4   : > { %v7971_v28 = vpop.f32.mrf.mxu1 }
 0x9c5   : > { %v7813_v29 = vpop.f32.mrf.mxu0  ;;  %v7991_v5 = vadd.f32 %v7971_v28, %v7810_v38 }
 0x9c7   : > { %v7815_v33 = vpop.f32.mrf.mxu0 }
 0x9c9   : > { %v7975_v3 = vpop.f32.mrf.mxu1 }
 0x9cb   : > { %v17618_v39 = vpop.f32.mrf.mxu0  ;;  %v7977_v11 = vpop.f32.mrf.mxu1 }
 0x9cc   : > { %18032 = vst [vmem:[#allocation50_spill] sm:$0xff] %v17618_v39  ;;  %v7804_v39 = vadd.f32 %v7803_v8, %v7696_v37  ;;  %v7790_v8 = vadd.f32 %v7789_v18, %v17586_v60 }
 0x9cd   : > { %v17620_v43 = vpop.f32.mrf.mxu0 }
 0x9ce   : > { %18033 = vst [vmem:[#allocation44_spill] sm:$0xff] %v17620_v43  ;;  %v17622_v36 = vpop.f32.mrf.mxu1 }
 0x9cf   : > { %18034 = vst [vmem:[#allocation43_spill] sm:$0xff] %v17622_v36  ;;  %v17624_v24 = vpop.f32.mrf.mxu0 }
 0x9d0   : > { %18035 = vst [vmem:[#allocation51_spill] sm:$0xff] %v17624_v24  ;;  %v17626_v56 = vpop.f32.mrf.mxu1 }
 0x9d1   : > { %18036 = vst [vmem:[#allocation42_spill] sm:$0xff] %v17626_v56  ;;  %v17628_v22 = vpop.f32.mrf.mxu0  ;;  %v7808_v56 = vadd.f32 %v7807_v19, %v7700_v46  ;;  %v7796_v19 = vadd.f32 %v7795_v21, %v17590_v34  ;;  %v7786_v34 = vadd.f32 %v17612_v6, %v17584_v1  ;;  %v7984_v1 = vadd.f32 %v17606_v20, %v7790_v8 }
 0x9d2   : > { %v17630_v12 = vpop.f32.mrf.mxu1 }
 0x9d3   : > { %18037 = vst [vmem:[#allocation41_spill] sm:$0xff] %v17630_v12  ;;  %v17632_v57 = vpop.f32.mrf.mxu0  ;;  %v7814_v12 = vadd.f32 %v7813_v29, %v7706_v47  ;;  %v7780_v47 = vadd.f32 %v7779_v14, %v17580_v59  ;;  %v7990_v29 = vadd.f32 %v7969_v17, %v7808_v56  ;;  %v7778_v59 = vadd.f32 %v17604_v10, %v17578_v54 }
 0x9d4   : > { %v17634_v25 = vpop.f32.mrf.mxu1 }
 0x9d5   : > { %18038 = vst [vmem:[#allocation52_spill] sm:$0xff] %v17634_v25  ;;  %v8129_v62 = vpop.f32.mrf.mxu0  ;;  %v8346_v25 = vld [vmem:[%s17771_s9] sm:$0x3]  ;;  %v7992_v35 = vadd.f32 %v7975_v3, %v7814_v12  ;;  %v7981_v10 = vadd.f32 %v17598_v16, %v7780_v47 }
 0x9d6   : > { %v17636_v50 = vpop.f32.mrf.mxu1  ;;  %v17647_v48 = vrot.slane %v8346_v25, %v8350_v58  ;;  %v17649_v4 = vrot.slane %v8346_v25, %v8354_v31 }
 0x9d7   : > { %18039 = vst [vmem:[#allocation40_spill] sm:$0xff] %v17636_v50  ;;  %v8133_v44 = vpop.f32.mrf.mxu0 }
 0x9d8   : > { %v17638_v23 = vpop.f32.mrf.mxu1 }
 0x9d9   : > { %18040 = vst [vmem:[#allocation39_spill] sm:$0xff] %v17638_v23  ;;  %v8135_v55 = vpop.f32.mrf.mxu0  ;;  %v7816_v23 = vadd.f32 %v7815_v33, %v7708_v32  ;;  %v7989_v32 = vadd.f32 %v7965_v7, %v7804_v39  ;;  %v7985_v7 = vadd.f32 %v17610_v27, %v7792_v30 }
 0x9da   : > { %v17640_v15 = vpop.f32.mrf.mxu1 }
 0x9db   : > { %18041 = vst [vmem:[#allocation53_spill] sm:$0xff] %v17640_v15  ;;  %v8139_v61 = vpop.f32.mrf.mxu0  ;;  %v7798_v15 = vadd.f32 %v7797_v51, %v17592_v13  ;;  %v7988_v51 = vadd.f32 %v7963_v52, %v7802_v53  ;;  %v7993_v28 = vadd.f32 %v7977_v11, %v7816_v23  ;;  %v7983_v11 = vadd.f32 %v17602_v49, %v7786_v34  ;;  %v18042_v23 = vld [vmem:[#allocation45_spill] sm:$0xff]  ;;  %v18043_v49 = vld [vmem:[#allocation51_spill] sm:$0xff] }
 0x9dc   : > { %v8311_v2 = vpop.f32.mrf.mxu1  ;;  %v8161_v63 = vadd.f32 %v8129_v62, %v7985_v7 }
 0x9dd   : > { %v8141_v36 = vpop.f32.mrf.mxu0  ;;  %v7987_v14 = vadd.f32 %v17616_v9, %v7798_v15  ;;  %v8164_v18 = vadd.f32 %v8139_v61, %v7988_v51  ;;  %v8159_v12 = vadd.f32 %v17628_v22, %v7983_v11  ;;  %v18045_v61 = vld [vmem:[#allocation44_spill] sm:$0xff] }
 0x9de   : > { %v8315_v50 = vpop.f32.mrf.mxu1  ;;  %v8165_v21 = vadd.f32 %v8141_v36, %v7989_v32  ;;  %v8160_v36 = vadd.f32 %v17632_v57, %v7984_v1  ;;  %v8157_v57 = vadd.f32 %v18045_v61, %v7981_v10  ;;  %v18050_v32 = vld [vmem:[#allocation41_spill] sm:$0xff]  ;;  %v8462_v11 = vld [vmem:[#allocation8] sm:$0xff] }
 0x9df   : > { %v8145_v43 = vpop.f32.mrf.mxu0  ;;  %v8163_v17 = vadd.f32 %v8135_v55, %v7987_v14  ;;  %v8340_v27 = vadd.f32 %v8315_v50, %v8164_v18  ;;  %v7980_v55 = vadd.f32 %v18042_v23, %v7778_v59  ;;  %v18052_v59 = vld [vmem:[#allocation43_spill] sm:$0xff] }
 0x9e0   : > { %v8317_v24 = vpop.f32.mrf.mxu1  ;;  %v8166_v33 = vadd.f32 %v8145_v43, %v7990_v29  ;;  %v7982_v43 = vadd.f32 %v17600_v0, %v7784_v40  ;;  %v18046_v50 = vld [vmem:[#allocation39_spill] sm:$0xff] }
 0x9e1   : > { %v8147_v46 = vpop.f32.mrf.mxu0  ;;  %v8341_v42 = vadd.f32 %v8317_v24, %v8165_v21  ;;  %v8339_v16 = vadd.f32 %v8311_v2, %v8163_v17  ;;  %v8337_v38 = vadd.f32 %v18046_v50, %v8161_v63  ;;  %v18047_v2 = vld [vmem:[#allocation50_spill] sm:$0xff]  ;;  %v8587_v63 = vld [vmem:[#allocation10 + $0x78] sm:$0xff] }
 0x9e2   : > { %v8321_v37 = vpop.f32.mrf.mxu1  ;;  %v8167_v45 = vadd.f32 %v8147_v46, %v7991_v5  ;;  %v7986_v5 = vadd.f32 %v17614_v41, %v7796_v19  ;;  %v8158_v62 = vadd.f32 %v18043_v49, %v7982_v43  ;;  %v18044_v24 = vld [vmem:[#allocation53_spill] sm:$0xff]  ;;  %v8156_v53 = vadd.f32 %v18047_v2, %v7980_v55  ;;  %v18048_v46 = vld [vmem:[#allocation40_spill] sm:$0xff] }
 0x9e3   : > { %v8151_v13 = vpop.f32.mrf.mxu0  ;;  %v8342_v9 = vadd.f32 %v8321_v37, %v8166_v33  ;;  %v8367_v58 = vadd.f32 %v17649_v4, %v8341_v42  ;;  %v8336_v47 = vadd.f32 %v18048_v46, %v8160_v36  ;;  %v8366_v19 = vadd.f32 %v17647_v48, %v8340_v27  ;;  %v8586_v42 = vld [vmem:[#allocation10 + $0x70] sm:$0xff]  ;;  %v8584_v43 = vld [vmem:[#allocation10 + $0x60] sm:$0xff]  ;;  %v8583_v36 = vld [vmem:[#allocation10 + $0x58] sm:$0xff] }
 0x9e4   : > { %v8168_v31 = vadd.f32 %v8151_v13, %v7992_v35  ;;  %v8323_v25 = vpop.f32.mrf.mxu1  ;;  %v8162_v6 = vadd.f32 %v8133_v44, %v7986_v5  ;;  %v18049_v35 = vld [vmem:[#allocation52_spill] sm:$0xff]  ;;  %v8365_v8 = vadd.f32 %v17649_v4, %v8339_v16  ;;  %v8332_v34 = vadd.f32 %v18052_v59, %v8156_v53  ;;  %v8582_v27 = vld [vmem:[#allocation10 + $0x50] sm:$0xff]  ;;  %v8579_v16 = vld [vmem:[#allocation10 + $0x38] sm:$0xff] }
 0x9e5   : > { %v8153_v60 = vpop.f32.mrf.mxu0  ;;  %v8343_v3 = vadd.f32 %v8323_v25, %v8167_v45  ;;  %v8368_v0 = vadd.f32 %v17647_v48, %v8342_v9  ;;  %v8335_v37 = vadd.f32 %v18049_v35, %v8159_v12  ;;  %v8334_v45 = vadd.f32 %v18050_v32, %v8158_v62  ;;  %v8463_v9 = vld [vmem:[#allocation8 + $0x8] sm:$0xff]  ;;  %v8580_v12 = vld [vmem:[#allocation10 + $0x40] sm:$0xff]  ;;  %v8575_v62 = vld [vmem:[#allocation10 + $0x18] sm:$0xff] }
 0x9e6   : > { %v8169_v26 = vadd.f32 %v8153_v60, %v7993_v28  ;;  %v8327_v52 = vpop.f32.mrf.mxu1  ;;  %v8338_v15 = vadd.f32 %v18044_v24, %v8162_v6  ;;  %v18051_v28 = vld [vmem:[#allocation42_spill] sm:$0xff]  ;;  %v8381_v25 = vmax.f32 %v8367_v58, 0.0  ;;  %v8362_v14 = vadd.f32 %v17647_v48, %v8336_v47  ;;  %v8386_v6 = vld [vmem:[%s17765_s3] sm:$0xff] }
 0x9e7   : > { %v8344_v54 = vadd.f32 %v8327_v52, %v8168_v31  ;;  %v8369_v20 = vadd.f32 %v17649_v4, %v8343_v3  ;;  %v8382_v51 = vmax.f32 %v8368_v0, 0.0  ;;  %v8333_v33 = vadd.f32 %v18051_v28, %v8157_v57  ;;  %v8576_v49 = vld [vmem:[#allocation10 + $0x20] sm:$0xff]  ;;  %v8574_v24 = vld [vmem:[#allocation10 + $0x10] sm:$0xff] }
 0x9e8   : > { %v8329_v39 = vpop.f32.mrf.mxu1  ;;  %v8364_v13 = vadd.f32 %v17647_v48, %v8338_v15  ;;  %v8363_v31 = vadd.f32 %v17649_v4, %v8337_v38  ;;  %v8380_v21 = vmax.f32 %v8366_v19, 0.0  ;;  %v8361_v60 = vadd.f32 %v17649_v4, %v8335_v37  ;;  %v8573_v15 = vld [vmem:[#allocation10 + $0x8] sm:$0xff]  ;;  %v8572_v0 = vld [vmem:[#allocation10] sm:$0xff] }
 0x9e9   : > { %v8345_v41 = vadd.f32 %v8329_v39, %v8169_v26  ;;  %v8370_v56 = vadd.f32 %v17647_v48, %v8344_v54  ;;  %v8383_v30 = vmax.f32 %v8369_v20, 0.0  ;;  %v8379_v40 = vmax.f32 %v8365_v8, 0.0  ;;  %v8478_v39 = vld [vmem:[#allocation8 + $0x80] sm:$0xff]  ;;  %v8578_v20 = vld [vmem:[#allocation10 + $0x30] sm:$0xff] }
 0x9ea   : > { %v8360_v5 = vadd.f32 %v17647_v48, %v8334_v45  ;;  %v8378_v18 = vmax.f32 %v8364_v13, 0.0  ;;  %v8359_v26 = vadd.f32 %v17649_v4, %v8333_v33  ;;  %v8377_v52 = vmax.f32 %v8363_v31, 0.0  ;;  %v9507_v57 = vld [vmem:[%s17773_s11] ss:$0 sm:$0xff] }
 0x9eb   : > { %v8371_v44 = vadd.f32 %v17649_v4, %v8345_v41  ;;  %v8384_v29 = vmax.f32 %v8370_v56, 0.0  ;;  %v8358_v7 = vadd.f32 %v17647_v48, %v8332_v34  ;;  %v8376_v17 = vmax.f32 %v8362_v14, 0.0  ;;  %v8479_v48 = vld [vmem:[#allocation8 + $0x88] sm:$0xff]  ;;  %v9508_v2 = vld [vmem:[%s17775_s13] ss:$0 sm:$0xff] }
 0x9ec   : > { %v8375_v3 = vmax.f32 %v8361_v60, 0.0  ;;  %v8374_v54 = vmax.f32 %v8360_v5, 0.0  ;;  %v8373_v10 = vmax.f32 %v8359_v26, 0.0  ;;  %v18053_v4 = vmov 0.0   ;;  %10116 = vmatprep.subr.mxu1 %v8479_v48  ;;  %v8585_v41 = vld [vmem:[#allocation10 + $0x68] sm:$0xff] }
 0x9ed   : > { %v8385_v22 = vmax.f32 %v8371_v44, 0.0  ;;  %v8372_v1 = vmax.f32 %v8358_v7, 0.0  ;;  %10117 = vmatpush3.msra.mxu1 %v8463_v9  ;;  %v8581_v56 = vld [vmem:[#allocation10 + $0x48] sm:$0xff] }
 0x9ee   : > { %10118 = vmatprep.subr.mxu1 %v8478_v39  ;;  %v8577_v44 = vld [vmem:[#allocation10 + $0x28] sm:$0xff] }
 0x9ef   : > { %8409 = vmatprep.subr.mxu0 %v8385_v22  ;;  %10119 = vmatpush3.msra.mxu1 %v8462_v11 }
 0x9f0   : > { %8410 = vmatpush1.msra.mxu0 %v8384_v29 }
 0x9f1   : > { %8411 = vmatprep.subr.mxu0 %v8383_v30 }
 0x9f2   : > { %8412 = vmatpush1.msra.mxu0 %v8382_v51 }
 0x9f3   : > { %8413 = vmatprep.subr.mxu0 %v8381_v25 }
 0x9f4   : > { %8414 = vmatpush1.msra.mxu0 %v8380_v21 }
 0x9f5   : > { %8415 = vmatprep.subr.mxu0 %v8379_v40 }
 0x9f6   : > { %8416 = vmatpush1.msra.mxu0 %v8378_v18 }
 0x9f7   : > { %8417 = vmatprep.subr.mxu0 %v8377_v52 }
 0x9f8   : > { %8418 = vmatpush1.msra.mxu0 %v8376_v17 }
 0x9f9   : > { %8419 = vmatprep.subr.mxu0 %v8375_v3 }
 0x9fa   : > { %8420 = vmatpush1.msra.mxu0 %v8374_v54 }
 0x9fb   : > { %8421 = vmatprep.subr.mxu0 %v8373_v10 }
 0x9fc   : > { %8422 = vmatpush1.msra.mxu0 %v8372_v1 }
 0x9fd   : > { %9506 = vmatmul.mubr.msk.f32.vlgmr.msra.gmra.mxu0 %vm8387_vm9, %v8386_v6  ;;  %11820 = vmatprep.subr.mxu0 %v18053_v4 }
 0x9fe   : > { %11852 = vmatprep.mubr.msk.f32.mxu0 %vm12336_vm0, %v18053_v4  ;;  %11821 = vmatpush3.msra.mxu0 %v8587_v63 }
 0x9ff   : > { %11822 = vmatprep.subr.mxu0 %v18053_v4 }
 0xa00   : > { %11823 = vmatpush3.msra.mxu0 %v8586_v42 }
 0xa01   : > { %11824 = vmatprep.subr.mxu0 %v18053_v4 }
 0xa02   : > { %11825 = vmatpush3.msra.mxu0 %v8585_v41 }
 0xa03   : > { %11826 = vmatprep.subr.mxu0 %v18053_v4 }
 0xa04   : > { %11827 = vmatpush3.msra.mxu0 %v8584_v43 }
 0xa05   : > { %11828 = vmatprep.subr.mxu0 %v18053_v4 }
 0xa06   : > { %11829 = vmatpush3.msra.mxu0 %v8583_v36 }
 0xa07   : > { %11830 = vmatprep.subr.mxu0 %v18053_v4 }
 0xa08   : > { %11831 = vmatpush3.msra.mxu0 %v8582_v27 }
 0xa09   : > { %11832 = vmatprep.subr.mxu0 %v18053_v4 }
 0xa0a   : > { %11833 = vmatpush3.msra.mxu0 %v8581_v56 }
 0xa0b   : > { %11834 = vmatprep.subr.mxu0 %v18053_v4 }
 0xa0c   : > { %11835 = vmatpush3.msra.mxu0 %v8580_v12 }
 0xa0d   : > { %11836 = vmatprep.subr.mxu0 %v18053_v4 }
 0xa0e   : > { %11837 = vmatpush3.msra.mxu0 %v8579_v16 }
 0xa0f   : > { %11838 = vmatprep.subr.mxu0 %v18053_v4 }
 0xa10   : > { %11839 = vmatpush3.msra.mxu0 %v8578_v20 }
 0xa11   : > { %11840 = vmatprep.subr.mxu0 %v18053_v4 }
 0xa12   : > { %11841 = vmatpush3.msra.mxu0 %v8577_v44 }
 0xa13   : > { %11842 = vmatprep.subr.mxu0 %v18053_v4 }
 0xa14   : > { %11843 = vmatpush3.msra.mxu0 %v8576_v49 }
 0xa15   : > { %11844 = vmatprep.subr.mxu0 %v18053_v4 }
 0xa16   : > { %11845 = vmatpush3.msra.mxu0 %v8575_v62 }
 0xa17   : > { %11846 = vmatprep.subr.mxu0 %v18053_v4 }
 0xa18   : > { %11847 = vmatpush3.msra.mxu0 %v8574_v24 }
 0xa19   : > { %11848 = vmatprep.subr.mxu0 %v18053_v4 }
 0xa1a   : > { %11849 = vmatpush3.msra.mxu0 %v8573_v15 }
 0xa1b   : > { %11850 = vmatprep.subr.mxu0 %v18053_v4 }
 0xa1c   : > { %11851 = vmatpush3.msra.mxu0 %v8572_v0 }
 0xabd   : > { %v8457_v23 = vpop.f32.mrf.mxu0 }
 0xabf   : > { %v8459_v55 = vpop.f32.mrf.mxu0 }
 0xac0   : > { %8565 = vmatprep.mubr.f32.mxu1 %v8459_v55 }
 0xac1   : > { %8566 = vmatmul.mubr.f32.vlgmr.msra.gmra.mxu1 %v8457_v23 }
 0xb81   : > { %v10120_v61 = vpop.f32.mrf.mxu1 }
 0xb83   : > { %v10121_v50 = vpop.f32.mrf.mxu1 }
 0xb84   : > { %v10122_v38 = vadd.f32 %v10121_v50, %v10120_v61 }
 0xb86   : > { %v8568_v58 = vadd.f32 %v10122_v38, %v9507_v57 }
 0xb88   : > { %v8571_v22 = vmax.f32 %v8568_v58, 0.0 }
 0xb8a   : > { %11853 = vmatmul.mubr.f32.vlgmr.msra.gmra.mxu0 %v8571_v22 }
 0xc4a   : > { %v8661_v53 = vpop.f32.mrf.mxu0 }
 0xc4b   : > { %v8662_v46 = vadd.f32 %v9508_v2, %v8661_v53 }
 0xc4c   : > { %v11854_v47 = vpop.f32.mrf.mxu0 }
 0xc4d   : > { %8665 = vst [vmem:[%s534_s21] sm:$0xff] %v8662_v46 }
 0xc4e   : > { %12263 = shalt.err (!%p12260_p3)
}
 0xc4f   : > { %s12264_s18 = scalar_lea.hbm %s17727_s24, 128  ;;  %s12268_s28 = scalar_lea.hbm %s18054_s19, 256 }
 0xc50   : > { %p12265_p9 = scmp.ne.s32.totalorder %s17727_s24, %s12264_s18  ;;  %p12269_p12 = scmp.lt.s32.totalorder %s17727_s24, %s18054_s19 }
 0xc51   : > { %p12270_p10 = scmp.lt.s32.totalorder %s12268_s28, %s12264_s18 }
 0xc52   : > { %p12266_p2 = pnand %p12265_p9, %p12451_p5 }
 0xc53   : > { %p12271_p7 = por %p12270_p10, %p12269_p12 }
 0xc54   : > { %p12267_p4 = pneg %p12266_p2 }
 0xc56   : > { %p12272_p8 = pnand %p12271_p7, %p12267_p4 }
 0xc58   : > { %12275 = shalt.err (!%p12272_p8)
}
 0xc59   : > { %11877 = dma.vmem_to_hbm [thread:$0]  (%p12451_p5), %s8681_s22, 128, %s17727_s24, %s8667_s26  }
 0xc5a PF: > { %s18055_s15 = sld [smem:[#allocation18_spill]] }
 0xc5b   : > { %s18056_s29 = sld [smem:[#allocation16_spill]] }
 0xc60   : > { %p11909_p0 = scmp.ge.s32.totalorder %s18055_s15, 2 }
 0xc61   : > { %s8692_s17 = sand.u32 1, %s18056_s29  }
 0xc62   : > { %p11896_p11 = pnand %p11909_p0, %p12455_p6  ;;  %s8693_s14 = scalar_lea.sflag [#allocation4], %s8692_s17 }
 0xc64   : > { %p11897_p1 = pneg %p11896_p11 }
 0xc66   : > { %12305 = dma.done.wait (%p11897_p1), %s8693_s14, 128  }
 0xc67   : > { %12307 = vsyncadd (%p11897_p1), %s8693_s14, 4294967168  ;;  %s18058_s16 = sld [smem:[#allocation19_spill]]  ;;  %s18061_s29 = smov %s12314_s30 }
 0xc68   : > { %s18059_s18 = sld [smem:[#allocation17_spill]] }
 0xc69   : > { %s18060_s15 = sld [smem:[#allocation20_spill]] }
 0xc6d   : > { %p27_p13 = scmp.ge.s32.totalorder %s18058_s16, 4  }
 0xc6e   : > { %s18062_s30 = smov %s18059_s18 }
 0xc6f   :  { %29 = sbr.rel (!%p27_p13) target bundleno = 8 (0x8), region = 144 }
 0xc74   :  { %8698 = vsyncpa [#allocation3], 1 }
 0xc75   :  { %8700 = vsyncpa [#allocation3 + $0x1], 1 }
 0xc76   :  { %8701 = vsyncpa [#allocation6], 1 }
 0xc77   :  { %8702 = vsyncpa [#allocation9], 1 }
 0xc78   :  { %8703 = vsyncpa [#allocation4], 1 }
 0xc79   :  { %8705 = vsyncpa [#allocation4 + $0x1], 1 }

</bundles_post_ra>
